<compile_context>
chip_gen: v5e
topology: v5e:2x2
jax: 0.10.0
libtpu: 0.0.40
codegen_flags: <defaults>
</compile_context>

<pallas_src>
import functools

import jax
import jax.numpy as jnp
from jax import lax
from jax.experimental import pallas as pl
from jax.experimental.pallas import tpu as pltpu

KSIZE = 7     # ScalConv1d / VecConv1d kernel size
DH = 16       # ProximityFlashAttention per-head feature size (hardcoded 16 in module)


# ----------------------------------------------------------------------------
# small in-kernel helpers
# ----------------------------------------------------------------------------
def _leaky(h):
    return jnp.where(h >= 0.0, h, 0.2 * h)


def _dot(a, b):
    return jnp.dot(a, b, preferred_element_type=jnp.float32)


# ----------------------------------------------------------------------------
# Pallas kernels
# ----------------------------------------------------------------------------
def _node_embed_kernel(rbf_ref, nv0_ref, nv1_ref, nv2_ref,
                       w0_ref, b0_ref, w1_ref, b1_ref, wv_ref,
                       oa_ref, ov0_ref, ov1_ref, ov2_ref):
    # TODO(synk): NodeRelativeEmbedMLP internals not provided; assume MLP on RBF of
    # |pos1-pos0| for scalars and VecLinear on [rel, centered] for vectors.
    h = _leaky(_dot(rbf_ref[...], w0_ref[...]) + b0_ref[...])
    oa_ref[...] = _dot(h, w1_ref[...]) + b1_ref[...]
    wv = wv_ref[...]
    ov0_ref[...] = _dot(nv0_ref[...], wv)
    ov1_ref[...] = _dot(nv1_ref[...], wv)
    ov2_ref[...] = _dot(nv2_ref[...], wv)


def _embed_kernel(rbfn_ref, rbfe_ref, nv0_ref, nv1_ref, nv2_ref,
                  ev0_ref, ev1_ref, ev2_ref,
                  nw0_ref, nb0_ref, nw1_ref, nb1_ref, nwv_ref,
                  ew0_ref, eb0_ref, ew1_ref, eb1_ref, ewv_ref,
                  oa_ref, ov0_ref, ov1_ref, ov2_ref):
    # Fused node-embed + edge-embed (sum of both contributions).
    hn = _leaky(_dot(rbfn_ref[...], nw0_ref[...]) + nb0_ref[...])
    an = _dot(hn, nw1_ref[...]) + nb1_ref[...]
    he = _leaky(_dot(rbfe_ref[...], ew0_ref[...]) + eb0_ref[...])
    ae = _dot(he, ew1_ref[...]) + eb1_ref[...]
    oa_ref[...] = an + ae
    nwv = nwv_ref[...]
    ewv = ewv_ref[...]
    ov0_ref[...] = _dot(nv0_ref[...], nwv) + _dot(ev0_ref[...], ewv)
    ov1_ref[...] = _dot(nv1_ref[...], nwv) + _dot(ev1_ref[...], ewv)
    ov2_ref[...] = _dot(nv2_ref[...], nwv) + _dot(ev2_ref[...], ewv)


def _conv_add_kernel(colsa_ref, cv0_ref, cv1_ref, cv2_ref,
                     ea_ref, e0_ref, e1_ref, e2_ref,
                     wa_ref, ba_ref, wv_ref,
                     oa_ref, o0_ref, o1_ref, o2_ref):
    # conv_0 as a single im2col matmul (cols built in the wrapper), + embedding.
    oa_ref[...] = _dot(colsa_ref[...], wa_ref[...]) + ba_ref[...] + ea_ref[...]
    wv = wv_ref[...]
    o0_ref[...] = _dot(cv0_ref[...], wv) + e0_ref[...]
    o1_ref[...] = _dot(cv1_ref[...], wv) + e1_ref[...]
    o2_ref[...] = _dot(cv2_ref[...], wv) + e2_ref[...]


def _local_res_kernel(xa_ref, x0_ref, x1_ref, x2_ref,
                      w1_ref, b1_ref, w2_ref, b2_ref, w3_ref, b3_ref,
                      wv1_ref, wv2_ref, wv3_ref,
                      war_ref, bar_ref, wvr_ref, wpa_ref, bpa_ref, wpv_ref,
                      ga_ref, bga_ref, proja_ref, gv_ref, projv_ref,
                      oa_ref, o0_ref, o1_ref, o2_ref):
    xa = xa_ref[...]
    xv = [x0_ref[...], x1_ref[...], x2_ref[...]]

    # scalar MLP: Linear -> LeakyReLU(0.2) -> Linear -> LeakyReLU(0.2) -> Linear
    h = _leaky(_dot(xa, w1_ref[...]) + b1_ref[...])
    h = _leaky(_dot(h, w2_ref[...]) + b2_ref[...])
    ya = _dot(h, w3_ref[...]) + b3_ref[...]

    # vector MLP (no kron: per-component matmuls with the raw (V,V) weights).
    # TODO(synk): VectorSigmoid definition not given; assume v * sigmoid(|v|).
    def vlayer(vs, w, act):
        hs = [_dot(v, w) for v in vs]
        if act:
            nsq = hs[0] * hs[0] + hs[1] * hs[1] + hs[2] * hs[2]
            gate = jax.nn.sigmoid(jnp.sqrt(nsq + 1e-12))
            hs = [hh * gate for hh in hs]
        return hs

    vs = vlayer(xv, wv1_ref[...], True)
    vs = vlayer(vs, wv2_ref[...], True)
    yv = vlayer(vs, wv3_ref[...], False)

    # TODO(synk): ScalVecProducts internals not provided; assume rank-limited
    # scalar*(vec.vec)->scalar and scalar*vec->vector products.
    a_r = _dot(xa, war_ref[...]) + bar_ref[...]
    vr = [_dot(v, wvr_ref[...]) for v in xv]
    dot_rr = vr[0] * vr[0] + vr[1] * vr[1] + vr[2] * vr[2]
    p_a = _dot(a_r * dot_rr, wpa_ref[...]) + bpa_ref[...]
    pv = [_dot(a_r * v, wpv_ref[...]) for v in vr]

    # TODO(synk): ScalGroupNorm axis convention not given; normalize per node over
    # channels within each group (group projector matmul keeps the data 2-D).
    za = ya + p_a
    mu = _dot(za, proja_ref[...])
    zc = za - mu
    var = _dot(zc * zc, proja_ref[...])
    zna = zc * lax.rsqrt(var + 1e-5) * ga_ref[...] + bga_ref[...]

    # TODO(synk): VecGroupNorm definition not given; RMS-normalize vector norms
    # per node within each group, per-channel scale, no bias (equivariant).
    zv = [yv[d] + pv[d] for d in range(3)]
    nsq = zv[0] * zv[0] + zv[1] * zv[1] + zv[2] * zv[2]
    inv = lax.rsqrt(_dot(nsq, projv_ref[...]) + 1e-5) * gv_ref[...]

    oa_ref[...] = xa + zna
    o0_ref[...] = xv[0] + zv[0] * inv
    o1_ref[...] = xv[1] + zv[1] * inv
    o2_ref[...] = xv[2] + zv[2] * inv


def _attn_pre_kernel(ya_ref, y0_ref, y1_ref, y2_ref, pos_ref,
                     wq_ref, wk_ref, wva_ref, bva_ref, wvv_ref, sc_ref,
                     q0_ref, q1_ref, q2_ref, k0_ref, k1_ref, k2_ref,
                     va_ref, v0_ref, v1_ref, v2_ref):
    # TODO(synk): ProbePoints3 internals not provided; assume pos + VecLinear offsets.
    yv = [y0_ref[...], y1_ref[...], y2_ref[...]]
    pos = pos_ref[...]
    wq = wq_ref[...]
    wk = wk_ref[...]
    wvv = wvv_ref[...]
    sc = sc_ref[...]                                   # 1/(sqrt(2)*r0) per head
    q_out = [q0_ref, q1_ref, q2_ref]
    k_out = [k0_ref, k1_ref, k2_ref]
    v_out = [v0_ref, v1_ref, v2_ref]
    for d in range(3):
        pd = pos[:, d:d + 1]
        q_out[d][...] = (pd + _dot(yv[d], wq)) * sc
        k_out[d][...] = (pd + _dot(yv[d], wk)) * sc
        v_out[d][...] = _dot(yv[d], wvv)
    va_ref[...] = _dot(ya_ref[...], wva_ref[...]) + bva_ref[...]


def _prox_attn_kernel(q0_ref, q1_ref, q2_ref, k0_ref, k1_ref, k2_ref,
                      va_ref, v0_ref, v1_ref, v2_ref,
                      oa_ref, o0_ref, o1_ref, o2_ref, *, nheads, dh):
    # One batch element per grid step, all heads fused.  logits = -(|q-k|^2) built
    # from the expanded-norm form 2 q.k - |q|^2 - |k|^2 (no (N,N,3) intermediate).
    qs = [q0_ref[0], q1_ref[0], q2_ref[0]]     # (N, H) each
    kts = [k0_ref[0], k1_ref[0], k2_ref[0]]    # (H, N) each (pre-transposed)
    va = va_ref[0]                             # (N, H*DH)
    vvs = [v0_ref[0], v1_ref[0], v2_ref[0]]    # (N, H*DH)
    for h in range(nheads):
        qk = 0.0
        qn = 0.0
        kn = 0.0
        for d in range(3):
            qc = qs[d][:, h:h + 1]             # (N, 1)
            kr = kts[d][h:h + 1, :]            # (1, N)
            qk = qk + qc * kr
            qn = qn + qc * qc
            kn = kn + kr * kr
        logits = 2.0 * qk - qn - kn            # (N, N)
        mx = jnp.max(logits, axis=-1, keepdims=True)
        p = jnp.exp(logits - mx)
        inv = pl.reciprocal(jnp.sum(p, axis=-1, keepdims=True), approx=True)
        attn = p * inv
        lo = h * dh
        hi = lo + dh
        oa_ref[0, :, lo:hi] = _dot(attn, va[:, lo:hi])
        o0_ref[0, :, lo:hi] = _dot(attn, vvs[0][:, lo:hi])
        o1_ref[0, :, lo:hi] = _dot(attn, vvs[1][:, lo:hi])
        o2_ref[0, :, lo:hi] = _dot(attn, vvs[2][:, lo:hi])


def _attn_post_kernel(oa_ref, ov0_ref, ov1_ref, ov2_ref,
                      ya_ref, y0_ref, y1_ref, y2_ref,
                      woa_ref, boa_ref, wov_ref,
                      na_ref, n0_ref, n1_ref, n2_ref):
    ov = [ov0_ref[...], ov1_ref[...], ov2_ref[...]]
    nsq = ov[0] * ov[0] + ov[1] * ov[1] + ov[2] * ov[2]
    gate = jax.nn.sigmoid(jnp.sqrt(nsq + 1e-12))       # VectorSigmoid (assumed)
    wov = wov_ref[...]
    na_ref[...] = ya_ref[...] + _dot(oa_ref[...], woa_ref[...]) + boa_ref[...]
    n0_ref[...] = y0_ref[...] + _dot(ov[0] * gate, wov)
    n1_ref[...] = y1_ref[...] + _dot(ov[1] * gate, wov)
    n2_ref[...] = y2_ref[...] + _dot(ov[2] * gate, wov)


def _conv_gn_res_kernel(colsa_ref, c0_ref, c1_ref, c2_ref,
                        ra_ref, r0_ref, r1_ref, r2_ref,
                        wa_ref, ba_ref, ga_ref, bga_ref, proja_ref,
                        wv_ref, gv_ref, projv_ref,
                        oa_ref, o0_ref, o1_ref, o2_ref):
    # conv_1 (im2col matmul) -> GroupNorm -> block residual, scalar + vector fused.
    za = _dot(colsa_ref[...], wa_ref[...]) + ba_ref[...]
    mu = _dot(za, proja_ref[...])
    zc = za - mu
    var = _dot(zc * zc, proja_ref[...])
    oa_ref[...] = ra_ref[...] + zc * lax.rsqrt(var + 1e-5) * ga_ref[...] + bga_ref[...]

    wv = wv_ref[...]
    zv = [_dot(c_ref[...], wv) for c_ref in (c0_ref, c1_ref, c2_ref)]
    nsq = zv[0] * zv[0] + zv[1] * zv[1] + zv[2] * zv[2]
    inv = lax.rsqrt(_dot(nsq, projv_ref[...]) + 1e-5) * gv_ref[...]
    o0_ref[...] = r0_ref[...] + zv[0] * inv
    o1_ref[...] = r1_ref[...] + zv[1] * inv
    o2_ref[...] = r2_ref[...] + zv[2] * inv


def _vec_out_kernel(y0_ref, y1_ref, y2_ref, w_ref, o0_ref, o1_ref, o2_ref):
    w = w_ref[...]
    o0_ref[...] = _dot(y0_ref[...], w)
    o1_ref[...] = _dot(y1_ref[...], w)
    o2_ref[...] = _dot(y2_ref[...], w)


# ----------------------------------------------------------------------------
# generic row-parallel pallas_call wrapper
# ----------------------------------------------------------------------------
def _row_tile(m):
    # split rows 2-way when possible so v7x's second TensorCore gets used.
    if m % 16 == 0 and m > 16:
        return m // 2
    return m


def _row_call(kernel, m, row_ins, bcast_ins, out_dims):
    tm = _row_tile(m)

    def _rspec(shape):
        rest = tuple(shape[1:])
        return pl.BlockSpec((tm,) + rest, lambda i, _n=len(rest): (i,) + (0,) * _n)

    def _bspec(shape):
        return pl.BlockSpec(tuple(shape), lambda i, _n=len(shape): (0,) * _n)

    in_specs = [_rspec(a.shape) for a in row_ins] + [_bspec(a.shape) for a in bcast_ins]
    out_specs = tuple(pl.BlockSpec((tm, d), lambda i: (i, 0)) for d in out_dims)
    out_shape = tuple(jax.ShapeDtypeStruct((m, d), jnp.float32) for d in out_dims)
    return pl.pallas_call(
        kernel,
        out_shape=out_shape,
        grid=(m // tm,),
        in_specs=in_specs,
        out_specs=out_specs,
        compiler_params=pltpu.CompilerParams(dimension_semantics=("parallel",)),
    )(*row_ins, *bcast_ins)


# ----------------------------------------------------------------------------
# plain-jnp feature plumbing (runs inside the single top-level jit)
# ----------------------------------------------------------------------------
def _rbf(d, num=8, rmax=4.0):
    centers = jnp.linspace(0.0, rmax, num, dtype=jnp.float32)
    return jnp.exp(-2.0 * (d[..., None] - centers) ** 2)


def _node_feats(pos0, pos1):
    rel = pos1 - pos0
    d = jnp.sqrt(jnp.sum(rel * rel, axis=-1) + 1e-12)
    rbf = _rbf(d)                                                 # (B,N,8)
    centered = pos1 - jnp.mean(pos1, axis=1, keepdims=True)
    nvec = [jnp.stack([rel[..., dd], centered[..., dd]], axis=-1) for dd in range(3)]
    return rbf, nvec                                              # nvec: 3x (B,N,2)


def _edge_feats(pos0, pos1):
    e_f = jnp.roll(pos1, -1, axis=1) - pos1
    e_b = pos1 - jnp.roll(pos1, 1, axis=1)
    rel = pos1 - pos0
    d_f = jnp.sqrt(jnp.sum(e_f * e_f, axis=-1) + 1e-12)
    d_b = jnp.sqrt(jnp.sum(e_b * e_b, axis=-1) + 1e-12)
    rbf = jnp.concatenate([_rbf(d_f), _rbf(d_b)], axis=-1)        # (B,N,16)
    evec = [jnp.stack([e_f[..., dd], e_b[..., dd], rel[..., dd]], axis=-1) for dd in range(3)]
    return rbf, evec                                              # evec: 3x (B,N,3)


def _im2col(x, k=KSIZE):
    # x: (B, N, C) -> (B, N, K*C), 'same' zero padding along the node axis.
    pad = k // 2
    xp = jnp.pad(x, ((0, 0), (pad, pad), (0, 0)))
    n = x.shape[1]
    return jnp.concatenate([xp[:, t:t + n, :] for t in range(k)], axis=-1)


def _group_proj(c, g):
    # (C, C) group-averaging projector: P[i,j] = 1/Cg if same group else 0.
    cg = c // g
    gids = jnp.arange(c) // cg
    return (gids[:, None] == gids[None, :]).astype(jnp.float32) / float(cg)


# ----------------------------------------------------------------------------
# module applications
# ----------------------------------------------------------------------------
def node_enc_apply(p, pos0, pos1):
    bsz, n, _ = pos0.shape
    m = bsz * n
    rbf, nvec = _node_feats(pos0, pos1)
    row_ins = [rbf.reshape(m, -1)] + [v.reshape(m, -1) for v in nvec]
    bcast = [p['lin_a0']['w'], p['lin_a0']['b'].reshape(1, -1),
             p['lin_a1']['w'], p['lin_a1']['b'].reshape(1, -1),
             p['w_v']]
    adim = p['lin_a1']['w'].shape[1]
    vdim = p['w_v'].shape[1]
    xa, x0, x1, x2 = _row_call(_node_embed_kernel, m, row_ins, bcast,
                               [adim, vdim, vdim, vdim])
    return xa, (x0, x1, x2)


def _prox_attention(qs, ks, va, vvs, bsz, n, nheads):
    hdh = va.shape[-1]
    dh = hdh // nheads
    q3 = [x.reshape(bsz, n, nheads) for x in qs]
    kt3 = [jnp.transpose(x.reshape(bsz, n, nheads), (0, 2, 1)) for x in ks]
    va3 = va.reshape(bsz, n, hdh)
    vv3 = [x.reshape(bsz, n, hdh) for x in vvs]
    kern = functools.partial(_prox_attn_kernel, nheads=nheads, dh=dh)
    spec_q = pl.BlockSpec((1, n, nheads), lambda b: (b, 0, 0))
    spec_k = pl.BlockSpec((1, nheads, n), lambda b: (b, 0, 0))
    spec_v = pl.BlockSpec((1, n, hdh), lambda b: (b, 0, 0))
    outs = pl.pallas_call(
        kern,
        out_shape=tuple(jax.ShapeDtypeStruct((bsz, n, hdh), jnp.float32) for _ in range(4)),
        grid=(bsz,),
        in_specs=[spec_q] * 3 + [spec_k] * 3 + [spec_v] * 4,
        out_specs=(spec_v,) * 4,
        compiler_params=pltpu.CompilerParams(dimension_semantics=("parallel",)),
    )(*q3, *kt3, va3, *vv3)
    m = bsz * n
    return tuple(o.reshape(m, hdh) for o in outs)


def block_apply(p, cfg, pos0, pos1, x_a, x_v):
    bsz, n, _ = pos0.shape
    m = bsz * n
    adim, vdim = cfg['adim'], cfg['vdim']
    proj_a = _group_proj(adim, cfg['agroups'])
    proj_v = _group_proj(vdim, cfg['vgroups'])

    # ---- fused node + edge relative embeddings ----
    rbf_n, nvec = _node_feats(pos0, pos1)
    rbf_e, evec = _edge_feats(pos0, pos1)
    ne, ee = p['node_embed'], p['edge_embed']
    row_ins = ([rbf_n.reshape(m, -1), rbf_e.reshape(m, -1)]
               + [v.reshape(m, -1) for v in nvec]
               + [v.reshape(m, -1) for v in evec])
    bcast = [ne['lin_a0']['w'], ne['lin_a0']['b'].reshape(1, -1),
             ne['lin_a1']['w'], ne['lin_a1']['b'].reshape(1, -1), ne['w_v'],
             ee['lin_a0']['w'], ee['lin_a0']['b'].reshape(1, -1),
             ee['lin_a1']['w'], ee['lin_a1']['b'].reshape(1, -1), ee['w_v']]
    emb_a, emb0, emb1, emb2 = _row_call(_embed_kernel, m, row_ins, bcast,
                                        [adim, vdim, vdim, vdim])

    # ---- conv_0 (single im2col matmul) + embedding add ----
    colsa = _im2col(x_a.reshape(bsz, n, adim)).reshape(m, -1)
    colsv = [_im2col(xc.reshape(bsz, n, vdim)).reshape(m, -1) for xc in x_v]
    row_ins = [colsa] + colsv + [emb_a, emb0, emb1, emb2]
    bcast = [p['conv0_a']['w'].reshape(KSIZE * adim, adim),
             p['conv0_a']['b'].reshape(1, adim),
             p['conv0_v_w'].reshape(KSIZE * vdim, vdim)]
    y_a, y0, y1, y2 = _row_call(_conv_add_kernel, m, row_ins, bcast,
                                [adim, vdim, vdim, vdim])

    # ---- fused LocalResidual ----
    lr = p['local_res']
    row_ins = [y_a, y0, y1, y2]
    bcast = [lr['mlp_a']['w1'], lr['mlp_a']['b1'].reshape(1, adim),
             lr['mlp_a']['w2'], lr['mlp_a']['b2'].reshape(1, adim),
             lr['mlp_a']['w3'], lr['mlp_a']['b3'].reshape(1, adim),
             lr['mlp_v']['w1'], lr['mlp_v']['w2'], lr['mlp_v']['w3'],
             lr['svp']['lin_ar']['w'], lr['svp']['lin_ar']['b'].reshape(1, -1),
             lr['svp']['w_vr'],
             lr['svp']['lin_pa']['w'], lr['svp']['lin_pa']['b'].reshape(1, adim),
             lr['svp']['w_pv'],
             lr['gn_a']['gamma'].reshape(1, adim), lr['gn_a']['beta'].reshape(1, adim),
             proj_a,
             lr['gn_v']['gamma'].reshape(1, vdim), proj_v]
    y_a, y0, y1, y2 = _row_call(_local_res_kernel, m, row_ins, bcast,
                                [adim, vdim, vdim, vdim])

    # ---- probe points + attention value projections ----
    at = p['attn']
    nheads = at['r0'].shape[0]
    hdh = nheads * DH
    scale = (1.0 / (jnp.sqrt(2.0) * at['r0'])).reshape(1, nheads)
    row_ins = [y_a, y0, y1, y2, pos1.reshape(m, 3)]
    bcast = [p['probe_q_w'], p['probe_k_w'],
             at['lin_va']['w'], at['lin_va']['b'].reshape(1, hdh), at['w_vv'], scale]
    outs = _row_call(_attn_pre_kernel, m, row_ins, bcast,
                     [nheads] * 6 + [hdh] * 4)
    q0, q1, q2, k0, k1, k2, va, vv0, vv1, vv2 = outs

    # ---- proximity attention ----
    oa, ov0, ov1, ov2 = _prox_attention([q0, q1, q2], [k0, k1, k2], va,
                                        [vv0, vv1, vv2], bsz, n, nheads)

    # ---- attention output projections + VectorSigmoid + residual ----
    row_ins = [oa, ov0, ov1, ov2, y_a, y0, y1, y2]
    bcast = [at['lin_oa']['w'], at['lin_oa']['b'].reshape(1, adim), at['w_ov']]
    y_a, y0, y1, y2 = _row_call(_attn_post_kernel, m, row_ins, bcast,
                                [adim, vdim, vdim, vdim])

    # ---- conv_1 + GroupNorm + block residual ----
    colsa = _im2col(y_a.reshape(bsz, n, adim)).reshape(m, -1)
    colsv = [_im2col(yc.reshape(bsz, n, vdim)).reshape(m, -1) for yc in (y0, y1, y2)]
    row_ins = [colsa] + colsv + [x_a] + list(x_v)
    bcast = [p['conv1_a']['w'].reshape(KSIZE * adim, adim),
             p['conv1_a']['b'].reshape(1, adim),
             p['gn_a']['gamma'].reshape(1, adim), p['gn_a']['beta'].reshape(1, adim),
             proj_a,
             p['conv1_v_w'].reshape(KSIZE * vdim, vdim),
             p['gn_v']['gamma'].reshape(1, vdim), proj_v]
    xa_new, n0, n1, n2 = _row_call(_conv_gn_res_kernel, m, row_ins, bcast,
                                   [adim, vdim, vdim, vdim])
    return xa_new, (n0, n1, n2)


def _vec_out(w, y_v):
    m = y_v[0].shape[0]
    o0, o1, o2 = _row_call(_vec_out_kernel, m, list(y_v), [w], [1, 1, 1])
    return jnp.concatenate([o0, o1, o2], axis=-1)      # (m, 3)


def _predict(params, cfg, pos0, noised):
    bsz, n, _ = pos0.shape
    x_a, x_v = node_enc_apply(params['node_enc'], pos0, noised)
    for bp in params['blocks']:
        x_a, x_v = block_apply(bp, cfg, pos0, noised, x_a, x_v)
    out = _vec_out(params['lin_v_node'], x_v) * (cfg['vdim'] ** -0.5)
    return out.reshape(bsz, n, 3)


def _finetune(params, cfg, pos0, noised, eps_a, eps_v):
    bsz, n, _ = pos0.shape
    m = bsz * n
    x_a, x_v = node_enc_apply(params['node_enc'], pos0, noised)
    x_a = x_a + eps_a.reshape(m, -1)
    x_v = tuple(x_v[d] + eps_v[..., d].reshape(m, -1) for d in range(3))
    for bp in params['blocks_tune']:
        x_a, x_v = block_apply(bp, cfg, pos0, noised, x_a, x_v)
    out = _vec_out(params['lin_v_node_tune'], x_v) * (cfg['vdim'] ** -0.5)
    return out.reshape(bsz, n, 3)


def make_generator_fn(cfg):
    @jax.jit
    def generator_apply(params, pos0, noise, eps_a, eps_v):
        noised = pos0 + noise
        pred_noise = _predict(params, cfg, pos0, noised)
        noised = noised - pred_noise
        return noised + _finetune(params, cfg, pos0, noised, eps_a, eps_v)
    return generator_apply


# ----------------------------------------------------------------------------
# deterministic parameter initialization (same structure as before)
# ----------------------------------------------------------------------------
def _init_linear(key, din, dout):
    kw, kb = jax.random.split(key)
    return {'w': jax.random.normal(kw, (din, dout), jnp.float32) / jnp.sqrt(din),
            'b': 0.01 * jax.random.normal(kb, (dout,), jnp.float32)}


def _init_veclinear(key, din, dout):
    return jax.random.normal(key, (din, dout), jnp.float32) / jnp.sqrt(din)


def _init_mlp3_a(key, a):
    ks = jax.random.split(key, 3)
    ps = [_init_linear(k, a, a) for k in ks]
    return {'w1': ps[0]['w'], 'b1': ps[0]['b'],
            'w2': ps[1]['w'], 'b2': ps[1]['b'],
            'w3': ps[2]['w'], 'b3': ps[2]['b']}


def _init_mlp3_v(key, v):
    ks = jax.random.split(key, 3)
    return {'w1': _init_veclinear(ks[0], v, v),
            'w2': _init_veclinear(ks[1], v, v),
            'w3': _init_veclinear(ks[2], v, v)}


def _init_conv(key, c):
    kw, kb = jax.random.split(key)
    return {'w': jax.random.normal(kw, (KSIZE, c, c), jnp.float32) / jnp.sqrt(KSIZE * c),
            'b': 0.01 * jax.random.normal(kb, (c,), jnp.float32)}


def _init_node_embed(key, cfg):
    a, v = cfg['adim'], cfg['vdim']
    k1, k2, k3 = jax.random.split(key, 3)
    return {'lin_a0': _init_linear(k1, 8, a),
            'lin_a1': _init_linear(k2, a, a),
            'w_v': _init_veclinear(k3, 2, v)}


def _init_edge_embed(key, cfg):
    a, v = cfg['adim'], cfg['vdim']
    k1, k2, k3 = jax.random.split(key, 3)
    return {'lin_a0': _init_linear(k1, 16, a),
            'lin_a1': _init_linear(k2, a, a),
            'w_v': _init_veclinear(k3, 3, v)}


def _init_svp(key, cfg):
    a, v, r = cfg['adim'], cfg['vdim'], cfg['rank']
    ks = jax.random.split(key, 4)
    return {'lin_ar': _init_linear(ks[0], a, r),
            'w_vr': _init_veclinear(ks[1], v, r),
            'lin_pa': _init_linear(ks[2], r, a),
            'w_pv': _init_veclinear(ks[3], r, v)}


def _init_gn_a(a):
    return {'gamma': jnp.ones((a,), jnp.float32), 'beta': jnp.zeros((a,), jnp.float32)}


def _init_gn_v(v):
    return {'gamma': jnp.ones((v,), jnp.float32)}


def _init_local_res(key, cfg):
    a, v = cfg['adim'], cfg['vdim']
    ks = jax.random.split(key, 3)
    return {'mlp_a': _init_mlp3_a(ks[0], a),
            'mlp_v': _init_mlp3_v(ks[1], v),
            'svp': _init_svp(ks[2], cfg),
            'gn_a': _init_gn_a(a),
            'gn_v': _init_gn_v(v)}


def _init_attn(key, cfg):
    a, v = cfg['adim'], cfg['vdim']
    h = len(cfg['r0_list'])
    ks = jax.random.split(key, 4)
    return {'lin_va': _init_linear(ks[0], a, h * DH),
            'w_vv': _init_veclinear(ks[1], v, h * DH),
            'lin_oa': _init_linear(ks[2], h * DH, a),
            'w_ov': _init_veclinear(ks[3], h * DH, v),
            'r0': jnp.asarray(cfg['r0_list'], jnp.float32)}


def _init_block(key, cfg):
    a, v = cfg['adim'], cfg['vdim']
    h = len(cfg['r0_list'])
    ks = jax.random.split(key, 10)
    return {'edge_embed': _init_edge_embed(ks[0], cfg),
            'node_embed': _init_node_embed(ks[1], cfg),
            'conv0_a': _init_conv(ks[2], a),
            'conv0_v_w': jax.random.normal(ks[3], (KSIZE, v, v), jnp.float32) / jnp.sqrt(KSIZE * v),
            'local_res': _init_local_res(ks[4], cfg),
            'conv1_a': _init_conv(ks[5], a),
            'conv1_v_w': jax.random.normal(ks[6], (KSIZE, v, v), jnp.float32) / jnp.sqrt(KSIZE * v),
            'probe_q_w': _init_veclinear(ks[7], v, h),
            'probe_k_w': _init_veclinear(ks[8], v, h),
            'attn': _init_attn(ks[9], cfg),
            'gn_a': _init_gn_a(a),
            'gn_v': _init_gn_v(v)}


def init_generator(key, cfg):
    v = cfg['vdim']
    ks = jax.random.split(key, 9)
    return {'node_enc': _init_node_embed(ks[0], cfg),
            'blocks': [_init_block(ks[1 + i], cfg) for i in range(3)],
            'blocks_tune': [_init_block(ks[4 + i], cfg) for i in range(3)],
            'lin_v_node': _init_veclinear(ks[7], v, 1),
            'lin_v_node_tune': _init_veclinear(ks[8], v, 1)}


# ----------------------------------------------------------------------------
if __name__ == "__main__":
    cfg = dict(adim=8, vdim=4, rank=4, agroups=2, vgroups=2, r0_list=[1.0, 2.0])
    B, N = 2, 16
    key = jax.random.PRNGKey(0)
    k1, k2, k3, k4 = jax.random.split(key, 4)
    pos0 = jax.random.normal(k1, (B, N, 3), jnp.float32)
    noise = 0.1 * jax.random.normal(k2, (B, N, 3), jnp.float32)
    eps_a = 0.1 * jax.random.normal(k3, (B, N, cfg['adim']), jnp.float32)
    eps_v = 0.1 * jax.random.normal(k4, (B, N, cfg['vdim'], 3), jnp.float32)

    params = init_generator(jax.random.PRNGKey(42), cfg)
    gen_fn = make_generator_fn(cfg)
    out = gen_fn(params, pos0, noise, eps_a, eps_v)
    out = jax.block_until_ready(out)
    assert out.shape == (B, N, 3), out.shape
    assert bool(jnp.all(jnp.isfinite(out)))
    print("KERNEL_OK")
</pallas_src>

<mosaic_0001>
module attributes {stable_mosaic.version = 11 : i64} {
  func.func @_node_embed_kernel(%arg0: i32, %arg1: memref<16x8xf32, #tpu.memory_space<vmem>>, %arg2: memref<16x2xf32, #tpu.memory_space<vmem>>, %arg3: memref<16x2xf32, #tpu.memory_space<vmem>>, %arg4: memref<16x2xf32, #tpu.memory_space<vmem>>, %arg5: memref<8x8xf32, #tpu.memory_space<vmem>>, %arg6: memref<1x8xf32, #tpu.memory_space<vmem>>, %arg7: memref<8x8xf32, #tpu.memory_space<vmem>>, %arg8: memref<1x8xf32, #tpu.memory_space<vmem>>, %arg9: memref<2x4xf32, #tpu.memory_space<vmem>>, %arg10: memref<16x8xf32, #tpu.memory_space<vmem>>, %arg11: memref<16x4xf32, #tpu.memory_space<vmem>>, %arg12: memref<16x4xf32, #tpu.memory_space<vmem>>, %arg13: memref<16x4xf32, #tpu.memory_space<vmem>>) attributes {dimension_semantics = [#tpu.dimension_semantics<parallel>], iteration_bounds = array<i64: 2>, scalar_prefetch = 0 : i64, scratch_operands = 0 : i64, tpu.core_type = #tpu.core_type<tc>, window_params = [{transform_indices = @transform_0, window_bounds = array<i64: 16, 8>}, {transform_indices = @transform_1, window_bounds = array<i64: 16, 2>}, {transform_indices = @transform_2, window_bounds = array<i64: 16, 2>}, {transform_indices = @transform_3, window_bounds = array<i64: 16, 2>}, {pipeline_mode = #tpu.pipeline_mode<synchronous>, transform_indices = @transform_4, window_bounds = array<i64: 8, 8>}, {pipeline_mode = #tpu.pipeline_mode<synchronous>, transform_indices = @transform_5, window_bounds = array<i64: 1, 8>}, {pipeline_mode = #tpu.pipeline_mode<synchronous>, transform_indices = @transform_6, window_bounds = array<i64: 8, 8>}, {pipeline_mode = #tpu.pipeline_mode<synchronous>, transform_indices = @transform_7, window_bounds = array<i64: 1, 8>}, {pipeline_mode = #tpu.pipeline_mode<synchronous>, transform_indices = @transform_8, window_bounds = array<i64: 2, 4>}, {transform_indices = @transform_9, window_bounds = array<i64: 16, 8>}, {transform_indices = @transform_10, window_bounds = array<i64: 16, 4>}, {transform_indices = @transform_11, window_bounds = array<i64: 16, 4>}, {transform_indices = @transform_12, window_bounds = array<i64: 16, 4>}]} {
    %c0 = arith.constant 0 : index
    %c0_0 = arith.constant 0 : index
    %0 = vector.load %arg1[%c0, %c0_0] : memref<16x8xf32, #tpu.memory_space<vmem>>, vector<16x8xf32>
    %c0_1 = arith.constant 0 : index
    %c0_2 = arith.constant 0 : index
    %1 = vector.load %arg5[%c0_1, %c0_2] : memref<8x8xf32, #tpu.memory_space<vmem>>, vector<8x8xf32>
    %cst = arith.constant dense<0.000000e+00> : vector<16x8xf32>
    %2 = tpu.matmul %0, %1, %cst {dimension_numbers = #tpu.dot_dimension_numbers<[1], [0], [0], [1], [0, 0, 1, 1], [], []>} : vector<16x8xf32>, vector<8x8xf32>, vector<16x8xf32> -> vector<16x8xf32>
    %c0_3 = arith.constant 0 : index
    %c0_4 = arith.constant 0 : index
    %3 = vector.load %arg6[%c0_3, %c0_4] : memref<1x8xf32, #tpu.memory_space<vmem>>, vector<1x8xf32>
    %4 = vector.broadcast %3 : vector<1x8xf32> to vector<16x8xf32>
    %5 = arith.addf %2, %4 : vector<16x8xf32>
    %cst_5 = arith.constant 0.000000e+00 : f32
    %6 = vector.broadcast %cst_5 : f32 to vector<16x8xf32>
    %7 = arith.cmpf oge, %5, %6 : vector<16x8xf32>
    %cst_6 = arith.constant 2.000000e-01 : f32
    %8 = vector.broadcast %cst_6 : f32 to vector<16x8xf32>
    %9 = arith.mulf %8, %5 : vector<16x8xf32>
    %10 = arith.select %7, %5, %9 : vector<16x8xi1>, vector<16x8xf32>
    %c0_7 = arith.constant 0 : index
    %c0_8 = arith.constant 0 : index
    %11 = vector.load %arg7[%c0_7, %c0_8] : memref<8x8xf32, #tpu.memory_space<vmem>>, vector<8x8xf32>
    %cst_9 = arith.constant dense<0.000000e+00> : vector<16x8xf32>
    %12 = tpu.matmul %10, %11, %cst_9 {dimension_numbers = #tpu.dot_dimension_numbers<[1], [0], [0], [1], [0, 0, 1, 1], [], []>} : vector<16x8xf32>, vector<8x8xf32>, vector<16x8xf32> -> vector<16x8xf32>
    %c0_10 = arith.constant 0 : index
    %c0_11 = arith.constant 0 : index
    %13 = vector.load %arg8[%c0_10, %c0_11] : memref<1x8xf32, #tpu.memory_space<vmem>>, vector<1x8xf32>
    %14 = vector.broadcast %13 : vector<1x8xf32> to vector<16x8xf32>
    %15 = arith.addf %12, %14 : vector<16x8xf32>
    %c0_12 = arith.constant 0 : index
    %c0_13 = arith.constant 0 : index
    %16 = vector.load %arg10[%c0_12, %c0_13] : memref<16x8xf32, #tpu.memory_space<vmem>>, vector<16x8xf32>
    tpu.vector_store %arg10[%c0_12, %c0_13], %15 {strides = array<i32>} : memref<16x8xf32, #tpu.memory_space<vmem>>, vector<16x8xf32>,
    %c0_14 = arith.constant 0 : index
    %c0_15 = arith.constant 0 : index
    %17 = vector.load %arg9[%c0_14, %c0_15] : memref<2x4xf32, #tpu.memory_space<vmem>>, vector<2x4xf32>
    %c0_16 = arith.constant 0 : index
    %c0_17 = arith.constant 0 : index
    %18 = vector.load %arg2[%c0_16, %c0_17] : memref<16x2xf32, #tpu.memory_space<vmem>>, vector<16x2xf32>
    %cst_18 = arith.constant dense<0.000000e+00> : vector<16x4xf32>
    %19 = tpu.matmul %18, %17, %cst_18 {dimension_numbers = #tpu.dot_dimension_numbers<[1], [0], [0], [1], [0, 0, 1, 1], [], []>} : vector<16x2xf32>, vector<2x4xf32>, vector<16x4xf32> -> vector<16x4xf32>
    %c0_19 = arith.constant 0 : index
    %c0_20 = arith.constant 0 : index
    %20 = vector.load %arg11[%c0_19, %c0_20] : memref<16x4xf32, #tpu.memory_space<vmem>>, vector<16x4xf32>
    tpu.vector_store %arg11[%c0_19, %c0_20], %19 {strides = array<i32>} : memref<16x4xf32, #tpu.memory_space<vmem>>, vector<16x4xf32>,
    %c0_21 = arith.constant 0 : index
    %c0_22 = arith.constant 0 : index
    %21 = vector.load %arg3[%c0_21, %c0_22] : memref<16x2xf32, #tpu.memory_space<vmem>>, vector<16x2xf32>
    %cst_23 = arith.constant dense<0.000000e+00> : vector<16x4xf32>
    %22 = tpu.matmul %21, %17, %cst_23 {dimension_numbers = #tpu.dot_dimension_numbers<[1], [0], [0], [1], [0, 0, 1, 1], [], []>} : vector<16x2xf32>, vector<2x4xf32>, vector<16x4xf32> -> vector<16x4xf32>
    %c0_24 = arith.constant 0 : index
    %c0_25 = arith.constant 0 : index
    %23 = vector.load %arg12[%c0_24, %c0_25] : memref<16x4xf32, #tpu.memory_space<vmem>>, vector<16x4xf32>
    tpu.vector_store %arg12[%c0_24, %c0_25], %22 {strides = array<i32>} : memref<16x4xf32, #tpu.memory_space<vmem>>, vector<16x4xf32>,
    %c0_26 = arith.constant 0 : index
    %c0_27 = arith.constant 0 : index
    %24 = vector.load %arg4[%c0_26, %c0_27] : memref<16x2xf32, #tpu.memory_space<vmem>>, vector<16x2xf32>
    %cst_28 = arith.constant dense<0.000000e+00> : vector<16x4xf32>
    %25 = tpu.matmul %24, %17, %cst_28 {dimension_numbers = #tpu.dot_dimension_numbers<[1], [0], [0], [1], [0, 0, 1, 1], [], []>} : vector<16x2xf32>, vector<2x4xf32>, vector<16x4xf32> -> vector<16x4xf32>
    %c0_29 = arith.constant 0 : index
    %c0_30 = arith.constant 0 : index
    %26 = vector.load %arg13[%c0_29, %c0_30] : memref<16x4xf32, #tpu.memory_space<vmem>>, vector<16x4xf32>
    tpu.vector_store %arg13[%c0_29, %c0_30], %25 {strides = array<i32>} : memref<16x4xf32, #tpu.memory_space<vmem>>, vector<16x4xf32>,
    return
  }
  func.func @transform_0(%arg0: i32) -> (i32, i32) {
    %c0_i32 = arith.constant 0 : i32
    %c0_i32_0 = arith.constant 0 : i32
    return %arg0, %c0_i32 : i32, i32
  }
  func.func @transform_1(%arg0: i32) -> (i32, i32) {
    %c0_i32 = arith.constant 0 : i32
    %c0_i32_0 = arith.constant 0 : i32
    return %arg0, %c0_i32 : i32, i32
  }
  func.func @transform_2(%arg0: i32) -> (i32, i32) {
    %c0_i32 = arith.constant 0 : i32
    %c0_i32_0 = arith.constant 0 : i32
    return %arg0, %c0_i32 : i32, i32
  }
  func.func @transform_3(%arg0: i32) -> (i32, i32) {
    %c0_i32 = arith.constant 0 : i32
    %c0_i32_0 = arith.constant 0 : i32
    return %arg0, %c0_i32 : i32, i32
  }
  func.func @transform_4(%arg0: i32) -> (i32, i32) {
    %c0_i32 = arith.constant 0 : i32
    %c0_i32_0 = arith.constant 0 : i32
    %c0_i32_1 = arith.constant 0 : i32
    return %c0_i32, %c0_i32_0 : i32, i32
  }
  func.func @transform_5(%arg0: i32) -> (i32, i32) {
    %c0_i32 = arith.constant 0 : i32
    %c0_i32_0 = arith.constant 0 : i32
    %c0_i32_1 = arith.constant 0 : i32
    return %c0_i32, %c0_i32_0 : i32, i32
  }
  func.func @transform_6(%arg0: i32) -> (i32, i32) {
    %c0_i32 = arith.constant 0 : i32
    %c0_i32_0 = arith.constant 0 : i32
    %c0_i32_1 = arith.constant 0 : i32
    return %c0_i32, %c0_i32_0 : i32, i32
  }
  func.func @transform_7(%arg0: i32) -> (i32, i32) {
    %c0_i32 = arith.constant 0 : i32
    %c0_i32_0 = arith.constant 0 : i32
    %c0_i32_1 = arith.constant 0 : i32
    return %c0_i32, %c0_i32_0 : i32, i32
  }
  func.func @transform_8(%arg0: i32) -> (i32, i32) {
    %c0_i32 = arith.constant 0 : i32
    %c0_i32_0 = arith.constant 0 : i32
    %c0_i32_1 = arith.constant 0 : i32
    return %c0_i32, %c0_i32_0 : i32, i32
  }
  func.func @transform_9(%arg0: i32) -> (i32, i32) {
    %c0_i32 = arith.constant 0 : i32
    %c0_i32_0 = arith.constant 0 : i32
    return %arg0, %c0_i32 : i32, i32
  }
  func.func @transform_10(%arg0: i32) -> (i32, i32) {
    %c0_i32 = arith.constant 0 : i32
    %c0_i32_0 = arith.constant 0 : i32
    return %arg0, %c0_i32 : i32, i32
  }
  func.func @transform_11(%arg0: i32) -> (i32, i32) {
    %c0_i32 = arith.constant 0 : i32
    %c0_i32_0 = arith.constant 0 : i32
    return %arg0, %c0_i32 : i32, i32
  }
  func.func @transform_12(%arg0: i32) -> (i32, i32) {
    %c0_i32 = arith.constant 0 : i32
    %c0_i32_0 = arith.constant 0 : i32
    return %arg0, %c0_i32 : i32, i32
  }
}

module attributes {stable_mosaic.version = 11 : i64} {
  func.func @_embed_kernel(%arg0: i32, %arg1: memref<16x8xf32, #tpu.memory_space<vmem>>, %arg2: memref<16x16xf32, #tpu.memory_space<vmem>>, %arg3: memref<16x2xf32, #tpu.memory_space<vmem>>, %arg4: memref<16x2xf32, #tpu.memory_space<vmem>>, %arg5: memref<16x2xf32, #tpu.memory_space<vmem>>, %arg6: memref<16x3xf32, #tpu.memory_space<vmem>>, %arg7: memref<16x3xf32, #tpu.memory_space<vmem>>, %arg8: memref<16x3xf32, #tpu.memory_space<vmem>>, %arg9: memref<8x8xf32, #tpu.memory_space<vmem>>, %arg10: memref<1x8xf32, #tpu.memory_space<vmem>>, %arg11: memref<8x8xf32, #tpu.memory_space<vmem>>, %arg12: memref<1x8xf32, #tpu.memory_space<vmem>>, %arg13: memref<2x4xf32, #tpu.memory_space<vmem>>, %arg14: memref<16x8xf32, #tpu.memory_space<vmem>>, %arg15: memref<1x8xf32, #tpu.memory_space<vmem>>, %arg16: memref<8x8xf32, #tpu.memory_space<vmem>>, %arg17: memref<1x8xf32, #tpu.memory_space<vmem>>, %arg18: memref<3x4xf32, #tpu.memory_space<vmem>>, %arg19: memref<16x8xf32, #tpu.memory_space<vmem>>, %arg20: memref<16x4xf32, #tpu.memory_space<vmem>>, %arg21: memref<16x4xf32, #tpu.memory_space<vmem>>, %arg22: memref<16x4xf32, #tpu.memory_space<vmem>>) attributes {dimension_semantics = [#tpu.dimension_semantics<parallel>], iteration_bounds = array<i64: 2>, scalar_prefetch = 0 : i64, scratch_operands = 0 : i64, tpu.core_type = #tpu.core_type<tc>, window_params = [{transform_indices = @transform_0, window_bounds = array<i64: 16, 8>}, {transform_indices = @transform_1, window_bounds = array<i64: 16, 16>}, {transform_indices = @transform_2, window_bounds = array<i64: 16, 2>}, {transform_indices = @transform_3, window_bounds = array<i64: 16, 2>}, {transform_indices = @transform_4, window_bounds = array<i64: 16, 2>}, {transform_indices = @transform_5, window_bounds = array<i64: 16, 3>}, {transform_indices = @transform_6, window_bounds = array<i64: 16, 3>}, {transform_indices = @transform_7, window_bounds = array<i64: 16, 3>}, {pipeline_mode = #tpu.pipeline_mode<synchronous>, transform_indices = @transform_8, window_bounds = array<i64: 8, 8>}, {pipeline_mode = #tpu.pipeline_mode<synchronous>, transform_indices = @transform_9, window_bounds = array<i64: 1, 8>}, {pipeline_mode = #tpu.pipeline_mode<synchronous>, transform_indices = @transform_10, window_bounds = array<i64: 8, 8>}, {pipeline_mode = #tpu.pipeline_mode<synchronous>, transform_indices = @transform_11, window_bounds = array<i64: 1, 8>}, {pipeline_mode = #tpu.pipeline_mode<synchronous>, transform_indices = @transform_12, window_bounds = array<i64: 2, 4>}, {pipeline_mode = #tpu.pipeline_mode<synchronous>, transform_indices = @transform_13, window_bounds = array<i64: 16, 8>}, {pipeline_mode = #tpu.pipeline_mode<synchronous>, transform_indices = @transform_14, window_bounds = array<i64: 1, 8>}, {pipeline_mode = #tpu.pipeline_mode<synchronous>, transform_indices = @transform_15, window_bounds = array<i64: 8, 8>}, {pipeline_mode = #tpu.pipeline_mode<synchronous>, transform_indices = @transform_16, window_bounds = array<i64: 1, 8>}, {pipeline_mode = #tpu.pipeline_mode<synchronous>, transform_indices = @transform_17, window_bounds = array<i64: 3, 4>}, {transform_indices = @transform_18, window_bounds = array<i64: 16, 8>}, {transform_indices = @transform_19, window_bounds = array<i64: 16, 4>}, {transform_indices = @transform_20, window_bounds = array<i64: 16, 4>}, {transform_indices = @transform_21, window_bounds = array<i64: 16, 4>}]} {
    %c0 = arith.constant 0 : index
    %c0_0 = arith.constant 0 : index
    %0 = vector.load %arg1[%c0, %c0_0] : memref<16x8xf32, #tpu.memory_space<vmem>>, vector<16x8xf32>
    %c0_1 = arith.constant 0 : index
    %c0_2 = arith.constant 0 : index
    %1 = vector.load %arg9[%c0_1, %c0_2] : memref<8x8xf32, #tpu.memory_space<vmem>>, vector<8x8xf32>
    %cst = arith.constant dense<0.000000e+00> : vector<16x8xf32>
    %2 = tpu.matmul %0, %1, %cst {dimension_numbers = #tpu.dot_dimension_numbers<[1], [0], [0], [1], [0, 0, 1, 1], [], []>} : vector<16x8xf32>, vector<8x8xf32>, vector<16x8xf32> -> vector<16x8xf32>
    %c0_3 = arith.constant 0 : index
    %c0_4 = arith.constant 0 : index
    %3 = vector.load %arg10[%c0_3, %c0_4] : memref<1x8xf32, #tpu.memory_space<vmem>>, vector<1x8xf32>
    %4 = vector.broadcast %3 : vector<1x8xf32> to vector<16x8xf32>
    %5 = arith.addf %2, %4 : vector<16x8xf32>
    %cst_5 = arith.constant 0.000000e+00 : f32
    %6 = vector.broadcast %cst_5 : f32 to vector<16x8xf32>
    %7 = arith.cmpf oge, %5, %6 : vector<16x8xf32>
    %cst_6 = arith.constant 2.000000e-01 : f32
    %8 = vector.broadcast %cst_6 : f32 to vector<16x8xf32>
    %9 = arith.mulf %8, %5 : vector<16x8xf32>
    %10 = arith.select %7, %5, %9 : vector<16x8xi1>, vector<16x8xf32>
    %c0_7 = arith.constant 0 : index
    %c0_8 = arith.constant 0 : index
    %11 = vector.load %arg11[%c0_7, %c0_8] : memref<8x8xf32, #tpu.memory_space<vmem>>, vector<8x8xf32>
    %cst_9 = arith.constant dense<0.000000e+00> : vector<16x8xf32>
    %12 = tpu.matmul %10, %11, %cst_9 {dimension_numbers = #tpu.dot_dimension_numbers<[1], [0], [0], [1], [0, 0, 1, 1], [], []>} : vector<16x8xf32>, vector<8x8xf32>, vector<16x8xf32> -> vector<16x8xf32>
    %c0_10 = arith.constant 0 : index
    %c0_11 = arith.constant 0 : index
    %13 = vector.load %arg12[%c0_10, %c0_11] : memref<1x8xf32, #tpu.memory_space<vmem>>, vector<1x8xf32>
    %14 = vector.broadcast %13 : vector<1x8xf32> to vector<16x8xf32>
    %15 = arith.addf %12, %14 : vector<16x8xf32>
    %c0_12 = arith.constant 0 : index
    %c0_13 = arith.constant 0 : index
    %16 = vector.load %arg2[%c0_12, %c0_13] : memref<16x16xf32, #tpu.memory_space<vmem>>, vector<16x16xf32>
    %c0_14 = arith.constant 0 : index
    %c0_15 = arith.constant 0 : index
    %17 = vector.load %arg14[%c0_14, %c0_15] : memref<16x8xf32, #tpu.memory_space<vmem>>, vector<16x8xf32>
    %cst_16 = arith.constant dense<0.000000e+00> : vector<16x8xf32>
    %18 = tpu.matmul %16, %17, %cst_16 {dimension_numbers = #tpu.dot_dimension_numbers<[1], [0], [0], [1], [0, 0, 1, 1], [], []>} : vector<16x16xf32>, vector<16x8xf32>, vector<16x8xf32> -> vector<16x8xf32>
    %c0_17 = arith.constant 0 : index
    %c0_18 = arith.constant 0 : index
    %19 = vector.load %arg15[%c0_17, %c0_18] : memref<1x8xf32, #tpu.memory_space<vmem>>, vector<1x8xf32>
    %20 = vector.broadcast %19 : vector<1x8xf32> to vector<16x8xf32>
    %21 = arith.addf %18, %20 : vector<16x8xf32>
    %cst_19 = arith.constant 0.000000e+00 : f32
    %22 = vector.broadcast %cst_19 : f32 to vector<16x8xf32>
    %23 = arith.cmpf oge, %21, %22 : vector<16x8xf32>
    %cst_20 = arith.constant 2.000000e-01 : f32
    %24 = vector.broadcast %cst_20 : f32 to vector<16x8xf32>
    %25 = arith.mulf %24, %21 : vector<16x8xf32>
    %26 = arith.select %23, %21, %25 : vector<16x8xi1>, vector<16x8xf32>
    %c0_21 = arith.constant 0 : index
    %c0_22 = arith.constant 0 : index
    %27 = vector.load %arg16[%c0_21, %c0_22] : memref<8x8xf32, #tpu.memory_space<vmem>>, vector<8x8xf32>
    %cst_23 = arith.constant dense<0.000000e+00> : vector<16x8xf32>
    %28 = tpu.matmul %26, %27, %cst_23 {dimension_numbers = #tpu.dot_dimension_numbers<[1], [0], [0], [1], [0, 0, 1, 1], [], []>} : vector<16x8xf32>, vector<8x8xf32>, vector<16x8xf32> -> vector<16x8xf32>
    %c0_24 = arith.constant 0 : index
    %c0_25 = arith.constant 0 : index
    %29 = vector.load %arg17[%c0_24, %c0_25] : memref<1x8xf32, #tpu.memory_space<vmem>>, vector<1x8xf32>
    %30 = vector.broadcast %29 : vector<1x8xf32> to vector<16x8xf32>
    %31 = arith.addf %28, %30 : vector<16x8xf32>
    %32 = arith.addf %15, %31 : vector<16x8xf32>
    %c0_26 = arith.constant 0 : index
    %c0_27 = arith.constant 0 : index
    %33 = vector.load %arg19[%c0_26, %c0_27] : memref<16x8xf32, #tpu.memory_space<vmem>>, vector<16x8xf32>
    tpu.vector_store %arg19[%c0_26, %c0_27], %32 {strides = array<i32>} : memref<16x8xf32, #tpu.memory_space<vmem>>, vector<16x8xf32>,
    %c0_28 = arith.constant 0 : index
    %c0_29 = arith.constant 0 : index
    %34 = vector.load %arg13[%c0_28, %c0_29] : memref<2x4xf32, #tpu.memory_space<vmem>>, vector<2x4xf32>
    %c0_30 = arith.constant 0 : index
    %c0_31 = arith.constant 0 : index
    %35 = vector.load %arg18[%c0_30, %c0_31] : memref<3x4xf32, #tpu.memory_space<vmem>>, vector<3x4xf32>
    %c0_32 = arith.constant 0 : index
    %c0_33 = arith.constant 0 : index
    %36 = vector.load %arg3[%c0_32, %c0_33] : memref<16x2xf32, #tpu.memory_space<vmem>>, vector<16x2xf32>
    %cst_34 = arith.constant dense<0.000000e+00> : vector<16x4xf32>
    %37 = tpu.matmul %36, %34, %cst_34 {dimension_numbers = #tpu.dot_dimension_numbers<[1], [0], [0], [1], [0, 0, 1, 1], [], []>} : vector<16x2xf32>, vector<2x4xf32>, vector<16x4xf32> -> vector<16x4xf32>
    %c0_35 = arith.constant 0 : index
    %c0_36 = arith.constant 0 : index
    %38 = vector.load %arg6[%c0_35, %c0_36] : memref<16x3xf32, #tpu.memory_space<vmem>>, vector<16x3xf32>
    %cst_37 = arith.constant dense<0.000000e+00> : vector<16x4xf32>
    %39 = tpu.matmul %38, %35, %cst_37 {dimension_numbers = #tpu.dot_dimension_numbers<[1], [0], [0], [1], [0, 0, 1, 1], [], []>} : vector<16x3xf32>, vector<3x4xf32>, vector<16x4xf32> -> vector<16x4xf32>
    %40 = arith.addf %37, %39 : vector<16x4xf32>
    %c0_38 = arith.constant 0 : index
    %c0_39 = arith.constant 0 : index
    %41 = vector.load %arg20[%c0_38, %c0_39] : memref<16x4xf32, #tpu.memory_space<vmem>>, vector<16x4xf32>
    tpu.vector_store %arg20[%c0_38, %c0_39], %40 {strides = array<i32>} : memref<16x4xf32, #tpu.memory_space<vmem>>, vector<16x4xf32>,
    %c0_40 = arith.constant 0 : index
    %c0_41 = arith.constant 0 : index
    %42 = vector.load %arg4[%c0_40, %c0_41] : memref<16x2xf32, #tpu.memory_space<vmem>>, vector<16x2xf32>
    %cst_42 = arith.constant dense<0.000000e+00> : vector<16x4xf32>
    %43 = tpu.matmul %42, %34, %cst_42 {dimension_numbers = #tpu.dot_dimension_numbers<[1], [0], [0], [1], [0, 0, 1, 1], [], []>} : vector<16x2xf32>, vector<2x4xf32>, vector<16x4xf32> -> vector<16x4xf32>
    %c0_43 = arith.constant 0 : index
    %c0_44 = arith.constant 0 : index
    %44 = vector.load %arg7[%c0_43, %c0_44] : memref<16x3xf32, #tpu.memory_space<vmem>>, vector<16x3xf32>
    %cst_45 = arith.constant dense<0.000000e+00> : vector<16x4xf32>
    %45 = tpu.matmul %44, %35, %cst_45 {dimension_numbers = #tpu.dot_dimension_numbers<[1], [0], [0], [1], [0, 0, 1, 1], [], []>} : vector<16x3xf32>, vector<3x4xf32>, vector<16x4xf32> -> vector<16x4xf32>
    %46 = arith.addf %43, %45 : vector<16x4xf32>
    %c0_46 = arith.constant 0 : index
    %c0_47 = arith.constant 0 : index
    %47 = vector.load %arg21[%c0_46, %c0_47] : memref<16x4xf32, #tpu.memory_space<vmem>>, vector<16x4xf32>
    tpu.vector_store %arg21[%c0_46, %c0_47], %46 {strides = array<i32>} : memref<16x4xf32, #tpu.memory_space<vmem>>, vector<16x4xf32>,
    %c0_48 = arith.constant 0 : index
    %c0_49 = arith.constant 0 : index
    %48 = vector.load %arg5[%c0_48, %c0_49] : memref<16x2xf32, #tpu.memory_space<vmem>>, vector<16x2xf32>
    %cst_50 = arith.constant dense<0.000000e+00> : vector<16x4xf32>
    %49 = tpu.matmul %48, %34, %cst_50 {dimension_numbers = #tpu.dot_dimension_numbers<[1], [0], [0], [1], [0, 0, 1, 1], [], []>} : vector<16x2xf32>, vector<2x4xf32>, vector<16x4xf32> -> vector<16x4xf32>
    %c0_51 = arith.constant 0 : index
    %c0_52 = arith.constant 0 : index
    %50 = vector.load %arg8[%c0_51, %c0_52] : memref<16x3xf32, #tpu.memory_space<vmem>>, vector<16x3xf32>
    %cst_53 = arith.constant dense<0.000000e+00> : vector<16x4xf32>
    %51 = tpu.matmul %50, %35, %cst_53 {dimension_numbers = #tpu.dot_dimension_numbers<[1], [0], [0], [1], [0, 0, 1, 1], [], []>} : vector<16x3xf32>, vector<3x4xf32>, vector<16x4xf32> -> vector<16x4xf32>
    %52 = arith.addf %49, %51 : vector<16x4xf32>
    %c0_54 = arith.constant 0 : index
    %c0_55 = arith.constant 0 : index
    %53 = vector.load %arg22[%c0_54, %c0_55] : memref<16x4xf32, #tpu.memory_space<vmem>>, vector<16x4xf32>
    tpu.vector_store %arg22[%c0_54, %c0_55], %52 {strides = array<i32>} : memref<16x4xf32, #tpu.memory_space<vmem>>, vector<16x4xf32>,
    return
  }
  func.func @transform_0(%arg0: i32) -> (i32, i32) {
    %c0_i32 = arith.constant 0 : i32
    %c0_i32_0 = arith.constant 0 : i32
    return %arg0, %c0_i32 : i32, i32
  }
  func.func @transform_1(%arg0: i32) -> (i32, i32) {
    %c0_i32 = arith.constant 0 : i32
    %c0_i32_0 = arith.constant 0 : i32
    return %arg0, %c0_i32 : i32, i32
  }
  func.func @transform_2(%arg0: i32) -> (i32, i32) {
    %c0_i32 = arith.constant 0 : i32
    %c0_i32_0 = arith.constant 0 : i32
    return %arg0, %c0_i32 : i32, i32
  }
  func.func @transform_3(%arg0: i32) -> (i32, i32) {
    %c0_i32 = arith.constant 0 : i32
    %c0_i32_0 = arith.constant 0 : i32
    return %arg0, %c0_i32 : i32, i32
  }
  func.func @transform_4(%arg0: i32) -> (i32, i32) {
    %c0_i32 = arith.constant 0 : i32
    %c0_i32_0 = arith.constant 0 : i32
    return %arg0, %c0_i32 : i32, i32
  }
  func.func @transform_5(%arg0: i32) -> (i32, i32) {
    %c0_i32 = arith.constant 0 : i32
    %c0_i32_0 = arith.constant 0 : i32
    return %arg0, %c0_i32 : i32, i32
  }
  func.func @transform_6(%arg0: i32) -> (i32, i32) {
    %c0_i32 = arith.constant 0 : i32
    %c0_i32_0 = arith.constant 0 : i32
    return %arg0, %c0_i32 : i32, i32
  }
  func.func @transform_7(%arg0: i32) -> (i32, i32) {
    %c0_i32 = arith.constant 0 : i32
    %c0_i32_0 = arith.constant 0 : i32
    return %arg0, %c0_i32 : i32, i32
  }
  func.func @transform_8(%arg0: i32) -> (i32, i32) {
    %c0_i32 = arith.constant 0 : i32
    %c0_i32_0 = arith.constant 0 : i32
    %c0_i32_1 = arith.constant 0 : i32
    return %c0_i32, %c0_i32_0 : i32, i32
  }
  func.func @transform_9(%arg0: i32) -> (i32, i32) {
    %c0_i32 = arith.constant 0 : i32
    %c0_i32_0 = arith.constant 0 : i32
    %c0_i32_1 = arith.constant 0 : i32
    return %c0_i32, %c0_i32_0 : i32, i32
  }
  func.func @transform_10(%arg0: i32) -> (i32, i32) {
    %c0_i32 = arith.constant 0 : i32
    %c0_i32_0 = arith.constant 0 : i32
    %c0_i32_1 = arith.constant 0 : i32
    return %c0_i32, %c0_i32_0 : i32, i32
  }
  func.func @transform_11(%arg0: i32) -> (i32, i32) {
    %c0_i32 = arith.constant 0 : i32
    %c0_i32_0 = arith.constant 0 : i32
    %c0_i32_1 = arith.constant 0 : i32
    return %c0_i32, %c0_i32_0 : i32, i32
  }
  func.func @transform_12(%arg0: i32) -> (i32, i32) {
    %c0_i32 = arith.constant 0 : i32
    %c0_i32_0 = arith.constant 0 : i32
    %c0_i32_1 = arith.constant 0 : i32
    return %c0_i32, %c0_i32_0 : i32, i32
  }
  func.func @transform_13(%arg0: i32) -> (i32, i32) {
    %c0_i32 = arith.constant 0 : i32
    %c0_i32_0 = arith.constant 0 : i32
    %c0_i32_1 = arith.constant 0 : i32
    return %c0_i32, %c0_i32_0 : i32, i32
  }
  func.func @transform_14(%arg0: i32) -> (i32, i32) {
    %c0_i32 = arith.constant 0 : i32
    %c0_i32_0 = arith.constant 0 : i32
    %c0_i32_1 = arith.constant 0 : i32
    return %c0_i32, %c0_i32_0 : i32, i32
  }
  func.func @transform_15(%arg0: i32) -> (i32, i32) {
    %c0_i32 = arith.constant 0 : i32
    %c0_i32_0 = arith.constant 0 : i32
    %c0_i32_1 = arith.constant 0 : i32
    return %c0_i32, %c0_i32_0 : i32, i32
  }
  func.func @transform_16(%arg0: i32) -> (i32, i32) {
    %c0_i32 = arith.constant 0 : i32
    %c0_i32_0 = arith.constant 0 : i32
    %c0_i32_1 = arith.constant 0 : i32
    return %c0_i32, %c0_i32_0 : i32, i32
  }
  func.func @transform_17(%arg0: i32) -> (i32, i32) {
    %c0_i32 = arith.constant 0 : i32
    %c0_i32_0 = arith.constant 0 : i32
    %c0_i32_1 = arith.constant 0 : i32
    return %c0_i32, %c0_i32_0 : i32, i32
  }
  func.func @transform_18(%arg0: i32) -> (i32, i32) {
    %c0_i32 = arith.constant 0 : i32
    %c0_i32_0 = arith.constant 0 : i32
    return %arg0, %c0_i32 : i32, i32
  }
  func.func @transform_19(%arg0: i32) -> (i32, i32) {
    %c0_i32 = arith.constant 0 : i32
    %c0_i32_0 = arith.constant 0 : i32
    return %arg0, %c0_i32 : i32, i32
  }
  func.func @transform_20(%arg0: i32) -> (i32, i32) {
    %c0_i32 = arith.constant 0 : i32
    %c0_i32_0 = arith.constant 0 : i32
    return %arg0, %c0_i32 : i32, i32
  }
  func.func @transform_21(%arg0: i32) -> (i32, i32) {
    %c0_i32 = arith.constant 0 : i32
    %c0_i32_0 = arith.constant 0 : i32
    return %arg0, %c0_i32 : i32, i32
  }
}

module attributes {stable_mosaic.version = 11 : i64} {
  func.func @_conv_add_kernel(%arg0: i32, %arg1: memref<16x56xf32, #tpu.memory_space<vmem>>, %arg2: memref<16x28xf32, #tpu.memory_space<vmem>>, %arg3: memref<16x28xf32, #tpu.memory_space<vmem>>, %arg4: memref<16x28xf32, #tpu.memory_space<vmem>>, %arg5: memref<16x8xf32, #tpu.memory_space<vmem>>, %arg6: memref<16x4xf32, #tpu.memory_space<vmem>>, %arg7: memref<16x4xf32, #tpu.memory_space<vmem>>, %arg8: memref<16x4xf32, #tpu.memory_space<vmem>>, %arg9: memref<56x8xf32, #tpu.memory_space<vmem>>, %arg10: memref<1x8xf32, #tpu.memory_space<vmem>>, %arg11: memref<28x4xf32, #tpu.memory_space<vmem>>, %arg12: memref<16x8xf32, #tpu.memory_space<vmem>>, %arg13: memref<16x4xf32, #tpu.memory_space<vmem>>, %arg14: memref<16x4xf32, #tpu.memory_space<vmem>>, %arg15: memref<16x4xf32, #tpu.memory_space<vmem>>) attributes {dimension_semantics = [#tpu.dimension_semantics<parallel>], iteration_bounds = array<i64: 2>, scalar_prefetch = 0 : i64, scratch_operands = 0 : i64, tpu.core_type = #tpu.core_type<tc>, window_params = [{transform_indices = @transform_0, window_bounds = array<i64: 16, 56>}, {transform_indices = @transform_1, window_bounds = array<i64: 16, 28>}, {transform_indices = @transform_2, window_bounds = array<i64: 16, 28>}, {transform_indices = @transform_3, window_bounds = array<i64: 16, 28>}, {transform_indices = @transform_4, window_bounds = array<i64: 16, 8>}, {transform_indices = @transform_5, window_bounds = array<i64: 16, 4>}, {transform_indices = @transform_6, window_bounds = array<i64: 16, 4>}, {transform_indices = @transform_7, window_bounds = array<i64: 16, 4>}, {pipeline_mode = #tpu.pipeline_mode<synchronous>, transform_indices = @transform_8, window_bounds = array<i64: 56, 8>}, {pipeline_mode = #tpu.pipeline_mode<synchronous>, transform_indices = @transform_9, window_bounds = array<i64: 1, 8>}, {pipeline_mode = #tpu.pipeline_mode<synchronous>, transform_indices = @transform_10, window_bounds = array<i64: 28, 4>}, {transform_indices = @transform_11, window_bounds = array<i64: 16, 8>}, {transform_indices = @transform_12, window_bounds = array<i64: 16, 4>}, {transform_indices = @transform_13, window_bounds = array<i64: 16, 4>}, {transform_indices = @transform_14, window_bounds = array<i64: 16, 4>}]} {
    %c0 = arith.constant 0 : index
    %c0_0 = arith.constant 0 : index
    %0 = vector.load %arg1[%c0, %c0_0] : memref<16x56xf32, #tpu.memory_space<vmem>>, vector<16x56xf32>
    %c0_1 = arith.constant 0 : index
    %c0_2 = arith.constant 0 : index
    %1 = vector.load %arg9[%c0_1, %c0_2] : memref<56x8xf32, #tpu.memory_space<vmem>>, vector<56x8xf32>
    %cst = arith.constant dense<0.000000e+00> : vector<16x8xf32>
    %2 = tpu.matmul %0, %1, %cst {dimension_numbers = #tpu.dot_dimension_numbers<[1], [0], [0], [1], [0, 0, 1, 1], [], []>} : vector<16x56xf32>, vector<56x8xf32>, vector<16x8xf32> -> vector<16x8xf32>
    %c0_3 = arith.constant 0 : index
    %c0_4 = arith.constant 0 : index
    %3 = vector.load %arg10[%c0_3, %c0_4] : memref<1x8xf32, #tpu.memory_space<vmem>>, vector<1x8xf32>
    %4 = vector.broadcast %3 : vector<1x8xf32> to vector<16x8xf32>
    %5 = arith.addf %2, %4 : vector<16x8xf32>
    %c0_5 = arith.constant 0 : index
    %c0_6 = arith.constant 0 : index
    %6 = vector.load %arg5[%c0_5, %c0_6] : memref<16x8xf32, #tpu.memory_space<vmem>>, vector<16x8xf32>
    %7 = arith.addf %5, %6 : vector<16x8xf32>
    %c0_7 = arith.constant 0 : index
    %c0_8 = arith.constant 0 : index
    %8 = vector.load %arg12[%c0_7, %c0_8] : memref<16x8xf32, #tpu.memory_space<vmem>>, vector<16x8xf32>
    tpu.vector_store %arg12[%c0_7, %c0_8], %7 {strides = array<i32>} : memref<16x8xf32, #tpu.memory_space<vmem>>, vector<16x8xf32>,
    %c0_9 = arith.constant 0 : index
    %c0_10 = arith.constant 0 : index
    %9 = vector.load %arg11[%c0_9, %c0_10] : memref<28x4xf32, #tpu.memory_space<vmem>>, vector<28x4xf32>
    %c0_11 = arith.constant 0 : index
    %c0_12 = arith.constant 0 : index
    %10 = vector.load %arg2[%c0_11, %c0_12] : memref<16x28xf32, #tpu.memory_space<vmem>>, vector<16x28xf32>
    %cst_13 = arith.constant dense<0.000000e+00> : vector<16x4xf32>
    %11 = tpu.matmul %10, %9, %cst_13 {dimension_numbers = #tpu.dot_dimension_numbers<[1], [0], [0], [1], [0, 0, 1, 1], [], []>} : vector<16x28xf32>, vector<28x4xf32>, vector<16x4xf32> -> vector<16x4xf32>
    %c0_14 = arith.constant 0 : index
    %c0_15 = arith.constant 0 : index
    %12 = vector.load %arg6[%c0_14, %c0_15] : memref<16x4xf32, #tpu.memory_space<vmem>>, vector<16x4xf32>
    %13 = arith.addf %11, %12 : vector<16x4xf32>
    %c0_16 = arith.constant 0 : index
    %c0_17 = arith.constant 0 : index
    %14 = vector.load %arg13[%c0_16, %c0_17] : memref<16x4xf32, #tpu.memory_space<vmem>>, vector<16x4xf32>
    tpu.vector_store %arg13[%c0_16, %c0_17], %13 {strides = array<i32>} : memref<16x4xf32, #tpu.memory_space<vmem>>, vector<16x4xf32>,
    %c0_18 = arith.constant 0 : index
    %c0_19 = arith.constant 0 : index
    %15 = vector.load %arg3[%c0_18, %c0_19] : memref<16x28xf32, #tpu.memory_space<vmem>>, vector<16x28xf32>
    %cst_20 = arith.constant dense<0.000000e+00> : vector<16x4xf32>
    %16 = tpu.matmul %15, %9, %cst_20 {dimension_numbers = #tpu.dot_dimension_numbers<[1], [0], [0], [1], [0, 0, 1, 1], [], []>} : vector<16x28xf32>, vector<28x4xf32>, vector<16x4xf32> -> vector<16x4xf32>
    %c0_21 = arith.constant 0 : index
    %c0_22 = arith.constant 0 : index
    %17 = vector.load %arg7[%c0_21, %c0_22] : memref<16x4xf32, #tpu.memory_space<vmem>>, vector<16x4xf32>
    %18 = arith.addf %16, %17 : vector<16x4xf32>
    %c0_23 = arith.constant 0 : index
    %c0_24 = arith.constant 0 : index
    %19 = vector.load %arg14[%c0_23, %c0_24] : memref<16x4xf32, #tpu.memory_space<vmem>>, vector<16x4xf32>
    tpu.vector_store %arg14[%c0_23, %c0_24], %18 {strides = array<i32>} : memref<16x4xf32, #tpu.memory_space<vmem>>, vector<16x4xf32>,
    %c0_25 = arith.constant 0 : index
    %c0_26 = arith.constant 0 : index
    %20 = vector.load %arg4[%c0_25, %c0_26] : memref<16x28xf32, #tpu.memory_space<vmem>>, vector<16x28xf32>
    %cst_27 = arith.constant dense<0.000000e+00> : vector<16x4xf32>
    %21 = tpu.matmul %20, %9, %cst_27 {dimension_numbers = #tpu.dot_dimension_numbers<[1], [0], [0], [1], [0, 0, 1, 1], [], []>} : vector<16x28xf32>, vector<28x4xf32>, vector<16x4xf32> -> vector<16x4xf32>
    %c0_28 = arith.constant 0 : index
    %c0_29 = arith.constant 0 : index
    %22 = vector.load %arg8[%c0_28, %c0_29] : memref<16x4xf32, #tpu.memory_space<vmem>>, vector<16x4xf32>
    %23 = arith.addf %21, %22 : vector<16x4xf32>
    %c0_30 = arith.constant 0 : index
    %c0_31 = arith.constant 0 : index
    %24 = vector.load %arg15[%c0_30, %c0_31] : memref<16x4xf32, #tpu.memory_space<vmem>>, vector<16x4xf32>
    tpu.vector_store %arg15[%c0_30, %c0_31], %23 {strides = array<i32>} : memref<16x4xf32, #tpu.memory_space<vmem>>, vector<16x4xf32>,
    return
  }
  func.func @transform_0(%arg0: i32) -> (i32, i32) {
    %c0_i32 = arith.constant 0 : i32
    %c0_i32_0 = arith.constant 0 : i32
    return %arg0, %c0_i32 : i32, i32
  }
  func.func @transform_1(%arg0: i32) -> (i32, i32) {
    %c0_i32 = arith.constant 0 : i32
    %c0_i32_0 = arith.constant 0 : i32
    return %arg0, %c0_i32 : i32, i32
  }
  func.func @transform_2(%arg0: i32) -> (i32, i32) {
    %c0_i32 = arith.constant 0 : i32
    %c0_i32_0 = arith.constant 0 : i32
    return %arg0, %c0_i32 : i32, i32
  }
  func.func @transform_3(%arg0: i32) -> (i32, i32) {
    %c0_i32 = arith.constant 0 : i32
    %c0_i32_0 = arith.constant 0 : i32
    return %arg0, %c0_i32 : i32, i32
  }
  func.func @transform_4(%arg0: i32) -> (i32, i32) {
    %c0_i32 = arith.constant 0 : i32
    %c0_i32_0 = arith.constant 0 : i32
    return %arg0, %c0_i32 : i32, i32
  }
  func.func @transform_5(%arg0: i32) -> (i32, i32) {
    %c0_i32 = arith.constant 0 : i32
    %c0_i32_0 = arith.constant 0 : i32
    return %arg0, %c0_i32 : i32, i32
  }
  func.func @transform_6(%arg0: i32) -> (i32, i32) {
    %c0_i32 = arith.constant 0 : i32
    %c0_i32_0 = arith.constant 0 : i32
    return %arg0, %c0_i32 : i32, i32
  }
  func.func @transform_7(%arg0: i32) -> (i32, i32) {
    %c0_i32 = arith.constant 0 : i32
    %c0_i32_0 = arith.constant 0 : i32
    return %arg0, %c0_i32 : i32, i32
  }
  func.func @transform_8(%arg0: i32) -> (i32, i32) {
    %c0_i32 = arith.constant 0 : i32
    %c0_i32_0 = arith.constant 0 : i32
    %c0_i32_1 = arith.constant 0 : i32
    return %c0_i32, %c0_i32_0 : i32, i32
  }
  func.func @transform_9(%arg0: i32) -> (i32, i32) {
    %c0_i32 = arith.constant 0 : i32
    %c0_i32_0 = arith.constant 0 : i32
    %c0_i32_1 = arith.constant 0 : i32
    return %c0_i32, %c0_i32_0 : i32, i32
  }
  func.func @transform_10(%arg0: i32) -> (i32, i32) {
    %c0_i32 = arith.constant 0 : i32
    %c0_i32_0 = arith.constant 0 : i32
    %c0_i32_1 = arith.constant 0 : i32
    return %c0_i32, %c0_i32_0 : i32, i32
  }
  func.func @transform_11(%arg0: i32) -> (i32, i32) {
    %c0_i32 = arith.constant 0 : i32
    %c0_i32_0 = arith.constant 0 : i32
    return %arg0, %c0_i32 : i32, i32
  }
  func.func @transform_12(%arg0: i32) -> (i32, i32) {
    %c0_i32 = arith.constant 0 : i32
    %c0_i32_0 = arith.constant 0 : i32
    return %arg0, %c0_i32 : i32, i32
  }
  func.func @transform_13(%arg0: i32) -> (i32, i32) {
    %c0_i32 = arith.constant 0 : i32
    %c0_i32_0 = arith.constant 0 : i32
    return %arg0, %c0_i32 : i32, i32
  }
  func.func @transform_14(%arg0: i32) -> (i32, i32) {
    %c0_i32 = arith.constant 0 : i32
    %c0_i32_0 = arith.constant 0 : i32
    return %arg0, %c0_i32 : i32, i32
  }
}

module attributes {stable_mosaic.version = 11 : i64} {
  func.func @_local_res_kernel(%arg0: i32, %arg1: memref<16x8xf32, #tpu.memory_space<vmem>>, %arg2: memref<16x4xf32, #tpu.memory_space<vmem>>, %arg3: memref<16x4xf32, #tpu.memory_space<vmem>>, %arg4: memref<16x4xf32, #tpu.memory_space<vmem>>, %arg5: memref<8x8xf32, #tpu.memory_space<vmem>>, %arg6: memref<1x8xf32, #tpu.memory_space<vmem>>, %arg7: memref<8x8xf32, #tpu.memory_space<vmem>>, %arg8: memref<1x8xf32, #tpu.memory_space<vmem>>, %arg9: memref<8x8xf32, #tpu.memory_space<vmem>>, %arg10: memref<1x8xf32, #tpu.memory_space<vmem>>, %arg11: memref<4x4xf32, #tpu.memory_space<vmem>>, %arg12: memref<4x4xf32, #tpu.memory_space<vmem>>, %arg13: memref<4x4xf32, #tpu.memory_space<vmem>>, %arg14: memref<8x4xf32, #tpu.memory_space<vmem>>, %arg15: memref<1x4xf32, #tpu.memory_space<vmem>>, %arg16: memref<4x4xf32, #tpu.memory_space<vmem>>, %arg17: memref<4x8xf32, #tpu.memory_space<vmem>>, %arg18: memref<1x8xf32, #tpu.memory_space<vmem>>, %arg19: memref<4x4xf32, #tpu.memory_space<vmem>>, %arg20: memref<1x8xf32, #tpu.memory_space<vmem>>, %arg21: memref<1x8xf32, #tpu.memory_space<vmem>>, %arg22: memref<8x8xf32, #tpu.memory_space<vmem>>, %arg23: memref<1x4xf32, #tpu.memory_space<vmem>>, %arg24: memref<4x4xf32, #tpu.memory_space<vmem>>, %arg25: memref<16x8xf32, #tpu.memory_space<vmem>>, %arg26: memref<16x4xf32, #tpu.memory_space<vmem>>, %arg27: memref<16x4xf32, #tpu.memory_space<vmem>>, %arg28: memref<16x4xf32, #tpu.memory_space<vmem>>) attributes {dimension_semantics = [#tpu.dimension_semantics<parallel>], iteration_bounds = array<i64: 2>, scalar_prefetch = 0 : i64, scratch_operands = 0 : i64, tpu.core_type = #tpu.core_type<tc>, window_params = [{transform_indices = @transform_0, window_bounds = array<i64: 16, 8>}, {transform_indices = @transform_1, window_bounds = array<i64: 16, 4>}, {transform_indices = @transform_2, window_bounds = array<i64: 16, 4>}, {transform_indices = @transform_3, window_bounds = array<i64: 16, 4>}, {pipeline_mode = #tpu.pipeline_mode<synchronous>, transform_indices = @transform_4, window_bounds = array<i64: 8, 8>}, {pipeline_mode = #tpu.pipeline_mode<synchronous>, transform_indices = @transform_5, window_bounds = array<i64: 1, 8>}, {pipeline_mode = #tpu.pipeline_mode<synchronous>, transform_indices = @transform_6, window_bounds = array<i64: 8, 8>}, {pipeline_mode = #tpu.pipeline_mode<synchronous>, transform_indices = @transform_7, window_bounds = array<i64: 1, 8>}, {pipeline_mode = #tpu.pipeline_mode<synchronous>, transform_indices = @transform_8, window_bounds = array<i64: 8, 8>}, {pipeline_mode = #tpu.pipeline_mode<synchronous>, transform_indices = @transform_9, window_bounds = array<i64: 1, 8>}, {pipeline_mode = #tpu.pipeline_mode<synchronous>, transform_indices = @transform_10, window_bounds = array<i64: 4, 4>}, {pipeline_mode = #tpu.pipeline_mode<synchronous>, transform_indices = @transform_11, window_bounds = array<i64: 4, 4>}, {pipeline_mode = #tpu.pipeline_mode<synchronous>, transform_indices = @transform_12, window_bounds = array<i64: 4, 4>}, {pipeline_mode = #tpu.pipeline_mode<synchronous>, transform_indices = @transform_13, window_bounds = array<i64: 8, 4>}, {pipeline_mode = #tpu.pipeline_mode<synchronous>, transform_indices = @transform_14, window_bounds = array<i64: 1, 4>}, {pipeline_mode = #tpu.pipeline_mode<synchronous>, transform_indices = @transform_15, window_bounds = array<i64: 4, 4>}, {pipeline_mode = #tpu.pipeline_mode<synchronous>, transform_indices = @transform_16, window_bounds = array<i64: 4, 8>}, {pipeline_mode = #tpu.pipeline_mode<synchronous>, transform_indices = @transform_17, window_bounds = array<i64: 1, 8>}, {pipeline_mode = #tpu.pipeline_mode<synchronous>, transform_indices = @transform_18, window_bounds = array<i64: 4, 4>}, {pipeline_mode = #tpu.pipeline_mode<synchronous>, transform_indices = @transform_19, window_bounds = array<i64: 1, 8>}, {pipeline_mode = #tpu.pipeline_mode<synchronous>, transform_indices = @transform_20, window_bounds = array<i64: 1, 8>}, {pipeline_mode = #tpu.pipeline_mode<synchronous>, transform_indices = @transform_21, window_bounds = array<i64: 8, 8>}, {pipeline_mode = #tpu.pipeline_mode<synchronous>, transform_indices = @transform_22, window_bounds = array<i64: 1, 4>}, {pipeline_mode = #tpu.pipeline_mode<synchronous>, transform_indices = @transform_23, window_bounds = array<i64: 4, 4>}, {transform_indices = @transform_24, window_bounds = array<i64: 16, 8>}, {transform_indices = @transform_25, window_bounds = array<i64: 16, 4>}, {transform_indices = @transform_26, window_bounds = array<i64: 16, 4>}, {transform_indices = @transform_27, window_bounds = array<i64: 16, 4>}]} {
    %c0 = arith.constant 0 : index
    %c0_0 = arith.constant 0 : index
    %0 = vector.load %arg1[%c0, %c0_0] : memref<16x8xf32, #tpu.memory_space<vmem>>, vector<16x8xf32>
    %c0_1 = arith.constant 0 : index
    %c0_2 = arith.constant 0 : index
    %1 = vector.load %arg2[%c0_1, %c0_2] : memref<16x4xf32, #tpu.memory_space<vmem>>, vector<16x4xf32>
    %c0_3 = arith.constant 0 : index
    %c0_4 = arith.constant 0 : index
    %2 = vector.load %arg3[%c0_3, %c0_4] : memref<16x4xf32, #tpu.memory_space<vmem>>, vector<16x4xf32>
    %c0_5 = arith.constant 0 : index
    %c0_6 = arith.constant 0 : index
    %3 = vector.load %arg4[%c0_5, %c0_6] : memref<16x4xf32, #tpu.memory_space<vmem>>, vector<16x4xf32>
    %c0_7 = arith.constant 0 : index
    %c0_8 = arith.constant 0 : index
    %4 = vector.load %arg5[%c0_7, %c0_8] : memref<8x8xf32, #tpu.memory_space<vmem>>, vector<8x8xf32>
    %cst = arith.constant dense<0.000000e+00> : vector<16x8xf32>
    %5 = tpu.matmul %0, %4, %cst {dimension_numbers = #tpu.dot_dimension_numbers<[1], [0], [0], [1], [0, 0, 1, 1], [], []>} : vector<16x8xf32>, vector<8x8xf32>, vector<16x8xf32> -> vector<16x8xf32>
    %c0_9 = arith.constant 0 : index
    %c0_10 = arith.constant 0 : index
    %6 = vector.load %arg6[%c0_9, %c0_10] : memref<1x8xf32, #tpu.memory_space<vmem>>, vector<1x8xf32>
    %7 = vector.broadcast %6 : vector<1x8xf32> to vector<16x8xf32>
    %8 = arith.addf %5, %7 : vector<16x8xf32>
    %cst_11 = arith.constant 0.000000e+00 : f32
    %9 = vector.broadcast %cst_11 : f32 to vector<16x8xf32>
    %10 = arith.cmpf oge, %8, %9 : vector<16x8xf32>
    %cst_12 = arith.constant 2.000000e-01 : f32
    %11 = vector.broadcast %cst_12 : f32 to vector<16x8xf32>
    %12 = arith.mulf %11, %8 : vector<16x8xf32>
    %13 = arith.select %10, %8, %12 : vector<16x8xi1>, vector<16x8xf32>
    %c0_13 = arith.constant 0 : index
    %c0_14 = arith.constant 0 : index
    %14 = vector.load %arg7[%c0_13, %c0_14] : memref<8x8xf32, #tpu.memory_space<vmem>>, vector<8x8xf32>
    %cst_15 = arith.constant dense<0.000000e+00> : vector<16x8xf32>
    %15 = tpu.matmul %13, %14, %cst_15 {dimension_numbers = #tpu.dot_dimension_numbers<[1], [0], [0], [1], [0, 0, 1, 1], [], []>} : vector<16x8xf32>, vector<8x8xf32>, vector<16x8xf32> -> vector<16x8xf32>
    %c0_16 = arith.constant 0 : index
    %c0_17 = arith.constant 0 : index
    %16 = vector.load %arg8[%c0_16, %c0_17] : memref<1x8xf32, #tpu.memory_space<vmem>>, vector<1x8xf32>
    %17 = vector.broadcast %16 : vector<1x8xf32> to vector<16x8xf32>
    %18 = arith.addf %15, %17 : vector<16x8xf32>
    %cst_18 = arith.constant 0.000000e+00 : f32
    %19 = vector.broadcast %cst_18 : f32 to vector<16x8xf32>
    %20 = arith.cmpf oge, %18, %19 : vector<16x8xf32>
    %cst_19 = arith.constant 2.000000e-01 : f32
    %21 = vector.broadcast %cst_19 : f32 to vector<16x8xf32>
    %22 = arith.mulf %21, %18 : vector<16x8xf32>
    %23 = arith.select %20, %18, %22 : vector<16x8xi1>, vector<16x8xf32>
    %c0_20 = arith.constant 0 : index
    %c0_21 = arith.constant 0 : index
    %24 = vector.load %arg9[%c0_20, %c0_21] : memref<8x8xf32, #tpu.memory_space<vmem>>, vector<8x8xf32>
    %cst_22 = arith.constant dense<0.000000e+00> : vector<16x8xf32>
    %25 = tpu.matmul %23, %24, %cst_22 {dimension_numbers = #tpu.dot_dimension_numbers<[1], [0], [0], [1], [0, 0, 1, 1], [], []>} : vector<16x8xf32>, vector<8x8xf32>, vector<16x8xf32> -> vector<16x8xf32>
    %c0_23 = arith.constant 0 : index
    %c0_24 = arith.constant 0 : index
    %26 = vector.load %arg10[%c0_23, %c0_24] : memref<1x8xf32, #tpu.memory_space<vmem>>, vector<1x8xf32>
    %27 = vector.broadcast %26 : vector<1x8xf32> to vector<16x8xf32>
    %28 = arith.addf %25, %27 : vector<16x8xf32>
    %c0_25 = arith.constant 0 : index
    %c0_26 = arith.constant 0 : index
    %29 = vector.load %arg11[%c0_25, %c0_26] : memref<4x4xf32, #tpu.memory_space<vmem>>, vector<4x4xf32>
    %cst_27 = arith.constant dense<0.000000e+00> : vector<16x4xf32>
    %30 = tpu.matmul %1, %29, %cst_27 {dimension_numbers = #tpu.dot_dimension_numbers<[1], [0], [0], [1], [0, 0, 1, 1], [], []>} : vector<16x4xf32>, vector<4x4xf32>, vector<16x4xf32> -> vector<16x4xf32>
    %cst_28 = arith.constant dense<0.000000e+00> : vector<16x4xf32>
    %31 = tpu.matmul %2, %29, %cst_28 {dimension_numbers = #tpu.dot_dimension_numbers<[1], [0], [0], [1], [0, 0, 1, 1], [], []>} : vector<16x4xf32>, vector<4x4xf32>, vector<16x4xf32> -> vector<16x4xf32>
    %cst_29 = arith.constant dense<0.000000e+00> : vector<16x4xf32>
    %32 = tpu.matmul %3, %29, %cst_29 {dimension_numbers = #tpu.dot_dimension_numbers<[1], [0], [0], [1], [0, 0, 1, 1], [], []>} : vector<16x4xf32>, vector<4x4xf32>, vector<16x4xf32> -> vector<16x4xf32>
    %33 = arith.mulf %30, %30 : vector<16x4xf32>
    %34 = arith.mulf %31, %31 : vector<16x4xf32>
    %35 = arith.addf %33, %34 : vector<16x4xf32>
    %36 = arith.mulf %32, %32 : vector<16x4xf32>
    %37 = arith.addf %35, %36 : vector<16x4xf32>
    %cst_30 = arith.constant 9.99999996E-13 : f32
    %38 = vector.broadcast %cst_30 : f32 to vector<16x4xf32>
    %39 = arith.addf %37, %38 : vector<16x4xf32>
    %40 = math.sqrt %39 : vector<16x4xf32>
    %41 = arith.negf %40 : vector<16x4xf32>
    %42 = math.exp %41 : vector<16x4xf32>
    %cst_31 = arith.constant 1.000000e+00 : f32
    %43 = vector.broadcast %cst_31 : f32 to vector<16x4xf32>
    %44 = arith.addf %43, %42 : vector<16x4xf32>
    %45 = arith.divf %43, %44 : vector<16x4xf32>
    %46 = arith.mulf %30, %45 : vector<16x4xf32>
    %47 = arith.mulf %31, %45 : vector<16x4xf32>
    %48 = arith.mulf %32, %45 : vector<16x4xf32>
    %c0_32 = arith.constant 0 : index
    %c0_33 = arith.constant 0 : index
    %49 = vector.load %arg12[%c0_32, %c0_33] : memref<4x4xf32, #tpu.memory_space<vmem>>, vector<4x4xf32>
    %cst_34 = arith.constant dense<0.000000e+00> : vector<16x4xf32>
    %50 = tpu.matmul %46, %49, %cst_34 {dimension_numbers = #tpu.dot_dimension_numbers<[1], [0], [0], [1], [0, 0, 1, 1], [], []>} : vector<16x4xf32>, vector<4x4xf32>, vector<16x4xf32> -> vector<16x4xf32>
    %cst_35 = arith.constant dense<0.000000e+00> : vector<16x4xf32>
    %51 = tpu.matmul %47, %49, %cst_35 {dimension_numbers = #tpu.dot_dimension_numbers<[1], [0], [0], [1], [0, 0, 1, 1], [], []>} : vector<16x4xf32>, vector<4x4xf32>, vector<16x4xf32> -> vector<16x4xf32>
    %cst_36 = arith.constant dense<0.000000e+00> : vector<16x4xf32>
    %52 = tpu.matmul %48, %49, %cst_36 {dimension_numbers = #tpu.dot_dimension_numbers<[1], [0], [0], [1], [0, 0, 1, 1], [], []>} : vector<16x4xf32>, vector<4x4xf32>, vector<16x4xf32> -> vector<16x4xf32>
    %53 = arith.mulf %50, %50 : vector<16x4xf32>
    %54 = arith.mulf %51, %51 : vector<16x4xf32>
    %55 = arith.addf %53, %54 : vector<16x4xf32>
    %56 = arith.mulf %52, %52 : vector<16x4xf32>
    %57 = arith.addf %55, %56 : vector<16x4xf32>
    %cst_37 = arith.constant 9.99999996E-13 : f32
    %58 = vector.broadcast %cst_37 : f32 to vector<16x4xf32>
    %59 = arith.addf %57, %58 : vector<16x4xf32>
    %60 = math.sqrt %59 : vector<16x4xf32>
    %61 = arith.negf %60 : vector<16x4xf32>
    %62 = math.exp %61 : vector<16x4xf32>
    %cst_38 = arith.constant 1.000000e+00 : f32
    %63 = vector.broadcast %cst_38 : f32 to vector<16x4xf32>
    %64 = arith.addf %63, %62 : vector<16x4xf32>
    %65 = arith.divf %63, %64 : vector<16x4xf32>
    %66 = arith.mulf %50, %65 : vector<16x4xf32>
    %67 = arith.mulf %51, %65 : vector<16x4xf32>
    %68 = arith.mulf %52, %65 : vector<16x4xf32>
    %c0_39 = arith.constant 0 : index
    %c0_40 = arith.constant 0 : index
    %69 = vector.load %arg13[%c0_39, %c0_40] : memref<4x4xf32, #tpu.memory_space<vmem>>, vector<4x4xf32>
    %cst_41 = arith.constant dense<0.000000e+00> : vector<16x4xf32>
    %70 = tpu.matmul %66, %69, %cst_41 {dimension_numbers = #tpu.dot_dimension_numbers<[1], [0], [0], [1], [0, 0, 1, 1], [], []>} : vector<16x4xf32>, vector<4x4xf32>, vector<16x4xf32> -> vector<16x4xf32>
    %cst_42 = arith.constant dense<0.000000e+00> : vector<16x4xf32>
    %71 = tpu.matmul %67, %69, %cst_42 {dimension_numbers = #tpu.dot_dimension_numbers<[1], [0], [0], [1], [0, 0, 1, 1], [], []>} : vector<16x4xf32>, vector<4x4xf32>, vector<16x4xf32> -> vector<16x4xf32>
    %cst_43 = arith.constant dense<0.000000e+00> : vector<16x4xf32>
    %72 = tpu.matmul %68, %69, %cst_43 {dimension_numbers = #tpu.dot_dimension_numbers<[1], [0], [0], [1], [0, 0, 1, 1], [], []>} : vector<16x4xf32>, vector<4x4xf32>, vector<16x4xf32> -> vector<16x4xf32>
    %c0_44 = arith.constant 0 : index
    %c0_45 = arith.constant 0 : index
    %73 = vector.load %arg14[%c0_44, %c0_45] : memref<8x4xf32, #tpu.memory_space<vmem>>, vector<8x4xf32>
    %cst_46 = arith.constant dense<0.000000e+00> : vector<16x4xf32>
    %74 = tpu.matmul %0, %73, %cst_46 {dimension_numbers = #tpu.dot_dimension_numbers<[1], [0], [0], [1], [0, 0, 1, 1], [], []>} : vector<16x8xf32>, vector<8x4xf32>, vector<16x4xf32> -> vector<16x4xf32>
    %c0_47 = arith.constant 0 : index
    %c0_48 = arith.constant 0 : index
    %75 = vector.load %arg15[%c0_47, %c0_48] : memref<1x4xf32, #tpu.memory_space<vmem>>, vector<1x4xf32>
    %76 = vector.broadcast %75 : vector<1x4xf32> to vector<16x4xf32>
    %77 = arith.addf %74, %76 : vector<16x4xf32>
    %c0_49 = arith.constant 0 : index
    %c0_50 = arith.constant 0 : index
    %78 = vector.load %arg16[%c0_49, %c0_50] : memref<4x4xf32, #tpu.memory_space<vmem>>, vector<4x4xf32>
    %cst_51 = arith.constant dense<0.000000e+00> : vector<16x4xf32>
    %79 = tpu.matmul %1, %78, %cst_51 {dimension_numbers = #tpu.dot_dimension_numbers<[1], [0], [0], [1], [0, 0, 1, 1], [], []>} : vector<16x4xf32>, vector<4x4xf32>, vector<16x4xf32> -> vector<16x4xf32>
    %c0_52 = arith.constant 0 : index
    %c0_53 = arith.constant 0 : index
    %80 = vector.load %arg16[%c0_52, %c0_53] : memref<4x4xf32, #tpu.memory_space<vmem>>, vector<4x4xf32>
    %cst_54 = arith.constant dense<0.000000e+00> : vector<16x4xf32>
    %81 = tpu.matmul %2, %80, %cst_54 {dimension_numbers = #tpu.dot_dimension_numbers<[1], [0], [0], [1], [0, 0, 1, 1], [], []>} : vector<16x4xf32>, vector<4x4xf32>, vector<16x4xf32> -> vector<16x4xf32>
    %c0_55 = arith.constant 0 : index
    %c0_56 = arith.constant 0 : index
    %82 = vector.load %arg16[%c0_55, %c0_56] : memref<4x4xf32, #tpu.memory_space<vmem>>, vector<4x4xf32>
    %cst_57 = arith.constant dense<0.000000e+00> : vector<16x4xf32>
    %83 = tpu.matmul %3, %82, %cst_57 {dimension_numbers = #tpu.dot_dimension_numbers<[1], [0], [0], [1], [0, 0, 1, 1], [], []>} : vector<16x4xf32>, vector<4x4xf32>, vector<16x4xf32> -> vector<16x4xf32>
    %84 = arith.mulf %79, %79 : vector<16x4xf32>
    %85 = arith.mulf %81, %81 : vector<16x4xf32>
    %86 = arith.addf %84, %85 : vector<16x4xf32>
    %87 = arith.mulf %83, %83 : vector<16x4xf32>
    %88 = arith.addf %86, %87 : vector<16x4xf32>
    %89 = arith.mulf %77, %88 : vector<16x4xf32>
    %c0_58 = arith.constant 0 : index
    %c0_59 = arith.constant 0 : index
    %90 = vector.load %arg17[%c0_58, %c0_59] : memref<4x8xf32, #tpu.memory_space<vmem>>, vector<4x8xf32>
    %cst_60 = arith.constant dense<0.000000e+00> : vector<16x8xf32>
    %91 = tpu.matmul %89, %90, %cst_60 {dimension_numbers = #tpu.dot_dimension_numbers<[1], [0], [0], [1], [0, 0, 1, 1], [], []>} : vector<16x4xf32>, vector<4x8xf32>, vector<16x8xf32> -> vector<16x8xf32>
    %c0_61 = arith.constant 0 : index
    %c0_62 = arith.constant 0 : index
    %92 = vector.load %arg18[%c0_61, %c0_62] : memref<1x8xf32, #tpu.memory_space<vmem>>, vector<1x8xf32>
    %93 = vector.broadcast %92 : vector<1x8xf32> to vector<16x8xf32>
    %94 = arith.addf %91, %93 : vector<16x8xf32>
    %95 = arith.mulf %77, %79 : vector<16x4xf32>
    %c0_63 = arith.constant 0 : index
    %c0_64 = arith.constant 0 : index
    %96 = vector.load %arg19[%c0_63, %c0_64] : memref<4x4xf32, #tpu.memory_space<vmem>>, vector<4x4xf32>
    %cst_65 = arith.constant dense<0.000000e+00> : vector<16x4xf32>
    %97 = tpu.matmul %95, %96, %cst_65 {dimension_numbers = #tpu.dot_dimension_numbers<[1], [0], [0], [1], [0, 0, 1, 1], [], []>} : vector<16x4xf32>, vector<4x4xf32>, vector<16x4xf32> -> vector<16x4xf32>
    %98 = arith.mulf %77, %81 : vector<16x4xf32>
    %c0_66 = arith.constant 0 : index
    %c0_67 = arith.constant 0 : index
    %99 = vector.load %arg19[%c0_66, %c0_67] : memref<4x4xf32, #tpu.memory_space<vmem>>, vector<4x4xf32>
    %cst_68 = arith.constant dense<0.000000e+00> : vector<16x4xf32>
    %100 = tpu.matmul %98, %99, %cst_68 {dimension_numbers = #tpu.dot_dimension_numbers<[1], [0], [0], [1], [0, 0, 1, 1], [], []>} : vector<16x4xf32>, vector<4x4xf32>, vector<16x4xf32> -> vector<16x4xf32>
    %101 = arith.mulf %77, %83 : vector<16x4xf32>
    %c0_69 = arith.constant 0 : index
    %c0_70 = arith.constant 0 : index
    %102 = vector.load %arg19[%c0_69, %c0_70] : memref<4x4xf32, #tpu.memory_space<vmem>>, vector<4x4xf32>
    %cst_71 = arith.constant dense<0.000000e+00> : vector<16x4xf32>
    %103 = tpu.matmul %101, %102, %cst_71 {dimension_numbers = #tpu.dot_dimension_numbers<[1], [0], [0], [1], [0, 0, 1, 1], [], []>} : vector<16x4xf32>, vector<4x4xf32>, vector<16x4xf32> -> vector<16x4xf32>
    %104 = arith.addf %28, %94 : vector<16x8xf32>
    %c0_72 = arith.constant 0 : index
    %c0_73 = arith.constant 0 : index
    %105 = vector.load %arg22[%c0_72, %c0_73] : memref<8x8xf32, #tpu.memory_space<vmem>>, vector<8x8xf32>
    %cst_74 = arith.constant dense<0.000000e+00> : vector<16x8xf32>
    %106 = tpu.matmul %104, %105, %cst_74 {dimension_numbers = #tpu.dot_dimension_numbers<[1], [0], [0], [1], [0, 0, 1, 1], [], []>} : vector<16x8xf32>, vector<8x8xf32>, vector<16x8xf32> -> vector<16x8xf32>
    %107 = arith.subf %104, %106 : vector<16x8xf32>
    %108 = arith.mulf %107, %107 : vector<16x8xf32>
    %c0_75 = arith.constant 0 : index
    %c0_76 = arith.constant 0 : index
    %109 = vector.load %arg22[%c0_75, %c0_76] : memref<8x8xf32, #tpu.memory_space<vmem>>, vector<8x8xf32>
    %cst_77 = arith.constant dense<0.000000e+00> : vector<16x8xf32>
    %110 = tpu.matmul %108, %109, %cst_77 {dimension_numbers = #tpu.dot_dimension_numbers<[1], [0], [0], [1], [0, 0, 1, 1], [], []>} : vector<16x8xf32>, vector<8x8xf32>, vector<16x8xf32> -> vector<16x8xf32>
    %cst_78 = arith.constant 9.99999974E-6 : f32
    %111 = vector.broadcast %cst_78 : f32 to vector<16x8xf32>
    %112 = arith.addf %110, %111 : vector<16x8xf32>
    %113 = math.rsqrt %112 : vector<16x8xf32>
    %114 = arith.mulf %107, %113 : vector<16x8xf32>
    %c0_79 = arith.constant 0 : index
    %c0_80 = arith.constant 0 : index
    %115 = vector.load %arg20[%c0_79, %c0_80] : memref<1x8xf32, #tpu.memory_space<vmem>>, vector<1x8xf32>
    %116 = vector.broadcast %115 : vector<1x8xf32> to vector<16x8xf32>
    %117 = arith.mulf %114, %116 : vector<16x8xf32>
    %c0_81 = arith.constant 0 : index
    %c0_82 = arith.constant 0 : index
    %118 = vector.load %arg21[%c0_81, %c0_82] : memref<1x8xf32, #tpu.memory_space<vmem>>, vector<1x8xf32>
    %119 = vector.broadcast %118 : vector<1x8xf32> to vector<16x8xf32>
    %120 = arith.addf %117, %119 : vector<16x8xf32>
    %121 = arith.addf %70, %97 : vector<16x4xf32>
    %122 = arith.addf %71, %100 : vector<16x4xf32>
    %123 = arith.addf %72, %103 : vector<16x4xf32>
    %124 = arith.mulf %121, %121 : vector<16x4xf32>
    %125 = arith.mulf %122, %122 : vector<16x4xf32>
    %126 = arith.addf %124, %125 : vector<16x4xf32>
    %127 = arith.mulf %123, %123 : vector<16x4xf32>
    %128 = arith.addf %126, %127 : vector<16x4xf32>
    %c0_83 = arith.constant 0 : index
    %c0_84 = arith.constant 0 : index
    %129 = vector.load %arg24[%c0_83, %c0_84] : memref<4x4xf32, #tpu.memory_space<vmem>>, vector<4x4xf32>
    %cst_85 = arith.constant dense<0.000000e+00> : vector<16x4xf32>
    %130 = tpu.matmul %128, %129, %cst_85 {dimension_numbers = #tpu.dot_dimension_numbers<[1], [0], [0], [1], [0, 0, 1, 1], [], []>} : vector<16x4xf32>, vector<4x4xf32>, vector<16x4xf32> -> vector<16x4xf32>
    %cst_86 = arith.constant 9.99999974E-6 : f32
    %131 = vector.broadcast %cst_86 : f32 to vector<16x4xf32>
    %132 = arith.addf %130, %131 : vector<16x4xf32>
    %133 = math.rsqrt %132 : vector<16x4xf32>
    %c0_87 = arith.constant 0 : index
    %c0_88 = arith.constant 0 : index
    %134 = vector.load %arg23[%c0_87, %c0_88] : memref<1x4xf32, #tpu.memory_space<vmem>>, vector<1x4xf32>
    %135 = vector.broadcast %134 : vector<1x4xf32> to vector<16x4xf32>
    %136 = arith.mulf %133, %135 : vector<16x4xf32>
    %137 = arith.addf %0, %120 : vector<16x8xf32>
    %c0_89 = arith.constant 0 : index
    %c0_90 = arith.constant 0 : index
    %138 = vector.load %arg25[%c0_89, %c0_90] : memref<16x8xf32, #tpu.memory_space<vmem>>, vector<16x8xf32>
    tpu.vector_store %arg25[%c0_89, %c0_90], %137 {strides = array<i32>} : memref<16x8xf32, #tpu.memory_space<vmem>>, vector<16x8xf32>,
    %139 = arith.mulf %121, %136 : vector<16x4xf32>
    %140 = arith.addf %1, %139 : vector<16x4xf32>
    %c0_91 = arith.constant 0 : index
    %c0_92 = arith.constant 0 : index
    %141 = vector.load %arg26[%c0_91, %c0_92] : memref<16x4xf32, #tpu.memory_space<vmem>>, vector<16x4xf32>
    tpu.vector_store %arg26[%c0_91, %c0_92], %140 {strides = array<i32>} : memref<16x4xf32, #tpu.memory_space<vmem>>, vector<16x4xf32>,
    %142 = arith.mulf %122, %136 : vector<16x4xf32>
    %143 = arith.addf %2, %142 : vector<16x4xf32>
    %c0_93 = arith.constant 0 : index
    %c0_94 = arith.constant 0 : index
    %144 = vector.load %arg27[%c0_93, %c0_94] : memref<16x4xf32, #tpu.memory_space<vmem>>, vector<16x4xf32>
    tpu.vector_store %arg27[%c0_93, %c0_94], %143 {strides = array<i32>} : memref<16x4xf32, #tpu.memory_space<vmem>>, vector<16x4xf32>,
    %145 = arith.mulf %123, %136 : vector<16x4xf32>
    %146 = arith.addf %3, %145 : vector<16x4xf32>
    %c0_95 = arith.constant 0 : index
    %c0_96 = arith.constant 0 : index
    %147 = vector.load %arg28[%c0_95, %c0_96] : memref<16x4xf32, #tpu.memory_space<vmem>>, vector<16x4xf32>
    tpu.vector_store %arg28[%c0_95, %c0_96], %146 {strides = array<i32>} : memref<16x4xf32, #tpu.memory_space<vmem>>, vector<16x4xf32>,
    return
  }
  func.func @transform_0(%arg0: i32) -> (i32, i32) {
    %c0_i32 = arith.constant 0 : i32
    %c0_i32_0 = arith.constant 0 : i32
    return %arg0, %c0_i32 : i32, i32
  }
  func.func @transform_1(%arg0: i32) -> (i32, i32) {
    %c0_i32 = arith.constant 0 : i32
    %c0_i32_0 = arith.constant 0 : i32
    return %arg0, %c0_i32 : i32, i32
  }
  func.func @transform_2(%arg0: i32) -> (i32, i32) {
    %c0_i32 = arith.constant 0 : i32
    %c0_i32_0 = arith.constant 0 : i32
    return %arg0, %c0_i32 : i32, i32
  }
  func.func @transform_3(%arg0: i32) -> (i32, i32) {
    %c0_i32 = arith.constant 0 : i32
    %c0_i32_0 = arith.constant 0 : i32
    return %arg0, %c0_i32 : i32, i32
  }
  func.func @transform_4(%arg0: i32) -> (i32, i32) {
    %c0_i32 = arith.constant 0 : i32
    %c0_i32_0 = arith.constant 0 : i32
    %c0_i32_1 = arith.constant 0 : i32
    return %c0_i32, %c0_i32_0 : i32, i32
  }
  func.func @transform_5(%arg0: i32) -> (i32, i32) {
    %c0_i32 = arith.constant 0 : i32
    %c0_i32_0 = arith.constant 0 : i32
    %c0_i32_1 = arith.constant 0 : i32
    return %c0_i32, %c0_i32_0 : i32, i32
  }
  func.func @transform_6(%arg0: i32) -> (i32, i32) {
    %c0_i32 = arith.constant 0 : i32
    %c0_i32_0 = arith.constant 0 : i32
    %c0_i32_1 = arith.constant 0 : i32
    return %c0_i32, %c0_i32_0 : i32, i32
  }
  func.func @transform_7(%arg0: i32) -> (i32, i32) {
    %c0_i32 = arith.constant 0 : i32
    %c0_i32_0 = arith.constant 0 : i32
    %c0_i32_1 = arith.constant 0 : i32
    return %c0_i32, %c0_i32_0 : i32, i32
  }
  func.func @transform_8(%arg0: i32) -> (i32, i32) {
    %c0_i32 = arith.constant 0 : i32
    %c0_i32_0 = arith.constant 0 : i32
    %c0_i32_1 = arith.constant 0 : i32
    return %c0_i32, %c0_i32_0 : i32, i32
  }
  func.func @transform_9(%arg0: i32) -> (i32, i32) {
    %c0_i32 = arith.constant 0 : i32
    %c0_i32_0 = arith.constant 0 : i32
    %c0_i32_1 = arith.constant 0 : i32
    return %c0_i32, %c0_i32_0 : i32, i32
  }
  func.func @transform_10(%arg0: i32) -> (i32, i32) {
    %c0_i32 = arith.constant 0 : i32
    %c0_i32_0 = arith.constant 0 : i32
    %c0_i32_1 = arith.constant 0 : i32
    return %c0_i32, %c0_i32_0 : i32, i32
  }
  func.func @transform_11(%arg0: i32) -> (i32, i32) {
    %c0_i32 = arith.constant 0 : i32
    %c0_i32_0 = arith.constant 0 : i32
    %c0_i32_1 = arith.constant 0 : i32
    return %c0_i32, %c0_i32_0 : i32, i32
  }
  func.func @transform_12(%arg0: i32) -> (i32, i32) {
    %c0_i32 = arith.constant 0 : i32
    %c0_i32_0 = arith.constant 0 : i32
    %c0_i32_1 = arith.constant 0 : i32
    return %c0_i32, %c0_i32_0 : i32, i32
  }
  func.func @transform_13(%arg0: i32) -> (i32, i32) {
    %c0_i32 = arith.constant 0 : i32
    %c0_i32_0 = arith.constant 0 : i32
    %c0_i32_1 = arith.constant 0 : i32
    return %c0_i32, %c0_i32_0 : i32, i32
  }
  func.func @transform_14(%arg0: i32) -> (i32, i32) {
    %c0_i32 = arith.constant 0 : i32
    %c0_i32_0 = arith.constant 0 : i32
    %c0_i32_1 = arith.constant 0 : i32
    return %c0_i32, %c0_i32_0 : i32, i32
  }
  func.func @transform_15(%arg0: i32) -> (i32, i32) {
    %c0_i32 = arith.constant 0 : i32
    %c0_i32_0 = arith.constant 0 : i32
    %c0_i32_1 = arith.constant 0 : i32
    return %c0_i32, %c0_i32_0 : i32, i32
  }
  func.func @transform_16(%arg0: i32) -> (i32, i32) {
    %c0_i32 = arith.constant 0 : i32
    %c0_i32_0 = arith.constant 0 : i32
    %c0_i32_1 = arith.constant 0 : i32
    return %c0_i32, %c0_i32_0 : i32, i32
  }
  func.func @transform_17(%arg0: i32) -> (i32, i32) {
    %c0_i32 = arith.constant 0 : i32
    %c0_i32_0 = arith.constant 0 : i32
    %c0_i32_1 = arith.constant 0 : i32
    return %c0_i32, %c0_i32_0 : i32, i32
  }
  func.func @transform_18(%arg0: i32) -> (i32, i32) {
    %c0_i32 = arith.constant 0 : i32
    %c0_i32_0 = arith.constant 0 : i32
    %c0_i32_1 = arith.constant 0 : i32
    return %c0_i32, %c0_i32_0 : i32, i32
  }
  func.func @transform_19(%arg0: i32) -> (i32, i32) {
    %c0_i32 = arith.constant 0 : i32
    %c0_i32_0 = arith.constant 0 : i32
    %c0_i32_1 = arith.constant 0 : i32
    return %c0_i32, %c0_i32_0 : i32, i32
  }
  func.func @transform_20(%arg0: i32) -> (i32, i32) {
    %c0_i32 = arith.constant 0 : i32
    %c0_i32_0 = arith.constant 0 : i32
    %c0_i32_1 = arith.constant 0 : i32
    return %c0_i32, %c0_i32_0 : i32, i32
  }
  func.func @transform_21(%arg0: i32) -> (i32, i32) {
    %c0_i32 = arith.constant 0 : i32
    %c0_i32_0 = arith.constant 0 : i32
    %c0_i32_1 = arith.constant 0 : i32
    return %c0_i32, %c0_i32_0 : i32, i32
  }
  func.func @transform_22(%arg0: i32) -> (i32, i32) {
    %c0_i32 = arith.constant 0 : i32
    %c0_i32_0 = arith.constant 0 : i32
    %c0_i32_1 = arith.constant 0 : i32
    return %c0_i32, %c0_i32_0 : i32, i32
  }
  func.func @transform_23(%arg0: i32) -> (i32, i32) {
    %c0_i32 = arith.constant 0 : i32
    %c0_i32_0 = arith.constant 0 : i32
    %c0_i32_1 = arith.constant 0 : i32
    return %c0_i32, %c0_i32_0 : i32, i32
  }
  func.func @transform_24(%arg0: i32) -> (i32, i32) {
    %c0_i32 = arith.constant 0 : i32
    %c0_i32_0 = arith.constant 0 : i32
    return %arg0, %c0_i32 : i32, i32
  }
  func.func @transform_25(%arg0: i32) -> (i32, i32) {
    %c0_i32 = arith.constant 0 : i32
    %c0_i32_0 = arith.constant 0 : i32
    return %arg0, %c0_i32 : i32, i32
  }
  func.func @transform_26(%arg0: i32) -> (i32, i32) {
    %c0_i32 = arith.constant 0 : i32
    %c0_i32_0 = arith.constant 0 : i32
    return %arg0, %c0_i32 : i32, i32
  }
  func.func @transform_27(%arg0: i32) -> (i32, i32) {
    %c0_i32 = arith.constant 0 : i32
    %c0_i32_0 = arith.constant 0 : i32
    return %arg0, %c0_i32 : i32, i32
  }
}

module attributes {stable_mosaic.version = 11 : i64} {
  func.func @_attn_pre_kernel(%arg0: i32, %arg1: memref<16x8xf32, #tpu.memory_space<vmem>>, %arg2: memref<16x4xf32, #tpu.memory_space<vmem>>, %arg3: memref<16x4xf32, #tpu.memory_space<vmem>>, %arg4: memref<16x4xf32, #tpu.memory_space<vmem>>, %arg5: memref<16x3xf32, #tpu.memory_space<vmem>>, %arg6: memref<4x2xf32, #tpu.memory_space<vmem>>, %arg7: memref<4x2xf32, #tpu.memory_space<vmem>>, %arg8: memref<8x32xf32, #tpu.memory_space<vmem>>, %arg9: memref<1x32xf32, #tpu.memory_space<vmem>>, %arg10: memref<4x32xf32, #tpu.memory_space<vmem>>, %arg11: memref<1x2xf32, #tpu.memory_space<vmem>>, %arg12: memref<16x2xf32, #tpu.memory_space<vmem>>, %arg13: memref<16x2xf32, #tpu.memory_space<vmem>>, %arg14: memref<16x2xf32, #tpu.memory_space<vmem>>, %arg15: memref<16x2xf32, #tpu.memory_space<vmem>>, %arg16: memref<16x2xf32, #tpu.memory_space<vmem>>, %arg17: memref<16x2xf32, #tpu.memory_space<vmem>>, %arg18: memref<16x32xf32, #tpu.memory_space<vmem>>, %arg19: memref<16x32xf32, #tpu.memory_space<vmem>>, %arg20: memref<16x32xf32, #tpu.memory_space<vmem>>, %arg21: memref<16x32xf32, #tpu.memory_space<vmem>>) attributes {dimension_semantics = [#tpu.dimension_semantics<parallel>], iteration_bounds = array<i64: 2>, scalar_prefetch = 0 : i64, scratch_operands = 0 : i64, tpu.core_type = #tpu.core_type<tc>, window_params = [{transform_indices = @transform_0, window_bounds = array<i64: 16, 8>}, {transform_indices = @transform_1, window_bounds = array<i64: 16, 4>}, {transform_indices = @transform_2, window_bounds = array<i64: 16, 4>}, {transform_indices = @transform_3, window_bounds = array<i64: 16, 4>}, {transform_indices = @transform_4, window_bounds = array<i64: 16, 3>}, {pipeline_mode = #tpu.pipeline_mode<synchronous>, transform_indices = @transform_5, window_bounds = array<i64: 4, 2>}, {pipeline_mode = #tpu.pipeline_mode<synchronous>, transform_indices = @transform_6, window_bounds = array<i64: 4, 2>}, {pipeline_mode = #tpu.pipeline_mode<synchronous>, transform_indices = @transform_7, window_bounds = array<i64: 8, 32>}, {pipeline_mode = #tpu.pipeline_mode<synchronous>, transform_indices = @transform_8, window_bounds = array<i64: 1, 32>}, {pipeline_mode = #tpu.pipeline_mode<synchronous>, transform_indices = @transform_9, window_bounds = array<i64: 4, 32>}, {pipeline_mode = #tpu.pipeline_mode<synchronous>, transform_indices = @transform_10, window_bounds = array<i64: 1, 2>}, {transform_indices = @transform_11, window_bounds = array<i64: 16, 2>}, {transform_indices = @transform_12, window_bounds = array<i64: 16, 2>}, {transform_indices = @transform_13, window_bounds = array<i64: 16, 2>}, {transform_indices = @transform_14, window_bounds = array<i64: 16, 2>}, {transform_indices = @transform_15, window_bounds = array<i64: 16, 2>}, {transform_indices = @transform_16, window_bounds = array<i64: 16, 2>}, {transform_indices = @transform_17, window_bounds = array<i64: 16, 32>}, {transform_indices = @transform_18, window_bounds = array<i64: 16, 32>}, {transform_indices = @transform_19, window_bounds = array<i64: 16, 32>}, {transform_indices = @transform_20, window_bounds = array<i64: 16, 32>}]} {
    %c0 = arith.constant 0 : index
    %c0_0 = arith.constant 0 : index
    %0 = vector.load %arg2[%c0, %c0_0] : memref<16x4xf32, #tpu.memory_space<vmem>>, vector<16x4xf32>
    %c0_1 = arith.constant 0 : index
    %c0_2 = arith.constant 0 : index
    %1 = vector.load %arg3[%c0_1, %c0_2] : memref<16x4xf32, #tpu.memory_space<vmem>>, vector<16x4xf32>
    %c0_3 = arith.constant 0 : index
    %c0_4 = arith.constant 0 : index
    %2 = vector.load %arg4[%c0_3, %c0_4] : memref<16x4xf32, #tpu.memory_space<vmem>>, vector<16x4xf32>
    %c0_5 = arith.constant 0 : index
    %c0_6 = arith.constant 0 : index
    %3 = vector.load %arg5[%c0_5, %c0_6] : memref<16x3xf32, #tpu.memory_space<vmem>>, vector<16x3xf32>
    %c0_7 = arith.constant 0 : index
    %c0_8 = arith.constant 0 : index
    %4 = vector.load %arg6[%c0_7, %c0_8] : memref<4x2xf32, #tpu.memory_space<vmem>>, vector<4x2xf32>
    %c0_9 = arith.constant 0 : index
    %c0_10 = arith.constant 0 : index
    %5 = vector.load %arg7[%c0_9, %c0_10] : memref<4x2xf32, #tpu.memory_space<vmem>>, vector<4x2xf32>
    %c0_11 = arith.constant 0 : index
    %c0_12 = arith.constant 0 : index
    %6 = vector.load %arg10[%c0_11, %c0_12] : memref<4x32xf32, #tpu.memory_space<vmem>>, vector<4x32xf32>
    %c0_13 = arith.constant 0 : index
    %c0_14 = arith.constant 0 : index
    %7 = vector.load %arg11[%c0_13, %c0_14] : memref<1x2xf32, #tpu.memory_space<vmem>>, vector<1x2xf32>
    %8 = vector.extract_strided_slice %3 {offsets = [0, 0], sizes = [16, 1], strides = [1, 1]} : vector<16x3xf32> to vector<16x1xf32>
    %cst = arith.constant dense<0.000000e+00> : vector<16x2xf32>
    %9 = tpu.matmul %0, %4, %cst {dimension_numbers = #tpu.dot_dimension_numbers<[1], [0], [0], [1], [0, 0, 1, 1], [], []>} : vector<16x4xf32>, vector<4x2xf32>, vector<16x2xf32> -> vector<16x2xf32>
    %10 = vector.broadcast %8 : vector<16x1xf32> to vector<16x2xf32>
    %11 = arith.addf %10, %9 : vector<16x2xf32>
    %12 = vector.broadcast %7 : vector<1x2xf32> to vector<16x2xf32>
    %13 = arith.mulf %11, %12 : vector<16x2xf32>
    %c0_15 = arith.constant 0 : index
    %c0_16 = arith.constant 0 : index
    %14 = vector.load %arg12[%c0_15, %c0_16] : memref<16x2xf32, #tpu.memory_space<vmem>>, vector<16x2xf32>
    tpu.vector_store %arg12[%c0_15, %c0_16], %13 {strides = array<i32>} : memref<16x2xf32, #tpu.memory_space<vmem>>, vector<16x2xf32>,
    %cst_17 = arith.constant dense<0.000000e+00> : vector<16x2xf32>
    %15 = tpu.matmul %0, %5, %cst_17 {dimension_numbers = #tpu.dot_dimension_numbers<[1], [0], [0], [1], [0, 0, 1, 1], [], []>} : vector<16x4xf32>, vector<4x2xf32>, vector<16x2xf32> -> vector<16x2xf32>
    %16 = vector.broadcast %8 : vector<16x1xf32> to vector<16x2xf32>
    %17 = arith.addf %16, %15 : vector<16x2xf32>
    %18 = vector.broadcast %7 : vector<1x2xf32> to vector<16x2xf32>
    %19 = arith.mulf %17, %18 : vector<16x2xf32>
    %c0_18 = arith.constant 0 : index
    %c0_19 = arith.constant 0 : index
    %20 = vector.load %arg15[%c0_18, %c0_19] : memref<16x2xf32, #tpu.memory_space<vmem>>, vector<16x2xf32>
    tpu.vector_store %arg15[%c0_18, %c0_19], %19 {strides = array<i32>} : memref<16x2xf32, #tpu.memory_space<vmem>>, vector<16x2xf32>,
    %cst_20 = arith.constant dense<0.000000e+00> : vector<16x32xf32>
    %21 = tpu.matmul %0, %6, %cst_20 {dimension_numbers = #tpu.dot_dimension_numbers<[1], [0], [0], [1], [0, 0, 1, 1], [], []>} : vector<16x4xf32>, vector<4x32xf32>, vector<16x32xf32> -> vector<16x32xf32>
    %c0_21 = arith.constant 0 : index
    %c0_22 = arith.constant 0 : index
    %22 = vector.load %arg19[%c0_21, %c0_22] : memref<16x32xf32, #tpu.memory_space<vmem>>, vector<16x32xf32>
    tpu.vector_store %arg19[%c0_21, %c0_22], %21 {strides = array<i32>} : memref<16x32xf32, #tpu.memory_space<vmem>>, vector<16x32xf32>,
    %23 = vector.extract_strided_slice %3 {offsets = [0, 1], sizes = [16, 1], strides = [1, 1]} : vector<16x3xf32> to vector<16x1xf32>
    %cst_23 = arith.constant dense<0.000000e+00> : vector<16x2xf32>
    %24 = tpu.matmul %1, %4, %cst_23 {dimension_numbers = #tpu.dot_dimension_numbers<[1], [0], [0], [1], [0, 0, 1, 1], [], []>} : vector<16x4xf32>, vector<4x2xf32>, vector<16x2xf32> -> vector<16x2xf32>
    %25 = vector.broadcast %23 : vector<16x1xf32> to vector<16x2xf32>
    %26 = arith.addf %25, %24 : vector<16x2xf32>
    %27 = vector.broadcast %7 : vector<1x2xf32> to vector<16x2xf32>
    %28 = arith.mulf %26, %27 : vector<16x2xf32>
    %c0_24 = arith.constant 0 : index
    %c0_25 = arith.constant 0 : index
    %29 = vector.load %arg13[%c0_24, %c0_25] : memref<16x2xf32, #tpu.memory_space<vmem>>, vector<16x2xf32>
    tpu.vector_store %arg13[%c0_24, %c0_25], %28 {strides = array<i32>} : memref<16x2xf32, #tpu.memory_space<vmem>>, vector<16x2xf32>,
    %cst_26 = arith.constant dense<0.000000e+00> : vector<16x2xf32>
    %30 = tpu.matmul %1, %5, %cst_26 {dimension_numbers = #tpu.dot_dimension_numbers<[1], [0], [0], [1], [0, 0, 1, 1], [], []>} : vector<16x4xf32>, vector<4x2xf32>, vector<16x2xf32> -> vector<16x2xf32>
    %31 = vector.broadcast %23 : vector<16x1xf32> to vector<16x2xf32>
    %32 = arith.addf %31, %30 : vector<16x2xf32>
    %33 = vector.broadcast %7 : vector<1x2xf32> to vector<16x2xf32>
    %34 = arith.mulf %32, %33 : vector<16x2xf32>
    %c0_27 = arith.constant 0 : index
    %c0_28 = arith.constant 0 : index
    %35 = vector.load %arg16[%c0_27, %c0_28] : memref<16x2xf32, #tpu.memory_space<vmem>>, vector<16x2xf32>
    tpu.vector_store %arg16[%c0_27, %c0_28], %34 {strides = array<i32>} : memref<16x2xf32, #tpu.memory_space<vmem>>, vector<16x2xf32>,
    %cst_29 = arith.constant dense<0.000000e+00> : vector<16x32xf32>
    %36 = tpu.matmul %1, %6, %cst_29 {dimension_numbers = #tpu.dot_dimension_numbers<[1], [0], [0], [1], [0, 0, 1, 1], [], []>} : vector<16x4xf32>, vector<4x32xf32>, vector<16x32xf32> -> vector<16x32xf32>
    %c0_30 = arith.constant 0 : index
    %c0_31 = arith.constant 0 : index
    %37 = vector.load %arg20[%c0_30, %c0_31] : memref<16x32xf32, #tpu.memory_space<vmem>>, vector<16x32xf32>
    tpu.vector_store %arg20[%c0_30, %c0_31], %36 {strides = array<i32>} : memref<16x32xf32, #tpu.memory_space<vmem>>, vector<16x32xf32>,
    %38 = vector.extract_strided_slice %3 {offsets = [0, 2], sizes = [16, 1], strides = [1, 1]} : vector<16x3xf32> to vector<16x1xf32>
    %cst_32 = arith.constant dense<0.000000e+00> : vector<16x2xf32>
    %39 = tpu.matmul %2, %4, %cst_32 {dimension_numbers = #tpu.dot_dimension_numbers<[1], [0], [0], [1], [0, 0, 1, 1], [], []>} : vector<16x4xf32>, vector<4x2xf32>, vector<16x2xf32> -> vector<16x2xf32>
    %40 = vector.broadcast %38 : vector<16x1xf32> to vector<16x2xf32>
    %41 = arith.addf %40, %39 : vector<16x2xf32>
    %42 = vector.broadcast %7 : vector<1x2xf32> to vector<16x2xf32>
    %43 = arith.mulf %41, %42 : vector<16x2xf32>
    %c0_33 = arith.constant 0 : index
    %c0_34 = arith.constant 0 : index
    %44 = vector.load %arg14[%c0_33, %c0_34] : memref<16x2xf32, #tpu.memory_space<vmem>>, vector<16x2xf32>
    tpu.vector_store %arg14[%c0_33, %c0_34], %43 {strides = array<i32>} : memref<16x2xf32, #tpu.memory_space<vmem>>, vector<16x2xf32>,
    %cst_35 = arith.constant dense<0.000000e+00> : vector<16x2xf32>
    %45 = tpu.matmul %2, %5, %cst_35 {dimension_numbers = #tpu.dot_dimension_numbers<[1], [0], [0], [1], [0, 0, 1, 1], [], []>} : vector<16x4xf32>, vector<4x2xf32>, vector<16x2xf32> -> vector<16x2xf32>
    %46 = vector.broadcast %38 : vector<16x1xf32> to vector<16x2xf32>
    %47 = arith.addf %46, %45 : vector<16x2xf32>
    %48 = vector.broadcast %7 : vector<1x2xf32> to vector<16x2xf32>
    %49 = arith.mulf %47, %48 : vector<16x2xf32>
    %c0_36 = arith.constant 0 : index
    %c0_37 = arith.constant 0 : index
    %50 = vector.load %arg17[%c0_36, %c0_37] : memref<16x2xf32, #tpu.memory_space<vmem>>, vector<16x2xf32>
    tpu.vector_store %arg17[%c0_36, %c0_37], %49 {strides = array<i32>} : memref<16x2xf32, #tpu.memory_space<vmem>>, vector<16x2xf32>,
    %cst_38 = arith.constant dense<0.000000e+00> : vector<16x32xf32>
    %51 = tpu.matmul %2, %6, %cst_38 {dimension_numbers = #tpu.dot_dimension_numbers<[1], [0], [0], [1], [0, 0, 1, 1], [], []>} : vector<16x4xf32>, vector<4x32xf32>, vector<16x32xf32> -> vector<16x32xf32>
    %c0_39 = arith.constant 0 : index
    %c0_40 = arith.constant 0 : index
    %52 = vector.load %arg21[%c0_39, %c0_40] : memref<16x32xf32, #tpu.memory_space<vmem>>, vector<16x32xf32>
    tpu.vector_store %arg21[%c0_39, %c0_40], %51 {strides = array<i32>} : memref<16x32xf32, #tpu.memory_space<vmem>>, vector<16x32xf32>,
    %c0_41 = arith.constant 0 : index
    %c0_42 = arith.constant 0 : index
    %53 = vector.load %arg1[%c0_41, %c0_42] : memref<16x8xf32, #tpu.memory_space<vmem>>, vector<16x8xf32>
    %c0_43 = arith.constant 0 : index
    %c0_44 = arith.constant 0 : index
    %54 = vector.load %arg8[%c0_43, %c0_44] : memref<8x32xf32, #tpu.memory_space<vmem>>, vector<8x32xf32>
    %cst_45 = arith.constant dense<0.000000e+00> : vector<16x32xf32>
    %55 = tpu.matmul %53, %54, %cst_45 {dimension_numbers = #tpu.dot_dimension_numbers<[1], [0], [0], [1], [0, 0, 1, 1], [], []>} : vector<16x8xf32>, vector<8x32xf32>, vector<16x32xf32> -> vector<16x32xf32>
    %c0_46 = arith.constant 0 : index
    %c0_47 = arith.constant 0 : index
    %56 = vector.load %arg9[%c0_46, %c0_47] : memref<1x32xf32, #tpu.memory_space<vmem>>, vector<1x32xf32>
    %57 = vector.broadcast %56 : vector<1x32xf32> to vector<16x32xf32>
    %58 = arith.addf %55, %57 : vector<16x32xf32>
    %c0_48 = arith.constant 0 : index
    %c0_49 = arith.constant 0 : index
    %59 = vector.load %arg18[%c0_48, %c0_49] : memref<16x32xf32, #tpu.memory_space<vmem>>, vector<16x32xf32>
    tpu.vector_store %arg18[%c0_48, %c0_49], %58 {strides = array<i32>} : memref<16x32xf32, #tpu.memory_space<vmem>>, vector<16x32xf32>,
    return
  }
  func.func @transform_0(%arg0: i32) -> (i32, i32) {
    %c0_i32 = arith.constant 0 : i32
    %c0_i32_0 = arith.constant 0 : i32
    return %arg0, %c0_i32 : i32, i32
  }
  func.func @transform_1(%arg0: i32) -> (i32, i32) {
    %c0_i32 = arith.constant 0 : i32
    %c0_i32_0 = arith.constant 0 : i32
    return %arg0, %c0_i32 : i32, i32
  }
  func.func @transform_2(%arg0: i32) -> (i32, i32) {
    %c0_i32 = arith.constant 0 : i32
    %c0_i32_0 = arith.constant 0 : i32
    return %arg0, %c0_i32 : i32, i32
  }
  func.func @transform_3(%arg0: i32) -> (i32, i32) {
    %c0_i32 = arith.constant 0 : i32
    %c0_i32_0 = arith.constant 0 : i32
    return %arg0, %c0_i32 : i32, i32
  }
  func.func @transform_4(%arg0: i32) -> (i32, i32) {
    %c0_i32 = arith.constant 0 : i32
    %c0_i32_0 = arith.constant 0 : i32
    return %arg0, %c0_i32 : i32, i32
  }
  func.func @transform_5(%arg0: i32) -> (i32, i32) {
    %c0_i32 = arith.constant 0 : i32
    %c0_i32_0 = arith.constant 0 : i32
    %c0_i32_1 = arith.constant 0 : i32
    return %c0_i32, %c0_i32_0 : i32, i32
  }
  func.func @transform_6(%arg0: i32) -> (i32, i32) {
    %c0_i32 = arith.constant 0 : i32
    %c0_i32_0 = arith.constant 0 : i32
    %c0_i32_1 = arith.constant 0 : i32
    return %c0_i32, %c0_i32_0 : i32, i32
  }
  func.func @transform_7(%arg0: i32) -> (i32, i32) {
    %c0_i32 = arith.constant 0 : i32
    %c0_i32_0 = arith.constant 0 : i32
    %c0_i32_1 = arith.constant 0 : i32
    return %c0_i32, %c0_i32_0 : i32, i32
  }
  func.func @transform_8(%arg0: i32) -> (i32, i32) {
    %c0_i32 = arith.constant 0 : i32
    %c0_i32_0 = arith.constant 0 : i32
    %c0_i32_1 = arith.constant 0 : i32
    return %c0_i32, %c0_i32_0 : i32, i32
  }
  func.func @transform_9(%arg0: i32) -> (i32, i32) {
    %c0_i32 = arith.constant 0 : i32
    %c0_i32_0 = arith.constant 0 : i32
    %c0_i32_1 = arith.constant 0 : i32
    return %c0_i32, %c0_i32_0 : i32, i32
  }
  func.func @transform_10(%arg0: i32) -> (i32, i32) {
    %c0_i32 = arith.constant 0 : i32
    %c0_i32_0 = arith.constant 0 : i32
    %c0_i32_1 = arith.constant 0 : i32
    return %c0_i32, %c0_i32_0 : i32, i32
  }
  func.func @transform_11(%arg0: i32) -> (i32, i32) {
    %c0_i32 = arith.constant 0 : i32
    %c0_i32_0 = arith.constant 0 : i32
    return %arg0, %c0_i32 : i32, i32
  }
  func.func @transform_12(%arg0: i32) -> (i32, i32) {
    %c0_i32 = arith.constant 0 : i32
    %c0_i32_0 = arith.constant 0 : i32
    return %arg0, %c0_i32 : i32, i32
  }
  func.func @transform_13(%arg0: i32) -> (i32, i32) {
    %c0_i32 = arith.constant 0 : i32
    %c0_i32_0 = arith.constant 0 : i32
    return %arg0, %c0_i32 : i32, i32
  }
  func.func @transform_14(%arg0: i32) -> (i32, i32) {
    %c0_i32 = arith.constant 0 : i32
    %c0_i32_0 = arith.constant 0 : i32
    return %arg0, %c0_i32 : i32, i32
  }
  func.func @transform_15(%arg0: i32) -> (i32, i32) {
    %c0_i32 = arith.constant 0 : i32
    %c0_i32_0 = arith.constant 0 : i32
    return %arg0, %c0_i32 : i32, i32
  }
  func.func @transform_16(%arg0: i32) -> (i32, i32) {
    %c0_i32 = arith.constant 0 : i32
    %c0_i32_0 = arith.constant 0 : i32
    return %arg0, %c0_i32 : i32, i32
  }
  func.func @transform_17(%arg0: i32) -> (i32, i32) {
    %c0_i32 = arith.constant 0 : i32
    %c0_i32_0 = arith.constant 0 : i32
    return %arg0, %c0_i32 : i32, i32
  }
  func.func @transform_18(%arg0: i32) -> (i32, i32) {
    %c0_i32 = arith.constant 0 : i32
    %c0_i32_0 = arith.constant 0 : i32
    return %arg0, %c0_i32 : i32, i32
  }
  func.func @transform_19(%arg0: i32) -> (i32, i32) {
    %c0_i32 = arith.constant 0 : i32
    %c0_i32_0 = arith.constant 0 : i32
    return %arg0, %c0_i32 : i32, i32
  }
  func.func @transform_20(%arg0: i32) -> (i32, i32) {
    %c0_i32 = arith.constant 0 : i32
    %c0_i32_0 = arith.constant 0 : i32
    return %arg0, %c0_i32 : i32, i32
  }
}

module attributes {stable_mosaic.version = 11 : i64} {
  func.func @_prox_attn_kernel(%arg0: i32, %arg1: memref<1x16x2xf32, #tpu.memory_space<vmem>>, %arg2: memref<1x16x2xf32, #tpu.memory_space<vmem>>, %arg3: memref<1x16x2xf32, #tpu.memory_space<vmem>>, %arg4: memref<1x2x16xf32, #tpu.memory_space<vmem>>, %arg5: memref<1x2x16xf32, #tpu.memory_space<vmem>>, %arg6: memref<1x2x16xf32, #tpu.memory_space<vmem>>, %arg7: memref<1x16x32xf32, #tpu.memory_space<vmem>>, %arg8: memref<1x16x32xf32, #tpu.memory_space<vmem>>, %arg9: memref<1x16x32xf32, #tpu.memory_space<vmem>>, %arg10: memref<1x16x32xf32, #tpu.memory_space<vmem>>, %arg11: memref<1x16x32xf32, #tpu.memory_space<vmem>>, %arg12: memref<1x16x32xf32, #tpu.memory_space<vmem>>, %arg13: memref<1x16x32xf32, #tpu.memory_space<vmem>>, %arg14: memref<1x16x32xf32, #tpu.memory_space<vmem>>) attributes {dimension_semantics = [#tpu.dimension_semantics<parallel>], iteration_bounds = array<i64: 2>, scalar_prefetch = 0 : i64, scratch_operands = 0 : i64, tpu.core_type = #tpu.core_type<tc>, window_params = [{transform_indices = @transform_0, window_bounds = array<i64: 1, 16, 2>}, {transform_indices = @transform_1, window_bounds = array<i64: 1, 16, 2>}, {transform_indices = @transform_2, window_bounds = array<i64: 1, 16, 2>}, {transform_indices = @transform_3, window_bounds = array<i64: 1, 2, 16>}, {transform_indices = @transform_4, window_bounds = array<i64: 1, 2, 16>}, {transform_indices = @transform_5, window_bounds = array<i64: 1, 2, 16>}, {transform_indices = @transform_6, window_bounds = array<i64: 1, 16, 32>}, {transform_indices = @transform_7, window_bounds = array<i64: 1, 16, 32>}, {transform_indices = @transform_8, window_bounds = array<i64: 1, 16, 32>}, {transform_indices = @transform_9, window_bounds = array<i64: 1, 16, 32>}, {transform_indices = @transform_10, window_bounds = array<i64: 1, 16, 32>}, {transform_indices = @transform_11, window_bounds = array<i64: 1, 16, 32>}, {transform_indices = @transform_12, window_bounds = array<i64: 1, 16, 32>}, {transform_indices = @transform_13, window_bounds = array<i64: 1, 16, 32>}]} {
    %c0 = arith.constant 0 : index
    %c0_0 = arith.constant 0 : index
    %c0_1 = arith.constant 0 : index
    %0 = vector.load %arg1[%c0, %c0_0, %c0_1] : memref<1x16x2xf32, #tpu.memory_space<vmem>>, vector<1x16x2xf32>
    %1 = vector.shape_cast %0 : vector<1x16x2xf32> to vector<16x2xf32>
    %c0_2 = arith.constant 0 : index
    %c0_3 = arith.constant 0 : index
    %c0_4 = arith.constant 0 : index
    %2 = vector.load %arg2[%c0_2, %c0_3, %c0_4] : memref<1x16x2xf32, #tpu.memory_space<vmem>>, vector<1x16x2xf32>
    %3 = vector.shape_cast %2 : vector<1x16x2xf32> to vector<16x2xf32>
    %c0_5 = arith.constant 0 : index
    %c0_6 = arith.constant 0 : index
    %c0_7 = arith.constant 0 : index
    %4 = vector.load %arg3[%c0_5, %c0_6, %c0_7] : memref<1x16x2xf32, #tpu.memory_space<vmem>>, vector<1x16x2xf32>
    %5 = vector.shape_cast %4 : vector<1x16x2xf32> to vector<16x2xf32>
    %c0_8 = arith.constant 0 : index
    %c0_9 = arith.constant 0 : index
    %c0_10 = arith.constant 0 : index
    %6 = vector.load %arg4[%c0_8, %c0_9, %c0_10] : memref<1x2x16xf32, #tpu.memory_space<vmem>>, vector<1x2x16xf32>
    %7 = vector.shape_cast %6 : vector<1x2x16xf32> to vector<2x16xf32>
    %c0_11 = arith.constant 0 : index
    %c0_12 = arith.constant 0 : index
    %c0_13 = arith.constant 0 : index
    %8 = vector.load %arg5[%c0_11, %c0_12, %c0_13] : memref<1x2x16xf32, #tpu.memory_space<vmem>>, vector<1x2x16xf32>
    %9 = vector.shape_cast %8 : vector<1x2x16xf32> to vector<2x16xf32>
    %c0_14 = arith.constant 0 : index
    %c0_15 = arith.constant 0 : index
    %c0_16 = arith.constant 0 : index
    %10 = vector.load %arg6[%c0_14, %c0_15, %c0_16] : memref<1x2x16xf32, #tpu.memory_space<vmem>>, vector<1x2x16xf32>
    %11 = vector.shape_cast %10 : vector<1x2x16xf32> to vector<2x16xf32>
    %c0_17 = arith.constant 0 : index
    %c0_18 = arith.constant 0 : index
    %c0_19 = arith.constant 0 : index
    %12 = vector.load %arg7[%c0_17, %c0_18, %c0_19] : memref<1x16x32xf32, #tpu.memory_space<vmem>>, vector<1x16x32xf32>
    %13 = vector.shape_cast %12 : vector<1x16x32xf32> to vector<16x32xf32>
    %c0_20 = arith.constant 0 : index
    %c0_21 = arith.constant 0 : index
    %c0_22 = arith.constant 0 : index
    %14 = vector.load %arg8[%c0_20, %c0_21, %c0_22] : memref<1x16x32xf32, #tpu.memory_space<vmem>>, vector<1x16x32xf32>
    %15 = vector.shape_cast %14 : vector<1x16x32xf32> to vector<16x32xf32>
    %c0_23 = arith.constant 0 : index
    %c0_24 = arith.constant 0 : index
    %c0_25 = arith.constant 0 : index
    %16 = vector.load %arg9[%c0_23, %c0_24, %c0_25] : memref<1x16x32xf32, #tpu.memory_space<vmem>>, vector<1x16x32xf32>
    %17 = vector.shape_cast %16 : vector<1x16x32xf32> to vector<16x32xf32>
    %c0_26 = arith.constant 0 : index
    %c0_27 = arith.constant 0 : index
    %c0_28 = arith.constant 0 : index
    %18 = vector.load %arg10[%c0_26, %c0_27, %c0_28] : memref<1x16x32xf32, #tpu.memory_space<vmem>>, vector<1x16x32xf32>
    %19 = vector.shape_cast %18 : vector<1x16x32xf32> to vector<16x32xf32>
    %20 = vector.extract_strided_slice %1 {offsets = [0, 0], sizes = [16, 1], strides = [1, 1]} : vector<16x2xf32> to vector<16x1xf32>
    %21 = vector.extract_strided_slice %7 {offsets = [0, 0], sizes = [1, 16], strides = [1, 1]} : vector<2x16xf32> to vector<1x16xf32>
    %22 = vector.broadcast %20 : vector<16x1xf32> to vector<16x16xf32>
    %23 = vector.broadcast %21 : vector<1x16xf32> to vector<16x16xf32>
    %24 = arith.mulf %22, %23 : vector<16x16xf32>
    %cst = arith.constant 0.000000e+00 : f32
    %25 = vector.broadcast %cst : f32 to vector<16x16xf32>
    %26 = arith.addf %25, %24 : vector<16x16xf32>
    %27 = arith.mulf %20, %20 : vector<16x1xf32>
    %cst_29 = arith.constant 0.000000e+00 : f32
    %28 = vector.broadcast %cst_29 : f32 to vector<16x1xf32>
    %29 = arith.addf %28, %27 : vector<16x1xf32>
    %30 = arith.mulf %21, %21 : vector<1x16xf32>
    %cst_30 = arith.constant 0.000000e+00 : f32
    %31 = vector.broadcast %cst_30 : f32 to vector<1x16xf32>
    %32 = arith.addf %31, %30 : vector<1x16xf32>
    %33 = vector.extract_strided_slice %3 {offsets = [0, 0], sizes = [16, 1], strides = [1, 1]} : vector<16x2xf32> to vector<16x1xf32>
    %34 = vector.extract_strided_slice %9 {offsets = [0, 0], sizes = [1, 16], strides = [1, 1]} : vector<2x16xf32> to vector<1x16xf32>
    %35 = vector.broadcast %33 : vector<16x1xf32> to vector<16x16xf32>
    %36 = vector.broadcast %34 : vector<1x16xf32> to vector<16x16xf32>
    %37 = arith.mulf %35, %36 : vector<16x16xf32>
    %38 = arith.addf %26, %37 : vector<16x16xf32>
    %39 = arith.mulf %33, %33 : vector<16x1xf32>
    %40 = arith.addf %29, %39 : vector<16x1xf32>
    %41 = arith.mulf %34, %34 : vector<1x16xf32>
    %42 = arith.addf %32, %41 : vector<1x16xf32>
    %43 = vector.extract_strided_slice %5 {offsets = [0, 0], sizes = [16, 1], strides = [1, 1]} : vector<16x2xf32> to vector<16x1xf32>
    %44 = vector.extract_strided_slice %11 {offsets = [0, 0], sizes = [1, 16], strides = [1, 1]} : vector<2x16xf32> to vector<1x16xf32>
    %45 = vector.broadcast %43 : vector<16x1xf32> to vector<16x16xf32>
    %46 = vector.broadcast %44 : vector<1x16xf32> to vector<16x16xf32>
    %47 = arith.mulf %45, %46 : vector<16x16xf32>
    %48 = arith.addf %38, %47 : vector<16x16xf32>
    %49 = arith.mulf %43, %43 : vector<16x1xf32>
    %50 = arith.addf %40, %49 : vector<16x1xf32>
    %51 = arith.mulf %44, %44 : vector<1x16xf32>
    %52 = arith.addf %42, %51 : vector<1x16xf32>
    %cst_31 = arith.constant 2.000000e+00 : f32
    %53 = vector.broadcast %cst_31 : f32 to vector<16x16xf32>
    %54 = arith.mulf %53, %48 : vector<16x16xf32>
    %55 = vector.broadcast %50 : vector<16x1xf32> to vector<16x16xf32>
    %56 = arith.subf %54, %55 : vector<16x16xf32>
    %57 = vector.broadcast %52 : vector<1x16xf32> to vector<16x16xf32>
    %58 = arith.subf %56, %57 : vector<16x16xf32>
    %cst_32 = arith.constant dense<0xFF800000> : vector<16xf32>
    %59 = vector.multi_reduction <maximumf>, %58, %cst_32 [1] : vector<16x16xf32> to vector<16xf32>
    %60 = vector.shape_cast %59 : vector<16xf32> to vector<16x1xf32>
    %61 = vector.broadcast %60 : vector<16x1xf32> to vector<16x16xf32>
    %62 = arith.subf %58, %61 : vector<16x16xf32>
    %63 = math.exp %62 : vector<16x16xf32>
    %cst_33 = arith.constant dense<0.000000e+00> : vector<16xf32>
    %64 = vector.multi_reduction <add>, %63, %cst_33 [1] : vector<16x16xf32> to vector<16xf32>
    %65 = vector.shape_cast %64 : vector<16xf32> to vector<16x1xf32>
    %66 = tpu.reciprocal %65 {approx = true} : vector<16x1xf32> -> vector<16x1xf32>
    %67 = vector.broadcast %66 : vector<16x1xf32> to vector<16x16xf32>
    %68 = arith.mulf %63, %67 : vector<16x16xf32>
    %69 = vector.extract_strided_slice %13 {offsets = [0, 0], sizes = [16, 16], strides = [1, 1]} : vector<16x32xf32> to vector<16x16xf32>
    %cst_34 = arith.constant dense<0.000000e+00> : vector<16x16xf32>
    %70 = tpu.matmul %68, %69, %cst_34 {dimension_numbers = #tpu.dot_dimension_numbers<[1], [0], [0], [1], [0, 0, 1, 1], [], []>} : vector<16x16xf32>, vector<16x16xf32>, vector<16x16xf32> -> vector<16x16xf32>
    %c0_35 = arith.constant 0 : index
    %c0_36 = arith.constant 0 : index
    %c0_37 = arith.constant 0 : index
    %71 = vector.load %arg11[%c0_35, %c0_36, %c0_37] : memref<1x16x32xf32, #tpu.memory_space<vmem>>, vector<1x16x16xf32>
    %72 = vector.shape_cast %71 : vector<1x16x16xf32> to vector<16x16xf32>
    %73 = vector.shape_cast %70 : vector<16x16xf32> to vector<1x16x16xf32>
    tpu.vector_store %arg11[%c0_35, %c0_36, %c0_37], %73 {strides = array<i32>} : memref<1x16x32xf32, #tpu.memory_space<vmem>>, vector<1x16x16xf32>,
    %74 = vector.extract_strided_slice %15 {offsets = [0, 0], sizes = [16, 16], strides = [1, 1]} : vector<16x32xf32> to vector<16x16xf32>
    %cst_38 = arith.constant dense<0.000000e+00> : vector<16x16xf32>
    %75 = tpu.matmul %68, %74, %cst_38 {dimension_numbers = #tpu.dot_dimension_numbers<[1], [0], [0], [1], [0, 0, 1, 1], [], []>} : vector<16x16xf32>, vector<16x16xf32>, vector<16x16xf32> -> vector<16x16xf32>
    %c0_39 = arith.constant 0 : index
    %c0_40 = arith.constant 0 : index
    %c0_41 = arith.constant 0 : index
    %76 = vector.load %arg12[%c0_39, %c0_40, %c0_41] : memref<1x16x32xf32, #tpu.memory_space<vmem>>, vector<1x16x16xf32>
    %77 = vector.shape_cast %76 : vector<1x16x16xf32> to vector<16x16xf32>
    %78 = vector.shape_cast %75 : vector<16x16xf32> to vector<1x16x16xf32>
    tpu.vector_store %arg12[%c0_39, %c0_40, %c0_41], %78 {strides = array<i32>} : memref<1x16x32xf32, #tpu.memory_space<vmem>>, vector<1x16x16xf32>,
    %79 = vector.extract_strided_slice %17 {offsets = [0, 0], sizes = [16, 16], strides = [1, 1]} : vector<16x32xf32> to vector<16x16xf32>
    %cst_42 = arith.constant dense<0.000000e+00> : vector<16x16xf32>
    %80 = tpu.matmul %68, %79, %cst_42 {dimension_numbers = #tpu.dot_dimension_numbers<[1], [0], [0], [1], [0, 0, 1, 1], [], []>} : vector<16x16xf32>, vector<16x16xf32>, vector<16x16xf32> -> vector<16x16xf32>
    %c0_43 = arith.constant 0 : index
    %c0_44 = arith.constant 0 : index
    %c0_45 = arith.constant 0 : index
    %81 = vector.load %arg13[%c0_43, %c0_44, %c0_45] : memref<1x16x32xf32, #tpu.memory_space<vmem>>, vector<1x16x16xf32>
    %82 = vector.shape_cast %81 : vector<1x16x16xf32> to vector<16x16xf32>
    %83 = vector.shape_cast %80 : vector<16x16xf32> to vector<1x16x16xf32>
    tpu.vector_store %arg13[%c0_43, %c0_44, %c0_45], %83 {strides = array<i32>} : memref<1x16x32xf32, #tpu.memory_space<vmem>>, vector<1x16x16xf32>,
    %84 = vector.extract_strided_slice %19 {offsets = [0, 0], sizes = [16, 16], strides = [1, 1]} : vector<16x32xf32> to vector<16x16xf32>
    %cst_46 = arith.constant dense<0.000000e+00> : vector<16x16xf32>
    %85 = tpu.matmul %68, %84, %cst_46 {dimension_numbers = #tpu.dot_dimension_numbers<[1], [0], [0], [1], [0, 0, 1, 1], [], []>} : vector<16x16xf32>, vector<16x16xf32>, vector<16x16xf32> -> vector<16x16xf32>
    %c0_47 = arith.constant 0 : index
    %c0_48 = arith.constant 0 : index
    %c0_49 = arith.constant 0 : index
    %86 = vector.load %arg14[%c0_47, %c0_48, %c0_49] : memref<1x16x32xf32, #tpu.memory_space<vmem>>, vector<1x16x16xf32>
    %87 = vector.shape_cast %86 : vector<1x16x16xf32> to vector<16x16xf32>
    %88 = vector.shape_cast %85 : vector<16x16xf32> to vector<1x16x16xf32>
    tpu.vector_store %arg14[%c0_47, %c0_48, %c0_49], %88 {strides = array<i32>} : memref<1x16x32xf32, #tpu.memory_space<vmem>>, vector<1x16x16xf32>,
    %89 = vector.extract_strided_slice %1 {offsets = [0, 1], sizes = [16, 1], strides = [1, 1]} : vector<16x2xf32> to vector<16x1xf32>
    %90 = vector.extract_strided_slice %7 {offsets = [1, 0], sizes = [1, 16], strides = [1, 1]} : vector<2x16xf32> to vector<1x16xf32>
    %91 = vector.broadcast %89 : vector<16x1xf32> to vector<16x16xf32>
    %92 = vector.broadcast %90 : vector<1x16xf32> to vector<16x16xf32>
    %93 = arith.mulf %91, %92 : vector<16x16xf32>
    %cst_50 = arith.constant 0.000000e+00 : f32
    %94 = vector.broadcast %cst_50 : f32 to vector<16x16xf32>
    %95 = arith.addf %94, %93 : vector<16x16xf32>
    %96 = arith.mulf %89, %89 : vector<16x1xf32>
    %cst_51 = arith.constant 0.000000e+00 : f32
    %97 = vector.broadcast %cst_51 : f32 to vector<16x1xf32>
    %98 = arith.addf %97, %96 : vector<16x1xf32>
    %99 = arith.mulf %90, %90 : vector<1x16xf32>
    %cst_52 = arith.constant 0.000000e+00 : f32
    %100 = vector.broadcast %cst_52 : f32 to vector<1x16xf32>
    %101 = arith.addf %100, %99 : vector<1x16xf32>
    %102 = vector.extract_strided_slice %3 {offsets = [0, 1], sizes = [16, 1], strides = [1, 1]} : vector<16x2xf32> to vector<16x1xf32>
    %103 = vector.extract_strided_slice %9 {offsets = [1, 0], sizes = [1, 16], strides = [1, 1]} : vector<2x16xf32> to vector<1x16xf32>
    %104 = vector.broadcast %102 : vector<16x1xf32> to vector<16x16xf32>
    %105 = vector.broadcast %103 : vector<1x16xf32> to vector<16x16xf32>
    %106 = arith.mulf %104, %105 : vector<16x16xf32>
    %107 = arith.addf %95, %106 : vector<16x16xf32>
    %108 = arith.mulf %102, %102 : vector<16x1xf32>
    %109 = arith.addf %98, %108 : vector<16x1xf32>
    %110 = arith.mulf %103, %103 : vector<1x16xf32>
    %111 = arith.addf %101, %110 : vector<1x16xf32>
    %112 = vector.extract_strided_slice %5 {offsets = [0, 1], sizes = [16, 1], strides = [1, 1]} : vector<16x2xf32> to vector<16x1xf32>
    %113 = vector.extract_strided_slice %11 {offsets = [1, 0], sizes = [1, 16], strides = [1, 1]} : vector<2x16xf32> to vector<1x16xf32>
    %114 = vector.broadcast %112 : vector<16x1xf32> to vector<16x16xf32>
    %115 = vector.broadcast %113 : vector<1x16xf32> to vector<16x16xf32>
    %116 = arith.mulf %114, %115 : vector<16x16xf32>
    %117 = arith.addf %107, %116 : vector<16x16xf32>
    %118 = arith.mulf %112, %112 : vector<16x1xf32>
    %119 = arith.addf %109, %118 : vector<16x1xf32>
    %120 = arith.mulf %113, %113 : vector<1x16xf32>
    %121 = arith.addf %111, %120 : vector<1x16xf32>
    %cst_53 = arith.constant 2.000000e+00 : f32
    %122 = vector.broadcast %cst_53 : f32 to vector<16x16xf32>
    %123 = arith.mulf %122, %117 : vector<16x16xf32>
    %124 = vector.broadcast %119 : vector<16x1xf32> to vector<16x16xf32>
    %125 = arith.subf %123, %124 : vector<16x16xf32>
    %126 = vector.broadcast %121 : vector<1x16xf32> to vector<16x16xf32>
    %127 = arith.subf %125, %126 : vector<16x16xf32>
    %cst_54 = arith.constant dense<0xFF800000> : vector<16xf32>
    %128 = vector.multi_reduction <maximumf>, %127, %cst_54 [1] : vector<16x16xf32> to vector<16xf32>
    %129 = vector.shape_cast %128 : vector<16xf32> to vector<16x1xf32>
    %130 = vector.broadcast %129 : vector<16x1xf32> to vector<16x16xf32>
    %131 = arith.subf %127, %130 : vector<16x16xf32>
    %132 = math.exp %131 : vector<16x16xf32>
    %cst_55 = arith.constant dense<0.000000e+00> : vector<16xf32>
    %133 = vector.multi_reduction <add>, %132, %cst_55 [1] : vector<16x16xf32> to vector<16xf32>
    %134 = vector.shape_cast %133 : vector<16xf32> to vector<16x1xf32>
    %135 = tpu.reciprocal %134 {approx = true} : vector<16x1xf32> -> vector<16x1xf32>
    %136 = vector.broadcast %135 : vector<16x1xf32> to vector<16x16xf32>
    %137 = arith.mulf %132, %136 : vector<16x16xf32>
    %138 = vector.extract_strided_slice %13 {offsets = [0, 16], sizes = [16, 16], strides = [1, 1]} : vector<16x32xf32> to vector<16x16xf32>
    %cst_56 = arith.constant dense<0.000000e+00> : vector<16x16xf32>
    %139 = tpu.matmul %137, %138, %cst_56 {dimension_numbers = #tpu.dot_dimension_numbers<[1], [0], [0], [1], [0, 0, 1, 1], [], []>} : vector<16x16xf32>, vector<16x16xf32>, vector<16x16xf32> -> vector<16x16xf32>
    %c0_57 = arith.constant 0 : index
    %c0_58 = arith.constant 0 : index
    %c16 = arith.constant 16 : index
    %140 = vector.load %arg11[%c0_57, %c0_58, %c16] : memref<1x16x32xf32, #tpu.memory_space<vmem>>, vector<1x16x16xf32>
    %141 = vector.shape_cast %140 : vector<1x16x16xf32> to vector<16x16xf32>
    %142 = vector.shape_cast %139 : vector<16x16xf32> to vector<1x16x16xf32>
    tpu.vector_store %arg11[%c0_57, %c0_58, %c16], %142 {strides = array<i32>} : memref<1x16x32xf32, #tpu.memory_space<vmem>>, vector<1x16x16xf32>,
    %143 = vector.extract_strided_slice %15 {offsets = [0, 16], sizes = [16, 16], strides = [1, 1]} : vector<16x32xf32> to vector<16x16xf32>
    %cst_59 = arith.constant dense<0.000000e+00> : vector<16x16xf32>
    %144 = tpu.matmul %137, %143, %cst_59 {dimension_numbers = #tpu.dot_dimension_numbers<[1], [0], [0], [1], [0, 0, 1, 1], [], []>} : vector<16x16xf32>, vector<16x16xf32>, vector<16x16xf32> -> vector<16x16xf32>
    %c0_60 = arith.constant 0 : index
    %c0_61 = arith.constant 0 : index
    %c16_62 = arith.constant 16 : index
    %145 = vector.load %arg12[%c0_60, %c0_61, %c16_62] : memref<1x16x32xf32, #tpu.memory_space<vmem>>, vector<1x16x16xf32>
    %146 = vector.shape_cast %145 : vector<1x16x16xf32> to vector<16x16xf32>
    %147 = vector.shape_cast %144 : vector<16x16xf32> to vector<1x16x16xf32>
    tpu.vector_store %arg12[%c0_60, %c0_61, %c16_62], %147 {strides = array<i32>} : memref<1x16x32xf32, #tpu.memory_space<vmem>>, vector<1x16x16xf32>,
    %148 = vector.extract_strided_slice %17 {offsets = [0, 16], sizes = [16, 16], strides = [1, 1]} : vector<16x32xf32> to vector<16x16xf32>
    %cst_63 = arith.constant dense<0.000000e+00> : vector<16x16xf32>
    %149 = tpu.matmul %137, %148, %cst_63 {dimension_numbers = #tpu.dot_dimension_numbers<[1], [0], [0], [1], [0, 0, 1, 1], [], []>} : vector<16x16xf32>, vector<16x16xf32>, vector<16x16xf32> -> vector<16x16xf32>
    %c0_64 = arith.constant 0 : index
    %c0_65 = arith.constant 0 : index
    %c16_66 = arith.constant 16 : index
    %150 = vector.load %arg13[%c0_64, %c0_65, %c16_66] : memref<1x16x32xf32, #tpu.memory_space<vmem>>, vector<1x16x16xf32>
    %151 = vector.shape_cast %150 : vector<1x16x16xf32> to vector<16x16xf32>
    %152 = vector.shape_cast %149 : vector<16x16xf32> to vector<1x16x16xf32>
    tpu.vector_store %arg13[%c0_64, %c0_65, %c16_66], %152 {strides = array<i32>} : memref<1x16x32xf32, #tpu.memory_space<vmem>>, vector<1x16x16xf32>,
    %153 = vector.extract_strided_slice %19 {offsets = [0, 16], sizes = [16, 16], strides = [1, 1]} : vector<16x32xf32> to vector<16x16xf32>
    %cst_67 = arith.constant dense<0.000000e+00> : vector<16x16xf32>
    %154 = tpu.matmul %137, %153, %cst_67 {dimension_numbers = #tpu.dot_dimension_numbers<[1], [0], [0], [1], [0, 0, 1, 1], [], []>} : vector<16x16xf32>, vector<16x16xf32>, vector<16x16xf32> -> vector<16x16xf32>
    %c0_68 = arith.constant 0 : index
    %c0_69 = arith.constant 0 : index
    %c16_70 = arith.constant 16 : index
    %155 = vector.load %arg14[%c0_68, %c0_69, %c16_70] : memref<1x16x32xf32, #tpu.memory_space<vmem>>, vector<1x16x16xf32>
    %156 = vector.shape_cast %155 : vector<1x16x16xf32> to vector<16x16xf32>
    %157 = vector.shape_cast %154 : vector<16x16xf32> to vector<1x16x16xf32>
    tpu.vector_store %arg14[%c0_68, %c0_69, %c16_70], %157 {strides = array<i32>} : memref<1x16x32xf32, #tpu.memory_space<vmem>>, vector<1x16x16xf32>,
    return
  }
  func.func @transform_0(%arg0: i32) -> (i32, i32, i32) {
    %c0_i32 = arith.constant 0 : i32
    %c0_i32_0 = arith.constant 0 : i32
    %c0_i32_1 = arith.constant 0 : i32
    return %arg0, %c0_i32, %c0_i32_0 : i32, i32, i32
  }
  func.func @transform_1(%arg0: i32) -> (i32, i32, i32) {
    %c0_i32 = arith.constant 0 : i32
    %c0_i32_0 = arith.constant 0 : i32
    %c0_i32_1 = arith.constant 0 : i32
    return %arg0, %c0_i32, %c0_i32_0 : i32, i32, i32
  }
  func.func @transform_2(%arg0: i32) -> (i32, i32, i32) {
    %c0_i32 = arith.constant 0 : i32
    %c0_i32_0 = arith.constant 0 : i32
    %c0_i32_1 = arith.constant 0 : i32
    return %arg0, %c0_i32, %c0_i32_0 : i32, i32, i32
  }
  func.func @transform_3(%arg0: i32) -> (i32, i32, i32) {
    %c0_i32 = arith.constant 0 : i32
    %c0_i32_0 = arith.constant 0 : i32
    %c0_i32_1 = arith.constant 0 : i32
    return %arg0, %c0_i32, %c0_i32_0 : i32, i32, i32
  }
  func.func @transform_4(%arg0: i32) -> (i32, i32, i32) {
    %c0_i32 = arith.constant 0 : i32
    %c0_i32_0 = arith.constant 0 : i32
    %c0_i32_1 = arith.constant 0 : i32
    return %arg0, %c0_i32, %c0_i32_0 : i32, i32, i32
  }
  func.func @transform_5(%arg0: i32) -> (i32, i32, i32) {
    %c0_i32 = arith.constant 0 : i32
    %c0_i32_0 = arith.constant 0 : i32
    %c0_i32_1 = arith.constant 0 : i32
    return %arg0, %c0_i32, %c0_i32_0 : i32, i32, i32
  }
  func.func @transform_6(%arg0: i32) -> (i32, i32, i32) {
    %c0_i32 = arith.constant 0 : i32
    %c0_i32_0 = arith.constant 0 : i32
    %c0_i32_1 = arith.constant 0 : i32
    return %arg0, %c0_i32, %c0_i32_0 : i32, i32, i32
  }
  func.func @transform_7(%arg0: i32) -> (i32, i32, i32) {
    %c0_i32 = arith.constant 0 : i32
    %c0_i32_0 = arith.constant 0 : i32
    %c0_i32_1 = arith.constant 0 : i32
    return %arg0, %c0_i32, %c0_i32_0 : i32, i32, i32
  }
  func.func @transform_8(%arg0: i32) -> (i32, i32, i32) {
    %c0_i32 = arith.constant 0 : i32
    %c0_i32_0 = arith.constant 0 : i32
    %c0_i32_1 = arith.constant 0 : i32
    return %arg0, %c0_i32, %c0_i32_0 : i32, i32, i32
  }
  func.func @transform_9(%arg0: i32) -> (i32, i32, i32) {
    %c0_i32 = arith.constant 0 : i32
    %c0_i32_0 = arith.constant 0 : i32
    %c0_i32_1 = arith.constant 0 : i32
    return %arg0, %c0_i32, %c0_i32_0 : i32, i32, i32
  }
  func.func @transform_10(%arg0: i32) -> (i32, i32, i32) {
    %c0_i32 = arith.constant 0 : i32
    %c0_i32_0 = arith.constant 0 : i32
    %c0_i32_1 = arith.constant 0 : i32
    return %arg0, %c0_i32, %c0_i32_0 : i32, i32, i32
  }
  func.func @transform_11(%arg0: i32) -> (i32, i32, i32) {
    %c0_i32 = arith.constant 0 : i32
    %c0_i32_0 = arith.constant 0 : i32
    %c0_i32_1 = arith.constant 0 : i32
    return %arg0, %c0_i32, %c0_i32_0 : i32, i32, i32
  }
  func.func @transform_12(%arg0: i32) -> (i32, i32, i32) {
    %c0_i32 = arith.constant 0 : i32
    %c0_i32_0 = arith.constant 0 : i32
    %c0_i32_1 = arith.constant 0 : i32
    return %arg0, %c0_i32, %c0_i32_0 : i32, i32, i32
  }
  func.func @transform_13(%arg0: i32) -> (i32, i32, i32) {
    %c0_i32 = arith.constant 0 : i32
    %c0_i32_0 = arith.constant 0 : i32
    %c0_i32_1 = arith.constant 0 : i32
    return %arg0, %c0_i32, %c0_i32_0 : i32, i32, i32
  }
}

module attributes {stable_mosaic.version = 11 : i64} {
  func.func @_attn_post_kernel(%arg0: i32, %arg1: memref<16x32xf32, #tpu.memory_space<vmem>>, %arg2: memref<16x32xf32, #tpu.memory_space<vmem>>, %arg3: memref<16x32xf32, #tpu.memory_space<vmem>>, %arg4: memref<16x32xf32, #tpu.memory_space<vmem>>, %arg5: memref<16x8xf32, #tpu.memory_space<vmem>>, %arg6: memref<16x4xf32, #tpu.memory_space<vmem>>, %arg7: memref<16x4xf32, #tpu.memory_space<vmem>>, %arg8: memref<16x4xf32, #tpu.memory_space<vmem>>, %arg9: memref<32x8xf32, #tpu.memory_space<vmem>>, %arg10: memref<1x8xf32, #tpu.memory_space<vmem>>, %arg11: memref<32x4xf32, #tpu.memory_space<vmem>>, %arg12: memref<16x8xf32, #tpu.memory_space<vmem>>, %arg13: memref<16x4xf32, #tpu.memory_space<vmem>>, %arg14: memref<16x4xf32, #tpu.memory_space<vmem>>, %arg15: memref<16x4xf32, #tpu.memory_space<vmem>>) attributes {dimension_semantics = [#tpu.dimension_semantics<parallel>], iteration_bounds = array<i64: 2>, scalar_prefetch = 0 : i64, scratch_operands = 0 : i64, tpu.core_type = #tpu.core_type<tc>, window_params = [{transform_indices = @transform_0, window_bounds = array<i64: 16, 32>}, {transform_indices = @transform_1, window_bounds = array<i64: 16, 32>}, {transform_indices = @transform_2, window_bounds = array<i64: 16, 32>}, {transform_indices = @transform_3, window_bounds = array<i64: 16, 32>}, {transform_indices = @transform_4, window_bounds = array<i64: 16, 8>}, {transform_indices = @transform_5, window_bounds = array<i64: 16, 4>}, {transform_indices = @transform_6, window_bounds = array<i64: 16, 4>}, {transform_indices = @transform_7, window_bounds = array<i64: 16, 4>}, {pipeline_mode = #tpu.pipeline_mode<synchronous>, transform_indices = @transform_8, window_bounds = array<i64: 32, 8>}, {pipeline_mode = #tpu.pipeline_mode<synchronous>, transform_indices = @transform_9, window_bounds = array<i64: 1, 8>}, {pipeline_mode = #tpu.pipeline_mode<synchronous>, transform_indices = @transform_10, window_bounds = array<i64: 32, 4>}, {transform_indices = @transform_11, window_bounds = array<i64: 16, 8>}, {transform_indices = @transform_12, window_bounds = array<i64: 16, 4>}, {transform_indices = @transform_13, window_bounds = array<i64: 16, 4>}, {transform_indices = @transform_14, window_bounds = array<i64: 16, 4>}]} {
    %c0 = arith.constant 0 : index
    %c0_0 = arith.constant 0 : index
    %0 = vector.load %arg2[%c0, %c0_0] : memref<16x32xf32, #tpu.memory_space<vmem>>, vector<16x32xf32>
    %c0_1 = arith.constant 0 : index
    %c0_2 = arith.constant 0 : index
    %1 = vector.load %arg3[%c0_1, %c0_2] : memref<16x32xf32, #tpu.memory_space<vmem>>, vector<16x32xf32>
    %c0_3 = arith.constant 0 : index
    %c0_4 = arith.constant 0 : index
    %2 = vector.load %arg4[%c0_3, %c0_4] : memref<16x32xf32, #tpu.memory_space<vmem>>, vector<16x32xf32>
    %3 = arith.mulf %0, %0 : vector<16x32xf32>
    %4 = arith.mulf %1, %1 : vector<16x32xf32>
    %5 = arith.addf %3, %4 : vector<16x32xf32>
    %6 = arith.mulf %2, %2 : vector<16x32xf32>
    %7 = arith.addf %5, %6 : vector<16x32xf32>
    %cst = arith.constant 9.99999996E-13 : f32
    %8 = vector.broadcast %cst : f32 to vector<16x32xf32>
    %9 = arith.addf %7, %8 : vector<16x32xf32>
    %10 = math.sqrt %9 : vector<16x32xf32>
    %11 = arith.negf %10 : vector<16x32xf32>
    %12 = math.exp %11 : vector<16x32xf32>
    %cst_5 = arith.constant 1.000000e+00 : f32
    %13 = vector.broadcast %cst_5 : f32 to vector<16x32xf32>
    %14 = arith.addf %13, %12 : vector<16x32xf32>
    %15 = arith.divf %13, %14 : vector<16x32xf32>
    %c0_6 = arith.constant 0 : index
    %c0_7 = arith.constant 0 : index
    %16 = vector.load %arg11[%c0_6, %c0_7] : memref<32x4xf32, #tpu.memory_space<vmem>>, vector<32x4xf32>
    %c0_8 = arith.constant 0 : index
    %c0_9 = arith.constant 0 : index
    %17 = vector.load %arg5[%c0_8, %c0_9] : memref<16x8xf32, #tpu.memory_space<vmem>>, vector<16x8xf32>
    %c0_10 = arith.constant 0 : index
    %c0_11 = arith.constant 0 : index
    %18 = vector.load %arg1[%c0_10, %c0_11] : memref<16x32xf32, #tpu.memory_space<vmem>>, vector<16x32xf32>
    %c0_12 = arith.constant 0 : index
    %c0_13 = arith.constant 0 : index
    %19 = vector.load %arg9[%c0_12, %c0_13] : memref<32x8xf32, #tpu.memory_space<vmem>>, vector<32x8xf32>
    %cst_14 = arith.constant dense<0.000000e+00> : vector<16x8xf32>
    %20 = tpu.matmul %18, %19, %cst_14 {dimension_numbers = #tpu.dot_dimension_numbers<[1], [0], [0], [1], [0, 0, 1, 1], [], []>} : vector<16x32xf32>, vector<32x8xf32>, vector<16x8xf32> -> vector<16x8xf32>
    %21 = arith.addf %17, %20 : vector<16x8xf32>
    %c0_15 = arith.constant 0 : index
    %c0_16 = arith.constant 0 : index
    %22 = vector.load %arg10[%c0_15, %c0_16] : memref<1x8xf32, #tpu.memory_space<vmem>>, vector<1x8xf32>
    %23 = vector.broadcast %22 : vector<1x8xf32> to vector<16x8xf32>
    %24 = arith.addf %21, %23 : vector<16x8xf32>
    %c0_17 = arith.constant 0 : index
    %c0_18 = arith.constant 0 : index
    %25 = vector.load %arg12[%c0_17, %c0_18] : memref<16x8xf32, #tpu.memory_space<vmem>>, vector<16x8xf32>
    tpu.vector_store %arg12[%c0_17, %c0_18], %24 {strides = array<i32>} : memref<16x8xf32, #tpu.memory_space<vmem>>, vector<16x8xf32>,
    %c0_19 = arith.constant 0 : index
    %c0_20 = arith.constant 0 : index
    %26 = vector.load %arg6[%c0_19, %c0_20] : memref<16x4xf32, #tpu.memory_space<vmem>>, vector<16x4xf32>
    %27 = arith.mulf %0, %15 : vector<16x32xf32>
    %cst_21 = arith.constant dense<0.000000e+00> : vector<16x4xf32>
    %28 = tpu.matmul %27, %16, %cst_21 {dimension_numbers = #tpu.dot_dimension_numbers<[1], [0], [0], [1], [0, 0, 1, 1], [], []>} : vector<16x32xf32>, vector<32x4xf32>, vector<16x4xf32> -> vector<16x4xf32>
    %29 = arith.addf %26, %28 : vector<16x4xf32>
    %c0_22 = arith.constant 0 : index
    %c0_23 = arith.constant 0 : index
    %30 = vector.load %arg13[%c0_22, %c0_23] : memref<16x4xf32, #tpu.memory_space<vmem>>, vector<16x4xf32>
    tpu.vector_store %arg13[%c0_22, %c0_23], %29 {strides = array<i32>} : memref<16x4xf32, #tpu.memory_space<vmem>>, vector<16x4xf32>,
    %c0_24 = arith.constant 0 : index
    %c0_25 = arith.constant 0 : index
    %31 = vector.load %arg7[%c0_24, %c0_25] : memref<16x4xf32, #tpu.memory_space<vmem>>, vector<16x4xf32>
    %32 = arith.mulf %1, %15 : vector<16x32xf32>
    %cst_26 = arith.constant dense<0.000000e+00> : vector<16x4xf32>
    %33 = tpu.matmul %32, %16, %cst_26 {dimension_numbers = #tpu.dot_dimension_numbers<[1], [0], [0], [1], [0, 0, 1, 1], [], []>} : vector<16x32xf32>, vector<32x4xf32>, vector<16x4xf32> -> vector<16x4xf32>
    %34 = arith.addf %31, %33 : vector<16x4xf32>
    %c0_27 = arith.constant 0 : index
    %c0_28 = arith.constant 0 : index
    %35 = vector.load %arg14[%c0_27, %c0_28] : memref<16x4xf32, #tpu.memory_space<vmem>>, vector<16x4xf32>
    tpu.vector_store %arg14[%c0_27, %c0_28], %34 {strides = array<i32>} : memref<16x4xf32, #tpu.memory_space<vmem>>, vector<16x4xf32>,
    %c0_29 = arith.constant 0 : index
    %c0_30 = arith.constant 0 : index
    %36 = vector.load %arg8[%c0_29, %c0_30] : memref<16x4xf32, #tpu.memory_space<vmem>>, vector<16x4xf32>
    %37 = arith.mulf %2, %15 : vector<16x32xf32>
    %cst_31 = arith.constant dense<0.000000e+00> : vector<16x4xf32>
    %38 = tpu.matmul %37, %16, %cst_31 {dimension_numbers = #tpu.dot_dimension_numbers<[1], [0], [0], [1], [0, 0, 1, 1], [], []>} : vector<16x32xf32>, vector<32x4xf32>, vector<16x4xf32> -> vector<16x4xf32>
    %39 = arith.addf %36, %38 : vector<16x4xf32>
    %c0_32 = arith.constant 0 : index
    %c0_33 = arith.constant 0 : index
    %40 = vector.load %arg15[%c0_32, %c0_33] : memref<16x4xf32, #tpu.memory_space<vmem>>, vector<16x4xf32>
    tpu.vector_store %arg15[%c0_32, %c0_33], %39 {strides = array<i32>} : memref<16x4xf32, #tpu.memory_space<vmem>>, vector<16x4xf32>,
    return
  }
  func.func @transform_0(%arg0: i32) -> (i32, i32) {
    %c0_i32 = arith.constant 0 : i32
    %c0_i32_0 = arith.constant 0 : i32
    return %arg0, %c0_i32 : i32, i32
  }
  func.func @transform_1(%arg0: i32) -> (i32, i32) {
    %c0_i32 = arith.constant 0 : i32
    %c0_i32_0 = arith.constant 0 : i32
    return %arg0, %c0_i32 : i32, i32
  }
  func.func @transform_2(%arg0: i32) -> (i32, i32) {
    %c0_i32 = arith.constant 0 : i32
    %c0_i32_0 = arith.constant 0 : i32
    return %arg0, %c0_i32 : i32, i32
  }
  func.func @transform_3(%arg0: i32) -> (i32, i32) {
    %c0_i32 = arith.constant 0 : i32
    %c0_i32_0 = arith.constant 0 : i32
    return %arg0, %c0_i32 : i32, i32
  }
  func.func @transform_4(%arg0: i32) -> (i32, i32) {
    %c0_i32 = arith.constant 0 : i32
    %c0_i32_0 = arith.constant 0 : i32
    return %arg0, %c0_i32 : i32, i32
  }
  func.func @transform_5(%arg0: i32) -> (i32, i32) {
    %c0_i32 = arith.constant 0 : i32
    %c0_i32_0 = arith.constant 0 : i32
    return %arg0, %c0_i32 : i32, i32
  }
  func.func @transform_6(%arg0: i32) -> (i32, i32) {
    %c0_i32 = arith.constant 0 : i32
    %c0_i32_0 = arith.constant 0 : i32
    return %arg0, %c0_i32 : i32, i32
  }
  func.func @transform_7(%arg0: i32) -> (i32, i32) {
    %c0_i32 = arith.constant 0 : i32
    %c0_i32_0 = arith.constant 0 : i32
    return %arg0, %c0_i32 : i32, i32
  }
  func.func @transform_8(%arg0: i32) -> (i32, i32) {
    %c0_i32 = arith.constant 0 : i32
    %c0_i32_0 = arith.constant 0 : i32
    %c0_i32_1 = arith.constant 0 : i32
    return %c0_i32, %c0_i32_0 : i32, i32
  }
  func.func @transform_9(%arg0: i32) -> (i32, i32) {
    %c0_i32 = arith.constant 0 : i32
    %c0_i32_0 = arith.constant 0 : i32
    %c0_i32_1 = arith.constant 0 : i32
    return %c0_i32, %c0_i32_0 : i32, i32
  }
  func.func @transform_10(%arg0: i32) -> (i32, i32) {
    %c0_i32 = arith.constant 0 : i32
    %c0_i32_0 = arith.constant 0 : i32
    %c0_i32_1 = arith.constant 0 : i32
    return %c0_i32, %c0_i32_0 : i32, i32
  }
  func.func @transform_11(%arg0: i32) -> (i32, i32) {
    %c0_i32 = arith.constant 0 : i32
    %c0_i32_0 = arith.constant 0 : i32
    return %arg0, %c0_i32 : i32, i32
  }
  func.func @transform_12(%arg0: i32) -> (i32, i32) {
    %c0_i32 = arith.constant 0 : i32
    %c0_i32_0 = arith.constant 0 : i32
    return %arg0, %c0_i32 : i32, i32
  }
  func.func @transform_13(%arg0: i32) -> (i32, i32) {
    %c0_i32 = arith.constant 0 : i32
    %c0_i32_0 = arith.constant 0 : i32
    return %arg0, %c0_i32 : i32, i32
  }
  func.func @transform_14(%arg0: i32) -> (i32, i32) {
    %c0_i32 = arith.constant 0 : i32
    %c0_i32_0 = arith.constant 0 : i32
    return %arg0, %c0_i32 : i32, i32
  }
}

module attributes {stable_mosaic.version = 11 : i64} {
  func.func @_conv_gn_res_kernel(%arg0: i32, %arg1: memref<16x56xf32, #tpu.memory_space<vmem>>, %arg2: memref<16x28xf32, #tpu.memory_space<vmem>>, %arg3: memref<16x28xf32, #tpu.memory_space<vmem>>, %arg4: memref<16x28xf32, #tpu.memory_space<vmem>>, %arg5: memref<16x8xf32, #tpu.memory_space<vmem>>, %arg6: memref<16x4xf32, #tpu.memory_space<vmem>>, %arg7: memref<16x4xf32, #tpu.memory_space<vmem>>, %arg8: memref<16x4xf32, #tpu.memory_space<vmem>>, %arg9: memref<56x8xf32, #tpu.memory_space<vmem>>, %arg10: memref<1x8xf32, #tpu.memory_space<vmem>>, %arg11: memref<1x8xf32, #tpu.memory_space<vmem>>, %arg12: memref<1x8xf32, #tpu.memory_space<vmem>>, %arg13: memref<8x8xf32, #tpu.memory_space<vmem>>, %arg14: memref<28x4xf32, #tpu.memory_space<vmem>>, %arg15: memref<1x4xf32, #tpu.memory_space<vmem>>, %arg16: memref<4x4xf32, #tpu.memory_space<vmem>>, %arg17: memref<16x8xf32, #tpu.memory_space<vmem>>, %arg18: memref<16x4xf32, #tpu.memory_space<vmem>>, %arg19: memref<16x4xf32, #tpu.memory_space<vmem>>, %arg20: memref<16x4xf32, #tpu.memory_space<vmem>>) attributes {dimension_semantics = [#tpu.dimension_semantics<parallel>], iteration_bounds = array<i64: 2>, scalar_prefetch = 0 : i64, scratch_operands = 0 : i64, tpu.core_type = #tpu.core_type<tc>, window_params = [{transform_indices = @transform_0, window_bounds = array<i64: 16, 56>}, {transform_indices = @transform_1, window_bounds = array<i64: 16, 28>}, {transform_indices = @transform_2, window_bounds = array<i64: 16, 28>}, {transform_indices = @transform_3, window_bounds = array<i64: 16, 28>}, {transform_indices = @transform_4, window_bounds = array<i64: 16, 8>}, {transform_indices = @transform_5, window_bounds = array<i64: 16, 4>}, {transform_indices = @transform_6, window_bounds = array<i64: 16, 4>}, {transform_indices = @transform_7, window_bounds = array<i64: 16, 4>}, {pipeline_mode = #tpu.pipeline_mode<synchronous>, transform_indices = @transform_8, window_bounds = array<i64: 56, 8>}, {pipeline_mode = #tpu.pipeline_mode<synchronous>, transform_indices = @transform_9, window_bounds = array<i64: 1, 8>}, {pipeline_mode = #tpu.pipeline_mode<synchronous>, transform_indices = @transform_10, window_bounds = array<i64: 1, 8>}, {pipeline_mode = #tpu.pipeline_mode<synchronous>, transform_indices = @transform_11, window_bounds = array<i64: 1, 8>}, {pipeline_mode = #tpu.pipeline_mode<synchronous>, transform_indices = @transform_12, window_bounds = array<i64: 8, 8>}, {pipeline_mode = #tpu.pipeline_mode<synchronous>, transform_indices = @transform_13, window_bounds = array<i64: 28, 4>}, {pipeline_mode = #tpu.pipeline_mode<synchronous>, transform_indices = @transform_14, window_bounds = array<i64: 1, 4>}, {pipeline_mode = #tpu.pipeline_mode<synchronous>, transform_indices = @transform_15, window_bounds = array<i64: 4, 4>}, {transform_indices = @transform_16, window_bounds = array<i64: 16, 8>}, {transform_indices = @transform_17, window_bounds = array<i64: 16, 4>}, {transform_indices = @transform_18, window_bounds = array<i64: 16, 4>}, {transform_indices = @transform_19, window_bounds = array<i64: 16, 4>}]} {
    %c0 = arith.constant 0 : index
    %c0_0 = arith.constant 0 : index
    %0 = vector.load %arg1[%c0, %c0_0] : memref<16x56xf32, #tpu.memory_space<vmem>>, vector<16x56xf32>
    %c0_1 = arith.constant 0 : index
    %c0_2 = arith.constant 0 : index
    %1 = vector.load %arg9[%c0_1, %c0_2] : memref<56x8xf32, #tpu.memory_space<vmem>>, vector<56x8xf32>
    %cst = arith.constant dense<0.000000e+00> : vector<16x8xf32>
    %2 = tpu.matmul %0, %1, %cst {dimension_numbers = #tpu.dot_dimension_numbers<[1], [0], [0], [1], [0, 0, 1, 1], [], []>} : vector<16x56xf32>, vector<56x8xf32>, vector<16x8xf32> -> vector<16x8xf32>
    %c0_3 = arith.constant 0 : index
    %c0_4 = arith.constant 0 : index
    %3 = vector.load %arg10[%c0_3, %c0_4] : memref<1x8xf32, #tpu.memory_space<vmem>>, vector<1x8xf32>
    %4 = vector.broadcast %3 : vector<1x8xf32> to vector<16x8xf32>
    %5 = arith.addf %2, %4 : vector<16x8xf32>
    %c0_5 = arith.constant 0 : index
    %c0_6 = arith.constant 0 : index
    %6 = vector.load %arg13[%c0_5, %c0_6] : memref<8x8xf32, #tpu.memory_space<vmem>>, vector<8x8xf32>
    %cst_7 = arith.constant dense<0.000000e+00> : vector<16x8xf32>
    %7 = tpu.matmul %5, %6, %cst_7 {dimension_numbers = #tpu.dot_dimension_numbers<[1], [0], [0], [1], [0, 0, 1, 1], [], []>} : vector<16x8xf32>, vector<8x8xf32>, vector<16x8xf32> -> vector<16x8xf32>
    %8 = arith.subf %5, %7 : vector<16x8xf32>
    %9 = arith.mulf %8, %8 : vector<16x8xf32>
    %c0_8 = arith.constant 0 : index
    %c0_9 = arith.constant 0 : index
    %10 = vector.load %arg13[%c0_8, %c0_9] : memref<8x8xf32, #tpu.memory_space<vmem>>, vector<8x8xf32>
    %cst_10 = arith.constant dense<0.000000e+00> : vector<16x8xf32>
    %11 = tpu.matmul %9, %10, %cst_10 {dimension_numbers = #tpu.dot_dimension_numbers<[1], [0], [0], [1], [0, 0, 1, 1], [], []>} : vector<16x8xf32>, vector<8x8xf32>, vector<16x8xf32> -> vector<16x8xf32>
    %c0_11 = arith.constant 0 : index
    %c0_12 = arith.constant 0 : index
    %12 = vector.load %arg5[%c0_11, %c0_12] : memref<16x8xf32, #tpu.memory_space<vmem>>, vector<16x8xf32>
    %cst_13 = arith.constant 9.99999974E-6 : f32
    %13 = vector.broadcast %cst_13 : f32 to vector<16x8xf32>
    %14 = arith.addf %11, %13 : vector<16x8xf32>
    %15 = math.rsqrt %14 : vector<16x8xf32>
    %16 = arith.mulf %8, %15 : vector<16x8xf32>
    %c0_14 = arith.constant 0 : index
    %c0_15 = arith.constant 0 : index
    %17 = vector.load %arg11[%c0_14, %c0_15] : memref<1x8xf32, #tpu.memory_space<vmem>>, vector<1x8xf32>
    %18 = vector.broadcast %17 : vector<1x8xf32> to vector<16x8xf32>
    %19 = arith.mulf %16, %18 : vector<16x8xf32>
    %20 = arith.addf %12, %19 : vector<16x8xf32>
    %c0_16 = arith.constant 0 : index
    %c0_17 = arith.constant 0 : index
    %21 = vector.load %arg12[%c0_16, %c0_17] : memref<1x8xf32, #tpu.memory_space<vmem>>, vector<1x8xf32>
    %22 = vector.broadcast %21 : vector<1x8xf32> to vector<16x8xf32>
    %23 = arith.addf %20, %22 : vector<16x8xf32>
    %c0_18 = arith.constant 0 : index
    %c0_19 = arith.constant 0 : index
    %24 = vector.load %arg17[%c0_18, %c0_19] : memref<16x8xf32, #tpu.memory_space<vmem>>, vector<16x8xf32>
    tpu.vector_store %arg17[%c0_18, %c0_19], %23 {strides = array<i32>} : memref<16x8xf32, #tpu.memory_space<vmem>>, vector<16x8xf32>,
    %c0_20 = arith.constant 0 : index
    %c0_21 = arith.constant 0 : index
    %25 = vector.load %arg14[%c0_20, %c0_21] : memref<28x4xf32, #tpu.memory_space<vmem>>, vector<28x4xf32>
    %c0_22 = arith.constant 0 : index
    %c0_23 = arith.constant 0 : index
    %26 = vector.load %arg2[%c0_22, %c0_23] : memref<16x28xf32, #tpu.memory_space<vmem>>, vector<16x28xf32>
    %cst_24 = arith.constant dense<0.000000e+00> : vector<16x4xf32>
    %27 = tpu.matmul %26, %25, %cst_24 {dimension_numbers = #tpu.dot_dimension_numbers<[1], [0], [0], [1], [0, 0, 1, 1], [], []>} : vector<16x28xf32>, vector<28x4xf32>, vector<16x4xf32> -> vector<16x4xf32>
    %c0_25 = arith.constant 0 : index
    %c0_26 = arith.constant 0 : index
    %28 = vector.load %arg3[%c0_25, %c0_26] : memref<16x28xf32, #tpu.memory_space<vmem>>, vector<16x28xf32>
    %cst_27 = arith.constant dense<0.000000e+00> : vector<16x4xf32>
    %29 = tpu.matmul %28, %25, %cst_27 {dimension_numbers = #tpu.dot_dimension_numbers<[1], [0], [0], [1], [0, 0, 1, 1], [], []>} : vector<16x28xf32>, vector<28x4xf32>, vector<16x4xf32> -> vector<16x4xf32>
    %c0_28 = arith.constant 0 : index
    %c0_29 = arith.constant 0 : index
    %30 = vector.load %arg4[%c0_28, %c0_29] : memref<16x28xf32, #tpu.memory_space<vmem>>, vector<16x28xf32>
    %cst_30 = arith.constant dense<0.000000e+00> : vector<16x4xf32>
    %31 = tpu.matmul %30, %25, %cst_30 {dimension_numbers = #tpu.dot_dimension_numbers<[1], [0], [0], [1], [0, 0, 1, 1], [], []>} : vector<16x28xf32>, vector<28x4xf32>, vector<16x4xf32> -> vector<16x4xf32>
    %32 = arith.mulf %27, %27 : vector<16x4xf32>
    %33 = arith.mulf %29, %29 : vector<16x4xf32>
    %34 = arith.addf %32, %33 : vector<16x4xf32>
    %35 = arith.mulf %31, %31 : vector<16x4xf32>
    %36 = arith.addf %34, %35 : vector<16x4xf32>
    %c0_31 = arith.constant 0 : index
    %c0_32 = arith.constant 0 : index
    %37 = vector.load %arg16[%c0_31, %c0_32] : memref<4x4xf32, #tpu.memory_space<vmem>>, vector<4x4xf32>
    %cst_33 = arith.constant dense<0.000000e+00> : vector<16x4xf32>
    %38 = tpu.matmul %36, %37, %cst_33 {dimension_numbers = #tpu.dot_dimension_numbers<[1], [0], [0], [1], [0, 0, 1, 1], [], []>} : vector<16x4xf32>, vector<4x4xf32>, vector<16x4xf32> -> vector<16x4xf32>
    %cst_34 = arith.constant 9.99999974E-6 : f32
    %39 = vector.broadcast %cst_34 : f32 to vector<16x4xf32>
    %40 = arith.addf %38, %39 : vector<16x4xf32>
    %41 = math.rsqrt %40 : vector<16x4xf32>
    %c0_35 = arith.constant 0 : index
    %c0_36 = arith.constant 0 : index
    %42 = vector.load %arg15[%c0_35, %c0_36] : memref<1x4xf32, #tpu.memory_space<vmem>>, vector<1x4xf32>
    %43 = vector.broadcast %42 : vector<1x4xf32> to vector<16x4xf32>
    %44 = arith.mulf %41, %43 : vector<16x4xf32>
    %c0_37 = arith.constant 0 : index
    %c0_38 = arith.constant 0 : index
    %45 = vector.load %arg6[%c0_37, %c0_38] : memref<16x4xf32, #tpu.memory_space<vmem>>, vector<16x4xf32>
    %46 = arith.mulf %27, %44 : vector<16x4xf32>
    %47 = arith.addf %45, %46 : vector<16x4xf32>
    %c0_39 = arith.constant 0 : index
    %c0_40 = arith.constant 0 : index
    %48 = vector.load %arg18[%c0_39, %c0_40] : memref<16x4xf32, #tpu.memory_space<vmem>>, vector<16x4xf32>
    tpu.vector_store %arg18[%c0_39, %c0_40], %47 {strides = array<i32>} : memref<16x4xf32, #tpu.memory_space<vmem>>, vector<16x4xf32>,
    %c0_41 = arith.constant 0 : index
    %c0_42 = arith.constant 0 : index
    %49 = vector.load %arg7[%c0_41, %c0_42] : memref<16x4xf32, #tpu.memory_space<vmem>>, vector<16x4xf32>
    %50 = arith.mulf %29, %44 : vector<16x4xf32>
    %51 = arith.addf %49, %50 : vector<16x4xf32>
    %c0_43 = arith.constant 0 : index
    %c0_44 = arith.constant 0 : index
    %52 = vector.load %arg19[%c0_43, %c0_44] : memref<16x4xf32, #tpu.memory_space<vmem>>, vector<16x4xf32>
    tpu.vector_store %arg19[%c0_43, %c0_44], %51 {strides = array<i32>} : memref<16x4xf32, #tpu.memory_space<vmem>>, vector<16x4xf32>,
    %c0_45 = arith.constant 0 : index
    %c0_46 = arith.constant 0 : index
    %53 = vector.load %arg8[%c0_45, %c0_46] : memref<16x4xf32, #tpu.memory_space<vmem>>, vector<16x4xf32>
    %54 = arith.mulf %31, %44 : vector<16x4xf32>
    %55 = arith.addf %53, %54 : vector<16x4xf32>
    %c0_47 = arith.constant 0 : index
    %c0_48 = arith.constant 0 : index
    %56 = vector.load %arg20[%c0_47, %c0_48] : memref<16x4xf32, #tpu.memory_space<vmem>>, vector<16x4xf32>
    tpu.vector_store %arg20[%c0_47, %c0_48], %55 {strides = array<i32>} : memref<16x4xf32, #tpu.memory_space<vmem>>, vector<16x4xf32>,
    return
  }
  func.func @transform_0(%arg0: i32) -> (i32, i32) {
    %c0_i32 = arith.constant 0 : i32
    %c0_i32_0 = arith.constant 0 : i32
    return %arg0, %c0_i32 : i32, i32
  }
  func.func @transform_1(%arg0: i32) -> (i32, i32) {
    %c0_i32 = arith.constant 0 : i32
    %c0_i32_0 = arith.constant 0 : i32
    return %arg0, %c0_i32 : i32, i32
  }
  func.func @transform_2(%arg0: i32) -> (i32, i32) {
    %c0_i32 = arith.constant 0 : i32
    %c0_i32_0 = arith.constant 0 : i32
    return %arg0, %c0_i32 : i32, i32
  }
  func.func @transform_3(%arg0: i32) -> (i32, i32) {
    %c0_i32 = arith.constant 0 : i32
    %c0_i32_0 = arith.constant 0 : i32
    return %arg0, %c0_i32 : i32, i32
  }
  func.func @transform_4(%arg0: i32) -> (i32, i32) {
    %c0_i32 = arith.constant 0 : i32
    %c0_i32_0 = arith.constant 0 : i32
    return %arg0, %c0_i32 : i32, i32
  }
  func.func @transform_5(%arg0: i32) -> (i32, i32) {
    %c0_i32 = arith.constant 0 : i32
    %c0_i32_0 = arith.constant 0 : i32
    return %arg0, %c0_i32 : i32, i32
  }
  func.func @transform_6(%arg0: i32) -> (i32, i32) {
    %c0_i32 = arith.constant 0 : i32
    %c0_i32_0 = arith.constant 0 : i32
    return %arg0, %c0_i32 : i32, i32
  }
  func.func @transform_7(%arg0: i32) -> (i32, i32) {
    %c0_i32 = arith.constant 0 : i32
    %c0_i32_0 = arith.constant 0 : i32
    return %arg0, %c0_i32 : i32, i32
  }
  func.func @transform_8(%arg0: i32) -> (i32, i32) {
    %c0_i32 = arith.constant 0 : i32
    %c0_i32_0 = arith.constant 0 : i32
    %c0_i32_1 = arith.constant 0 : i32
    return %c0_i32, %c0_i32_0 : i32, i32
  }
  func.func @transform_9(%arg0: i32) -> (i32, i32) {
    %c0_i32 = arith.constant 0 : i32
    %c0_i32_0 = arith.constant 0 : i32
    %c0_i32_1 = arith.constant 0 : i32
    return %c0_i32, %c0_i32_0 : i32, i32
  }
  func.func @transform_10(%arg0: i32) -> (i32, i32) {
    %c0_i32 = arith.constant 0 : i32
    %c0_i32_0 = arith.constant 0 : i32
    %c0_i32_1 = arith.constant 0 : i32
    return %c0_i32, %c0_i32_0 : i32, i32
  }
  func.func @transform_11(%arg0: i32) -> (i32, i32) {
    %c0_i32 = arith.constant 0 : i32
    %c0_i32_0 = arith.constant 0 : i32
    %c0_i32_1 = arith.constant 0 : i32
    return %c0_i32, %c0_i32_0 : i32, i32
  }
  func.func @transform_12(%arg0: i32) -> (i32, i32) {
    %c0_i32 = arith.constant 0 : i32
    %c0_i32_0 = arith.constant 0 : i32
    %c0_i32_1 = arith.constant 0 : i32
    return %c0_i32, %c0_i32_0 : i32, i32
  }
  func.func @transform_13(%arg0: i32) -> (i32, i32) {
    %c0_i32 = arith.constant 0 : i32
    %c0_i32_0 = arith.constant 0 : i32
    %c0_i32_1 = arith.constant 0 : i32
    return %c0_i32, %c0_i32_0 : i32, i32
  }
  func.func @transform_14(%arg0: i32) -> (i32, i32) {
    %c0_i32 = arith.constant 0 : i32
    %c0_i32_0 = arith.constant 0 : i32
    %c0_i32_1 = arith.constant 0 : i32
    return %c0_i32, %c0_i32_0 : i32, i32
  }
  func.func @transform_15(%arg0: i32) -> (i32, i32) {
    %c0_i32 = arith.constant 0 : i32
    %c0_i32_0 = arith.constant 0 : i32
    %c0_i32_1 = arith.constant 0 : i32
    return %c0_i32, %c0_i32_0 : i32, i32
  }
  func.func @transform_16(%arg0: i32) -> (i32, i32) {
    %c0_i32 = arith.constant 0 : i32
    %c0_i32_0 = arith.constant 0 : i32
    return %arg0, %c0_i32 : i32, i32
  }
  func.func @transform_17(%arg0: i32) -> (i32, i32) {
    %c0_i32 = arith.constant 0 : i32
    %c0_i32_0 = arith.constant 0 : i32
    return %arg0, %c0_i32 : i32, i32
  }
  func.func @transform_18(%arg0: i32) -> (i32, i32) {
    %c0_i32 = arith.constant 0 : i32
    %c0_i32_0 = arith.constant 0 : i32
    return %arg0, %c0_i32 : i32, i32
  }
  func.func @transform_19(%arg0: i32) -> (i32, i32) {
    %c0_i32 = arith.constant 0 : i32
    %c0_i32_0 = arith.constant 0 : i32
    return %arg0, %c0_i32 : i32, i32
  }
}

module attributes {stable_mosaic.version = 11 : i64} {
  func.func @_conv_gn_res_kernel(%arg0: i32, %arg1: memref<16x56xf32, #tpu.memory_space<vmem>>, %arg2: memref<16x28xf32, #tpu.memory_space<vmem>>, %arg3: memref<16x28xf32, #tpu.memory_space<vmem>>, %arg4: memref<16x28xf32, #tpu.memory_space<vmem>>, %arg5: memref<16x8xf32, #tpu.memory_space<vmem>>, %arg6: memref<16x4xf32, #tpu.memory_space<vmem>>, %arg7: memref<16x4xf32, #tpu.memory_space<vmem>>, %arg8: memref<16x4xf32, #tpu.memory_space<vmem>>, %arg9: memref<56x8xf32, #tpu.memory_space<vmem>>, %arg10: memref<1x8xf32, #tpu.memory_space<vmem>>, %arg11: memref<1x8xf32, #tpu.memory_space<vmem>>, %arg12: memref<1x8xf32, #tpu.memory_space<vmem>>, %arg13: memref<8x8xf32, #tpu.memory_space<vmem>>, %arg14: memref<28x4xf32, #tpu.memory_space<vmem>>, %arg15: memref<1x4xf32, #tpu.memory_space<vmem>>, %arg16: memref<4x4xf32, #tpu.memory_space<vmem>>, %arg17: memref<16x8xf32, #tpu.memory_space<vmem>>, %arg18: memref<16x4xf32, #tpu.memory_space<vmem>>, %arg19: memref<16x4xf32, #tpu.memory_space<vmem>>, %arg20: memref<16x4xf32, #tpu.memory_space<vmem>>) attributes {dimension_semantics = [#tpu.dimension_semantics<parallel>], iteration_bounds = array<i64: 2>, scalar_prefetch = 0 : i64, scratch_operands = 0 : i64, tpu.core_type = #tpu.core_type<tc>, window_params = [{transform_indices = @transform_0, window_bounds = array<i64: 16, 56>}, {transform_indices = @transform_1, window_bounds = array<i64: 16, 28>}, {transform_indices = @transform_2, window_bounds = array<i64: 16, 28>}, {transform_indices = @transform_3, window_bounds = array<i64: 16, 28>}, {transform_indices = @transform_4, window_bounds = array<i64: 16, 8>}, {transform_indices = @transform_5, window_bounds = array<i64: 16, 4>}, {transform_indices = @transform_6, window_bounds = array<i64: 16, 4>}, {transform_indices = @transform_7, window_bounds = array<i64: 16, 4>}, {pipeline_mode = #tpu.pipeline_mode<synchronous>, transform_indices = @transform_8, window_bounds = array<i64: 56, 8>}, {pipeline_mode = #tpu.pipeline_mode<synchronous>, transform_indices = @transform_9, window_bounds = array<i64: 1, 8>}, {pipeline_mode = #tpu.pipeline_mode<synchronous>, transform_indices = @transform_10, window_bounds = array<i64: 1, 8>}, {pipeline_mode = #tpu.pipeline_mode<synchronous>, transform_indices = @transform_11, window_bounds = array<i64: 1, 8>}, {pipeline_mode = #tpu.pipeline_mode<synchronous>, transform_indices = @transform_12, window_bounds = array<i64: 8, 8>}, {pipeline_mode = #tpu.pipeline_mode<synchronous>, transform_indices = @transform_13, window_bounds = array<i64: 28, 4>}, {pipeline_mode = #tpu.pipeline_mode<synchronous>, transform_indices = @transform_14, window_bounds = array<i64: 1, 4>}, {pipeline_mode = #tpu.pipeline_mode<synchronous>, transform_indices = @transform_15, window_bounds = array<i64: 4, 4>}, {transform_indices = @transform_16, window_bounds = array<i64: 16, 8>}, {transform_indices = @transform_17, window_bounds = array<i64: 16, 4>}, {transform_indices = @transform_18, window_bounds = array<i64: 16, 4>}, {transform_indices = @transform_19, window_bounds = array<i64: 16, 4>}]} {
    %c0 = arith.constant 0 : index
    %c0_0 = arith.constant 0 : index
    %0 = vector.load %arg1[%c0, %c0_0] : memref<16x56xf32, #tpu.memory_space<vmem>>, vector<16x56xf32>
    %c0_1 = arith.constant 0 : index
    %c0_2 = arith.constant 0 : index
    %1 = vector.load %arg9[%c0_1, %c0_2] : memref<56x8xf32, #tpu.memory_space<vmem>>, vector<56x8xf32>
    %cst = arith.constant dense<0.000000e+00> : vector<16x8xf32>
    %2 = tpu.matmul %0, %1, %cst {dimension_numbers = #tpu.dot_dimension_numbers<[1], [0], [0], [1], [0, 0, 1, 1], [], []>} : vector<16x56xf32>, vector<56x8xf32>, vector<16x8xf32> -> vector<16x8xf32>
    %c0_3 = arith.constant 0 : index
    %c0_4 = arith.constant 0 : index
    %3 = vector.load %arg10[%c0_3, %c0_4] : memref<1x8xf32, #tpu.memory_space<vmem>>, vector<1x8xf32>
    %4 = vector.broadcast %3 : vector<1x8xf32> to vector<16x8xf32>
    %5 = arith.addf %2, %4 : vector<16x8xf32>
    %c0_5 = arith.constant 0 : index
    %c0_6 = arith.constant 0 : index
    %6 = vector.load %arg13[%c0_5, %c0_6] : memref<8x8xf32, #tpu.memory_space<vmem>>, vector<8x8xf32>
    %cst_7 = arith.constant dense<0.000000e+00> : vector<16x8xf32>
    %7 = tpu.matmul %5, %6, %cst_7 {dimension_numbers = #tpu.dot_dimension_numbers<[1], [0], [0], [1], [0, 0, 1, 1], [], []>} : vector<16x8xf32>, vector<8x8xf32>, vector<16x8xf32> -> vector<16x8xf32>
    %8 = arith.subf %5, %7 : vector<16x8xf32>
    %9 = arith.mulf %8, %8 : vector<16x8xf32>
    %c0_8 = arith.constant 0 : index
    %c0_9 = arith.constant 0 : index
    %10 = vector.load %arg13[%c0_8, %c0_9] : memref<8x8xf32, #tpu.memory_space<vmem>>, vector<8x8xf32>
    %cst_10 = arith.constant dense<0.000000e+00> : vector<16x8xf32>
    %11 = tpu.matmul %9, %10, %cst_10 {dimension_numbers = #tpu.dot_dimension_numbers<[1], [0], [0], [1], [0, 0, 1, 1], [], []>} : vector<16x8xf32>, vector<8x8xf32>, vector<16x8xf32> -> vector<16x8xf32>
    %c0_11 = arith.constant 0 : index
    %c0_12 = arith.constant 0 : index
    %12 = vector.load %arg5[%c0_11, %c0_12] : memref<16x8xf32, #tpu.memory_space<vmem>>, vector<16x8xf32>
    %cst_13 = arith.constant 9.99999974E-6 : f32
    %13 = vector.broadcast %cst_13 : f32 to vector<16x8xf32>
    %14 = arith.addf %11, %13 : vector<16x8xf32>
    %15 = math.rsqrt %14 : vector<16x8xf32>
    %16 = arith.mulf %8, %15 : vector<16x8xf32>
    %c0_14 = arith.constant 0 : index
    %c0_15 = arith.constant 0 : index
    %17 = vector.load %arg11[%c0_14, %c0_15] : memref<1x8xf32, #tpu.memory_space<vmem>>, vector<1x8xf32>
    %18 = vector.broadcast %17 : vector<1x8xf32> to vector<16x8xf32>
    %19 = arith.mulf %16, %18 : vector<16x8xf32>
    %20 = arith.addf %12, %19 : vector<16x8xf32>
    %c0_16 = arith.constant 0 : index
    %c0_17 = arith.constant 0 : index
    %21 = vector.load %arg12[%c0_16, %c0_17] : memref<1x8xf32, #tpu.memory_space<vmem>>, vector<1x8xf32>
    %22 = vector.broadcast %21 : vector<1x8xf32> to vector<16x8xf32>
    %23 = arith.addf %20, %22 : vector<16x8xf32>
    %c0_18 = arith.constant 0 : index
    %c0_19 = arith.constant 0 : index
    %24 = vector.load %arg17[%c0_18, %c0_19] : memref<16x8xf32, #tpu.memory_space<vmem>>, vector<16x8xf32>
    tpu.vector_store %arg17[%c0_18, %c0_19], %23 {strides = array<i32>} : memref<16x8xf32, #tpu.memory_space<vmem>>, vector<16x8xf32>,
    %c0_20 = arith.constant 0 : index
    %c0_21 = arith.constant 0 : index
    %25 = vector.load %arg14[%c0_20, %c0_21] : memref<28x4xf32, #tpu.memory_space<vmem>>, vector<28x4xf32>
    %c0_22 = arith.constant 0 : index
    %c0_23 = arith.constant 0 : index
    %26 = vector.load %arg2[%c0_22, %c0_23] : memref<16x28xf32, #tpu.memory_space<vmem>>, vector<16x28xf32>
    %cst_24 = arith.constant dense<0.000000e+00> : vector<16x4xf32>
    %27 = tpu.matmul %26, %25, %cst_24 {dimension_numbers = #tpu.dot_dimension_numbers<[1], [0], [0], [1], [0, 0, 1, 1], [], []>} : vector<16x28xf32>, vector<28x4xf32>, vector<16x4xf32> -> vector<16x4xf32>
    %c0_25 = arith.constant 0 : index
    %c0_26 = arith.constant 0 : index
    %28 = vector.load %arg3[%c0_25, %c0_26] : memref<16x28xf32, #tpu.memory_space<vmem>>, vector<16x28xf32>
    %cst_27 = arith.constant dense<0.000000e+00> : vector<16x4xf32>
    %29 = tpu.matmul %28, %25, %cst_27 {dimension_numbers = #tpu.dot_dimension_numbers<[1], [0], [0], [1], [0, 0, 1, 1], [], []>} : vector<16x28xf32>, vector<28x4xf32>, vector<16x4xf32> -> vector<16x4xf32>
    %c0_28 = arith.constant 0 : index
    %c0_29 = arith.constant 0 : index
    %30 = vector.load %arg4[%c0_28, %c0_29] : memref<16x28xf32, #tpu.memory_space<vmem>>, vector<16x28xf32>
    %cst_30 = arith.constant dense<0.000000e+00> : vector<16x4xf32>
    %31 = tpu.matmul %30, %25, %cst_30 {dimension_numbers = #tpu.dot_dimension_numbers<[1], [0], [0], [1], [0, 0, 1, 1], [], []>} : vector<16x28xf32>, vector<28x4xf32>, vector<16x4xf32> -> vector<16x4xf32>
    %32 = arith.mulf %27, %27 : vector<16x4xf32>
    %33 = arith.mulf %29, %29 : vector<16x4xf32>
    %34 = arith.addf %32, %33 : vector<16x4xf32>
    %35 = arith.mulf %31, %31 : vector<16x4xf32>
    %36 = arith.addf %34, %35 : vector<16x4xf32>
    %c0_31 = arith.constant 0 : index
    %c0_32 = arith.constant 0 : index
    %37 = vector.load %arg16[%c0_31, %c0_32] : memref<4x4xf32, #tpu.memory_space<vmem>>, vector<4x4xf32>
    %cst_33 = arith.constant dense<0.000000e+00> : vector<16x4xf32>
    %38 = tpu.matmul %36, %37, %cst_33 {dimension_numbers = #tpu.dot_dimension_numbers<[1], [0], [0], [1], [0, 0, 1, 1], [], []>} : vector<16x4xf32>, vector<4x4xf32>, vector<16x4xf32> -> vector<16x4xf32>
    %cst_34 = arith.constant 9.99999974E-6 : f32
    %39 = vector.broadcast %cst_34 : f32 to vector<16x4xf32>
    %40 = arith.addf %38, %39 : vector<16x4xf32>
    %41 = math.rsqrt %40 : vector<16x4xf32>
    %c0_35 = arith.constant 0 : index
    %c0_36 = arith.constant 0 : index
    %42 = vector.load %arg15[%c0_35, %c0_36] : memref<1x4xf32, #tpu.memory_space<vmem>>, vector<1x4xf32>
    %43 = vector.broadcast %42 : vector<1x4xf32> to vector<16x4xf32>
    %44 = arith.mulf %41, %43 : vector<16x4xf32>
    %c0_37 = arith.constant 0 : index
    %c0_38 = arith.constant 0 : index
    %45 = vector.load %arg6[%c0_37, %c0_38] : memref<16x4xf32, #tpu.memory_space<vmem>>, vector<16x4xf32>
    %46 = arith.mulf %27, %44 : vector<16x4xf32>
    %47 = arith.addf %45, %46 : vector<16x4xf32>
    %c0_39 = arith.constant 0 : index
    %c0_40 = arith.constant 0 : index
    %48 = vector.load %arg18[%c0_39, %c0_40] : memref<16x4xf32, #tpu.memory_space<vmem>>, vector<16x4xf32>
    tpu.vector_store %arg18[%c0_39, %c0_40], %47 {strides = array<i32>} : memref<16x4xf32, #tpu.memory_space<vmem>>, vector<16x4xf32>,
    %c0_41 = arith.constant 0 : index
    %c0_42 = arith.constant 0 : index
    %49 = vector.load %arg7[%c0_41, %c0_42] : memref<16x4xf32, #tpu.memory_space<vmem>>, vector<16x4xf32>
    %50 = arith.mulf %29, %44 : vector<16x4xf32>
    %51 = arith.addf %49, %50 : vector<16x4xf32>
    %c0_43 = arith.constant 0 : index
    %c0_44 = arith.constant 0 : index
    %52 = vector.load %arg19[%c0_43, %c0_44] : memref<16x4xf32, #tpu.memory_space<vmem>>, vector<16x4xf32>
    tpu.vector_store %arg19[%c0_43, %c0_44], %51 {strides = array<i32>} : memref<16x4xf32, #tpu.memory_space<vmem>>, vector<16x4xf32>,
    %c0_45 = arith.constant 0 : index
    %c0_46 = arith.constant 0 : index
    %53 = vector.load %arg8[%c0_45, %c0_46] : memref<16x4xf32, #tpu.memory_space<vmem>>, vector<16x4xf32>
    %54 = arith.mulf %31, %44 : vector<16x4xf32>
    %55 = arith.addf %53, %54 : vector<16x4xf32>
    %c0_47 = arith.constant 0 : index
    %c0_48 = arith.constant 0 : index
    %56 = vector.load %arg20[%c0_47, %c0_48] : memref<16x4xf32, #tpu.memory_space<vmem>>, vector<16x4xf32>
    tpu.vector_store %arg20[%c0_47, %c0_48], %55 {strides = array<i32>} : memref<16x4xf32, #tpu.memory_space<vmem>>, vector<16x4xf32>,
    return
  }
  func.func @transform_0(%arg0: i32) -> (i32, i32) {
    %c0_i32 = arith.constant 0 : i32
    %c0_i32_0 = arith.constant 0 : i32
    return %arg0, %c0_i32 : i32, i32
  }
  func.func @transform_1(%arg0: i32) -> (i32, i32) {
    %c0_i32 = arith.constant 0 : i32
    %c0_i32_0 = arith.constant 0 : i32
    return %arg0, %c0_i32 : i32, i32
  }
  func.func @transform_2(%arg0: i32) -> (i32, i32) {
    %c0_i32 = arith.constant 0 : i32
    %c0_i32_0 = arith.constant 0 : i32
    return %arg0, %c0_i32 : i32, i32
  }
  func.func @transform_3(%arg0: i32) -> (i32, i32) {
    %c0_i32 = arith.constant 0 : i32
    %c0_i32_0 = arith.constant 0 : i32
    return %arg0, %c0_i32 : i32, i32
  }
  func.func @transform_4(%arg0: i32) -> (i32, i32) {
    %c0_i32 = arith.constant 0 : i32
    %c0_i32_0 = arith.constant 0 : i32
    return %arg0, %c0_i32 : i32, i32
  }
  func.func @transform_5(%arg0: i32) -> (i32, i32) {
    %c0_i32 = arith.constant 0 : i32
    %c0_i32_0 = arith.constant 0 : i32
    return %arg0, %c0_i32 : i32, i32
  }
  func.func @transform_6(%arg0: i32) -> (i32, i32) {
    %c0_i32 = arith.constant 0 : i32
    %c0_i32_0 = arith.constant 0 : i32
    return %arg0, %c0_i32 : i32, i32
  }
  func.func @transform_7(%arg0: i32) -> (i32, i32) {
    %c0_i32 = arith.constant 0 : i32
    %c0_i32_0 = arith.constant 0 : i32
    return %arg0, %c0_i32 : i32, i32
  }
  func.func @transform_8(%arg0: i32) -> (i32, i32) {
    %c0_i32 = arith.constant 0 : i32
    %c0_i32_0 = arith.constant 0 : i32
    %c0_i32_1 = arith.constant 0 : i32
    return %c0_i32, %c0_i32_0 : i32, i32
  }
  func.func @transform_9(%arg0: i32) -> (i32, i32) {
    %c0_i32 = arith.constant 0 : i32
    %c0_i32_0 = arith.constant 0 : i32
    %c0_i32_1 = arith.constant 0 : i32
    return %c0_i32, %c0_i32_0 : i32, i32
  }
  func.func @transform_10(%arg0: i32) -> (i32, i32) {
    %c0_i32 = arith.constant 0 : i32
    %c0_i32_0 = arith.constant 0 : i32
    %c0_i32_1 = arith.constant 0 : i32
    return %c0_i32, %c0_i32_0 : i32, i32
  }
  func.func @transform_11(%arg0: i32) -> (i32, i32) {
    %c0_i32 = arith.constant 0 : i32
    %c0_i32_0 = arith.constant 0 : i32
    %c0_i32_1 = arith.constant 0 : i32
    return %c0_i32, %c0_i32_0 : i32, i32
  }
  func.func @transform_12(%arg0: i32) -> (i32, i32) {
    %c0_i32 = arith.constant 0 : i32
    %c0_i32_0 = arith.constant 0 : i32
    %c0_i32_1 = arith.constant 0 : i32
    return %c0_i32, %c0_i32_0 : i32, i32
  }
  func.func @transform_13(%arg0: i32) -> (i32, i32) {
    %c0_i32 = arith.constant 0 : i32
    %c0_i32_0 = arith.constant 0 : i32
    %c0_i32_1 = arith.constant 0 : i32
    return %c0_i32, %c0_i32_0 : i32, i32
  }
  func.func @transform_14(%arg0: i32) -> (i32, i32) {
    %c0_i32 = arith.constant 0 : i32
    %c0_i32_0 = arith.constant 0 : i32
    %c0_i32_1 = arith.constant 0 : i32
    return %c0_i32, %c0_i32_0 : i32, i32
  }
  func.func @transform_15(%arg0: i32) -> (i32, i32) {
    %c0_i32 = arith.constant 0 : i32
    %c0_i32_0 = arith.constant 0 : i32
    %c0_i32_1 = arith.constant 0 : i32
    return %c0_i32, %c0_i32_0 : i32, i32
  }
  func.func @transform_16(%arg0: i32) -> (i32, i32) {
    %c0_i32 = arith.constant 0 : i32
    %c0_i32_0 = arith.constant 0 : i32
    return %arg0, %c0_i32 : i32, i32
  }
  func.func @transform_17(%arg0: i32) -> (i32, i32) {
    %c0_i32 = arith.constant 0 : i32
    %c0_i32_0 = arith.constant 0 : i32
    return %arg0, %c0_i32 : i32, i32
  }
  func.func @transform_18(%arg0: i32) -> (i32, i32) {
    %c0_i32 = arith.constant 0 : i32
    %c0_i32_0 = arith.constant 0 : i32
    return %arg0, %c0_i32 : i32, i32
  }
  func.func @transform_19(%arg0: i32) -> (i32, i32) {
    %c0_i32 = arith.constant 0 : i32
    %c0_i32_0 = arith.constant 0 : i32
    return %arg0, %c0_i32 : i32, i32
  }
}

module attributes {stable_mosaic.version = 11 : i64} {
  func.func @_vec_out_kernel(%arg0: i32, %arg1: memref<16x4xf32, #tpu.memory_space<vmem>>, %arg2: memref<16x4xf32, #tpu.memory_space<vmem>>, %arg3: memref<16x4xf32, #tpu.memory_space<vmem>>, %arg4: memref<4x1xf32, #tpu.memory_space<vmem>>, %arg5: memref<16x1xf32, #tpu.memory_space<vmem>>, %arg6: memref<16x1xf32, #tpu.memory_space<vmem>>, %arg7: memref<16x1xf32, #tpu.memory_space<vmem>>) attributes {dimension_semantics = [#tpu.dimension_semantics<parallel>], iteration_bounds = array<i64: 2>, scalar_prefetch = 0 : i64, scratch_operands = 0 : i64, tpu.core_type = #tpu.core_type<tc>, window_params = [{transform_indices = @transform_0, window_bounds = array<i64: 16, 4>}, {transform_indices = @transform_1, window_bounds = array<i64: 16, 4>}, {transform_indices = @transform_2, window_bounds = array<i64: 16, 4>}, {pipeline_mode = #tpu.pipeline_mode<synchronous>, transform_indices = @transform_3, window_bounds = array<i64: 4, 1>}, {transform_indices = @transform_4, window_bounds = array<i64: 16, 1>}, {transform_indices = @transform_5, window_bounds = array<i64: 16, 1>}, {transform_indices = @transform_6, window_bounds = array<i64: 16, 1>}]} {
    %c0 = arith.constant 0 : index
    %c0_0 = arith.constant 0 : index
    %0 = vector.load %arg4[%c0, %c0_0] : memref<4x1xf32, #tpu.memory_space<vmem>>, vector<4x1xf32>
    %c0_1 = arith.constant 0 : index
    %c0_2 = arith.constant 0 : index
    %1 = vector.load %arg1[%c0_1, %c0_2] : memref<16x4xf32, #tpu.memory_space<vmem>>, vector<16x4xf32>
    %cst = arith.constant dense<0.000000e+00> : vector<16x1xf32>
    %2 = tpu.matmul %1, %0, %cst {dimension_numbers = #tpu.dot_dimension_numbers<[1], [0], [0], [1], [0, 0, 1, 1], [], []>} : vector<16x4xf32>, vector<4x1xf32>, vector<16x1xf32> -> vector<16x1xf32>
    %c0_3 = arith.constant 0 : index
    %c0_4 = arith.constant 0 : index
    %3 = vector.load %arg5[%c0_3, %c0_4] : memref<16x1xf32, #tpu.memory_space<vmem>>, vector<16x1xf32>
    tpu.vector_store %arg5[%c0_3, %c0_4], %2 {strides = array<i32>} : memref<16x1xf32, #tpu.memory_space<vmem>>, vector<16x1xf32>,
    %c0_5 = arith.constant 0 : index
    %c0_6 = arith.constant 0 : index
    %4 = vector.load %arg2[%c0_5, %c0_6] : memref<16x4xf32, #tpu.memory_space<vmem>>, vector<16x4xf32>
    %cst_7 = arith.constant dense<0.000000e+00> : vector<16x1xf32>
    %5 = tpu.matmul %4, %0, %cst_7 {dimension_numbers = #tpu.dot_dimension_numbers<[1], [0], [0], [1], [0, 0, 1, 1], [], []>} : vector<16x4xf32>, vector<4x1xf32>, vector<16x1xf32> -> vector<16x1xf32>
    %c0_8 = arith.constant 0 : index
    %c0_9 = arith.constant 0 : index
    %6 = vector.load %arg6[%c0_8, %c0_9] : memref<16x1xf32, #tpu.memory_space<vmem>>, vector<16x1xf32>
    tpu.vector_store %arg6[%c0_8, %c0_9], %5 {strides = array<i32>} : memref<16x1xf32, #tpu.memory_space<vmem>>, vector<16x1xf32>,
    %c0_10 = arith.constant 0 : index
    %c0_11 = arith.constant 0 : index
    %7 = vector.load %arg3[%c0_10, %c0_11] : memref<16x4xf32, #tpu.memory_space<vmem>>, vector<16x4xf32>
    %cst_12 = arith.constant dense<0.000000e+00> : vector<16x1xf32>
    %8 = tpu.matmul %7, %0, %cst_12 {dimension_numbers = #tpu.dot_dimension_numbers<[1], [0], [0], [1], [0, 0, 1, 1], [], []>} : vector<16x4xf32>, vector<4x1xf32>, vector<16x1xf32> -> vector<16x1xf32>
    %c0_13 = arith.constant 0 : index
    %c0_14 = arith.constant 0 : index
    %9 = vector.load %arg7[%c0_13, %c0_14] : memref<16x1xf32, #tpu.memory_space<vmem>>, vector<16x1xf32>
    tpu.vector_store %arg7[%c0_13, %c0_14], %8 {strides = array<i32>} : memref<16x1xf32, #tpu.memory_space<vmem>>, vector<16x1xf32>,
    return
  }
  func.func @transform_0(%arg0: i32) -> (i32, i32) {
    %c0_i32 = arith.constant 0 : i32
    %c0_i32_0 = arith.constant 0 : i32
    return %arg0, %c0_i32 : i32, i32
  }
  func.func @transform_1(%arg0: i32) -> (i32, i32) {
    %c0_i32 = arith.constant 0 : i32
    %c0_i32_0 = arith.constant 0 : i32
    return %arg0, %c0_i32 : i32, i32
  }
  func.func @transform_2(%arg0: i32) -> (i32, i32) {
    %c0_i32 = arith.constant 0 : i32
    %c0_i32_0 = arith.constant 0 : i32
    return %arg0, %c0_i32 : i32, i32
  }
  func.func @transform_3(%arg0: i32) -> (i32, i32) {
    %c0_i32 = arith.constant 0 : i32
    %c0_i32_0 = arith.constant 0 : i32
    %c0_i32_1 = arith.constant 0 : i32
    return %c0_i32, %c0_i32_0 : i32, i32
  }
  func.func @transform_4(%arg0: i32) -> (i32, i32) {
    %c0_i32 = arith.constant 0 : i32
    %c0_i32_0 = arith.constant 0 : i32
    return %arg0, %c0_i32 : i32, i32
  }
  func.func @transform_5(%arg0: i32) -> (i32, i32) {
    %c0_i32 = arith.constant 0 : i32
    %c0_i32_0 = arith.constant 0 : i32
    return %arg0, %c0_i32 : i32, i32
  }
  func.func @transform_6(%arg0: i32) -> (i32, i32) {
    %c0_i32 = arith.constant 0 : i32
    %c0_i32_0 = arith.constant 0 : i32
    return %arg0, %c0_i32 : i32, i32
  }
}

</mosaic_0001>

<bundles_post_ra>
// kernel: generator_apply.46
= control target key start
LH: loop header
LB: loop body
LE: loop exit
PB: predicated region body
PF: predicated region fallthrough
CT: control target
= control target key end

     0   :  { %s1022_s21 = smov 0   ;;  %s1088_s0 = inlined_call_operand.vmem [shape: f32[32,8], index: 0, kind: input, shape index: {}]   ;;  %s1089_s1 = inlined_call_operand.vmem [shape: f32[32,2], index: 1, kind: input, shape index: {}]   ;;  %s1090_s2 = inlined_call_operand.vmem [shape: f32[32,2], index: 2, kind: input, shape index: {}]   ;;  %s1091_s3 = inlined_call_operand.vmem [shape: f32[32,2], index: 3, kind: input, shape index: {}]   ;;  %s1092_s4 = inlined_call_operand.vmem [shape: f32[8,8], index: 4, kind: input, shape index: {}]   ;;  %s1093_s5 = inlined_call_operand.vmem [shape: f32[1,8], index: 5, kind: input, shape index: {}]   ;;  %s1094_s6 = inlined_call_operand.vmem [shape: f32[8,8], index: 6, kind: input, shape index: {}]   ;;  %s1095_s7 = inlined_call_operand.vmem [shape: f32[1,8], index: 7, kind: input, shape index: {}]   ;;  %s1096_s8 = inlined_call_operand.vmem [shape: f32[2,4], index: 8, kind: input, shape index: {}]   ;;  %s1097_s9 = inlined_call_operand.vmem [shape: f32[32,8], index: 9, kind: output, shape index: {0}]   ;;  %s1098_s10 = inlined_call_operand.vmem [shape: f32[32,4], index: 10, kind: output, shape index: {1}]   ;;  %s1099_s11 = inlined_call_operand.vmem [shape: f32[32,4], index: 11, kind: output, shape index: {2}]   ;;  %s1100_s12 = inlined_call_operand.vmem [shape: f32[32,4], index: 12, kind: output, shape index: {3}]  }
   0x1 LB: > { %s902_s22 = sadd.s32 4294967295, %s955_s21   ;;  %p906_p0 = scmp.ge.s32.totalorder %s955_s21, 1  ;;  %s955_s21 = sphi %s1022_s21, %s23_s21  }
   0x2   : > { %p403_p1 = scmp.lt.s32.totalorder %s955_s21, 3 }
   0x4   : > { %p404_p2 = pnand %p906_p0, %p403_p1 }
   0x5   : > { %s907_s25 = sshll.u32 (!%p404_p2), %s902_s22, 1 }
   0x6   : > { %407 = sbr.rel (%p404_p2) target bundleno = 283 (0x11b), region = 56  ;;  %p476_p3 = scmp.lt.s32.totalorder (!%p404_p2), %s907_s25, 3 }
   0xb   : > { %v525_v0 = vld [vmem:[%s1092_s4] sm:$0xff]  ;;  %s1102_s25 = smov (!%p476_p3, %s907_s25), 3  ;;  %vm530_vm0 = vcmask 64512   ;;  %vm612_vm1 = vcmask 1041408   ;;  %vm605_vm2 = vcmask 15360   ;;  %vm639_vm5 = vcmask 31744  }
   0xc   : > { %v566_v1 = vld [vmem:[%s1094_s6] sm:$0xff]  ;;  %552 = vmatpush.msra.mxu0 %v525_v0  ;;  %938 = vmatpush.msra.mxu1 %v525_v0  ;;  %s1036_s28 = sshll.u32 %s1102_s25, 3 }
   0xd   : > { %s479_s13 = scalar_lea.vmem %s1088_s0, %s1036_s28  ;;  %s485_s16 = scalar_lea.vmem %s1089_s1, %s1036_s28  ;;  %v602_v4 = vld [vmem:[%s1096_s8] sm:$0x3] }
   0xe   : > { %592 = vmatpush.msrb.mxu1 %v566_v1  ;;  %v523_v2 = vld [vmem:[%s479_s13] sm:$0xff]  ;;  %v524_v3 = vld [vmem:[%s479_s13 + $0x8] sm:$0xff]  ;;  %s491_s19 = scalar_lea.vmem %s1090_s2, %s1036_s28  ;;  %933 = vmatpush.msk.msrb.mxu0 %vm612_vm1, %v602_v4  ;;  %s497_s25 = scalar_lea.vmem %s1091_s3, %s1036_s28 }
   0xf   : > { %923 = vmatmul.msk.f32.vlgmr.msra.gmra.mxu0 %vm530_vm0, %v523_v2  ;;  %924 = vmatmul.msk.f32.vlgmr.msra.gmra.mxu1 %vm530_vm0, %v524_v3  ;;  %v603_v5 = vld [vmem:[%s485_s16] sm:$0xff]  ;;  %v604_v8 = vld [vmem:[%s485_s16 + $0x8] sm:$0xff]  ;;  %s509_s13 = scalar_lea.vmem %s1098_s10, %s1036_s28  ;;  %s515_s16 = scalar_lea.vmem %s1099_s11, %s1036_s28 }
  0x10   : > { %927 = vmatpush.msk.msra.mxu2 %vm612_vm1, %v602_v4  ;;  %v642_v6 = vld [vmem:[%s491_s19] sm:$0xff]  ;;  %930 = vmatpush.msk.msra.mxu3 %vm612_vm1, %v602_v4  ;;  %v643_v9 = vld [vmem:[%s491_s19 + $0x8] sm:$0xff]  ;;  %s521_s19 = scalar_lea.vmem %s1100_s12, %s1036_s28 }
  0x11   : > { %928 = vmatmul.msk.f32.vlgmr.msra.gmra.mxu2 %vm605_vm2, %v603_v5  ;;  %931 = vmatmul.msk.f32.vlgmr.msra.gmra.mxu3 %vm605_vm2, %v642_v6  ;;  %v675_v7 = vld [vmem:[%s497_s25] sm:$0xff]  ;;  %v676_v10 = vld [vmem:[%s497_s25 + $0x8] sm:$0xff]  ;;  %s503_s25 = scalar_lea.vmem %s1097_s9, %s1036_s28 }
  0x12   : > { %v947_v11 = vld [vmem:[%s1093_s5] ss:$0 sm:$0xff] }
  0x13   : > { %v948_v26 = vld [vmem:[%s1095_s7] ss:$0 sm:$0xff] }
  0x17   : > { %934 = vmatmul.msk.f32.vlgmr.msrb.gmra.mxu0 %vm605_vm2, %v675_v7 }
  0x19   : > { %929 = vmatmul.msk.f32.gmra.mxu2 %vm605_vm2, %v604_v8  ;;  %932 = vmatmul.msk.f32.gmra.mxu3 %vm605_vm2, %v643_v9 }
  0x1f   : > { %935 = vmatmul.msk.f32.gmra.mxu0 %vm605_vm2, %v676_v10 }
  0x8c   : > { %v554_v12 = vpop.f32.mrf.mxu0  ;;  %v557_v14 = vpop.f32.mrf.mxu1 }
  0x8d   : > { %v555_v13 = vadd.f32 %v947_v11, %v554_v12  ;;  %v558_v16 = vadd.f32 %v947_v11, %v557_v14 }
  0x8f   : > { %vm560_vm3 = vcmp.ge.f32.partialorder %v555_v13, 0.0  ;;  %v562_v15 = vmul.f32 0.2, %v555_v13  ;;  %v563_v18 = vmul.f32 0.2, %v558_v16  ;;  %vm561_vm4 = vcmp.ge.f32.partialorder %v558_v16, 0.0 }
  0x91   : > { %v564_v17 = vsel %vm560_vm3, %v555_v13, %v562_v15  ;;  %v565_v19 = vsel %vm561_vm4, %v558_v16, %v563_v18 }
  0x92   : > { %925 = vmatmul.msk.f32.vlgmr.msrb.gmra.mxu1 %vm530_vm0, %v564_v17 }
  0x94   : > { %v633_v20 = vpop.f32.mrf.mxu2  ;;  %v700_v21 = vpop.f32.mrf.mxu0 }
  0x95   : > { %640 = vst.msk [vmem:[%s509_s13] sm:$0xff] %vm639_vm5, %v633_v20  ;;  %v667_v22 = vpop.f32.mrf.mxu3 }
  0x96   : > { %673 = vst.msk [vmem:[%s515_s16] sm:$0xff] %vm639_vm5, %v667_v22 }
  0x97   : > { %706 = vst.msk [vmem:[%s521_s19] sm:$0xff] %vm639_vm5, %v700_v21 }
  0x9a   : > { %926 = vmatmul.msk.f32.gmra.mxu1 %vm530_vm0, %v565_v19 }
  0x9c   : > { %v636_v23 = vpop.f32.mrf.mxu2  ;;  %v703_v24 = vpop.f32.mrf.mxu0 }
  0x9d   : > { %641 = vst.msk [vmem:[%s509_s13 + $0x8] sm:$0xff] %vm639_vm5, %v636_v23  ;;  %v670_v25 = vpop.f32.mrf.mxu3 }
  0x9e   : > { %674 = vst.msk [vmem:[%s515_s16 + $0x8] sm:$0xff] %vm639_vm5, %v670_v25 }
  0x9f   : > { %707 = vst.msk [vmem:[%s521_s19 + $0x8] sm:$0xff] %vm639_vm5, %v703_v24 }
 0x10f   : > { %v594_v27 = vpop.f32.mrf.mxu1 }
 0x110   : > { %v595_v28 = vadd.f32 %v948_v26, %v594_v27 }
 0x112   : > { %600 = vst.msk [vmem:[%s503_s25] sm:$0xff] %vm530_vm0, %v595_v28 }
 0x117   : > { %v597_v29 = vpop.f32.mrf.mxu1 }
 0x118   : > { %v598_v30 = vadd.f32 %v948_v26, %v597_v29 }
 0x11a   : > { %601 = vst.msk [vmem:[%s503_s25 + $0x8] sm:$0xff] %vm530_vm0, %v598_v30 }
 0x11b PF: > { %s23_s21 = sadd.s32 1, %s955_s21  }
 0x11c   : > { %p20_p4 = scmp.ge.s32.totalorder %s23_s21, 4  }
 0x11e   :  { %22 = sbr.rel (!%p20_p4) target bundleno = 1 (0x1), region = 131 }

// kernel: generator_apply.47
= control target key start
LH: loop header
LB: loop body
LE: loop exit
PB: predicated region body
PF: predicated region fallthrough
CT: control target
= control target key end

     0   :  { %s1769_s0 = inlined_call_operand.vmem [shape: f32[32,8], index: 0, kind: input, shape index: {}]   ;;  %s1770_s1 = inlined_call_operand.vmem [shape: f32[32,16], index: 1, kind: input, shape index: {}]   ;;  %s1771_s2 = inlined_call_operand.vmem [shape: f32[32,2], index: 2, kind: input, shape index: {}]   ;;  %s1772_s3 = inlined_call_operand.vmem [shape: f32[32,2], index: 3, kind: input, shape index: {}]   ;;  %s1773_s4 = inlined_call_operand.vmem [shape: f32[32,2], index: 4, kind: input, shape index: {}]   ;;  %s1774_s5 = inlined_call_operand.vmem [shape: f32[32,3], index: 5, kind: input, shape index: {}]   ;;  %s1775_s6 = inlined_call_operand.vmem [shape: f32[32,3], index: 6, kind: input, shape index: {}]   ;;  %s1776_s7 = inlined_call_operand.vmem [shape: f32[32,3], index: 7, kind: input, shape index: {}]   ;;  %s1777_s8 = inlined_call_operand.vmem [shape: f32[8,8], index: 8, kind: input, shape index: {}]   ;;  %s1778_s9 = inlined_call_operand.vmem [shape: f32[1,8], index: 9, kind: input, shape index: {}]   ;;  %s1779_s10 = inlined_call_operand.vmem [shape: f32[8,8], index: 10, kind: input, shape index: {}]   ;;  %s1780_s11 = inlined_call_operand.vmem [shape: f32[1,8], index: 11, kind: input, shape index: {}]   ;;  %s1781_s12 = inlined_call_operand.vmem [shape: f32[2,4], index: 12, kind: input, shape index: {}]   ;;  %s1782_s13 = inlined_call_operand.vmem [shape: f32[16,8], index: 13, kind: input, shape index: {}]   ;;  %s1783_s14 = inlined_call_operand.vmem [shape: f32[1,8], index: 14, kind: input, shape index: {}]   ;;  %s1784_s15 = inlined_call_operand.vmem [shape: f32[8,8], index: 15, kind: input, shape index: {}]   ;;  %s1785_s16 = inlined_call_operand.vmem [shape: f32[1,8], index: 16, kind: input, shape index: {}]   ;;  %s1786_s17 = inlined_call_operand.vmem [shape: f32[3,4], index: 17, kind: input, shape index: {}]   ;;  %s1787_s18 = inlined_call_operand.vmem [shape: f32[32,8], index: 18, kind: output, shape index: {0}]   ;;  %s1788_s19 = inlined_call_operand.vmem [shape: f32[32,4], index: 19, kind: output, shape index: {1}]   ;;  %s1789_s20 = inlined_call_operand.vmem [shape: f32[32,4], index: 20, kind: output, shape index: {2}]   ;;  %s1790_s21 = inlined_call_operand.vmem [shape: f32[32,4], index: 21, kind: output, shape index: {3}]  }
   0x1   :  { %1791 = sst [smem:[#allocation2_spill]] %s1769_s0 }
   0x2   :  { %1792 = sst [smem:[#allocation3_spill]] %s1770_s1 }
   0x3   :  { %1793 = sst [smem:[#allocation4_spill]] %s1771_s2  ;;  %s1649_s2 = smov 0  }
   0x4   :  { %1794 = sst [smem:[#allocation5_spill]] %s1772_s3 }
   0x5   :  { %1795 = sst [smem:[#allocation6_spill]] %s1773_s4 }
   0x6   :  { %1796 = sst [smem:[#allocation7_spill]] %s1774_s5 }
   0x7 LB: > { %s1460_s25 = sadd.s32 4294967295, %s1537_s2   ;;  %p1464_p0 = scmp.ge.s32.totalorder %s1537_s2, 1  ;;  %s1537_s2 = sphi %s1649_s2, %s32_s2  }
   0x8   : > { %p672_p1 = scmp.lt.s32.totalorder %s1537_s2, 3 }
   0xa   : > { %p673_p2 = pnand %p1464_p0, %p672_p1 }
   0xb   : > { %s1465_s3 = sshll.u32 (!%p673_p2), %s1460_s25, 1  ;;  %s1797_s4 = sld [smem:[#allocation2_spill]] (!%p673_p2) }
   0xc   : > { %676 = sbr.rel (%p673_p2) target bundleno = 462 (0x1ce), region = 92  ;;  %p783_p3 = scmp.lt.s32.totalorder (!%p673_p2), %s1465_s3, 3 }
   0xd   : > { %s1798_s0 = sld [smem:[#allocation3_spill]] (!%p673_p2) }
   0xe   : > { %s1799_s27 = sld [smem:[#allocation7_spill]] (!%p673_p2) }
   0xf   : > { %s1801_s23 = sld [smem:[#allocation5_spill]] (!%p673_p2) }
  0x11   : > { %v856_v0 = vld [vmem:[%s1777_s8] sm:$0xff]  ;;  %s1804_s3 = smov (!%p783_p3, %s1465_s3), 3  ;;  %vm861_vm0 = vcmask 64512   ;;  %v934_v3 = vld [vmem:[%s1782_s13 + $0x8] sm:$0xff]  ;;  %vm939_vm2 = vcmask 130048   ;;  %vm1026_vm4 = vcmask 1042432  }
  0x12   : > { %1517 = vmatpush.msra.mxu3 %v856_v0  ;;  %883 = vmatpush.msra.mxu0 %v856_v0  ;;  %s1660_s28 = sshll.u32 %s1804_s3, 3  ;;  %v897_v2 = vld [vmem:[%s1779_s10] sm:$0xff]  ;;  %vm1060_vm5 = vcmask 1041408   ;;  %vm1019_vm6 = vcmask 23552   ;;  %vm1053_vm7 = vcmask 15360   ;;  %vm1087_vm10 = vcmask 31744  }
  0x13   : > { %s786_s30 = scalar_lea.vmem %s1797_s4, %s1660_s28  ;;  %1518 = vmatpush.msra.mxu2 %v897_v2  ;;  %923 = vmatpush.msra.mxu1 %v897_v2  ;;  %v933_v4 = vld [vmem:[%s1782_s13] sm:$0xff]  ;;  %s792_s4 = scalar_lea.vmem %s1798_s0, %s1660_s28 }
  0x14   : > { %v855_v1 = vld [vmem:[%s786_s30 + $0x8] sm:$0xff]  ;;  %v854_v5 = vld [vmem:[%s786_s30] sm:$0xff]  ;;  %s816_s3 = scalar_lea.vmem %s1799_s27, %s1660_s28  ;;  %s828_s26 = scalar_lea.vmem %s1776_s7, %s1660_s28 }
  0x15   : > { %1490 = vmatmul.msk.f32.vlgmr.msra.gmra.mxu3 %vm861_vm0, %v855_v1  ;;  %960 = vmatpush.msrb.mxu2 %v934_v3  ;;  %v1527_v6 = vld [vmem:[%s1778_s9] ss:$0 sm:$0xff]  ;;  %v932_v12 = vld [vmem:[%s792_s4 + $0x8] sm:$0xff]  ;;  %s804_s1 = scalar_lea.vmem %s1801_s23, %s1660_s28  ;;  %s1802_s0 = sld [smem:[#allocation6_spill]] }
  0x16   : > { %1489 = vmatmul.msk.f32.vlgmr.msra.gmra.mxu0 %vm861_vm0, %v854_v5  ;;  %v931_v11 = vld [vmem:[%s792_s4] sm:$0xff]  ;;  %s1800_s4 = sld [smem:[#allocation4_spill]]  ;;  %v1018_v22 = vld [vmem:[%s816_s3 + $0x8] sm:$0xff]  ;;  %s822_s23 = scalar_lea.vmem %s1775_s6, %s1660_s28 }
  0x17   : > { %961 = vmatpush.msrb.mxu2 %v933_v4  ;;  %v975_v13 = vld [vmem:[%s1784_s15] sm:$0xff]  ;;  %v1091_v29 = vld [vmem:[%s804_s1 + $0x8] sm:$0xff]  ;;  %s840_s25 = scalar_lea.vmem %s1788_s19, %s1660_s28  ;;  %s852_s29 = scalar_lea.vmem %s1790_s21, %s1660_s28 }
  0x18   : > { %1001 = vmatpush.msrb.mxu3 %v975_v13  ;;  %v1014_v18 = vld [vmem:[%s1786_s17] sm:$0x7]  ;;  %v1157_v32 = vld [vmem:[%s828_s26 + $0x8] sm:$0xff] }
  0x19   : > { %v1013_v19 = vld [vmem:[%s1781_s12] sm:$0x3]  ;;  %1497 = vmatpush.msk.msrb.mxu0 %vm1026_vm4, %v1014_v18  ;;  %v1093_v41 = vld [vmem:[%s822_s23 + $0x8] sm:$0xff] }
  0x1a   : > { %1500 = vmatpush.msk.msrb.mxu1 %vm1060_vm5, %v1013_v19  ;;  %1503 = vmatpush.msk.msra.mxu3 %vm1026_vm4, %v1014_v18  ;;  %v1017_v20 = vld [vmem:[%s816_s3] sm:$0xff] }
  0x1b   : > { %1509 = vmatpush.msk.msra.mxu0 %vm1026_vm4, %v1014_v18  ;;  %v1090_v24 = vld [vmem:[%s804_s1] sm:$0xff]  ;;  %s810_s3 = scalar_lea.vmem %s1802_s0, %s1660_s28 }
  0x1c   : > { %s798_s30 = scalar_lea.vmem %s1800_s4, %s1660_s28  ;;  %v1156_v26 = vld [vmem:[%s828_s26] sm:$0xff]  ;;  %v1155_v33 = vld [vmem:[%s810_s3 + $0x8] sm:$0xff] }
  0x1d   : > { %v1015_v21 = vld [vmem:[%s798_s30] sm:$0xff]  ;;  %v1016_v23 = vld [vmem:[%s798_s30 + $0x8] sm:$0xff] }
  0x1e   : > { %1498 = vmatmul.msk.f32.vlgmr.msrb.gmra.mxu0 %vm1019_vm6, %v1017_v20  ;;  %v1154_v27 = vld [vmem:[%s810_s3] sm:$0xff] }
  0x1f   : > { %v1529_v28 = vld [vmem:[%s1783_s14] ss:$0 sm:$0xff] }
  0x20   : > { %v1092_v40 = vld [vmem:[%s822_s23] sm:$0xff]  ;;  %s834_s23 = scalar_lea.vmem %s1787_s18, %s1660_s28 }
  0x21   : > { %v1530_v55 = vld [vmem:[%s1785_s16] ss:$0 sm:$0xff] }
  0x22   : > { %v1528_v56 = vld [vmem:[%s1780_s11] ss:$0 sm:$0xff] }
  0x26   : > { %1499 = vmatmul.msk.f32.gmra.mxu0 %vm1019_vm6, %v1018_v22 }
  0x2e   : > { %1510 = vmatmul.msk.f32.vlgmr.msra.gmra.mxu0 %vm1019_vm6, %v1156_v26 }
  0x36   : > { %1511 = vmatmul.msk.f32.gmra.mxu0 %vm1019_vm6, %v1157_v32 }
  0x93   : > { %v885_v14 = vpop.f32.mrf.mxu0 }
  0x94   : > { %v886_v15 = vadd.f32 %v1527_v6, %v885_v14 }
  0x96   : > { %v893_v16 = vmul.f32 0.2, %v886_v15  ;;  %vm891_vm3 = vcmp.ge.f32.partialorder %v886_v15, 0.0 }
  0x98   : > { %v888_v7 = vpop.f32.mrf.mxu3  ;;  %v895_v17 = vsel %vm891_vm3, %v886_v15, %v893_v16 }
  0x99   : > { %v889_v8 = vadd.f32 %v1527_v6, %v888_v7  ;;  %1491 = vmatmul.msk.f32.vlgmr.msra.gmra.mxu1 %vm861_vm0, %v895_v17 }
  0x9a   : > { %1512 = vmatpush.msk.msra.mxu1 %vm1060_vm5, %v1013_v19 }
  0x9b   : > { %v894_v9 = vmul.f32 0.2, %v889_v8  ;;  %vm892_vm1 = vcmp.ge.f32.partialorder %v889_v8, 0.0  ;;  %v1047_v43 = vpop.f32.mrf.mxu0 }
  0x9d   : > { %v896_v10 = vsel %vm892_vm1, %v889_v8, %v894_v9 }
  0x9e   : > { %1492 = vmatmul.msk.f32.vlgmr.msra.gmra.mxu2 %vm861_vm0, %v896_v10 }
  0x9f   : > { %1506 = vmatpush.msk.msra.mxu2 %vm1060_vm5, %v1013_v19 }
  0xa1   : > { %1501 = vmatmul.msk.f32.vlgmr.msrb.gmra.mxu1 %vm1053_vm7, %v1015_v21 }
  0xa3   : > { %v1050_v46 = vpop.f32.mrf.mxu0 }
  0xa6   : > { %1493 = vmatmul.msk.f32.vlgmr.msrb.gmra.mxu2 %vm939_vm2, %v931_v11 }
  0xa9   : > { %1502 = vmatmul.msk.f32.gmra.mxu1 %vm1053_vm7, %v1016_v23 }
  0xab   : > { %v1181_v49 = vpop.f32.mrf.mxu0 }
  0xae   : > { %1494 = vmatmul.msk.f32.gmra.mxu2 %vm939_vm2, %v932_v12 }
  0xb1   : > { %1513 = vmatmul.msk.f32.vlgmr.msra.gmra.mxu1 %vm1053_vm7, %v1154_v27 }
  0xb3   : > { %v1184_v52 = vpop.f32.mrf.mxu0 }
  0xb6   : > { %1507 = vmatmul.msk.f32.vlgmr.msra.gmra.mxu2 %vm1053_vm7, %v1090_v24 }
  0xb9   : > { %1514 = vmatmul.msk.f32.gmra.mxu1 %vm1053_vm7, %v1155_v33 }
  0xbe   : > { %1508 = vmatmul.msk.f32.gmra.mxu2 %vm1053_vm7, %v1091_v29 }
 0x116   : > { %v925_v42 = vpop.f32.mrf.mxu1 }
 0x117   : > { %v926_v58 = vadd.f32 %v1528_v56, %v925_v42 }
 0x11e   : > { %v1081_v44 = vpop.f32.mrf.mxu1 }
 0x11f   : > { %v1082_v45 = vadd.f32 %v1081_v44, %v1047_v43 }
 0x121   : > { %v928_v25 = vpop.f32.mrf.mxu2  ;;  %1088 = vst.msk [vmem:[%s840_s25] sm:$0xff] %vm1087_vm10, %v1082_v45 }
 0x122   : > { %v929_v62 = vadd.f32 %v1528_v56, %v928_v25 }
 0x126   : > { %v1084_v47 = vpop.f32.mrf.mxu1 }
 0x127   : > { %v1085_v48 = vadd.f32 %v1084_v47, %v1050_v46 }
 0x129   : > { %v963_v30 = vpop.f32.mrf.mxu2  ;;  %1089 = vst.msk [vmem:[%s840_s25 + $0x8] sm:$0xff] %vm1087_vm10, %v1085_v48  ;;  %s846_s25 = scalar_lea.vmem %s1789_s20, %s1660_s28 }
 0x12a   : > { %v964_v31 = vadd.f32 %v1529_v28, %v963_v30 }
 0x12c   : > { %vm969_vm8 = vcmp.ge.f32.partialorder %v964_v31, 0.0  ;;  %v971_v34 = vmul.f32 0.2, %v964_v31 }
 0x12e   : > { %v973_v35 = vsel %vm969_vm8, %v964_v31, %v971_v34  ;;  %v1210_v50 = vpop.f32.mrf.mxu1 }
 0x12f   : > { %1495 = vmatmul.msk.f32.vlgmr.msrb.gmra.mxu3 %vm861_vm0, %v973_v35  ;;  %v1211_v51 = vadd.f32 %v1210_v50, %v1181_v49 }
 0x131   : > { %v966_v36 = vpop.f32.mrf.mxu2  ;;  %1216 = vst.msk [vmem:[%s852_s29] sm:$0xff] %vm1087_vm10, %v1211_v51 }
 0x132   : > { %v967_v37 = vadd.f32 %v1529_v28, %v966_v36 }
 0x134   : > { %v972_v38 = vmul.f32 0.2, %v967_v37  ;;  %vm970_vm9 = vcmp.ge.f32.partialorder %v967_v37, 0.0 }
 0x136   : > { %v974_v39 = vsel %vm970_vm9, %v967_v37, %v972_v38  ;;  %v1213_v53 = vpop.f32.mrf.mxu1 }
 0x137   : > { %1496 = vmatmul.msk.f32.gmra.mxu3 %vm861_vm0, %v974_v39  ;;  %v1214_v54 = vadd.f32 %v1213_v53, %v1184_v52 }
 0x139   : > { %1217 = vst.msk [vmem:[%s852_s29 + $0x8] sm:$0xff] %vm1087_vm10, %v1214_v54  ;;  %v1146_v1 = vpop.f32.mrf.mxu2 }
 0x13f   : > { %1504 = vmatmul.msk.f32.vlgmr.msra.gmra.mxu3 %vm1019_vm6, %v1092_v40 }
 0x141   : > { %v1149_v4 = vpop.f32.mrf.mxu2 }
 0x147   : > { %1505 = vmatmul.msk.f32.gmra.mxu3 %vm1019_vm6, %v1093_v41 }
 0x1b2   : > { %v1003_v57 = vpop.f32.mrf.mxu3 }
 0x1b3   : > { %v1004_v59 = vadd.f32 %v1530_v55, %v1003_v57 }
 0x1b5   : > { %v1009_v60 = vadd.f32 %v1004_v59, %v926_v58 }
 0x1b7   : > { %1011 = vst.msk [vmem:[%s834_s23] sm:$0xff] %vm861_vm0, %v1009_v60 }
 0x1ba   : > { %v1006_v61 = vpop.f32.mrf.mxu3 }
 0x1bb   : > { %v1007_v63 = vadd.f32 %v1530_v55, %v1006_v61 }
 0x1bd   : > { %v1010_v0 = vadd.f32 %v1007_v63, %v929_v62 }
 0x1bf   : > { %1012 = vst.msk [vmem:[%s834_s23 + $0x8] sm:$0xff] %vm861_vm0, %v1010_v0 }
 0x1c2   : > { %v1117_v2 = vpop.f32.mrf.mxu3 }
 0x1c3   : > { %v1147_v3 = vadd.f32 %v1146_v1, %v1117_v2 }
 0x1c5   : > { %1152 = vst.msk [vmem:[%s846_s25] sm:$0xff] %vm1087_vm10, %v1147_v3 }
 0x1ca   : > { %v1120_v5 = vpop.f32.mrf.mxu3 }
 0x1cb   : > { %v1150_v6 = vadd.f32 %v1149_v4, %v1120_v5 }
 0x1cd   : > { %1153 = vst.msk [vmem:[%s846_s25 + $0x8] sm:$0xff] %vm1087_vm10, %v1150_v6 }
 0x1ce PF: > { %s32_s2 = sadd.s32 1, %s1537_s2  }
 0x1cf   : > { %p29_p4 = scmp.ge.s32.totalorder %s32_s2, 4  }
 0x1d1   :  { %31 = sbr.rel (!%p29_p4) target bundleno = 7 (0x7), region = 179 }

// kernel: generator_apply.48
= control target key start
LH: loop header
LB: loop body
LE: loop exit
PB: predicated region body
PF: predicated region fallthrough
CT: control target
= control target key end

     0   :  { %s1206_s29 = smov 0   ;;  %s1317_s0 = inlined_call_operand.vmem [shape: f32[32,56], index: 0, kind: input, shape index: {}]   ;;  %s1318_s1 = inlined_call_operand.vmem [shape: f32[32,28], index: 1, kind: input, shape index: {}]   ;;  %s1319_s2 = inlined_call_operand.vmem [shape: f32[32,28], index: 2, kind: input, shape index: {}]   ;;  %s1320_s3 = inlined_call_operand.vmem [shape: f32[32,28], index: 3, kind: input, shape index: {}]   ;;  %s1321_s4 = inlined_call_operand.vmem [shape: f32[32,8], index: 4, kind: input, shape index: {}]   ;;  %s1322_s5 = inlined_call_operand.vmem [shape: f32[32,4], index: 5, kind: input, shape index: {}]   ;;  %s1323_s6 = inlined_call_operand.vmem [shape: f32[32,4], index: 6, kind: input, shape index: {}]   ;;  %s1324_s7 = inlined_call_operand.vmem [shape: f32[32,4], index: 7, kind: input, shape index: {}]   ;;  %s1325_s8 = inlined_call_operand.vmem [shape: f32[56,8], index: 8, kind: input, shape index: {}]   ;;  %s1326_s9 = inlined_call_operand.vmem [shape: f32[1,8], index: 9, kind: input, shape index: {}]   ;;  %s1327_s10 = inlined_call_operand.vmem [shape: f32[28,4], index: 10, kind: input, shape index: {}]   ;;  %s1328_s11 = inlined_call_operand.vmem [shape: f32[32,8], index: 11, kind: output, shape index: {0}]   ;;  %s1329_s12 = inlined_call_operand.vmem [shape: f32[32,4], index: 12, kind: output, shape index: {1}]   ;;  %s1330_s13 = inlined_call_operand.vmem [shape: f32[32,4], index: 13, kind: output, shape index: {2}]   ;;  %s1331_s14 = inlined_call_operand.vmem [shape: f32[32,4], index: 14, kind: output, shape index: {3}]  }
   0x1   :  { %1332 = sst [smem:[#allocation2_spill]] %s1317_s0 }
   0x2 LB: > { %s1072_s30 = sadd.s32 4294967295, %s1129_s29   ;;  %p1076_p0 = scmp.ge.s32.totalorder %s1129_s29, 1  ;;  %s1129_s29 = sphi %s1206_s29, %s25_s29  }
   0x3   : > { %p497_p1 = scmp.lt.s32.totalorder %s1129_s29, 3 }
   0x5   : > { %p498_p2 = pnand %p1076_p0, %p497_p1 }
   0x6   : > { %s1077_s21 = sshll.u32 (!%p498_p2), %s1072_s30, 1  ;;  %s1333_s0 = sld [smem:[#allocation2_spill]] (!%p498_p2) }
   0x7   : > { %501 = sbr.rel (%p498_p2) target bundleno = 165 (0xa5), region = 64  ;;  %p594_p3 = scmp.lt.s32.totalorder (!%p498_p2), %s1077_s21, 3 }
   0xc   : > { %v673_v0 = vld [vmem:[%s1325_s8 + $0x30] sm:$0xff]  ;;  %v672_v1 = vld [vmem:[%s1325_s8 + $0x28] sm:$0xff]  ;;  %v718_v2 = vld [vmem:[%s1327_s10 + $0x18] sm:$0xf]  ;;  %vm730_vm0 = vcmask 1043456   ;;  %s1335_s21 = smov (!%p594_p3, %s1077_s21), 3 }
   0xd   : > { %694 = vmatpush.msra.mxu0 %v673_v0  ;;  %1106 = vmatpush.msk.msra.mxu2 %vm730_vm0, %v718_v2  ;;  %v717_v3 = vld [vmem:[%s1327_s10 + $0x10] sm:$0xff]  ;;  %v671_v4 = vld [vmem:[%s1325_s8 + $0x20] sm:$0xff]  ;;  %v716_v5 = vld [vmem:[%s1327_s10 + $0x8] sm:$0xff]  ;;  %s1238_s17 = sshll.u32 %s1335_s21, 3  ;;  %vm723_vm1 = vcmask 228352   ;;  %vm678_vm2 = vcmask 457728  }
   0xe   : > { %1109 = vmatpush.msk.msra.mxu3 %vm730_vm0, %v718_v2  ;;  %1103 = vmatpush.msk.msra.mxu1 %vm730_vm0, %v718_v2  ;;  %v670_v6 = vld [vmem:[%s1325_s8 + $0x18] sm:$0xff]  ;;  %v715_v7 = vld [vmem:[%s1327_s10] sm:$0xff]  ;;  %v669_v8 = vld [vmem:[%s1325_s8 + $0x10] sm:$0xff]  ;;  %s609_s23 = scalar_lea.vmem %s1319_s2, %s1238_s17  ;;  %s615_s26 = scalar_lea.vmem %s1320_s3, %s1238_s17  ;;  %vm757_vm3 = vcmask 31744   ;;  %vm712_vm4 = vcmask 64512  }
   0xf   : > { %695 = vmatpush.msra.mxu0 %v672_v1  ;;  %783 = vmatpush.msra.mxu2 %v717_v3  ;;  %v760_v9 = vld [vmem:[%s609_s23] sm:$0xff]  ;;  %s603_s28 = scalar_lea.vmem %s1318_s1, %s1238_s17  ;;  %v668_v11 = vld [vmem:[%s1325_s8 + $0x8] sm:$0xff]  ;;  %s597_s19 = scalar_lea.vmem %s1333_s0, %s1238_s17 }
  0x10   : > { %818 = vmatpush.msra.mxu3 %v717_v3  ;;  %747 = vmatpush.msra.mxu1 %v717_v3  ;;  %v795_v10 = vld [vmem:[%s615_s26] sm:$0xff]  ;;  %v761_v15 = vld [vmem:[%s609_s23 + $0x8] sm:$0xff]  ;;  %s627_s21 = scalar_lea.vmem %s1322_s5, %s1238_s17  ;;  %s633_s23 = scalar_lea.vmem %s1323_s6, %s1238_s17 }
  0x11   : > { %696 = vmatpush.msra.mxu0 %v671_v4  ;;  %784 = vmatpush.msra.mxu2 %v716_v5  ;;  %v719_v12 = vld [vmem:[%s603_s28] sm:$0xff]  ;;  %v796_v16 = vld [vmem:[%s615_s26 + $0x8] sm:$0xff]  ;;  %s651_s0 = scalar_lea.vmem %s1329_s12, %s1238_s17  ;;  %s657_s26 = scalar_lea.vmem %s1330_s13, %s1238_s17 }
  0x12   : > { %819 = vmatpush.msra.mxu3 %v716_v5  ;;  %748 = vmatpush.msra.mxu1 %v716_v5  ;;  %v667_v13 = vld [vmem:[%s1325_s8] sm:$0xff]  ;;  %v720_v17 = vld [vmem:[%s603_s28 + $0x8] sm:$0xff]  ;;  %s639_s28 = scalar_lea.vmem %s1324_s7, %s1238_s17  ;;  %s663_s18 = scalar_lea.vmem %s1331_s14, %s1238_s17 }
  0x13   : > { %697 = vmatpush.msra.mxu0 %v670_v6  ;;  %785 = vmatpush.msra.mxu2 %v715_v7  ;;  %v665_v14 = vld [vmem:[%s597_s19] sm:$0xff]  ;;  %v666_v18 = vld [vmem:[%s597_s19 + $0x8] sm:$0xff]  ;;  %s621_s19 = scalar_lea.vmem %s1321_s4, %s1238_s17  ;;  %s645_s24 = scalar_lea.vmem %s1328_s11, %s1238_s17 }
  0x14   : > { %820 = vmatpush.msra.mxu3 %v715_v7  ;;  %1107 = vmatmul.msk.f32.vlgmr.msra.gmra.mxu2 %vm723_vm1, %v760_v9  ;;  %v721_v19 = vld [vmem:[%s627_s21] sm:$0xff]  ;;  %v722_v33 = vld [vmem:[%s627_s21 + $0x8] sm:$0xff] }
  0x15   : > { %698 = vmatpush.msra.mxu0 %v669_v8  ;;  %1110 = vmatmul.msk.f32.vlgmr.msra.gmra.mxu3 %vm723_vm1, %v795_v10  ;;  %v1122_v20 = vld [vmem:[%s1326_s9] ss:$0 sm:$0xff]  ;;  %v763_v36 = vld [vmem:[%s633_s23 + $0x8] sm:$0xff] }
  0x16   : > { %749 = vmatpush.msra.mxu1 %v715_v7  ;;  %v762_v23 = vld [vmem:[%s633_s23] sm:$0xff]  ;;  %v798_v37 = vld [vmem:[%s639_s28 + $0x8] sm:$0xff] }
  0x17   : > { %699 = vmatpush.msra.mxu0 %v668_v11  ;;  %1104 = vmatmul.msk.f32.vlgmr.msra.gmra.mxu1 %vm723_vm1, %v719_v12  ;;  %v797_v24 = vld [vmem:[%s639_s28] sm:$0xff]  ;;  %v709_v39 = vld [vmem:[%s621_s19 + $0x8] sm:$0xff] }
  0x18   : > { %v708_v26 = vld [vmem:[%s621_s19] sm:$0xff] }
  0x19   : > { %700 = vmatpush.msra.mxu0 %v667_v13 }
  0x1a   : > { %1101 = vmatmul.msk.f32.vlgmr.msra.gmra.mxu0 %vm678_vm2, %v665_v14 }
  0x1c   : > { %1108 = vmatmul.msk.f32.gmra.mxu2 %vm723_vm1, %v761_v15 }
  0x1d   : > { %1111 = vmatmul.msk.f32.gmra.mxu3 %vm723_vm1, %v796_v16 }
  0x1f   : > { %1105 = vmatmul.msk.f32.gmra.mxu1 %vm723_vm1, %v720_v17 }
  0x22   : > { %1102 = vmatmul.msk.f32.gmra.mxu0 %vm678_vm2, %v666_v18 }
  0x94   : > { %v751_v21 = vpop.f32.mrf.mxu1 }
  0x95   : > { %v752_v22 = vadd.f32 %v751_v21, %v721_v19 }
  0x97   : > { %v702_v25 = vpop.f32.mrf.mxu0  ;;  %758 = vst.msk [vmem:[%s651_s0] sm:$0xff] %vm757_vm3, %v752_v22  ;;  %v787_v27 = vpop.f32.mrf.mxu2 }
  0x98   : > { %v703_v28 = vadd.f32 %v1122_v20, %v702_v25  ;;  %v788_v29 = vadd.f32 %v787_v27, %v762_v23  ;;  %v822_v30 = vpop.f32.mrf.mxu3 }
  0x99   : > { %v823_v31 = vadd.f32 %v822_v30, %v797_v24 }
  0x9a   : > { %v710_v32 = vadd.f32 %v708_v26, %v703_v28  ;;  %793 = vst.msk [vmem:[%s657_s26] sm:$0xff] %vm757_vm3, %v788_v29 }
  0x9b   : > { %828 = vst.msk [vmem:[%s663_s18] sm:$0xff] %vm757_vm3, %v823_v31 }
  0x9c   : > { %713 = vst.msk [vmem:[%s645_s24] sm:$0xff] %vm712_vm4, %v710_v32  ;;  %v754_v34 = vpop.f32.mrf.mxu1 }
  0x9d   : > { %v755_v35 = vadd.f32 %v754_v34, %v722_v33 }
  0x9f   : > { %v705_v38 = vpop.f32.mrf.mxu0  ;;  %759 = vst.msk [vmem:[%s651_s0 + $0x8] sm:$0xff] %vm757_vm3, %v755_v35  ;;  %v790_v40 = vpop.f32.mrf.mxu2 }
  0xa0   : > { %v706_v41 = vadd.f32 %v1122_v20, %v705_v38  ;;  %v791_v42 = vadd.f32 %v790_v40, %v763_v36  ;;  %v825_v43 = vpop.f32.mrf.mxu3 }
  0xa1   : > { %v826_v44 = vadd.f32 %v825_v43, %v798_v37 }
  0xa2   : > { %v711_v45 = vadd.f32 %v709_v39, %v706_v41  ;;  %794 = vst.msk [vmem:[%s657_s26 + $0x8] sm:$0xff] %vm757_vm3, %v791_v42 }
  0xa3   : > { %829 = vst.msk [vmem:[%s663_s18 + $0x8] sm:$0xff] %vm757_vm3, %v826_v44 }
  0xa4   : > { %714 = vst.msk [vmem:[%s645_s24 + $0x8] sm:$0xff] %vm712_vm4, %v711_v45 }
  0xa5 PF: > { %s25_s29 = sadd.s32 1, %s1129_s29  }
  0xa6   : > { %p22_p4 = scmp.ge.s32.totalorder %s25_s29, 4  }
  0xa8   :  { %24 = sbr.rel (!%p22_p4) target bundleno = 2 (0x2), region = 151 }

// kernel: generator_apply.49
= control target key start
LH: loop header
LB: loop body
LE: loop exit
PB: predicated region body
PF: predicated region fallthrough
CT: control target
= control target key end

     0   :  { %s2721_s0 = inlined_call_operand.vmem [shape: f32[32,8], index: 0, kind: input, shape index: {}]   ;;  %s2722_s1 = inlined_call_operand.vmem [shape: f32[32,4], index: 1, kind: input, shape index: {}]   ;;  %s2723_s2 = inlined_call_operand.vmem [shape: f32[32,4], index: 2, kind: input, shape index: {}]   ;;  %s2724_s3 = inlined_call_operand.vmem [shape: f32[32,4], index: 3, kind: input, shape index: {}]   ;;  %s2725_s4 = inlined_call_operand.vmem [shape: f32[8,8], index: 4, kind: input, shape index: {}]   ;;  %s2726_s5 = inlined_call_operand.vmem [shape: f32[1,8], index: 5, kind: input, shape index: {}]   ;;  %s2727_s6 = inlined_call_operand.vmem [shape: f32[8,8], index: 6, kind: input, shape index: {}]   ;;  %s2728_s7 = inlined_call_operand.vmem [shape: f32[1,8], index: 7, kind: input, shape index: {}]   ;;  %s2729_s8 = inlined_call_operand.vmem [shape: f32[8,8], index: 8, kind: input, shape index: {}]   ;;  %s2730_s9 = inlined_call_operand.vmem [shape: f32[1,8], index: 9, kind: input, shape index: {}]   ;;  %s2731_s10 = inlined_call_operand.vmem [shape: f32[4,4], index: 10, kind: input, shape index: {}]   ;;  %s2732_s11 = inlined_call_operand.vmem [shape: f32[4,4], index: 11, kind: input, shape index: {}]   ;;  %s2733_s12 = inlined_call_operand.vmem [shape: f32[4,4], index: 12, kind: input, shape index: {}]   ;;  %s2734_s13 = inlined_call_operand.vmem [shape: f32[8,4], index: 13, kind: input, shape index: {}]   ;;  %s2735_s14 = inlined_call_operand.vmem [shape: f32[1,4], index: 14, kind: input, shape index: {}]   ;;  %s2736_s15 = inlined_call_operand.vmem [shape: f32[4,4], index: 15, kind: input, shape index: {}]   ;;  %s2737_s16 = inlined_call_operand.vmem [shape: f32[4,8], index: 16, kind: input, shape index: {}]   ;;  %s2738_s17 = inlined_call_operand.vmem [shape: f32[1,8], index: 17, kind: input, shape index: {}]   ;;  %s2739_s18 = inlined_call_operand.vmem [shape: f32[4,4], index: 18, kind: input, shape index: {}]   ;;  %s2740_s19 = inlined_call_operand.vmem [shape: f32[1,8], index: 19, kind: input, shape index: {}]   ;;  %s2741_s20 = inlined_call_operand.vmem [shape: f32[1,8], index: 20, kind: input, shape index: {}]   ;;  %s2742_s21 = inlined_call_operand.vmem [shape: f32[8,8], index: 21, kind: input, shape index: {}]   ;;  %s2743_s22 = inlined_call_operand.vmem [shape: f32[1,4], index: 22, kind: input, shape index: {}]   ;;  %s2744_s23 = inlined_call_operand.vmem [shape: f32[4,4], index: 23, kind: input, shape index: {}]   ;;  %s2745_s24 = inlined_call_operand.vmem [shape: f32[32,8], index: 24, kind: output, shape index: {0}]   ;;  %s2746_s25 = inlined_call_operand.vmem [shape: f32[32,4], index: 25, kind: output, shape index: {1}]   ;;  %s2747_s26 = inlined_call_operand.vmem [shape: f32[32,4], index: 26, kind: output, shape index: {2}]   ;;  %s2748_s27 = inlined_call_operand.vmem [shape: f32[32,4], index: 27, kind: output, shape index: {3}]  }
   0x1   :  { %2749 = sst [smem:[#allocation2_spill]] %s2721_s0 }
   0x2   :  { %2750 = sst [smem:[#allocation3_spill]] %s2722_s1 }
   0x3   :  { %2751 = sst [smem:[#allocation4_spill]] %s2723_s2 }
   0x4   :  { %2752 = sst [smem:[#allocation5_spill]] %s2724_s3 }
   0x5   :  { %2753 = sst [smem:[#allocation6_spill]] %s2725_s4 }
   0x6   :  { %2754 = sst [smem:[#allocation7_spill]] %s2726_s5 }
   0x7   :  { %2755 = sst [smem:[#allocation8_spill]] %s2727_s6 }
   0x8   :  { %2756 = sst [smem:[#allocation9_spill]] %s2728_s7  ;;  %s2404_s7 = smov 0  }
   0x9   :  { %2757 = sst [smem:[#allocation10_spill]] %s2729_s8 }
   0xa   :  { %2758 = sst [smem:[#allocation11_spill]] %s2730_s9 }
   0xb   :  { %2759 = sst [smem:[#allocation12_spill]] %s2731_s10 }
   0xc   :  { %2760 = sst [smem:[#allocation13_spill]] %s2732_s11 }
   0xd LB: > { %s2117_s4 = sadd.s32 4294967295, %s2262_s7   ;;  %p2121_p0 = scmp.ge.s32.totalorder %s2262_s7, 1  ;;  %s2262_s7 = sphi %s2404_s7, %s38_s7  }
   0xe   : > { %p778_p1 = scmp.lt.s32.totalorder %s2262_s7, 3 }
  0x10   : > { %p779_p2 = pnand %p2121_p0, %p778_p1 }
  0x11   : > { %s2761_s9 = sld [smem:[#allocation6_spill]] (!%p779_p2)  ;;  %s2122_s5 = sshll.u32 (!%p779_p2), %s2117_s4, 1 }
  0x12   : > { %782 = sbr.rel (%p779_p2) target bundleno = 961 (0x3c1), region = 116  ;;  %p881_p3 = scmp.lt.s32.totalorder (!%p779_p2), %s2122_s5, 3 }
  0x13   : > { %s2762_s29 = sld [smem:[#allocation2_spill]] (!%p779_p2) }
  0x14   : > { %s2763_s2 = sld [smem:[#allocation8_spill]] (!%p779_p2) }
  0x15   : > { %s2764_s8 = sld [smem:[#allocation12_spill]] (!%p779_p2) }
  0x16   : > { %s2767_s3 = sld [smem:[#allocation7_spill]] (!%p779_p2) }
  0x17   : > { %v936_v0 = vld [vmem:[%s2761_s9] sm:$0xff]  ;;  %s2774_s5 = smov (!%p881_p3, %s2122_s5), 3  ;;  %vm941_vm0 = vcmask 64512   ;;  %vm1059_vm1 = vcmask 1043456   ;;  %vm1052_vm2 = vcmask 31744   ;;  %s2768_s30 = sld [smem:[#allocation5_spill]] }
  0x18   : > { %963 = vmatpush.msra.mxu0 %v936_v0  ;;  %2207 = vmatpush.msra.mxu3 %v936_v0  ;;  %s2415_s28 = sshll.u32 %s2774_s5, 3  ;;  %s2765_s5 = sld [smem:[#allocation3_spill]] }
  0x19   : > { %s884_s1 = scalar_lea.vmem %s2762_s29, %s2415_s28  ;;  %s2769_s10 = sld [smem:[#allocation10_spill]] }
  0x1a   : > { %v2421_v1 = vld [vmem:[%s884_s1] sm:$0xff]  ;;  %v2423_v2 = vld [vmem:[%s884_s1 + $0x8] sm:$0xff]  ;;  %s2766_s1 = sld [smem:[#allocation4_spill]] }
  0x1b   : > { %2138 = vmatmul.msk.f32.vlgmr.msra.gmra.mxu0 %vm941_vm0, %v2421_v1  ;;  %2139 = vmatmul.msk.f32.vlgmr.msra.gmra.mxu3 %vm941_vm0, %v2423_v2  ;;  %v977_v3 = vld [vmem:[%s2763_s2] sm:$0xff] }
  0x1c   : > { %1003 = vmatpush.msra.mxu1 %v977_v3  ;;  %v1051_v4 = vld [vmem:[%s2764_s8] sm:$0xf]  ;;  %s908_s8 = scalar_lea.vmem %s2745_s24, %s2415_s28 }
  0x1d   : > { %2144 = vmatpush.msk.msrb.mxu3 %vm1059_vm1, %v1051_v4  ;;  %2147 = vmatpush.msk.msrb.mxu0 %vm1059_vm1, %v1051_v4  ;;  %v2216_v9 = vld [vmem:[%s2767_s3] ss:$0 sm:$0xff]  ;;  %s902_s9 = scalar_lea.vmem %s2768_s30, %s2415_s28  ;;  %s2771_s3 = sld [smem:[#allocation13_spill]] }
  0x1e   : > { %2150 = vmatpush.msk.msrb.mxu1 %vm1059_vm1, %v1051_v4  ;;  %s890_s0 = scalar_lea.vmem %s2765_s5, %s2415_s28  ;;  %v2471_v18 = vld [vmem:[%s902_s9] sm:$0xff]  ;;  %v2475_v19 = vld [vmem:[%s902_s9 + $0x8] sm:$0xff]  ;;  %s2772_s9 = sld [smem:[#allocation11_spill]] }
  0x1f   : > { %v2446_v5 = vld [vmem:[%s890_s0] sm:$0xff]  ;;  %v2454_v7 = vld [vmem:[%s890_s0 + $0x8] sm:$0xff] }
  0x20   : > { %s896_s6 = scalar_lea.vmem %s2766_s1, %s2415_s28  ;;  %v1017_v20 = vld [vmem:[%s2769_s10] sm:$0xff]  ;;  %s914_s10 = scalar_lea.vmem %s2746_s25, %s2415_s28 }
  0x21   : > { %v2450_v6 = vld [vmem:[%s896_s6] sm:$0xff]  ;;  %v2458_v8 = vld [vmem:[%s896_s6 + $0x8] sm:$0xff]  ;;  %1043 = vmatpush.msra.mxu2 %v1017_v20  ;;  %s2770_s6 = sld [smem:[#allocation9_spill]] }
  0x23   : > { %2145 = vmatmul.msk.f32.vlgmr.msrb.gmra.mxu3 %vm1052_vm2, %v2446_v5  ;;  %2148 = vmatmul.msk.f32.vlgmr.msrb.gmra.mxu0 %vm1052_vm2, %v2450_v6  ;;  %v1224_v58 = vld [vmem:[%s2771_s3] sm:$0xf]  ;;  %s926_s3 = scalar_lea.vmem %s2748_s27, %s2415_s28 }
  0x24   : > { %2155 = vmatpush.msk.msrb.mxu2 %vm1059_vm1, %v1224_v58  ;;  %2158 = vmatpush.msk.msra.mxu3 %vm1059_vm1, %v1224_v58 }
  0x25   : > { %2161 = vmatpush.msk.msra.mxu0 %vm1059_vm1, %v1224_v58 }
  0x27   : > { %v2217_v21 = vld [vmem:[%s2770_s6] ss:$0 sm:$0xff]  ;;  %s920_s6 = scalar_lea.vmem %s2747_s26, %s2415_s28 }
  0x2b   : > { %2146 = vmatmul.msk.f32.gmra.mxu3 %vm1052_vm2, %v2454_v7  ;;  %2149 = vmatmul.msk.f32.gmra.mxu0 %vm1052_vm2, %v2458_v8 }
  0x98   : > { %v965_v10 = vpop.f32.mrf.mxu0 }
  0x99   : > { %v966_v11 = vadd.f32 %v2216_v9, %v965_v10 }
  0x9b   : > { %v973_v12 = vmul.f32 0.2, %v966_v11  ;;  %vm971_vm3 = vcmp.ge.f32.partialorder %v966_v11, 0.0 }
  0x9d   : > { %v975_v13 = vsel %vm971_vm3, %v966_v11, %v973_v12 }
  0x9e   : > { %v968_v14 = vpop.f32.mrf.mxu3  ;;  %2140 = vmatmul.msk.f32.vlgmr.msra.gmra.mxu1 %vm941_vm0, %v975_v13  ;;  %v1396_v13 = vld [vmem:[%s2734_s13] sm:$0xff] }
  0x9f   : > { %v969_v15 = vadd.f32 %v2216_v9, %v968_v14  ;;  %v1424_v9 = vld [vmem:[%s2736_s15] sm:$0xf]  ;;  %1416 = vmatpush.msra.mxu1 %v1396_v13 }
  0xa0   : > { %v2488_v27 = vpop.f32.mrf.mxu0  ;;  %2171 = vmatpush.msk.msrb.mxu3 %vm1059_vm1, %v1424_v9  ;;  %2174 = vmatpush.msk.msrb.mxu0 %vm1059_vm1, %v1424_v9 }
  0xa1   : > { %v974_v16 = vmul.f32 0.2, %v969_v15  ;;  %vm972_vm4 = vcmp.ge.f32.partialorder %v969_v15, 0.0  ;;  %v1146_v32 = vmul.f32 %v2488_v27, %v2488_v27 }
  0xa3   : > { %v976_v17 = vsel %vm972_vm4, %v969_v15, %v974_v16 }
  0xa6   : > { %2141 = vmatmul.msk.f32.gmra.mxu1 %vm941_vm0, %v976_v17  ;;  %v2485_v26 = vpop.f32.mrf.mxu3 }
  0xa7   : > { %v1144_v31 = vmul.f32 %v2485_v26, %v2485_v26 }
  0xa8   : > { %v2499_v37 = vpop.f32.mrf.mxu0 }
  0xa9   : > { %v1148_v34 = vadd.f32 %v1146_v32, %v1144_v31  ;;  %v1147_v41 = vmul.f32 %v2499_v37, %v2499_v37 }
  0xae   : > { %2151 = vmatmul.msk.f32.vlgmr.msrb.gmra.mxu1 %vm1052_vm2, %v2471_v18  ;;  %v2495_v35 = vpop.f32.mrf.mxu3 }
  0xaf   : > { %v1145_v40 = vmul.f32 %v2495_v35, %v2495_v35 }
  0xb1   : > { %v1149_v43 = vadd.f32 %v1147_v41, %v1145_v40 }
  0xb6   : > { %2152 = vmatmul.msk.f32.gmra.mxu1 %vm1052_vm2, %v2475_v19 }
  0xbe   : > { %2166 = vmatmul.msk.f32.vlgmr.msra.gmra.mxu1 %vm941_vm0, %v2421_v1 }
  0xc6   : > { %2167 = vmatmul.msk.f32.gmra.mxu1 %vm941_vm0, %v2423_v2 }
 0x11b   : > { %v1005_v22 = vpop.f32.mrf.mxu1 }
 0x11c   : > { %v1006_v23 = vadd.f32 %v2217_v21, %v1005_v22 }
 0x11e   : > { %v1013_v24 = vmul.f32 0.2, %v1006_v23  ;;  %vm1011_vm5 = vcmp.ge.f32.partialorder %v1006_v23, 0.0 }
 0x120   : > { %v1015_v25 = vsel %vm1011_vm5, %v1006_v23, %v1013_v24 }
 0x121   : > { %2142 = vmatmul.msk.f32.vlgmr.msra.gmra.mxu2 %vm941_vm0, %v1015_v25 }
 0x122   : > { %2168 = vmatpush.msk.msra.mxu2 %vm1059_vm1, %v1424_v9 }
 0x123   : > { %v1008_v28 = vpop.f32.mrf.mxu1 }
 0x124   : > { %v1009_v29 = vadd.f32 %v2217_v21, %v1008_v28 }
 0x126   : > { %v1014_v30 = vmul.f32 0.2, %v1009_v29  ;;  %vm1012_vm6 = vcmp.ge.f32.partialorder %v1009_v29, 0.0 }
 0x128   : > { %v1016_v33 = vsel %vm1012_vm6, %v1009_v29, %v1014_v30 }
 0x129   : > { %2143 = vmatmul.msk.f32.gmra.mxu2 %vm941_vm0, %v1016_v33 }
 0x12b   : > { %v2497_v36 = vpop.f32.mrf.mxu1 }
 0x12c   : > { %v1150_v38 = vmul.f32 %v2497_v36, %v2497_v36 }
 0x12e   : > { %v1152_v39 = vadd.f32 %v1150_v38, %v1148_v34 }
 0x130   : > { %v1154_v42 = vadd.f32 1e-12, %v1152_v39 }
 0x132   : > { %2224 = vrsqrt.f32 %v1154_v42  ;;  %vm1163_vm7 = vcmp.eq.f32.partialorder %v1154_v42, inf  ;;  %v1166_v59 = vand.u32 2147483648, %v1154_v42  ;;  %vm1165_vm8 = vcmp.eq.f32.partialorder %v1154_v42, 0.0 }
 0x133   : > { %v2507_v44 = vpop.f32.mrf.mxu1 }
 0x134   : > { %v1151_v45 = vmul.f32 %v2507_v44, %v2507_v44 }
 0x136   : > { %v1153_v46 = vadd.f32 %v1151_v45, %v1149_v43 }
 0x138   : > { %v2225_v47 = vpop.eup %2224  ;;  %v1155_v48 = vadd.f32 1e-12, %v1153_v46 }
 0x139   : > { %v1157_v49 = vmul.f32 %v2225_v47, %v1154_v42 }
 0x13a   : > { %2226 = vrsqrt.f32 %v1155_v48  ;;  %vm1175_vm9 = vcmp.eq.f32.partialorder %v1155_v48, inf  ;;  %v1178_v10 = vand.u32 2147483648, %v1155_v48  ;;  %vm1177_vm10 = vcmp.eq.f32.partialorder %v1155_v48, 0.0 }
 0x13b   : > { %v1158_v50 = vmul.f32 %v2225_v47, %v1157_v49 }
 0x13d   : > { %v1159_v51 = vmul.f32 0.5, %v1158_v50  ;;  %v1509_v50 = vld [vmem:[%s2737_s16] sm:$0xf] }
 0x13e   : > { %2177 = vmatpush.msk.msrb.mxu1 %vm1059_vm1, %v1509_v50 }
 0x13f   : > { %v1160_v52 = vsub.f32 1.5, %v1159_v51 }
 0x140   : > { %v2227_v53 = vpop.eup %2226 }
 0x141   : > { %v1161_v54 = vmul.f32 %v2225_v47, %v1160_v52  ;;  %v1169_v55 = vmul.f32 %v2227_v53, %v1155_v48 }
 0x143   : > { %v1162_v56 = vmul.f32 %v1161_v54, %v1154_v42  ;;  %v1170_v57 = vmul.f32 %v2227_v53, %v1169_v55 }
 0x145   : > { %v1164_v60 = vsel %vm1163_vm7, %v1154_v42, %v1162_v56  ;;  %v1171_v61 = vmul.f32 0.5, %v1170_v57 }
 0x146   : > { %v1167_v62 = vsel %vm1165_vm8, %v1166_v59, %v1164_v60  ;;  %v1418_v60 = vpop.f32.mrf.mxu1 }
 0x147   : > { %v2153_v63 = vmul.f32 -1.442695, %v1167_v62  ;;  %v1172_v0 = vsub.f32 1.5, %v1171_v61  ;;  %v2219_v61 = vld [vmem:[%s2735_s14] ss:$0 sm:$0xff] }
 0x148   : > { %v1419_v9 = vadd.f32 %v2219_v61, %v1418_v60 }
 0x149   : > { %2228 = vpow2.f32 %v2153_v63  ;;  %v1173_v3 = vmul.f32 %v2227_v53, %v1172_v0 }
 0x14b   : > { %v1174_v4 = vmul.f32 %v1173_v3, %v1155_v48 }
 0x14d   : > { %v1176_v11 = vsel %vm1175_vm9, %v1155_v48, %v1174_v4 }
 0x14e   : > { %v1179_v12 = vsel %vm1177_vm10, %v1178_v10, %v1176_v11 }
 0x14f   : > { %v2229_v14 = vpop.eup %2228  ;;  %v2154_v15 = vmul.f32 -1.442695, %v1179_v12 }
 0x150   : > { %v1186_v16 = vadd.f32 1.0, %v2229_v14 }
 0x151   : > { %2230 = vpow2.f32 %v2154_v15 }
 0x152   : > { %2232 = vrcp.f32 %v1186_v16  ;;  %v1199_v24 = vand.u32 2147483648, %v1186_v16  ;;  %v1197_v28 = vand.u32 2147483647, %v1186_v16  ;;  %vm1193_vm12 = vweird.f32 %v1186_v16 }
 0x154   : > { %v1200_v31 = vor.u32 1.1754944e-38, %v1199_v24  ;;  %vm1198_vm14 = vcmp.eq.f32.partialorder %v1197_v28, 8.507059e+37 }
 0x157   : > { %v2231_v17 = vpop.eup %2230 }
 0x158   : > { %v2233_v20 = vpop.eup %2232  ;;  %v1187_v21 = vadd.f32 1.0, %v2231_v17 }
 0x159   : > { %v1189_v22 = vmul.f32 %v2233_v20, %v1186_v16  ;;  %vm1194_vm11 = vweird.f32 %v2233_v20  ;;  %v1421_v16 = vpop.f32.mrf.mxu1 }
 0x15a   : > { %2234 = vrcp.f32 %v1187_v21  ;;  %vm1195_vm13 = vmor %vm1193_vm12, %vm1194_vm11  ;;  %v1214_v42 = vand.u32 2147483648, %v1187_v21  ;;  %v1212_v45 = vand.u32 2147483647, %v1187_v21  ;;  %vm1208_vm3 = vweird.f32 %v1187_v21 }
 0x15b   : > { %v1190_v23 = vsub.f32 1.0, %v1189_v22 }
 0x15c   : > { %v1215_v47 = vor.u32 1.1754944e-38, %v1214_v42  ;;  %vm1213_vm5 = vcmp.eq.f32.partialorder %v1212_v45, 8.507059e+37 }
 0x15d   : > { %v1191_v25 = vmul.f32 %v2233_v20, %v1190_v23 }
 0x15f   : > { %v1192_v29 = vadd.f32 %v2233_v20, %v1191_v25 }
 0x160   : > { %v2235_v30 = vpop.eup %2234 }
 0x161   : > { %v1196_v32 = vsel %vm1195_vm13, %v2233_v20, %v1192_v29  ;;  %v1204_v33 = vmul.f32 %v2235_v30, %v1187_v21  ;;  %vm1209_vm15 = vweird.f32 %v2235_v30 }
 0x162   : > { %v1201_v34 = vsel %vm1198_vm14, %v1200_v31, %v1196_v32  ;;  %vm1210_vm4 = vmor %vm1208_vm3, %vm1209_vm15  ;;  %v1422_v31 = vadd.f32 %v2219_v61, %v1421_v16  ;;  %v1395_v61 = vld [vmem:[%s2733_s12] sm:$0xf] }
 0x163   : > { %v1218_v38 = vmul.f32 %v1201_v34, %v2485_v26  ;;  %v1220_v39 = vmul.f32 %v1201_v34, %v2488_v27  ;;  %v1222_v40 = vmul.f32 %v1201_v34, %v2497_v36  ;;  %v1205_v41 = vsub.f32 1.0, %v1204_v33 }
 0x165   : > { %v1206_v43 = vmul.f32 %v2235_v30, %v1205_v41  ;;  %2156 = vmatmul.msk.f32.vlgmr.msrb.gmra.mxu2 %vm1052_vm2, %v1218_v38  ;;  %2159 = vmatmul.msk.f32.vlgmr.msra.gmra.mxu3 %vm1052_vm2, %v1220_v39 }
 0x166   : > { %2162 = vmatmul.msk.f32.vlgmr.msra.gmra.mxu0 %vm1052_vm2, %v1222_v40 }
 0x167   : > { %v1207_v46 = vadd.f32 %v2235_v30, %v1206_v43 }
 0x169   : > { %v1211_v26 = vsel %vm1210_vm4, %v2235_v30, %v1207_v46 }
 0x16a   : > { %v1216_v27 = vsel %vm1213_vm5, %v1215_v47, %v1211_v26 }
 0x16b   : > { %v1223_v36 = vmul.f32 %v1216_v27, %v2507_v44  ;;  %v1219_v48 = vmul.f32 %v1216_v27, %v2495_v35  ;;  %v1221_v49 = vmul.f32 %v1216_v27, %v2499_v37  ;;  %v1548_v37 = vld [vmem:[%s2739_s18] sm:$0xf] }
 0x16c   : > { %2180 = vmatpush.msk.msrb.mxu2 %vm1059_vm1, %v1548_v37  ;;  %2183 = vmatpush.msk.msra.mxu3 %vm1059_vm1, %v1548_v37 }
 0x16d   : > { %2157 = vmatmul.msk.f32.gmra.mxu2 %vm1052_vm2, %v1219_v48  ;;  %2160 = vmatmul.msk.f32.gmra.mxu3 %vm1052_vm2, %v1221_v49 }
 0x16e   : > { %2163 = vmatmul.msk.f32.gmra.mxu0 %vm1052_vm2, %v1223_v36 }
 0x16f   : > { %2186 = vmatpush.msk.msra.mxu0 %vm1059_vm1, %v1548_v37 }
 0x175   : > { %2169 = vmatmul.msk.f32.vlgmr.msra.gmra.mxu2 %vm1052_vm2, %v2446_v5  ;;  %2172 = vmatmul.msk.f32.vlgmr.msrb.gmra.mxu3 %vm1052_vm2, %v2450_v6 }
 0x176   : > { %2175 = vmatmul.msk.f32.vlgmr.msrb.gmra.mxu0 %vm1052_vm2, %v2471_v18  ;;  %2193 = vmatpush.msk.msrb.mxu3 %vm1059_vm1, %v1395_v61 }
 0x177   : > { %2196 = vmatpush.msk.msrb.mxu0 %vm1059_vm1, %v1395_v61 }
 0x17d   : > { %2170 = vmatmul.msk.f32.gmra.mxu2 %vm1052_vm2, %v2454_v7  ;;  %2173 = vmatmul.msk.f32.gmra.mxu3 %vm1052_vm2, %v2458_v8 }
 0x17e   : > { %2176 = vmatmul.msk.f32.gmra.mxu0 %vm1052_vm2, %v2475_v19 }
 0x1a4   : > { %v2554_v35 = vpop.f32.mrf.mxu2 }
 0x1ac   : > { %v2562_v44 = vpop.f32.mrf.mxu2 }
 0x1e3   : > { %v2567_v51 = vpop.f32.mrf.mxu0 }
 0x1e4   : > { %v1321_v56 = vmul.f32 %v2567_v51, %v2567_v51 }
 0x1e8   : > { %v2570_v52 = vpop.f32.mrf.mxu2  ;;  %v2572_v53 = vpop.f32.mrf.mxu3 }
 0x1e9   : > { %v1315_v54 = vmul.f32 %v2570_v52, %v2570_v52  ;;  %v1317_v55 = vmul.f32 %v2572_v53, %v2572_v53 }
 0x1eb   : > { %v1319_v57 = vadd.f32 %v1317_v55, %v1315_v54  ;;  %v2580_v58 = vpop.f32.mrf.mxu0 }
 0x1ec   : > { %v1322_v11 = vmul.f32 %v2580_v58, %v2580_v58 }
 0x1ed   : > { %v1323_v59 = vadd.f32 %v1321_v56, %v1319_v57 }
 0x1ef   : > { %v1325_v62 = vadd.f32 1e-12, %v1323_v59 }
 0x1f0   : > { %v2585_v63 = vpop.f32.mrf.mxu2  ;;  %v2587_v0 = vpop.f32.mrf.mxu3 }
 0x1f1   : > { %2236 = vrsqrt.f32 %v1325_v62  ;;  %v1316_v3 = vmul.f32 %v2585_v63, %v2585_v63  ;;  %v1318_v4 = vmul.f32 %v2587_v0, %v2587_v0  ;;  %vm1334_vm6 = vcmp.eq.f32.partialorder %v1325_v62, inf }
 0x1f2   : > { %v1337_v50 = vand.u32 2147483648, %v1325_v62  ;;  %vm1336_vm7 = vcmp.eq.f32.partialorder %v1325_v62, 0.0 }
 0x1f3   : > { %v1491_v10 = vpop.f32.mrf.mxu0  ;;  %v1320_v12 = vadd.f32 %v1318_v4, %v1316_v3 }
 0x1f4   : > { %v1612_v13 = vmul.f32 %v1491_v10, %v1419_v9  ;;  %v1503_v23 = vmul.f32 %v1491_v10, %v1491_v10 }
 0x1f5   : > { %v1324_v14 = vadd.f32 %v1322_v11, %v1320_v12 }
 0x1f6   : > { %2187 = vmatmul.msk.f32.vlgmr.msra.gmra.mxu0 %vm1052_vm2, %v1612_v13 }
 0x1f7   : > { %v2237_v15 = vpop.eup %2236  ;;  %v1326_v20 = vadd.f32 1e-12, %v1324_v14 }
 0x1f8   : > { %v1328_v17 = vmul.f32 %v2237_v15, %v1325_v62  ;;  %v1445_v21 = vpop.f32.mrf.mxu2  ;;  %v1468_v22 = vpop.f32.mrf.mxu3 }
 0x1f9   : > { %v1497_v24 = vmul.f32 %v1445_v21, %v1445_v21  ;;  %v1546_v25 = vmul.f32 %v1445_v21, %v1419_v9  ;;  %v1499_v28 = vmul.f32 %v1468_v22, %v1468_v22  ;;  %v1581_v29 = vmul.f32 %v1468_v22, %v1419_v9 }
 0x1fa   : > { %v1329_v30 = vmul.f32 %v2237_v15, %v1328_v17  ;;  %2238 = vrsqrt.f32 %v1326_v20  ;;  %vm1346_vm8 = vcmp.eq.f32.partialorder %v1326_v20, inf  ;;  %v1349_v11 = vand.u32 2147483648, %v1326_v20 }
 0x1fb   : > { %v1501_v32 = vadd.f32 %v1499_v28, %v1497_v24  ;;  %2181 = vmatmul.msk.f32.vlgmr.msrb.gmra.mxu2 %vm1052_vm2, %v1546_v25  ;;  %2184 = vmatmul.msk.f32.vlgmr.msra.gmra.mxu3 %vm1052_vm2, %v1581_v29  ;;  %v1494_v33 = vpop.f32.mrf.mxu0  ;;  %vm1348_vm9 = vcmp.eq.f32.partialorder %v1326_v20, 0.0 }
 0x1fc   : > { %v1330_v34 = vmul.f32 0.5, %v1329_v30  ;;  %v1613_v38 = vmul.f32 %v1494_v33, %v1422_v31  ;;  %v1504_v47 = vmul.f32 %v1494_v33, %v1494_v33 }
 0x1fd   : > { %v1505_v39 = vadd.f32 %v1503_v23, %v1501_v32 }
 0x1fe   : > { %v1331_v40 = vsub.f32 1.5, %v1330_v34  ;;  %2188 = vmatmul.msk.f32.gmra.mxu0 %vm1052_vm2, %v1613_v38 }
 0x1ff   : > { %v1507_v41 = vmul.f32 %v1505_v39, %v1419_v9 }
 0x200   : > { %v2239_v42 = vpop.eup %2238  ;;  %v1332_v43 = vmul.f32 %v2237_v15, %v1331_v40  ;;  %v1448_v45 = vpop.f32.mrf.mxu2  ;;  %v1645_v15 = vld [vmem:[%s2742_s21] sm:$0xff] }
 0x201   : > { %v1471_v46 = vpop.f32.mrf.mxu3  ;;  %v1340_v26 = vmul.f32 %v2239_v42, %v1326_v20  ;;  %v1498_v27 = vmul.f32 %v1448_v45, %v1448_v45  ;;  %v1547_v36 = vmul.f32 %v1448_v45, %v1422_v31  ;;  %2178 = vmatmul.msk.f32.vlgmr.msrb.gmra.mxu1 %vm1052_vm2, %v1507_v41  ;;  %1700 = vmatpush.msra.mxu2 %v1645_v15 }
 0x202   : > { %v1500_v48 = vmul.f32 %v1471_v46, %v1471_v46  ;;  %v1333_v49 = vmul.f32 %v1332_v43, %v1325_v62  ;;  %v1582_v37 = vmul.f32 %v1471_v46, %v1422_v31  ;;  %1667 = vmatpush.msra.mxu1 %v1645_v15 }
 0x203   : > { %v1341_v54 = vmul.f32 %v2239_v42, %v1340_v26  ;;  %2182 = vmatmul.msk.f32.gmra.mxu2 %vm1052_vm2, %v1547_v36 }
 0x204   : > { %v1502_v55 = vadd.f32 %v1500_v48, %v1498_v27  ;;  %v1335_v56 = vsel %vm1334_vm6, %v1325_v62, %v1333_v49  ;;  %2185 = vmatmul.msk.f32.gmra.mxu3 %vm1052_vm2, %v1582_v37  ;;  %2199 = vmatpush.msk.msrb.mxu1 %vm1059_vm1, %v1395_v61  ;;  %v2218_v48 = vld [vmem:[%s2772_s9] ss:$0 sm:$0xff] }
 0x205   : > { %v1338_v57 = vsel %vm1336_vm7, %v1337_v50, %v1335_v56  ;;  %v1342_v59 = vmul.f32 0.5, %v1341_v54  ;;  %v2220_v49 = vld [vmem:[%s2738_s17] ss:$0 sm:$0xff]  ;;  %v1046_v50 = vadd.f32 %v2218_v48, %v2554_v35 }
 0x206   : > { %v1506_v60 = vadd.f32 %v1504_v47, %v1502_v55  ;;  %v2164_v3 = vmul.f32 -1.442695, %v1338_v57  ;;  %v1842_v57 = vld [vmem:[%s2744_s23] sm:$0xf] }
 0x207   : > { %v1343_v4 = vsub.f32 1.5, %v1342_v59  ;;  %2202 = vmatpush.msk.msrb.mxu2 %vm1059_vm1, %v1842_v57 }
 0x208   : > { %v1508_v9 = vmul.f32 %v1506_v60, %v1422_v31  ;;  %2240 = vpow2.f32 %v2164_v3 }
 0x209   : > { %v1344_v10 = vmul.f32 %v2239_v42, %v1343_v4 }
 0x20a   : > { %2179 = vmatmul.msk.f32.gmra.mxu1 %vm1052_vm2, %v1508_v9 }
 0x20b   : > { %v1345_v62 = vmul.f32 %v1344_v10, %v1326_v20 }
 0x20d   : > { %v1347_v12 = vsel %vm1346_vm8, %v1326_v20, %v1345_v62 }
 0x20e   : > { %v2241_v13 = vpop.eup %2240  ;;  %v1350_v14 = vsel %vm1348_vm9, %v1349_v11, %v1347_v12 }
 0x20f   : > { %v1357_v16 = vadd.f32 1.0, %v2241_v13  ;;  %v2165_v17 = vmul.f32 -1.442695, %v1350_v14 }
 0x211   : > { %2242 = vrcp.f32 %v1357_v16  ;;  %v1370_v20 = vand.u32 2147483648, %v1357_v16  ;;  %v1368_v29 = vand.u32 2147483647, %v1357_v16  ;;  %vm1364_vm11 = vweird.f32 %v1357_v16 }
 0x212   : > { %2244 = vpow2.f32 %v2165_v17 }
 0x213   : > { %v1371_v31 = vor.u32 1.1754944e-38, %v1370_v20  ;;  %vm1369_vm13 = vcmp.eq.f32.partialorder %v1368_v29, 8.507059e+37 }
 0x217   : > { %v2243_v21 = vpop.eup %2242 }
 0x218   : > { %v2245_v22 = vpop.eup %2244  ;;  %v1360_v23 = vmul.f32 %v2243_v21, %v1357_v16  ;;  %vm1365_vm10 = vweird.f32 %v2243_v21 }
 0x219   : > { %v1358_v24 = vadd.f32 1.0, %v2245_v22  ;;  %vm1366_vm12 = vmor %vm1364_vm11, %vm1365_vm10 }
 0x21a   : > { %v1361_v25 = vsub.f32 1.0, %v1360_v23 }
 0x21b   : > { %2246 = vrcp.f32 %v1358_v24  ;;  %v1385_v43 = vand.u32 2147483648, %v1358_v24  ;;  %v1383_v46 = vand.u32 2147483647, %v1358_v24  ;;  %vm1379_vm15 = vweird.f32 %v1358_v24 }
 0x21c   : > { %v1362_v28 = vmul.f32 %v2243_v21, %v1361_v25 }
 0x21d   : > { %v1386_v26 = vor.u32 1.1754944e-38, %v1385_v43  ;;  %vm1384_vm4 = vcmp.eq.f32.partialorder %v1383_v46, 8.507059e+37 }
 0x21e   : > { %v1363_v30 = vadd.f32 %v2243_v21, %v1362_v28 }
 0x220   : > { %v1367_v32 = vsel %vm1366_vm12, %v2243_v21, %v1363_v30 }
 0x221   : > { %v2247_v33 = vpop.eup %2246  ;;  %v1372_v34 = vsel %vm1369_vm13, %v1371_v31, %v1367_v32 }
 0x222   : > { %v1389_v38 = vmul.f32 %v1372_v34, %v2570_v52  ;;  %v1391_v39 = vmul.f32 %v1372_v34, %v2572_v53  ;;  %v1393_v40 = vmul.f32 %v1372_v34, %v2567_v51  ;;  %v1375_v41 = vmul.f32 %v2247_v33, %v1358_v24 }
 0x223   : > { %vm1380_vm14 = vweird.f32 %v2247_v33 }
 0x224   : > { %v1376_v42 = vsub.f32 1.0, %v1375_v41  ;;  %2194 = vmatmul.msk.f32.vlgmr.msrb.gmra.mxu3 %vm1052_vm2, %v1389_v38  ;;  %2197 = vmatmul.msk.f32.vlgmr.msrb.gmra.mxu0 %vm1052_vm2, %v1391_v39  ;;  %vm1381_vm3 = vmor %vm1379_vm15, %vm1380_vm14 }
 0x226   : > { %v1377_v45 = vmul.f32 %v2247_v33, %v1376_v42 }
 0x228   : > { %v1378_v47 = vadd.f32 %v2247_v33, %v1377_v45 }
 0x22a   : > { %v1382_v27 = vsel %vm1381_vm3, %v2247_v33, %v1378_v47 }
 0x22b   : > { %v1387_v52 = vsel %vm1384_vm4, %v1386_v26, %v1382_v27 }
 0x22c   : > { %v1392_v53 = vmul.f32 %v1387_v52, %v2587_v0  ;;  %v1390_v51 = vmul.f32 %v1387_v52, %v2585_v63  ;;  %v1394_v36 = vmul.f32 %v1387_v52, %v2580_v58  ;;  %v1049_v63 = vadd.f32 %v2218_v48, %v2562_v44 }
 0x22e   : > { %2195 = vmatmul.msk.f32.gmra.mxu3 %vm1052_vm2, %v1390_v51  ;;  %2198 = vmatmul.msk.f32.gmra.mxu0 %vm1052_vm2, %v1392_v53 }
 0x273   : > { %v1637_v59 = vpop.f32.mrf.mxu0 }
 0x27b   : > { %v1640_v61 = vpop.f32.mrf.mxu0 }
 0x27e   : > { %v1540_v37 = vpop.f32.mrf.mxu1  ;;  %v1606_v35 = vpop.f32.mrf.mxu3 }
 0x27f   : > { %v1541_v0 = vadd.f32 %v2220_v49, %v1540_v37  ;;  %v1575_v10 = vpop.f32.mrf.mxu2  ;;  %v2221_v37 = vld [vmem:[%s2740_s19] ss:$0 sm:$0xff] }
 0x281   : > { %v1643_v54 = vadd.f32 %v1541_v0, %v1046_v50 }
 0x283   : > { %2189 = vmatmul.msk.f32.vlgmr.msra.gmra.mxu1 %vm941_vm0, %v1643_v54 }
 0x287   : > { %v1543_v58 = vpop.f32.mrf.mxu1  ;;  %v1609_v60 = vpop.f32.mrf.mxu3 }
 0x288   : > { %v1544_v55 = vadd.f32 %v2220_v49, %v1543_v58  ;;  %v1578_v24 = vpop.f32.mrf.mxu2 }
 0x28a   : > { %v1644_v56 = vadd.f32 %v1544_v55, %v1049_v63  ;;  %v2222_v63 = vld [vmem:[%s2741_s20] ss:$0 sm:$0xff] }
 0x28c   : > { %2190 = vmatmul.msk.f32.gmra.mxu1 %vm941_vm0, %v1644_v56 }
 0x294   : > { %2200 = vmatmul.msk.f32.vlgmr.msrb.gmra.mxu1 %vm1052_vm2, %v1393_v40 }
 0x29c   : > { %2201 = vmatmul.msk.f32.gmra.mxu1 %vm1052_vm2, %v1394_v36 }
 0x2a1   : > { %v1797_v62 = vpop.f32.mrf.mxu0 }
 0x2a2   : > { %v2645_v15 = vadd.f32 %v1797_v62, %v1606_v35 }
 0x2a4   : > { %v1834_v22 = vmul.f32 %v2645_v15, %v2645_v15 }
 0x2a7   : > { %v1768_v9 = vpop.f32.mrf.mxu3 }
 0x2a8   : > { %v2641_v13 = vadd.f32 %v1768_v9, %v1575_v10 }
 0x2aa   : > { %v1832_v16 = vmul.f32 %v2641_v13, %v2641_v13 }
 0x2ab   : > { %v1800_v25 = vpop.f32.mrf.mxu0 }
 0x2ac   : > { %v1836_v20 = vadd.f32 %v1834_v22, %v1832_v16  ;;  %v2658_v30 = vadd.f32 %v1800_v25, %v1609_v60 }
 0x2ae   : > { %v1835_v34 = vmul.f32 %v2658_v30, %v2658_v30 }
 0x2b1   : > { %v1771_v17 = vpop.f32.mrf.mxu3 }
 0x2b2   : > { %v2654_v28 = vadd.f32 %v1771_v17, %v1578_v24 }
 0x2b4   : > { %v1833_v32 = vmul.f32 %v2654_v28, %v2654_v28 }
 0x2b6   : > { %v1837_v39 = vadd.f32 %v1835_v34, %v1833_v32 }
 0x300   : > { %v1669_v3 = vpop.f32.mrf.mxu1 }
 0x301   : > { %v1675_v44 = vsub.f32 %v1643_v54, %v1669_v3 }
 0x303   : > { %v1677_v4 = vmul.f32 %v1675_v44, %v1675_v44 }
 0x305   : > { %2191 = vmatmul.msk.f32.vlgmr.msra.gmra.mxu2 %vm941_vm0, %v1677_v4 }
 0x309   : > { %v1672_v11 = vpop.f32.mrf.mxu1 }
 0x30a   : > { %v2639_v12 = vsub.f32 %v1644_v56, %v1672_v11 }
 0x30c   : > { %v1678_v14 = vmul.f32 %v2639_v12, %v2639_v12 }
 0x30e   : > { %2192 = vmatmul.msk.f32.gmra.mxu2 %vm941_vm0, %v1678_v14 }
 0x311   : > { %v1826_v21 = vpop.f32.mrf.mxu1 }
 0x312   : > { %v2652_v23 = vadd.f32 %v1826_v21, %v1637_v59 }
 0x314   : > { %v1838_v29 = vmul.f32 %v2652_v23, %v2652_v23 }
 0x316   : > { %v1840_v31 = vadd.f32 %v1838_v29, %v1836_v20 }
 0x318   : > { %2203 = vmatmul.msk.f32.vlgmr.msrb.gmra.mxu2 %vm1052_vm2, %v1840_v31 }
 0x319   : > { %v1829_v33 = vpop.f32.mrf.mxu1 }
 0x31a   : > { %v2665_v38 = vadd.f32 %v1829_v33, %v1640_v61 }
 0x31c   : > { %v1839_v40 = vmul.f32 %v2665_v38, %v2665_v38 }
 0x31e   : > { %v1841_v41 = vadd.f32 %v1839_v40, %v1837_v39 }
 0x320   : > { %2204 = vmatmul.msk.f32.gmra.mxu2 %vm1052_vm2, %v1841_v41 }
 0x388   : > { %v1702_v42 = vpop.f32.mrf.mxu2 }
 0x389   : > { %v1703_v43 = vadd.f32 1e-05, %v1702_v42 }
 0x38b   : > { %2248 = vrsqrt.f32 %v1703_v43  ;;  %vm1714_vm5 = vweird.f32 %v1703_v43 }
 0x391   : > { %v1705_v45 = vpop.f32.mrf.mxu2  ;;  %v2249_v46 = vpop.eup %2248 }
 0x392   : > { %v1706_v47 = vadd.f32 1e-05, %v1705_v45  ;;  %v1709_v26 = vmul.f32 %v2249_v46, %v1703_v43  ;;  %vm1715_vm1 = vweird.f32 %v2249_v46 }
 0x393   : > { %vm1716_vm6 = vmor %vm1714_vm5, %vm1715_vm1 }
 0x394   : > { %2250 = vrsqrt.f32 %v1706_v47  ;;  %v1710_v27 = vmul.f32 %v2249_v46, %v1709_v26  ;;  %vm1724_vm8 = vweird.f32 %v1706_v47 }
 0x396   : > { %v1711_v52 = vmul.f32 0.5, %v1710_v27 }
 0x398   : > { %v1712_v53 = vsub.f32 1.5, %v1711_v52 }
 0x39a   : > { %v2251_v51 = vpop.eup %2250  ;;  %v1713_v36 = vmul.f32 %v2249_v46, %v1712_v53 }
 0x39b   : > { %v1719_v48 = vmul.f32 %v2251_v51, %v1706_v47  ;;  %v1869_v49 = vpop.f32.mrf.mxu2  ;;  %vm1725_vm7 = vweird.f32 %v2251_v51 }
 0x39c   : > { %v1870_v50 = vadd.f32 1e-05, %v1869_v49  ;;  %v1717_v0 = vsel %vm1716_vm6, %v2249_v46, %v1713_v36  ;;  %vm1726_vm9 = vmor %vm1724_vm8, %vm1725_vm7 }
 0x39d   : > { %v1720_v54 = vmul.f32 %v2251_v51, %v1719_v48  ;;  %v1728_v58 = vmul.f32 %v1717_v0, %v1675_v44 }
 0x39e   : > { %2252 = vrsqrt.f32 %v1870_v50  ;;  %vm1881_vm11 = vweird.f32 %v1870_v50 }
 0x39f   : > { %v1721_v55 = vmul.f32 0.5, %v1720_v54  ;;  %v1734_v56 = vmul.f32 %v2221_v37, %v1728_v58 }
 0x3a1   : > { %v1722_v57 = vsub.f32 1.5, %v1721_v55  ;;  %v1740_v35 = vadd.f32 %v2222_v63, %v1734_v56 }
 0x3a3   : > { %v1723_v59 = vmul.f32 %v2251_v51, %v1722_v57  ;;  %v1872_v60 = vpop.f32.mrf.mxu2  ;;  %v1901_v3 = vadd.f32 %v1740_v35, %v2421_v1  ;;  %v2223_v1 = vld [vmem:[%s2743_s22] ss:$0 sm:$0xff] }
 0x3a4   : > { %v2253_v61 = vpop.eup %2252  ;;  %v1873_v44 = vadd.f32 1e-05, %v1872_v60 }
 0x3a5   : > { %v1727_v4 = vsel %vm1726_vm9, %v2251_v51, %v1723_v59  ;;  %v1876_v9 = vmul.f32 %v2253_v61, %v1870_v50  ;;  %1903 = vst.msk [vmem:[%s908_s8] sm:$0xff] %vm941_vm0, %v1901_v3  ;;  %vm1882_vm10 = vweird.f32 %v2253_v61 }
 0x3a6   : > { %v1729_v10 = vmul.f32 %v1727_v4, %v2639_v12  ;;  %2254 = vrsqrt.f32 %v1873_v44  ;;  %vm1883_vm12 = vmor %vm1881_vm11, %vm1882_vm10 }
 0x3a7   : > { %v1877_v62 = vmul.f32 %v2253_v61, %v1876_v9 }
 0x3a8   : > { %v1735_v11 = vmul.f32 %v2221_v37, %v1729_v10 }
 0x3a9   : > { %v1878_v14 = vmul.f32 0.5, %v1877_v62 }
 0x3aa   : > { %v1741_v16 = vadd.f32 %v2222_v63, %v1735_v11 }
 0x3ab   : > { %v1879_v17 = vsub.f32 1.5, %v1878_v14 }
 0x3ac   : > { %v2255_v21 = vpop.eup %2254  ;;  %v1902_v22 = vadd.f32 %v1741_v16, %v2423_v2 }
 0x3ad   : > { %v1880_v24 = vmul.f32 %v2253_v61, %v1879_v17  ;;  %v1886_v25 = vmul.f32 %v2255_v21, %v1873_v44  ;;  %vm1892_vm13 = vweird.f32 %v2255_v21 }
 0x3ae   : > { %1904 = vst.msk [vmem:[%s908_s8 + $0x8] sm:$0xff] %vm941_vm0, %v1902_v22  ;;  %vm1891_vm0 = vweird.f32 %v1873_v44 }
 0x3af   : > { %v1884_v12 = vsel %vm1883_vm12, %v2253_v61, %v1880_v24  ;;  %v1887_v20 = vmul.f32 %v2255_v21, %v1886_v25  ;;  %vm1893_vm14 = vmor %vm1891_vm0, %vm1892_vm13 }
 0x3b0   : > { %v1899_v29 = vmul.f32 %v2223_v1, %v1884_v12 }
 0x3b1   : > { %v1888_v31 = vmul.f32 0.5, %v1887_v20 }
 0x3b2   : > { %v1905_v32 = vmul.f32 %v1899_v29, %v2641_v13  ;;  %v1911_v2 = vmul.f32 %v1899_v29, %v2645_v15  ;;  %v1917_v33 = vmul.f32 %v1899_v29, %v2652_v23 }
 0x3b3   : > { %v1889_v34 = vsub.f32 1.5, %v1888_v31 }
 0x3b4   : > { %v1907_v39 = vadd.f32 %v1905_v32, %v2446_v5  ;;  %v1913_v40 = vadd.f32 %v1911_v2, %v2450_v6  ;;  %v1919_v13 = vadd.f32 %v1917_v33, %v2471_v18 }
 0x3b5   : > { %v1890_v15 = vmul.f32 %v2255_v21, %v1889_v34 }
 0x3b6   : > { %1909 = vst.msk [vmem:[%s914_s10] sm:$0xff] %vm1052_vm2, %v1907_v39 }
 0x3b7   : > { %1915 = vst.msk [vmem:[%s920_s6] sm:$0xff] %vm1052_vm2, %v1913_v40  ;;  %v1894_v23 = vsel %vm1893_vm14, %v2255_v21, %v1890_v15 }
 0x3b8   : > { %1921 = vst.msk [vmem:[%s926_s3] sm:$0xff] %vm1052_vm2, %v1919_v13  ;;  %v1900_v41 = vmul.f32 %v2223_v1, %v1894_v23 }
 0x3ba   : > { %v1906_v5 = vmul.f32 %v1900_v41, %v2654_v28  ;;  %v1912_v6 = vmul.f32 %v1900_v41, %v2658_v30  ;;  %v1918_v18 = vmul.f32 %v1900_v41, %v2665_v38 }
 0x3bc   : > { %v1908_v42 = vadd.f32 %v1906_v5, %v2454_v7  ;;  %v1914_v43 = vadd.f32 %v1912_v6, %v2458_v8  ;;  %v1920_v45 = vadd.f32 %v1918_v18, %v2475_v19 }
 0x3be   : > { %1910 = vst.msk [vmem:[%s914_s10 + $0x8] sm:$0xff] %vm1052_vm2, %v1908_v42 }
 0x3bf   : > { %1916 = vst.msk [vmem:[%s920_s6 + $0x8] sm:$0xff] %vm1052_vm2, %v1914_v43 }
 0x3c0   : > { %1922 = vst.msk [vmem:[%s926_s3 + $0x8] sm:$0xff] %vm1052_vm2, %v1920_v45 }
 0x3c1 PF: > { %s38_s7 = sadd.s32 1, %s2262_s7  }
 0x3c2   : > { %p35_p4 = scmp.ge.s32.totalorder %s38_s7, 4  }
 0x3c4   :  { %37 = sbr.rel (!%p35_p4) target bundleno = 13 (0xd), region = 191 }

// kernel: generator_apply.50
= control target key start
LH: loop header
LB: loop body
LE: loop exit
PB: predicated region body
PF: predicated region fallthrough
CT: control target
= control target key end

     0   :  { %s1971_s0 = inlined_call_operand.vmem [shape: f32[32,8], index: 0, kind: input, shape index: {}]   ;;  %s1972_s1 = inlined_call_operand.vmem [shape: f32[32,4], index: 1, kind: input, shape index: {}]   ;;  %s1973_s2 = inlined_call_operand.vmem [shape: f32[32,4], index: 2, kind: input, shape index: {}]   ;;  %s1974_s3 = inlined_call_operand.vmem [shape: f32[32,4], index: 3, kind: input, shape index: {}]   ;;  %s1975_s4 = inlined_call_operand.vmem [shape: f32[32,3], index: 4, kind: input, shape index: {}]   ;;  %s1976_s5 = inlined_call_operand.vmem [shape: f32[4,2], index: 5, kind: input, shape index: {}]   ;;  %s1977_s6 = inlined_call_operand.vmem [shape: f32[4,2], index: 6, kind: input, shape index: {}]   ;;  %s1978_s7 = inlined_call_operand.vmem [shape: f32[8,32], index: 7, kind: input, shape index: {}]   ;;  %s1979_s8 = inlined_call_operand.vmem [shape: f32[1,32], index: 8, kind: input, shape index: {}]   ;;  %s1980_s9 = inlined_call_operand.vmem [shape: f32[4,32], index: 9, kind: input, shape index: {}]   ;;  %s1981_s10 = inlined_call_operand.vmem [shape: f32[1,2], index: 10, kind: input, shape index: {}]   ;;  %s1982_s11 = inlined_call_operand.vmem [shape: f32[32,2], index: 11, kind: output, shape index: {0}]   ;;  %s1983_s12 = inlined_call_operand.vmem [shape: f32[32,2], index: 12, kind: output, shape index: {1}]   ;;  %s1984_s13 = inlined_call_operand.vmem [shape: f32[32,2], index: 13, kind: output, shape index: {2}]   ;;  %s1985_s14 = inlined_call_operand.vmem [shape: f32[32,2], index: 14, kind: output, shape index: {3}]   ;;  %s1986_s15 = inlined_call_operand.vmem [shape: f32[32,2], index: 15, kind: output, shape index: {4}]   ;;  %s1987_s16 = inlined_call_operand.vmem [shape: f32[32,2], index: 16, kind: output, shape index: {5}]   ;;  %s1988_s17 = inlined_call_operand.vmem [shape: f32[32,32], index: 17, kind: output, shape index: {6}]   ;;  %s1989_s18 = inlined_call_operand.vmem [shape: f32[32,32], index: 18, kind: output, shape index: {7}]   ;;  %s1990_s19 = inlined_call_operand.vmem [shape: f32[32,32], index: 19, kind: output, shape index: {8}]   ;;  %s1991_s20 = inlined_call_operand.vmem [shape: f32[32,32], index: 20, kind: output, shape index: {9}]  }
   0x1   :  { %1992 = sst [smem:[#allocation2_spill]] %s1971_s0 }
   0x2   :  { %1993 = sst [smem:[#allocation3_spill]] %s1972_s1  ;;  %s1813_s1 = smov 0  }
   0x3   :  { %1994 = sst [smem:[#allocation4_spill]] %s1973_s2 }
   0x4   :  { %1995 = sst [smem:[#allocation5_spill]] %s1974_s3 }
   0x5   :  { %1996 = sst [smem:[#allocation6_spill]] %s1975_s4 }
   0x6 LB: > { %s1609_s22 = sadd.s32 4294967295, %s1703_s1   ;;  %p1613_p0 = scmp.ge.s32.totalorder %s1703_s1, 1  ;;  %s1703_s1 = sphi %s1813_s1, %s31_s1  }
   0x7   : > { %p626_p1 = scmp.lt.s32.totalorder %s1703_s1, 3 }
   0x9   : > { %p627_p2 = pnand %p1613_p0, %p626_p1 }
   0xa   : > { %s1614_s3 = sshll.u32 (!%p627_p2), %s1609_s22, 1  ;;  %s1997_s30 = sld [smem:[#allocation3_spill]] (!%p627_p2) }
   0xb   : > { %630 = sbr.rel (%p627_p2) target bundleno = 192 (0xc0), region = 64  ;;  %p750_p3 = scmp.lt.s32.totalorder (!%p627_p2), %s1614_s3, 3 }
   0xc   : > { %s1998_s23 = sld [smem:[#allocation6_spill]] (!%p627_p2) }
   0xd   : > { %s1999_s27 = sld [smem:[#allocation4_spill]] (!%p627_p2) }
  0x10   : > { %v847_v0 = vld [vmem:[%s1976_s5] sm:$0xf]  ;;  %vm858_vm0 = vcmask 1043456   ;;  %s2003_s3 = smov (!%p750_p3, %s1614_s3), 3  ;;  %v1705_v3 = vmov 2   ;;  %vm851_vm1 = vcmask 31744  }
  0x11   : > { %v848_v1 = vld [vmem:[%s1977_s6] sm:$0xf]  ;;  %1675 = vmatpush.msk.msra.mxu2 %vm858_vm0, %v847_v0  ;;  %1644 = vmatpush.msk.msra.mxu0 %vm858_vm0, %v847_v0  ;;  %s1837_s28 = sshll.u32 %s2003_s3, 3  ;;  %v1706_v4 = vmov 0   ;;  %v1707_v5 = vmov 1   ;;  %vm1167_vm2 = vcmask 64512  }
  0x12   : > { %1676 = vmatpush.msk.msra.mxu3 %vm858_vm0, %v848_v1  ;;  %v849_v2 = vld [vmem:[%s1980_s9] sm:$0xf]  ;;  %1647 = vmatpush.msk.msra.mxu1 %vm858_vm0, %v848_v1  ;;  %s759_s0 = scalar_lea.vmem %s1997_s30, %s1837_s28  ;;  %s777_s24 = scalar_lea.vmem %s1998_s23, %s1837_s28  ;;  %vm902_vm3 = vcmask 15360   ;;  %vm963_vm4 = vcmask 261120  }
  0x13   : > { %1650 = vmatpush.msk.msrb.mxu2 %vm858_vm0, %v849_v2  ;;  %1690 = vset.pattern.permute.xlu1 %v1705_v3  ;;  %v840_v6 = vld [vmem:[%s759_s0 + $0x8] sm:$0xff]  ;;  %v839_v7 = vld [vmem:[%s759_s0] sm:$0xff]  ;;  %s765_s4 = scalar_lea.vmem %s1999_s27, %s1837_s28  ;;  %s2000_s0 = sld [smem:[#allocation5_spill]] }
  0x14   : > { %1653 = vmatpush.msk.msrb.mxu3 %vm858_vm0, %v847_v0  ;;  %1659 = vmatpush.msk.msrb.mxu1 %vm858_vm0, %v849_v2  ;;  %v845_v8 = vld [vmem:[%s777_s24] sm:$0xff]  ;;  %v846_v10 = vld [vmem:[%s777_s24 + $0x8] sm:$0xff]  ;;  %s2001_s24 = sld [smem:[#allocation2_spill]]  ;;  %s831_s23 = scalar_lea.vmem %s1990_s19, %s1837_s28 }
  0x15   : > { %1656 = vmatpush.msk.msrb.mxu0 %vm858_vm0, %v848_v1  ;;  %1688 = vset.pattern.permute.xlu0 %v1706_v4  ;;  %v1162_v9 = vld [vmem:[%s1978_s7] sm:$0xff]  ;;  %v842_v12 = vld [vmem:[%s765_s4 + $0x8] sm:$0xff]  ;;  %s807_s25 = scalar_lea.vmem %s1986_s15, %s1837_s28  ;;  %s825_s27 = scalar_lea.vmem %s1989_s18, %s1837_s28 }
  0x16   : > { %1692 = vset.pattern.permute.xlu2 %v1707_v5  ;;  %1646 = vmatmul.msk.f32.vlgmr.msra.gmra.mxu2 %vm851_vm1, %v840_v6  ;;  %v841_v11 = vld [vmem:[%s765_s4] sm:$0xff]  ;;  %s783_s4 = scalar_lea.vmem %s1982_s11, %s1837_s28  ;;  %s789_s30 = scalar_lea.vmem %s1983_s12, %s1837_s28 }
  0x17   : > { %1649 = vmatmul.msk.f32.vlgmr.msra.gmra.mxu3 %vm851_vm1, %v840_v6  ;;  %1645 = vmatmul.msk.f32.vlgmr.msra.gmra.mxu0 %vm851_vm1, %v839_v7  ;;  %v1889_v19 = vld [vmem:[%s1981_s10] ss:$0 sm:$0xff]  ;;  %s819_s26 = scalar_lea.vmem %s1988_s17, %s1837_s28 }
  0x18   : > { %1648 = vmatmul.msk.f32.vlgmr.msra.gmra.mxu1 %vm851_vm1, %v839_v7  ;;  %1093 = vperm.xlu1 %1690, %v845_v8   ;;  %v1696_v49 = vld [vmem:[%s1979_s8] ss:$0 sm:$0xff] }
  0x19   : > { %1662 = vmatpush.msk.msra.mxu2 %vm858_vm0, %v847_v0  ;;  %1665 = vmatpush.msk.msra.mxu3 %vm858_vm0, %v848_v1  ;;  %s771_s21 = scalar_lea.vmem %s2000_s0, %s1837_s28  ;;  %s801_s0 = scalar_lea.vmem %s1985_s14, %s1837_s28 }
  0x1a   : > { %887 = vperm.xlu0 %1688, %v845_v8   ;;  %1189 = vmatpush.msra.mxu1 %v1162_v9  ;;  %s753_s2 = scalar_lea.vmem %s2001_s24, %s1837_s28  ;;  %v843_v13 = vld [vmem:[%s771_s21] sm:$0xff]  ;;  %v844_v15 = vld [vmem:[%s771_s21 + $0x8] sm:$0xff]  ;;  %s813_s21 = scalar_lea.vmem %s1987_s16, %s1837_s28 }
  0x1b   : > { %1668 = vmatpush.msk.msra.mxu0 %vm858_vm0, %v849_v2  ;;  %1000 = vperm.xlu2 %1692, %v846_v10   ;;  %v1160_v14 = vld [vmem:[%s753_s2] sm:$0xff]  ;;  %v1161_v16 = vld [vmem:[%s753_s2 + $0x8] sm:$0xff] }
  0x1e   : > { %1651 = vmatmul.msk.f32.vlgmr.msrb.gmra.mxu2 %vm851_vm1, %v839_v7 }
  0x1f   : > { %1654 = vmatmul.msk.f32.vlgmr.msrb.gmra.mxu3 %vm851_vm1, %v841_v11  ;;  %1657 = vmatmul.msk.f32.vlgmr.msrb.gmra.mxu0 %vm851_vm1, %v841_v11 }
  0x20   : > { %1660 = vmatmul.msk.f32.vlgmr.msrb.gmra.mxu1 %vm851_vm1, %v841_v11  ;;  %1691 = vset.pattern.permute.xlu1 %v1706_v4 }
  0x21   : > { %892 = vperm.xlu1 %1691, %v846_v10  }
  0x22   : > { %1689 = vset.pattern.permute.xlu0 %v1707_v5 }
  0x23   : > { %996 = vperm.xlu0 %1689, %v845_v8   ;;  %1693 = vset.pattern.permute.xlu2 %v1705_v3 }
  0x24   : > { %1097 = vperm.xlu2 %1693, %v846_v10  }
  0x26   : > { %1652 = vmatmul.msk.f32.gmra.mxu2 %vm851_vm1, %v840_v6 }
  0x27   : > { %1655 = vmatmul.msk.f32.gmra.mxu3 %vm851_vm1, %v842_v12  ;;  %1658 = vmatmul.msk.f32.gmra.mxu0 %vm851_vm1, %v842_v12 }
  0x28   : > { %1661 = vmatmul.msk.f32.gmra.mxu1 %vm851_vm1, %v842_v12 }
  0x2b   : > { %1694 = vset.pattern.permute.xlu0 %v1705_v3 }
  0x2e   : > { %1663 = vmatmul.msk.f32.vlgmr.msra.gmra.mxu2 %vm851_vm1, %v843_v13 }
  0x2f   : > { %1666 = vmatmul.msk.f32.vlgmr.msra.gmra.mxu3 %vm851_vm1, %v843_v13  ;;  %1669 = vmatmul.msk.f32.vlgmr.msra.gmra.mxu0 %vm851_vm1, %v843_v13 }
  0x30   : > { %1671 = vmatmul.msk.f32.vlgmr.msra.gmra.mxu1 %vm1167_vm2, %v1160_v14 }
  0x36   : > { %1664 = vmatmul.msk.f32.gmra.mxu2 %vm851_vm1, %v844_v15 }
  0x37   : > { %1667 = vmatmul.msk.f32.gmra.mxu3 %vm851_vm1, %v844_v15  ;;  %1670 = vmatmul.msk.f32.gmra.mxu0 %vm851_vm1, %v844_v15 }
  0x38   : > { %1672 = vmatmul.msk.f32.gmra.mxu1 %vm1167_vm2, %v1161_v16 }
  0x75   : > { %v1001_v41 = vpop.permute.xlu2 %1000 }
  0x7e   : > { %v1098_v0 = vpop.permute.xlu2 %1097 }
  0x8a   : > { %v1884_v17 = vpop.permute.xlu1 %1093 }
  0x8c   : > { %v888_v18 = vpop.permute.xlu0 %887 }
  0x93   : > { %v893_v26 = vpop.permute.xlu1 %892 }
  0x94   : > { %v879_v20 = vpop.f32.mrf.mxu0 }
  0x95   : > { %v925_v21 = vpop.f32.mrf.mxu1  ;;  %v895_v22 = vadd.f32 %v888_v18, %v879_v20  ;;  %v997_v31 = vpop.permute.xlu0 %996 }
  0x96   : > { %v931_v23 = vadd.f32 %v925_v21, %v888_v18 }
  0x97   : > { %v900_v24 = vmul.f32 %v1889_v19, %v895_v22 }
  0x98   : > { %v933_v25 = vmul.f32 %v1889_v19, %v931_v23 }
  0x99   : > { %903 = vst.msk [vmem:[%s783_s4] sm:$0xff] %vm902_vm3, %v900_v24  ;;  %v882_v27 = vpop.f32.mrf.mxu2 }
  0x9a   : > { %v928_v28 = vpop.f32.mrf.mxu3  ;;  %935 = vst.msk [vmem:[%s801_s0] sm:$0xff] %vm902_vm3, %v933_v25  ;;  %v896_v29 = vadd.f32 %v893_v26, %v882_v27 }
  0x9b   : > { %v932_v30 = vadd.f32 %v928_v28, %v893_v26 }
  0x9c   : > { %v901_v32 = vmul.f32 %v1889_v19, %v896_v29  ;;  %v1026_v35 = vpop.f32.mrf.mxu0 }
  0x9d   : > { %v934_v33 = vmul.f32 %v1889_v19, %v932_v30  ;;  %v1055_v34 = vpop.f32.mrf.mxu1  ;;  %v1032_v36 = vadd.f32 %v1026_v35, %v997_v31 }
  0x9e   : > { %1061 = vst.msk [vmem:[%s831_s23] sm:$0xff] %vm963_vm4, %v1055_v34 }
  0x9f   : > { %904 = vst.msk [vmem:[%s783_s4 + $0x8] sm:$0xff] %vm902_vm3, %v901_v32  ;;  %v1034_v37 = vmul.f32 %v1889_v19, %v1032_v36  ;;  %s795_s4 = scalar_lea.vmem %s1984_s13, %s1837_s28 }
  0xa0   : > { %936 = vst.msk [vmem:[%s801_s0 + $0x8] sm:$0xff] %vm902_vm3, %v934_v33 }
  0xa1   : > { %v957_v38 = vpop.f32.mrf.mxu2  ;;  %1036 = vst.msk [vmem:[%s807_s25] sm:$0xff] %vm902_vm3, %v1034_v37 }
  0xa2   : > { %v989_v39 = vpop.f32.mrf.mxu3  ;;  %964 = vst.msk [vmem:[%s825_s27] sm:$0xff] %vm963_vm4, %v957_v38 }
  0xa3   : > { %v1003_v40 = vadd.f32 %v997_v31, %v989_v39 }
  0xa4   : > { %v1029_v44 = vpop.f32.mrf.mxu0 }
  0xa5   : > { %v1005_v42 = vmul.f32 %v1889_v19, %v1003_v40  ;;  %v1058_v43 = vpop.f32.mrf.mxu1  ;;  %v1033_v45 = vadd.f32 %v1029_v44, %v1001_v41 }
  0xa6   : > { %1062 = vst.msk [vmem:[%s831_s23 + $0x8] sm:$0xff] %vm963_vm4, %v1058_v43  ;;  %s837_s23 = scalar_lea.vmem %s1991_s20, %s1837_s28 }
  0xa7   : > { %1007 = vst.msk [vmem:[%s789_s30] sm:$0xff] %vm902_vm3, %v1005_v42  ;;  %v1035_v46 = vmul.f32 %v1889_v19, %v1033_v45 }
  0xa9   : > { %v960_v47 = vpop.f32.mrf.mxu2  ;;  %1037 = vst.msk [vmem:[%s807_s25 + $0x8] sm:$0xff] %vm902_vm3, %v1035_v46 }
  0xaa   : > { %v992_v48 = vpop.f32.mrf.mxu3  ;;  %965 = vst.msk [vmem:[%s825_s27 + $0x8] sm:$0xff] %vm963_vm4, %v960_v47 }
  0xab   : > { %v1004_v50 = vadd.f32 %v1001_v41, %v992_v48 }
  0xac   : > { %v1152_v53 = vpop.f32.mrf.mxu0 }
  0xad   : > { %v1006_v51 = vmul.f32 %v1889_v19, %v1004_v50  ;;  %v1191_v52 = vpop.f32.mrf.mxu1  ;;  %1158 = vst.msk [vmem:[%s837_s23] sm:$0xff] %vm963_vm4, %v1152_v53 }
  0xae   : > { %v1192_v54 = vadd.f32 %v1696_v49, %v1191_v52 }
  0xaf   : > { %1008 = vst.msk [vmem:[%s789_s30 + $0x8] sm:$0xff] %vm902_vm3, %v1006_v51 }
  0xb0   : > { %1197 = vst.msk [vmem:[%s819_s26] sm:$0xff] %vm963_vm4, %v1192_v54 }
  0xb1   : > { %v1086_v55 = vpop.f32.mrf.mxu2 }
  0xb2   : > { %v1123_v56 = vpop.f32.mrf.mxu3  ;;  %v1100_v57 = vadd.f32 %v1884_v17, %v1086_v55 }
  0xb3   : > { %v1129_v58 = vadd.f32 %v1123_v56, %v1884_v17 }
  0xb4   : > { %v1102_v59 = vmul.f32 %v1889_v19, %v1100_v57  ;;  %v1155_v62 = vpop.f32.mrf.mxu0 }
  0xb5   : > { %v1131_v60 = vmul.f32 %v1889_v19, %v1129_v58  ;;  %v1194_v61 = vpop.f32.mrf.mxu1  ;;  %1159 = vst.msk [vmem:[%s837_s23 + $0x8] sm:$0xff] %vm963_vm4, %v1155_v62 }
  0xb6   : > { %v1195_v63 = vadd.f32 %v1696_v49, %v1194_v61  ;;  %1104 = vst.msk [vmem:[%s795_s4] sm:$0xff] %vm902_vm3, %v1102_v59 }
  0xb7   : > { %1133 = vst.msk [vmem:[%s813_s21] sm:$0xff] %vm902_vm3, %v1131_v60 }
  0xb8   : > { %1198 = vst.msk [vmem:[%s819_s26 + $0x8] sm:$0xff] %vm963_vm4, %v1195_v63 }
  0xb9   : > { %v1089_v1 = vpop.f32.mrf.mxu2 }
  0xba   : > { %v1126_v2 = vpop.f32.mrf.mxu3  ;;  %v1101_v3 = vadd.f32 %v1098_v0, %v1089_v1 }
  0xbb   : > { %v1130_v4 = vadd.f32 %v1126_v2, %v1098_v0 }
  0xbc   : > { %v1103_v5 = vmul.f32 %v1889_v19, %v1101_v3 }
  0xbd   : > { %v1132_v6 = vmul.f32 %v1889_v19, %v1130_v4 }
  0xbe   : > { %1105 = vst.msk [vmem:[%s795_s4 + $0x8] sm:$0xff] %vm902_vm3, %v1103_v5 }
  0xbf   : > { %1134 = vst.msk [vmem:[%s813_s21 + $0x8] sm:$0xff] %vm902_vm3, %v1132_v6 }
  0xc0 PF: > { %s31_s1 = sadd.s32 1, %s1703_s1  }
  0xc1   : > { %p28_p4 = scmp.ge.s32.totalorder %s31_s1, 4  }
  0xc3   :  { %30 = sbr.rel (!%p28_p4) target bundleno = 6 (0x6), region = 214 }

// kernel: generator_apply.52
= control target key start
LH: loop header
LB: loop body
LE: loop exit
PB: predicated region body
PF: predicated region fallthrough
CT: control target
= control target key end

     0   :  { %s1297_s29 = smov 0   ;;  %s1429_s0 = inlined_call_operand.vmem [shape: f32[32,32], index: 0, kind: input, shape index: {}]   ;;  %s1430_s1 = inlined_call_operand.vmem [shape: f32[32,32], index: 1, kind: input, shape index: {}]   ;;  %s1431_s2 = inlined_call_operand.vmem [shape: f32[32,32], index: 2, kind: input, shape index: {}]   ;;  %s1432_s3 = inlined_call_operand.vmem [shape: f32[32,32], index: 3, kind: input, shape index: {}]   ;;  %s1433_s4 = inlined_call_operand.vmem [shape: f32[32,8], index: 4, kind: input, shape index: {}]   ;;  %s1434_s5 = inlined_call_operand.vmem [shape: f32[32,4], index: 5, kind: input, shape index: {}]   ;;  %s1435_s6 = inlined_call_operand.vmem [shape: f32[32,4], index: 6, kind: input, shape index: {}]   ;;  %s1436_s7 = inlined_call_operand.vmem [shape: f32[32,4], index: 7, kind: input, shape index: {}]   ;;  %s1437_s8 = inlined_call_operand.vmem [shape: f32[32,8], index: 8, kind: input, shape index: {}]   ;;  %s1438_s9 = inlined_call_operand.vmem [shape: f32[1,8], index: 9, kind: input, shape index: {}]   ;;  %s1439_s10 = inlined_call_operand.vmem [shape: f32[32,4], index: 10, kind: input, shape index: {}]   ;;  %s1440_s11 = inlined_call_operand.vmem [shape: f32[32,8], index: 11, kind: output, shape index: {0}]   ;;  %s1441_s12 = inlined_call_operand.vmem [shape: f32[32,4], index: 12, kind: output, shape index: {1}]   ;;  %s1442_s13 = inlined_call_operand.vmem [shape: f32[32,4], index: 13, kind: output, shape index: {2}]   ;;  %s1443_s14 = inlined_call_operand.vmem [shape: f32[32,4], index: 14, kind: output, shape index: {3}]  }
   0x1 LB: > { %s1152_s30 = sadd.s32 4294967295, %s1220_s29   ;;  %p1156_p0 = scmp.ge.s32.totalorder %s1220_s29, 1  ;;  %s1220_s29 = sphi %s1297_s29, %s25_s29  }
   0x2   : > { %p497_p1 = scmp.lt.s32.totalorder %s1220_s29, 3 }
   0x4   : > { %p498_p2 = pnand %p1156_p0, %p497_p1 }
   0x5   : > { %s1157_s21 = sshll.u32 (!%p498_p2), %s1152_s30, 1 }
   0x6   : > { %501 = sbr.rel (%p498_p2) target bundleno = 219 (0xdb), region = 64  ;;  %p594_p3 = scmp.lt.s32.totalorder (!%p498_p2), %s1157_s21, 3 }
   0xb   : > { %v748_v0 = vld [vmem:[%s1439_s10 + $0x18] sm:$0xff]  ;;  %v747_v1 = vld [vmem:[%s1439_s10 + $0x10] sm:$0xff]  ;;  %v746_v4 = vld [vmem:[%s1439_s10 + $0x8] sm:$0xff]  ;;  %s1445_s21 = smov (!%p594_p3, %s1157_s21), 3  ;;  %vm757_vm4 = vcmask 261120   ;;  %vm795_vm13 = vcmask 64512  }
   0xc   : > { %v756_v2 = vld [vmem:[%s1437_s8 + $0x18] sm:$0xff]  ;;  %858 = vmatpush.msra.mxu2 %v748_v0  ;;  %895 = vmatpush.msra.mxu3 %v748_v0  ;;  %v755_v3 = vld [vmem:[%s1437_s8 + $0x10] sm:$0xff]  ;;  %v745_v5 = vld [vmem:[%s1439_s10] sm:$0xff]  ;;  %s1323_s28 = sshll.u32 %s1445_s21, 3  ;;  %vm833_vm14 = vcmask 31744  }
   0xd   : > { %776 = vmatpush.msra.mxu0 %v756_v2  ;;  %820 = vmatpush.msra.mxu1 %v748_v0  ;;  %s603_s16 = scalar_lea.vmem %s1430_s1, %s1323_s28  ;;  %s609_s19 = scalar_lea.vmem %s1431_s2, %s1323_s28  ;;  %v754_v41 = vld [vmem:[%s1437_s8 + $0x8] sm:$0xff]  ;;  %v753_v42 = vld [vmem:[%s1437_s8] sm:$0xff] }
   0xe   : > { %859 = vmatpush.msra.mxu2 %v747_v1  ;;  %896 = vmatpush.msra.mxu3 %v747_v1  ;;  %s615_s23 = scalar_lea.vmem %s1432_s3, %s1323_s28  ;;  %v1337_v6 = vld [vmem:[%s603_s16] sm:$0xff]  ;;  %v1341_v8 = vld [vmem:[%s603_s16 + $0x8] sm:$0xff]  ;;  %s597_s25 = scalar_lea.vmem %s1429_s0, %s1323_s28 }
   0xf   : > { %777 = vmatpush.msra.mxu0 %v755_v3  ;;  %821 = vmatpush.msra.mxu1 %v747_v1  ;;  %v1339_v7 = vld [vmem:[%s609_s19] sm:$0xff]  ;;  %v671_v10 = vmul.f32 %v1337_v6, %v1337_v6  ;;  %v1349_v12 = vld [vmem:[%s609_s19 + $0x8] sm:$0xff]  ;;  %v672_v14 = vmul.f32 %v1341_v8, %v1341_v8  ;;  %s621_s18 = scalar_lea.vmem %s1433_s4, %s1323_s28  ;;  %s645_s21 = scalar_lea.vmem %s1440_s11, %s1323_s28 }
  0x10   : > { %860 = vmatpush.msra.mxu2 %v746_v4  ;;  %897 = vmatpush.msra.mxu3 %v746_v4  ;;  %v1343_v9 = vld [vmem:[%s615_s23] sm:$0xff]  ;;  %v673_v11 = vmul.f32 %v1339_v7, %v1339_v7  ;;  %v1351_v13 = vld [vmem:[%s615_s23 + $0x8] sm:$0xff]  ;;  %v674_v16 = vmul.f32 %v1349_v12, %v1349_v12  ;;  %s627_s26 = scalar_lea.vmem %s1434_s5, %s1323_s28  ;;  %s651_s15 = scalar_lea.vmem %s1441_s12, %s1323_s28 }
  0x11   : > { %822 = vmatpush.msra.mxu1 %v746_v4  ;;  %v677_v15 = vmul.f32 %v1343_v9, %v1343_v9  ;;  %v678_v17 = vmul.f32 %v1351_v13, %v1351_v13  ;;  %778 = vmatpush.msra.mxu0 %v754_v41  ;;  %v751_v44 = vld [vmem:[%s597_s25] sm:$0xff]  ;;  %v752_v49 = vld [vmem:[%s597_s25 + $0x8] sm:$0xff]  ;;  %s639_s22 = scalar_lea.vmem %s1436_s7, %s1323_s28  ;;  %s657_s24 = scalar_lea.vmem %s1442_s13, %s1323_s28 }
  0x12   : > { %861 = vmatpush.msra.mxu2 %v745_v5  ;;  %898 = vmatpush.msra.mxu3 %v745_v5  ;;  %v675_v18 = vadd.f32 %v673_v11, %v671_v10  ;;  %v676_v19 = vadd.f32 %v674_v16, %v672_v14  ;;  %s663_s30 = scalar_lea.vmem %s1443_s14, %s1323_s28 }
  0x13   : > { %823 = vmatpush.msra.mxu1 %v745_v5  ;;  %779 = vmatpush.msra.mxu0 %v753_v42 }
  0x14   : > { %v679_v20 = vadd.f32 %v677_v15, %v675_v18  ;;  %v680_v21 = vadd.f32 %v678_v17, %v676_v19  ;;  %1183 = vmatmul.msk.f32.vlgmr.msra.gmra.mxu0 %vm757_vm4, %v751_v44 }
  0x16   : > { %v681_v22 = vadd.f32 1e-12, %v679_v20  ;;  %v682_v23 = vadd.f32 1e-12, %v680_v21 }
  0x18   : > { %1202 = vrsqrt.f32 %v681_v22  ;;  %vm690_vm0 = vcmp.eq.f32.partialorder %v681_v22, inf  ;;  %v693_v35 = vand.u32 2147483648, %v681_v22  ;;  %vm692_vm1 = vcmp.eq.f32.partialorder %v681_v22, 0.0 }
  0x19   : > { %1204 = vrsqrt.f32 %v682_v23  ;;  %vm702_vm2 = vcmp.eq.f32.partialorder %v682_v23, inf  ;;  %v705_v38 = vand.u32 2147483648, %v682_v23  ;;  %vm704_vm3 = vcmp.eq.f32.partialorder %v682_v23, 0.0 }
  0x1c   : > { %1184 = vmatmul.msk.f32.gmra.mxu0 %vm757_vm4, %v752_v49 }
  0x1e   : > { %v1203_v24 = vpop.eup %1202 }
  0x1f   : > { %v1205_v25 = vpop.eup %1204  ;;  %v684_v26 = vmul.f32 %v1203_v24, %v681_v22 }
  0x20   : > { %v696_v27 = vmul.f32 %v1205_v25, %v682_v23 }
  0x21   : > { %v685_v28 = vmul.f32 %v1203_v24, %v684_v26 }
  0x22   : > { %v697_v29 = vmul.f32 %v1205_v25, %v696_v27 }
  0x23   : > { %v686_v30 = vmul.f32 0.5, %v685_v28 }
  0x24   : > { %v698_v31 = vmul.f32 0.5, %v697_v29  ;;  %v873_v29 = vld [vmem:[%s639_s22] sm:$0xff] }
  0x25   : > { %v687_v32 = vsub.f32 1.5, %v686_v30 }
  0x26   : > { %v699_v33 = vsub.f32 1.5, %v698_v31 }
  0x27   : > { %v688_v34 = vmul.f32 %v1203_v24, %v687_v32 }
  0x28   : > { %v700_v36 = vmul.f32 %v1205_v25, %v699_v33  ;;  %v798_v25 = vld [vmem:[%s627_s26] sm:$0xff] }
  0x29   : > { %v689_v37 = vmul.f32 %v688_v34, %v681_v22  ;;  %v799_v34 = vld [vmem:[%s627_s26 + $0x8] sm:$0xff] }
  0x2a   : > { %v701_v39 = vmul.f32 %v700_v36, %v682_v23 }
  0x2b   : > { %v691_v40 = vsel %vm690_vm0, %v681_v22, %v689_v37 }
  0x2c   : > { %v694_v43 = vsel %vm692_vm1, %v693_v35, %v691_v40  ;;  %v703_v45 = vsel %vm702_vm2, %v682_v23, %v701_v39 }
  0x2d   : > { %v1181_v46 = vmul.f32 -1.442695, %v694_v43  ;;  %v706_v47 = vsel %vm704_vm3, %v705_v38, %v703_v45  ;;  %v874_v38 = vld [vmem:[%s639_s22 + $0x8] sm:$0xff] }
  0x2e   : > { %v1182_v48 = vmul.f32 -1.442695, %v706_v47 }
  0x2f   : > { %1206 = vpow2.f32 %v1181_v46 }
  0x30   : > { %1208 = vpow2.f32 %v1182_v48 }
  0x35   : > { %v1207_v50 = vpop.eup %1206 }
  0x36   : > { %v1209_v51 = vpop.eup %1208  ;;  %v713_v52 = vadd.f32 1.0, %v1207_v50 }
  0x37   : > { %v714_v53 = vadd.f32 1.0, %v1209_v51 }
  0x38   : > { %1210 = vrcp.f32 %v713_v52  ;;  %v726_v57 = vand.u32 2147483648, %v713_v52  ;;  %vm720_vm5 = vweird.f32 %v713_v52  ;;  %v724_v60 = vand.u32 2147483647, %v713_v52 }
  0x39   : > { %1212 = vrcp.f32 %v714_v53  ;;  %vm735_vm7 = vweird.f32 %v714_v53  ;;  %v739_v1 = vand.u32 2147483647, %v714_v53  ;;  %v741_v2 = vand.u32 2147483648, %v714_v53 }
  0x3a   : > { %v727_v63 = vor.u32 1.1754944e-38, %v726_v57  ;;  %vm725_vm10 = vcmp.eq.f32.partialorder %v724_v60, 8.507059e+37 }
  0x3b   : > { %vm740_vm12 = vcmp.eq.f32.partialorder %v739_v1, 8.507059e+37  ;;  %v742_v11 = vor.u32 1.1754944e-38, %v741_v2 }
  0x3e   : > { %v1211_v54 = vpop.eup %1210 }
  0x3f   : > { %v1213_v55 = vpop.eup %1212  ;;  %v716_v56 = vmul.f32 %v1211_v54, %v713_v52  ;;  %vm721_vm6 = vweird.f32 %v1211_v54 }
  0x40   : > { %v731_v58 = vmul.f32 %v1213_v55, %v714_v53  ;;  %vm736_vm8 = vweird.f32 %v1213_v55  ;;  %vm722_vm9 = vmor %vm720_vm5, %vm721_vm6 }
  0x41   : > { %v717_v59 = vsub.f32 1.0, %v716_v56  ;;  %vm737_vm11 = vmor %vm735_vm7, %vm736_vm8 }
  0x42   : > { %v732_v61 = vsub.f32 1.0, %v731_v58 }
  0x43   : > { %v718_v62 = vmul.f32 %v1211_v54, %v717_v59 }
  0x44   : > { %v733_v0 = vmul.f32 %v1213_v55, %v732_v61 }
  0x45   : > { %v719_v3 = vadd.f32 %v1211_v54, %v718_v62 }
  0x46   : > { %v734_v4 = vadd.f32 %v1213_v55, %v733_v0 }
  0x47   : > { %v723_v5 = vsel %vm722_vm9, %v1211_v54, %v719_v3 }
  0x48   : > { %v728_v10 = vsel %vm725_vm10, %v727_v63, %v723_v5  ;;  %v738_v17 = vsel %vm737_vm11, %v1213_v55, %v734_v4 }
  0x49   : > { %v838_v14 = vmul.f32 %v728_v10, %v1339_v7  ;;  %v875_v15 = vmul.f32 %v728_v10, %v1343_v9  ;;  %v800_v16 = vmul.f32 %v728_v10, %v1337_v6  ;;  %v743_v18 = vsel %vm740_vm12, %v742_v11, %v738_v17  ;;  %v749_v6 = vld [vmem:[%s621_s18] sm:$0xff] }
  0x4a   : > { %v839_v19 = vmul.f32 %v743_v18, %v1349_v12  ;;  %v876_v20 = vmul.f32 %v743_v18, %v1351_v13  ;;  %v801_v21 = vmul.f32 %v743_v18, %v1341_v8  ;;  %v1201_v7 = vld [vmem:[%s1438_s9] ss:$0 sm:$0xff]  ;;  %v750_v13 = vld [vmem:[%s621_s18 + $0x8] sm:$0xff]  ;;  %s633_s18 = scalar_lea.vmem %s1435_s6, %s1323_s28 }
  0x4b   : > { %1187 = vmatmul.msk.f32.vlgmr.msra.gmra.mxu2 %vm757_vm4, %v838_v14  ;;  %1189 = vmatmul.msk.f32.vlgmr.msra.gmra.mxu3 %vm757_vm4, %v875_v15  ;;  %v836_v28 = vld [vmem:[%s633_s18] sm:$0xff]  ;;  %v837_v37 = vld [vmem:[%s633_s18 + $0x8] sm:$0xff] }
  0x4c   : > { %1185 = vmatmul.msk.f32.vlgmr.msra.gmra.mxu1 %vm757_vm4, %v800_v16 }
  0x53   : > { %1188 = vmatmul.msk.f32.gmra.mxu2 %vm757_vm4, %v839_v19  ;;  %1190 = vmatmul.msk.f32.gmra.mxu3 %vm757_vm4, %v876_v20 }
  0x54   : > { %1186 = vmatmul.msk.f32.gmra.mxu1 %vm757_vm4, %v801_v21 }
  0x91   : > { %v781_v9 = vpop.f32.mrf.mxu0 }
  0x92   : > { %v787_v8 = vadd.f32 %v781_v9, %v749_v6 }
  0x94   : > { %v793_v12 = vadd.f32 %v1201_v7, %v787_v8 }
  0x96   : > { %796 = vst.msk [vmem:[%s645_s21] sm:$0xff] %vm795_vm13, %v793_v12 }
  0x99   : > { %v784_v22 = vpop.f32.mrf.mxu0 }
  0x9a   : > { %v788_v23 = vadd.f32 %v784_v22, %v750_v13 }
  0x9c   : > { %v794_v24 = vadd.f32 %v1201_v7, %v788_v23 }
  0x9e   : > { %797 = vst.msk [vmem:[%s645_s21 + $0x8] sm:$0xff] %vm795_vm13, %v794_v24 }
  0xc9   : > { %v825_v26 = vpop.f32.mrf.mxu1 }
  0xca   : > { %v831_v27 = vadd.f32 %v825_v26, %v798_v25 }
  0xcc   : > { %834 = vst.msk [vmem:[%s651_s15] sm:$0xff] %vm833_vm14, %v831_v27 }
  0xce   : > { %v863_v30 = vpop.f32.mrf.mxu2  ;;  %v900_v31 = vpop.f32.mrf.mxu3 }
  0xcf   : > { %v869_v32 = vadd.f32 %v863_v30, %v836_v28  ;;  %v906_v33 = vadd.f32 %v900_v31, %v873_v29 }
  0xd1   : > { %871 = vst.msk [vmem:[%s657_s24] sm:$0xff] %vm833_vm14, %v869_v32  ;;  %v828_v35 = vpop.f32.mrf.mxu1 }
  0xd2   : > { %908 = vst.msk [vmem:[%s663_s30] sm:$0xff] %vm833_vm14, %v906_v33  ;;  %v832_v36 = vadd.f32 %v828_v35, %v799_v34 }
  0xd4   : > { %835 = vst.msk [vmem:[%s651_s15 + $0x8] sm:$0xff] %vm833_vm14, %v832_v36 }
  0xd6   : > { %v866_v39 = vpop.f32.mrf.mxu2  ;;  %v903_v40 = vpop.f32.mrf.mxu3 }
  0xd7   : > { %v870_v41 = vadd.f32 %v866_v39, %v837_v37  ;;  %v907_v42 = vadd.f32 %v903_v40, %v874_v38 }
  0xd9   : > { %872 = vst.msk [vmem:[%s657_s24 + $0x8] sm:$0xff] %vm833_vm14, %v870_v41 }
  0xda   : > { %909 = vst.msk [vmem:[%s663_s30 + $0x8] sm:$0xff] %vm833_vm14, %v907_v42 }
  0xdb PF: > { %s25_s29 = sadd.s32 1, %s1220_s29  }
  0xdc   : > { %p22_p4 = scmp.ge.s32.totalorder %s25_s29, 4  }
  0xde   :  { %24 = sbr.rel (!%p22_p4) target bundleno = 1 (0x1), region = 151 }

// kernel: generator_apply.51
= control target key start
LH: loop header
LB: loop body
LE: loop exit
PB: predicated region body
PF: predicated region fallthrough
CT: control target
= control target key end

     0   :  { %s1579_s25 = smov 0   ;;  %s1731_s0 = inlined_call_operand.vmem [shape: f32[2,16,2], index: 0, kind: input, shape index: {}]   ;;  %s1732_s1 = inlined_call_operand.vmem [shape: f32[2,16,2], index: 1, kind: input, shape index: {}]   ;;  %s1733_s2 = inlined_call_operand.vmem [shape: f32[2,16,2], index: 2, kind: input, shape index: {}]   ;;  %s1734_s3 = inlined_call_operand.vmem [shape: f32[2,2,16], index: 3, kind: input, shape index: {}]   ;;  %s1735_s4 = inlined_call_operand.vmem [shape: f32[2,2,16], index: 4, kind: input, shape index: {}]   ;;  %s1736_s5 = inlined_call_operand.vmem [shape: f32[2,2,16], index: 5, kind: input, shape index: {}]   ;;  %s1737_s6 = inlined_call_operand.vmem [shape: f32[2,16,32], index: 6, kind: input, shape index: {}]   ;;  %s1738_s7 = inlined_call_operand.vmem [shape: f32[2,16,32], index: 7, kind: input, shape index: {}]   ;;  %s1739_s8 = inlined_call_operand.vmem [shape: f32[2,16,32], index: 8, kind: input, shape index: {}]   ;;  %s1740_s9 = inlined_call_operand.vmem [shape: f32[2,16,32], index: 9, kind: input, shape index: {}]   ;;  %s1741_s10 = inlined_call_operand.vmem [shape: f32[2,16,32], index: 10, kind: output, shape index: {0}]   ;;  %s1742_s11 = inlined_call_operand.vmem [shape: f32[2,16,32], index: 11, kind: output, shape index: {1}]   ;;  %s1743_s12 = inlined_call_operand.vmem [shape: f32[2,16,32], index: 12, kind: output, shape index: {2}]   ;;  %s1744_s13 = inlined_call_operand.vmem [shape: f32[2,16,32], index: 13, kind: output, shape index: {3}]  }
   0x1 LB: > { %s1384_s26 = sadd.s32 4294967295, %s1503_s25   ;;  %p1388_p0 = scmp.ge.s32.totalorder %s1503_s25, 1  ;;  %s1503_s25 = sphi %s1579_s25, %s24_s25  }
   0x2   : > { %p481_p1 = scmp.lt.s32.totalorder %s1503_s25, 3 }
   0x4   : > { %p482_p2 = pnand %p1388_p0, %p481_p1 }
   0x5   : > { %p582_p3 = scmp.lt.s32.totalorder (!%p482_p2), %s1384_s26, 1  ;;  %s1507_s21 = smov (!%p482_p2), 112  }
   0x6   : > { %485 = sbr.rel (%p482_p2) target bundleno = 704 (0x2c0), region = 60 }
   0xb   : > { %v1505_v0 = vmov 0   ;;  %s1746_s26 = smov (!%p582_p3, %s1384_s26), 1  ;;  %v1506_v17 = vmov 1   ;;  %vm746_vm0 = vcmask 130048   ;;  %vm996_vm1 = vcmask 261248  }
   0xc   : > { %1456 = vset.pattern.permute.xlu1 %v1505_v0  ;;  %1455 = vset.pattern.permute.xlu0 %v1505_v0  ;;  %s1590_s27 = sshll.u32 %s1746_s26, 4  ;;  %s1395_s20 = sshll.u32 %s1746_s26, 1 }
   0xd   : > { %1457 = vset.pattern.permute.xlu2 %v1505_v0  ;;  %s596_s30 = scalar_lea.vmem %s1733_s2, %s1590_s27  ;;  %s586_s16 = scalar_lea.vmem %s1731_s0, %s1590_s27 }
   0xe   : > { %v653_v1 = vld [vmem:[%s596_s30] sm:$0xff]  ;;  %s591_s19 = scalar_lea.vmem %s1732_s1, %s1590_s27  ;;  %v650_v8 = vld [vmem:[%s586_s16 + $0x8] sm:$0xff]  ;;  %s604_s23 = scalar_lea.vmem %s1735_s4, %s1395_s20 }
   0xf   : > { %v649_v2 = vld [vmem:[%s586_s16] sm:$0xff]  ;;  %710 = vperm.xlu1 %1456, %v653_v1   ;;  %v652_v5 = vld [vmem:[%s591_s19 + $0x8] sm:$0xff]  ;;  %v723_v6 = vmul.f32 %v653_v1, %v653_v1  ;;  %v682_v10 = vmul.f32 %v650_v8, %v650_v8  ;;  %s600_s29 = scalar_lea.vmem %s1734_s3, %s1395_s20  ;;  %s608_s15 = scalar_lea.vmem %s1736_s5, %s1395_s20 }
  0x10   : > { %668 = vperm.xlu0 %1455, %v649_v2   ;;  %v681_v3 = vmul.f32 %v649_v2, %v649_v2  ;;  %v651_v4 = vld [vmem:[%s591_s19] sm:$0xff]  ;;  %694 = vperm.xlu2 %1457, %v652_v5   ;;  %v703_v11 = vmul.f32 %v652_v5, %v652_v5  ;;  %v654_v12 = vld [vmem:[%s596_s30 + $0x8] sm:$0xff]  ;;  %s1623_s17 = scalar_lea.vmem %s1739_s8, %s1590_s27  ;;  %s1629_s20 = scalar_lea.vmem %s1740_s9, %s1590_s27 }
  0x11   : > { %v702_v7 = vmul.f32 %v651_v4, %v651_v4  ;;  %v724_v15 = vmul.f32 %v654_v12, %v654_v12  ;;  %v1614_v21 = vld [vmem:[%s604_s23] sm:$0x3]  ;;  %v663_v45 = vld [vmem:[%s1623_s17 + $0x8] sm:$0xff]  ;;  %s613_s24 = scalar_lea.vmem %s1737_s6, %s1590_s27  ;;  %s618_s30 = scalar_lea.vmem %s1738_s7, %s1590_s27 }
  0x12   : > { %v705_v14 = vadd.f32 %v703_v11, %v682_v10  ;;  %v655_v23 = vld [vmem:[%s600_s29] sm:$0x3]  ;;  %v706_v24 = vmul.f32 %v1614_v21, %v1614_v21  ;;  %v697_v28 = vperm.slane %v1614_v21, 0  ;;  %v665_v46 = vld [vmem:[%s1629_s20 + $0x8] sm:$0xff]  ;;  %839 = vmatpush.msra.mxu2 %v663_v45  ;;  %v896_v59 = vperm.slane %v1614_v21, 1  ;;  %s1676_s26 = scalar_lea.vmem %s1741_s10, %s1590_s27  ;;  %s1682_s18 = scalar_lea.vmem %s1742_s11, %s1590_s27 }
  0x13   : > { %v704_v9 = vadd.f32 %v702_v7, %v681_v3  ;;  %v685_v25 = vmul.f32 %v655_v23, %v655_v23  ;;  %v657_v26 = vld [vmem:[%s608_s15] sm:$0x3]  ;;  %v676_v27 = vperm.slane %v655_v23, 0  ;;  %864 = vmatpush.msra.mxu3 %v665_v46  ;;  %v883_v56 = vperm.slane %v655_v23, 1 }
  0x14   : > { %v726_v16 = vadd.f32 %v724_v15, %v705_v14  ;;  %v718_v29 = vperm.slane %v657_v26, 0  ;;  %v727_v30 = vmul.f32 %v657_v26, %v657_v26  ;;  %v909_v58 = vperm.slane %v657_v26, 1 }
  0x15   : > { %v725_v13 = vadd.f32 %v723_v6, %v704_v9  ;;  %v707_v31 = vadd.f32 %v706_v24, %v685_v25  ;;  %v1461_v24 = vpack.i.bf16 %v665_v46, %v663_v45  ;;  %v660_v45 = vld [vmem:[%s618_s30] sm:$0xff] }
  0x17   : > { %673 = vperm.xlu1 %1456, %v650_v8   ;;  %v728_v38 = vadd.f32 %v727_v30, %v707_v31  ;;  %v664_v30 = vld [vmem:[%s1629_s20] sm:$0xff] }
  0x18   : > { %689 = vperm.xlu0 %1455, %v651_v4   ;;  %733 = vperm.xlu2 %1457, %v725_v13  }
  0x19   : > { %v743_v44 = vperm.slane %v728_v38, 0  ;;  %865 = vmatpush.msra.mxu3 %v664_v30 }
  0x1f   : > { %738 = vperm.xlu1 %1456, %v726_v16  }
  0x20   : > { %715 = vperm.xlu0 %1455, %v654_v12   ;;  %1458 = vset.pattern.permute.xlu2 %v1506_v17 }
  0x21   : > { %876 = vperm.xlu2 %1458, %v649_v2  }
  0x27   : > { %1460 = vset.pattern.permute.xlu1 %v1506_v17 }
  0x28   : > { %1459 = vset.pattern.permute.xlu0 %v1506_v17  ;;  %902 = vperm.xlu1 %1460, %v653_v1  }
  0x29   : > { %889 = vperm.xlu0 %1459, %v651_v4   ;;  %880 = vperm.xlu2 %1458, %v650_v8   ;;  %v926_v8 = vperm.slane %v728_v38, 1 }
  0x30   : > { %893 = vperm.xlu1 %1460, %v652_v5  }
  0x31   : > { %906 = vperm.xlu0 %1459, %v654_v12   ;;  %917 = vperm.xlu2 %1458, %v725_v13  }
  0x38   : > { %921 = vperm.xlu1 %1460, %v726_v16  }
  0x6a   : > { %v695_v18 = vpop.permute.xlu2 %694 }
  0x6b   : > { %v699_v42 = vmul.f32 %v697_v28, %v695_v18 }
  0x72   : > { %v734_v22 = vpop.permute.xlu2 %733 }
  0x7b   : > { %v877_v39 = vpop.permute.xlu2 %876 }
  0x7c   : > { %v884_v0 = vmul.f32 %v883_v56, %v877_v39 }
  0x81   : > { %v711_v19 = vpop.permute.xlu1 %710 }
  0x82   : > { %v669_v20 = vpop.permute.xlu0 %668  ;;  %v719_v36 = vmul.f32 %v718_v29, %v711_v19 }
  0x83   : > { %v677_v34 = vmul.f32 %v676_v27, %v669_v20  ;;  %v881_v57 = vpop.permute.xlu2 %880 }
  0x84   : > { %v885_v11 = vmul.f32 %v883_v56, %v881_v57 }
  0x89   : > { %v674_v32 = vpop.permute.xlu1 %673 }
  0x8a   : > { %v690_v33 = vpop.permute.xlu0 %689  ;;  %v678_v40 = vmul.f32 %v676_v27, %v674_v32 }
  0x8b   : > { %v698_v35 = vmul.f32 %v697_v28, %v690_v33  ;;  %v918_v6 = vpop.permute.xlu2 %917 }
  0x8c   : > { %v701_v49 = vadd.f32 %v699_v42, %v678_v40  ;;  %v659_v40 = vld [vmem:[%s613_s24 + $0x8] sm:$0xff] }
  0x8d   : > { %v700_v37 = vadd.f32 %v698_v35, %v677_v34  ;;  %789 = vmatpush.msra.mxu0 %v659_v40 }
  0x8f   : > { %v721_v41 = vadd.f32 %v719_v36, %v700_v37 }
  0x91   : > { %v729_v43 = vmul.f32 2.0, %v721_v41  ;;  %v739_v47 = vpop.permute.xlu1 %738  ;;  %v661_v41 = vld [vmem:[%s618_s30 + $0x8] sm:$0xff] }
  0x92   : > { %v716_v48 = vpop.permute.xlu0 %715  ;;  %814 = vmatpush.msra.mxu1 %v661_v41  ;;  %v1471_v56 = vpack.i.bf16 %v661_v41, %v659_v40 }
  0x93   : > { %v720_v50 = vmul.f32 %v718_v29, %v716_v48  ;;  %v741_v51 = vsub.f32 %v729_v43, %v734_v22  ;;  %v662_v29 = vld [vmem:[%s1623_s17] sm:$0xff] }
  0x94   : > { %840 = vmatpush.msra.mxu2 %v662_v29  ;;  %815 = vmatpush.msra.mxu1 %v660_v45 }
  0x95   : > { %v722_v52 = vadd.f32 %v720_v50, %v701_v49  ;;  %v744_v53 = vsub.f32 %v741_v51, %v743_v44 }
  0x97   : > { %v730_v54 = vmul.f32 2.0, %v722_v52  ;;  %v747_v55 = vsel %vm746_vm0, %v744_v53, -inf }
  0x98   : > { %748 = vmax.xlane.f32.xlu2 %v747_v55  ;;  %v1466_v55 = vpack.i.bf16 %v664_v30, %v662_v29 }
  0x99   : > { %v742_v60 = vsub.f32 %v730_v54, %v739_v47 }
  0x9a   : > { %v903_v61 = vpop.permute.xlu1 %902 }
  0x9b   : > { %v890_v62 = vpop.permute.xlu0 %889  ;;  %v745_v63 = vsub.f32 %v742_v60, %v743_v44  ;;  %v910_v1 = vmul.f32 %v909_v58, %v903_v61  ;;  %v658_v44 = vld [vmem:[%s613_s24] sm:$0xff]  ;;  %s1698_s24 = scalar_lea.vmem %s1744_s13, %s1590_s27 }
  0x9c   : > { %v897_v2 = vmul.f32 %v896_v59, %v890_v62  ;;  %790 = vmatpush.msra.mxu0 %v658_v44  ;;  %v1476_v49 = vpack.i.bf16 %v660_v45, %v658_v44 }
  0x9d   : > { %v750_v3 = vsel %vm746_vm0, %v745_v63, -inf }
  0x9e   : > { %v899_v4 = vadd.f32 %v897_v2, %v884_v0  ;;  %751 = vmax.xlane.f32.xlu0 %v750_v3 }
  0xa0   : > { %v912_v5 = vadd.f32 %v910_v1, %v899_v4 }
  0xa2   : > { %v914_v7 = vmul.f32 2.0, %v912_v5  ;;  %v894_v9 = vpop.permute.xlu1 %893 }
  0xa3   : > { %v907_v10 = vpop.permute.xlu0 %906  ;;  %v898_v12 = vmul.f32 %v896_v59, %v894_v9 }
  0xa4   : > { %v924_v13 = vsub.f32 %v914_v7, %v918_v6  ;;  %v911_v15 = vmul.f32 %v909_v58, %v907_v10 }
  0xa5   : > { %v900_v14 = vadd.f32 %v898_v12, %v885_v11 }
  0xa6   : > { %v927_v16 = vsub.f32 %v924_v13, %v926_v8 }
  0xa7   : > { %v913_v17 = vadd.f32 %v911_v15, %v900_v14 }
  0xa8   : > { %v929_v18 = vsel %vm746_vm0, %v927_v16, -inf }
  0xa9   : > { %930 = vmax.xlane.f32.xlu1 %v929_v18  ;;  %v915_v19 = vmul.f32 2.0, %v913_v17 }
  0xaa   : > { %v922_v20 = vpop.permute.xlu1 %921 }
  0xab   : > { %v925_v21 = vsub.f32 %v915_v19, %v922_v20 }
  0xad   : > { %v928_v22 = vsub.f32 %v925_v21, %v926_v8 }
  0xaf   : > { %v932_v23 = vsel %vm746_vm0, %v928_v22, -inf }
  0xb0   : > { %933 = vmax.xlane.f32.xlu2 %v932_v23 }
  0xc8   : > { %1462 = vrot.lane.b32.xlu2 %v1461_v24, %s1507_s21 }
 0x10b   : > { %v749_v25 = vpop.xlane.xlu2 %748 }
 0x10c   : > { %v753_v26 = vsub.f32 %v744_v53, %v749_v25 }
 0x10e   : > { %v755_v27 = vmul.f32 1.442695, %v753_v26 }
 0x110   : > { %1481 = vpow2.f32 %v755_v27 }
 0x111   : > { %v752_v28 = vpop.xlane.xlu0 %751 }
 0x112   : > { %v754_v31 = vsub.f32 %v745_v63, %v752_v28 }
 0x114   : > { %v757_v32 = vmul.f32 1.442695, %v754_v31 }
 0x116   : > { %v1482_v33 = vpop.eup %1481  ;;  %1483 = vpow2.f32 %v757_v32 }
 0x117   : > { %v759_v34 = vsel %vm746_vm0, %v1482_v33, 0.0 }
 0x118   : > { %760 = vadd.xlane.f32.xlu2 %v759_v34 }
 0x11c   : > { %v1484_v35 = vpop.eup %1483  ;;  %v931_v36 = vpop.xlane.xlu1 %930 }
 0x11d   : > { %v935_v37 = vsub.f32 %v927_v16, %v931_v36  ;;  %v762_v38 = vsel %vm746_vm0, %v1484_v35, 0.0 }
 0x11e   : > { %763 = vadd.xlane.f32.xlu0 %v762_v38 }
 0x11f   : > { %v937_v39 = vmul.f32 1.442695, %v935_v37 }
 0x121   : > { %1485 = vpow2.f32 %v937_v39 }
 0x123   : > { %v934_v42 = vpop.xlane.xlu2 %933 }
 0x124   : > { %v936_v43 = vsub.f32 %v928_v22, %v934_v42 }
 0x126   : > { %v939_v47 = vmul.f32 1.442695, %v936_v43 }
 0x127   : > { %v1486_v46 = vpop.eup %1485 }
 0x128   : > { %v941_v48 = vsel %vm746_vm0, %v1486_v46, 0.0  ;;  %1487 = vpow2.f32 %v939_v47 }
 0x129   : > { %942 = vadd.xlane.f32.xlu1 %v941_v48 }
 0x12b   : > { %v1463_v50 = vpop.permute.xlu2 %1462 }
 0x12c   : > { %v1464_v51 = vunpack.i.l.bf16 %v1463_v50  ;;  %v1465_v52 = vunpack.i.h.bf16 %v1463_v50 }
 0x12e   : > { %v1488_v53 = vpop.eup %1487  ;;  %1062 = vmatpush.msrb.mxu2 %v1464_v51  ;;  %1103 = vmatpush.msrb.mxu3 %v1465_v52 }
 0x12f   : > { %v944_v54 = vsel %vm746_vm0, %v1488_v53, 0.0 }
 0x130   : > { %1477 = vrot.lane.b32.xlu2 %v1476_v49, %s1507_s21  ;;  %945 = vadd.xlane.f32.xlu0 %v944_v54 }
 0x142   : > { %1467 = vrot.lane.b32.xlu1 %v1466_v55, %s1507_s21 }
 0x144   : > { %1472 = vrot.lane.b32.xlu0 %v1471_v56, %s1507_s21  ;;  %s1692_s21 = scalar_lea.vmem %s1743_s12, %s1590_s27  ;;  %s1508_s27 = smov 16  }
 0x18b   : > { %v761_v57 = vpop.xlane.xlu2 %760 }
 0x18c   : > { %1489 = vrcp.f32 %v761_v57 }
 0x191   : > { %v764_v58 = vpop.xlane.xlu0 %763 }
 0x192   : > { %v1490_v59 = vpop.eup %1489  ;;  %1491 = vrcp.f32 %v764_v58 }
 0x193   : > { %v767_v60 = vmul.f32 %v1490_v59, %v1482_v33  ;;  %v1478_v5 = vpop.permute.xlu2 %1477 }
 0x194   : > { %v1479_v10 = vunpack.i.l.bf16 %v1478_v5  ;;  %v1480_v11 = vunpack.i.h.bf16 %v1478_v5 }
 0x195   : > { %1414 = vmatmul.msk.f32.vlgmr.msra.gmra.mxu0 %vm746_vm0, %v767_v60  ;;  %1416 = vmatmul.msk.f32.vlgmr.msra.gmra.mxu1 %vm746_vm0, %v767_v60 }
 0x196   : > { %1418 = vmatmul.msk.f32.vlgmr.msra.gmra.mxu2 %vm746_vm0, %v767_v60  ;;  %1420 = vmatmul.msk.f32.vlgmr.msra.gmra.mxu3 %vm746_vm0, %v767_v60 }
 0x198   : > { %v1492_v61 = vpop.eup %1491 }
 0x199   : > { %v768_v62 = vmul.f32 %v1492_v61, %v1484_v35 }
 0x19c   : > { %v943_v63 = vpop.xlane.xlu1 %942 }
 0x19d   : > { %1415 = vmatmul.msk.f32.gmra.mxu0 %vm746_vm0, %v768_v62  ;;  %1417 = vmatmul.msk.f32.gmra.mxu1 %vm746_vm0, %v768_v62  ;;  %1493 = vrcp.f32 %v943_v63 }
 0x19e   : > { %1419 = vmatmul.msk.f32.gmra.mxu2 %vm746_vm0, %v768_v62  ;;  %1421 = vmatmul.msk.f32.gmra.mxu3 %vm746_vm0, %v768_v62 }
 0x1a3   : > { %v946_v0 = vpop.xlane.xlu0 %945  ;;  %v1494_v1 = vpop.eup %1493 }
 0x1a4   : > { %1495 = vrcp.f32 %v946_v0  ;;  %v949_v6 = vmul.f32 %v1494_v1, %v1486_v46 }
 0x1aa   : > { %v1496_v12 = vpop.eup %1495 }
 0x1ab   : > { %v950_v13 = vmul.f32 %v1496_v12, %v1488_v53 }
 0x1b4   : > { %v1468_v2 = vpop.permute.xlu1 %1467 }
 0x1b5   : > { %v1469_v3 = vunpack.i.l.bf16 %v1468_v2  ;;  %v1470_v4 = vunpack.i.h.bf16 %v1468_v2 }
 0x1b6   : > { %v1473_v7 = vpop.permute.xlu0 %1472 }
 0x1b7   : > { %1063 = vmatpush.msrb.mxu2 %v1469_v3  ;;  %1104 = vmatpush.msrb.mxu3 %v1470_v4  ;;  %v1474_v8 = vunpack.i.l.bf16 %v1473_v7  ;;  %v1475_v9 = vunpack.i.h.bf16 %v1473_v7 }
 0x1b8   : > { %1426 = vmatmul.msk.f32.vlgmr.msrb.gmra.mxu2 %vm746_vm0, %v949_v6  ;;  %1428 = vmatmul.msk.f32.vlgmr.msrb.gmra.mxu3 %vm746_vm0, %v949_v6 }
 0x1b9   : > { %979 = vmatpush.msrb.mxu0 %v1474_v8  ;;  %1021 = vmatpush.msrb.mxu1 %v1475_v9 }
 0x1bb   : > { %980 = vmatpush.msrb.mxu0 %v1479_v10  ;;  %1022 = vmatpush.msrb.mxu1 %v1480_v11 }
 0x1bc   : > { %1422 = vmatmul.msk.f32.vlgmr.msrb.gmra.mxu0 %vm746_vm0, %v949_v6  ;;  %1424 = vmatmul.msk.f32.vlgmr.msrb.gmra.mxu1 %vm746_vm0, %v949_v6 }
 0x1c0   : > { %1427 = vmatmul.msk.f32.gmra.mxu2 %vm746_vm0, %v950_v13  ;;  %1429 = vmatmul.msk.f32.gmra.mxu3 %vm746_vm0, %v950_v13 }
 0x1c4   : > { %1423 = vmatmul.msk.f32.gmra.mxu0 %vm746_vm0, %v950_v13  ;;  %1425 = vmatmul.msk.f32.gmra.mxu1 %vm746_vm0, %v950_v13 }
 0x212   : > { %v792_v14 = vpop.f32.mrf.mxu0  ;;  %v817_v15 = vpop.f32.mrf.mxu1 }
 0x213   : > { %798 = vst.msk [vmem:[%s1676_s26] sm:$0xff] %vm746_vm0, %v792_v14 }
 0x214   : > { %823 = vst.msk [vmem:[%s1682_s18] sm:$0xff] %vm746_vm0, %v817_v15 }
 0x219   : > { %v842_v16 = vpop.f32.mrf.mxu2  ;;  %v867_v17 = vpop.f32.mrf.mxu3 }
 0x21a   : > { %848 = vst.msk [vmem:[%s1692_s21] sm:$0xff] %vm746_vm0, %v842_v16  ;;  %v795_v18 = vpop.f32.mrf.mxu0  ;;  %v820_v19 = vpop.f32.mrf.mxu1 }
 0x21b   : > { %873 = vst.msk [vmem:[%s1698_s24] sm:$0xff] %vm746_vm0, %v867_v17 }
 0x21c   : > { %799 = vst.msk [vmem:[%s1676_s26 + $0x8] sm:$0xff] %vm746_vm0, %v795_v18 }
 0x21d   : > { %824 = vst.msk [vmem:[%s1682_s18 + $0x8] sm:$0xff] %vm746_vm0, %v820_v19 }
 0x221   : > { %v845_v20 = vpop.f32.mrf.mxu2  ;;  %v870_v21 = vpop.f32.mrf.mxu3 }
 0x222   : > { %849 = vst.msk [vmem:[%s1692_s21 + $0x8] sm:$0xff] %vm746_vm0, %v845_v20 }
 0x223   : > { %874 = vst.msk [vmem:[%s1698_s24 + $0x8] sm:$0xff] %vm746_vm0, %v870_v21 }
 0x239   : > { %v982_v22 = vpop.f32.mrf.mxu0  ;;  %v1024_v23 = vpop.f32.mrf.mxu1 }
 0x23a   : > { %1032 = vrot.lane.b32.xlu2 %v1024_v23, %s1508_s27  ;;  %990 = vrot.lane.b32.xlu1 %v982_v22, %s1508_s27 }
 0x23b   : > { %v1065_v24 = vpop.f32.mrf.mxu2  ;;  %v1106_v25 = vpop.f32.mrf.mxu3 }
 0x23c   : > { %1073 = vrot.lane.b32.xlu0 %v1065_v24, %s1508_s27 }
 0x241   : > { %v985_v26 = vpop.f32.mrf.mxu0  ;;  %v1027_v27 = vpop.f32.mrf.mxu1 }
 0x242   : > { %1034 = vrot.lane.b32.xlu1 %v1027_v27, %s1508_s27 }
 0x243   : > { %v1068_v28 = vpop.f32.mrf.mxu2  ;;  %v1109_v29 = vpop.f32.mrf.mxu3 }
 0x244   : > { %992 = vrot.lane.b32.xlu0 %v985_v26, %s1508_s27  ;;  %1075 = vrot.lane.b32.xlu2 %v1068_v28, %s1508_s27 }
 0x24a   : > { %1114 = vrot.lane.b32.xlu1 %v1106_v25, %s1508_s27 }
 0x24c   : > { %1116 = vrot.lane.b32.xlu0 %v1109_v29, %s1508_s27 }
 0x294   : > { %v1033_v30 = vpop.permute.xlu2 %1032 }
 0x295   : > { %1038 = vst.msk [vmem:[%s1682_s18] sm:$0xff] %vm996_vm1, %v1033_v30 }
 0x29e   : > { %v1076_v31 = vpop.permute.xlu2 %1075 }
 0x29f   : > { %1080 = vst.msk [vmem:[%s1692_s21 + $0x8] sm:$0xff] %vm996_vm1, %v1076_v31 }
 0x2ac   : > { %v991_v32 = vpop.permute.xlu1 %990 }
 0x2ad   : > { %997 = vst.msk [vmem:[%s1676_s26] sm:$0xff] %vm996_vm1, %v991_v32 }
 0x2ae   : > { %v1074_v33 = vpop.permute.xlu0 %1073 }
 0x2af   : > { %1079 = vst.msk [vmem:[%s1692_s21] sm:$0xff] %vm996_vm1, %v1074_v33 }
 0x2b4   : > { %v1035_v34 = vpop.permute.xlu1 %1034 }
 0x2b5   : > { %1039 = vst.msk [vmem:[%s1682_s18 + $0x8] sm:$0xff] %vm996_vm1, %v1035_v34 }
 0x2b6   : > { %v993_v35 = vpop.permute.xlu0 %992 }
 0x2b7   : > { %998 = vst.msk [vmem:[%s1676_s26 + $0x8] sm:$0xff] %vm996_vm1, %v993_v35 }
 0x2bc   : > { %v1115_v36 = vpop.permute.xlu1 %1114 }
 0x2bd   : > { %1120 = vst.msk [vmem:[%s1698_s24] sm:$0xff] %vm996_vm1, %v1115_v36 }
 0x2be   : > { %v1117_v37 = vpop.permute.xlu0 %1116 }
 0x2bf   : > { %1121 = vst.msk [vmem:[%s1698_s24 + $0x8] sm:$0xff] %vm996_vm1, %v1117_v37 }
 0x2c0 PF: > { %s24_s25 = sadd.s32 1, %s1503_s25  }
 0x2c1   : > { %p21_p4 = scmp.ge.s32.totalorder %s24_s25, 4  }
 0x2c3   :  { %23 = sbr.rel (!%p21_p4) target bundleno = 1 (0x1), region = 153 }

// kernel: generator_apply.53
= control target key start
LH: loop header
LB: loop body
LE: loop exit
PB: predicated region body
PF: predicated region fallthrough
CT: control target
= control target key end

     0   :  { %s1750_s0 = inlined_call_operand.vmem [shape: f32[32,56], index: 0, kind: input, shape index: {}]   ;;  %s1751_s1 = inlined_call_operand.vmem [shape: f32[32,28], index: 1, kind: input, shape index: {}]   ;;  %s1752_s2 = inlined_call_operand.vmem [shape: f32[32,28], index: 2, kind: input, shape index: {}]   ;;  %s1753_s3 = inlined_call_operand.vmem [shape: f32[32,28], index: 3, kind: input, shape index: {}]   ;;  %s1754_s4 = inlined_call_operand.vmem [shape: f32[32,8], index: 4, kind: input, shape index: {}]   ;;  %s1755_s5 = inlined_call_operand.vmem [shape: f32[32,4], index: 5, kind: input, shape index: {}]   ;;  %s1756_s6 = inlined_call_operand.vmem [shape: f32[32,4], index: 6, kind: input, shape index: {}]   ;;  %s1757_s7 = inlined_call_operand.vmem [shape: f32[32,4], index: 7, kind: input, shape index: {}]   ;;  %s1758_s8 = inlined_call_operand.vmem [shape: f32[56,8], index: 8, kind: input, shape index: {}]   ;;  %s1759_s9 = inlined_call_operand.vmem [shape: f32[1,8], index: 9, kind: input, shape index: {}]   ;;  %s1760_s10 = inlined_call_operand.vmem [shape: f32[1,8], index: 10, kind: input, shape index: {}]   ;;  %s1761_s11 = inlined_call_operand.vmem [shape: f32[1,8], index: 11, kind: input, shape index: {}]   ;;  %s1762_s12 = inlined_call_operand.vmem [shape: f32[8,8], index: 12, kind: input, shape index: {}]   ;;  %s1763_s13 = inlined_call_operand.vmem [shape: f32[28,4], index: 13, kind: input, shape index: {}]   ;;  %s1764_s14 = inlined_call_operand.vmem [shape: f32[1,4], index: 14, kind: input, shape index: {}]   ;;  %s1765_s15 = inlined_call_operand.vmem [shape: f32[4,4], index: 15, kind: input, shape index: {}]   ;;  %s1766_s16 = inlined_call_operand.vmem [shape: f32[32,8], index: 16, kind: output, shape index: {0}]   ;;  %s1767_s17 = inlined_call_operand.vmem [shape: f32[32,4], index: 17, kind: output, shape index: {1}]   ;;  %s1768_s18 = inlined_call_operand.vmem [shape: f32[32,4], index: 18, kind: output, shape index: {2}]   ;;  %s1769_s19 = inlined_call_operand.vmem [shape: f32[32,4], index: 19, kind: output, shape index: {3}]  }
   0x1   :  { %1770 = sst [smem:[#allocation2_spill]] %s1750_s0  ;;  %s1566_s0 = smov 0  }
   0x2   :  { %1771 = sst [smem:[#allocation3_spill]] %s1751_s1 }
   0x3   :  { %1772 = sst [smem:[#allocation4_spill]] %s1752_s2 }
   0x4   :  { %1773 = sst [smem:[#allocation5_spill]] %s1753_s3 }
   0x5 LB: > { %s1385_s30 = sadd.s32 4294967295, %s1464_s0   ;;  %p1389_p0 = scmp.ge.s32.totalorder %s1464_s0, 1  ;;  %s1464_s0 = sphi %s1566_s0, %s30_s0  }
   0x6   : > { %p622_p1 = scmp.lt.s32.totalorder %s1464_s0, 3 }
   0x8   : > { %p623_p2 = pnand %p1389_p0, %p622_p1 }
   0x9   : > { %s1390_s2 = sshll.u32 (!%p623_p2), %s1385_s30, 1  ;;  %s1774_s1 = sld [smem:[#allocation2_spill]] (!%p623_p2) }
   0xa   : > { %626 = sbr.rel (%p623_p2) target bundleno = 608 (0x260), region = 84  ;;  %p729_p3 = scmp.lt.s32.totalorder (!%p623_p2), %s1390_s2, 3 }
   0xb   : > { %s1775_s25 = sld [smem:[#allocation3_spill]] (!%p623_p2) }
   0xc   : > { %s1776_s29 = sld [smem:[#allocation4_spill]] (!%p623_p2) }
   0xf   : > { %v808_v0 = vld [vmem:[%s1758_s8 + $0x30] sm:$0xff]  ;;  %v807_v1 = vld [vmem:[%s1758_s8 + $0x28] sm:$0xff]  ;;  %v806_v2 = vld [vmem:[%s1758_s8 + $0x20] sm:$0xff]  ;;  %s1779_s2 = smov (!%p729_p3, %s1390_s2), 3  ;;  %vm813_vm0 = vcmask 457728   ;;  %vm844_vm1 = vcmask 64512  }
  0x10   : > { %829 = vmatpush.msra.mxu0 %v808_v0  ;;  %v805_v3 = vld [vmem:[%s1758_s8 + $0x18] sm:$0xff]  ;;  %s1586_s26 = sshll.u32 %s1779_s2, 3  ;;  %v804_v4 = vld [vmem:[%s1758_s8 + $0x10] sm:$0xff]  ;;  %v803_v5 = vld [vmem:[%s1758_s8 + $0x8] sm:$0xff]  ;;  %vm960_vm2 = vcmask 1043456   ;;  %vm953_vm3 = vcmask 228352  }
  0x11   : > { %s732_s22 = scalar_lea.vmem %s1774_s1, %s1586_s26  ;;  %v802_v6 = vld [vmem:[%s1758_s8] sm:$0xff]  ;;  %v950_v15 = vld [vmem:[%s1763_s13 + $0x18] sm:$0xf]  ;;  %v949_v16 = vld [vmem:[%s1763_s13 + $0x10] sm:$0xff]  ;;  %s738_s3 = scalar_lea.vmem %s1775_s25, %s1586_s26  ;;  %vm1060_vm6 = vcmask 31744  }
  0x12   : > { %830 = vmatpush.msra.mxu0 %v807_v1  ;;  %v800_v7 = vld [vmem:[%s732_s22] sm:$0xff]  ;;  %v801_v8 = vld [vmem:[%s732_s22 + $0x8] sm:$0xff]  ;;  %1434 = vmatpush.msk.msra.mxu3 %vm960_vm2, %v950_v15  ;;  %s744_s30 = scalar_lea.vmem %s1776_s29, %s1586_s26  ;;  %s1777_s1 = sld [smem:[#allocation5_spill]] }
  0x13   : > { %v843_v9 = vld [vmem:[%s1762_s12] sm:$0xff]  ;;  %v948_v17 = vld [vmem:[%s1763_s13 + $0x8] sm:$0xff]  ;;  %s1703_s25 = scalar_lea.vmem %s1755_s5, %s1586_s26  ;;  %s1709_s28 = scalar_lea.vmem %s1756_s6, %s1586_s26 }
  0x14   : > { %831 = vmatpush.msra.mxu0 %v806_v2  ;;  %866 = vmatpush.msra.mxu1 %v843_v9  ;;  %v1446_v10 = vld [vmem:[%s1759_s9] ss:$0 sm:$0xff]  ;;  %v952_v21 = vld [vmem:[%s738_s3 + $0x8] sm:$0xff]  ;;  %s1715_s20 = scalar_lea.vmem %s1757_s7, %s1586_s26  ;;  %s792_s2 = scalar_lea.vmem %s1768_s18, %s1586_s26 }
  0x15   : > { %901 = vmatpush.msra.mxu2 %v843_v9  ;;  %v947_v18 = vld [vmem:[%s1763_s13] sm:$0xff]  ;;  %1435 = vmatpush.msra.mxu3 %v949_v16  ;;  %v988_v22 = vld [vmem:[%s744_s30 + $0x8] sm:$0xff]  ;;  %s798_s29 = scalar_lea.vmem %s1769_s19, %s1586_s26 }
  0x16   : > { %832 = vmatpush.msra.mxu0 %v805_v3  ;;  %1423 = vmatpush.msk.msrb.mxu1 %vm960_vm2, %v950_v15  ;;  %v951_v19 = vld [vmem:[%s738_s3] sm:$0xff]  ;;  %s756_s3 = scalar_lea.vmem %s1754_s4, %s1586_s26 }
  0x17   : > { %1426 = vmatpush.msk.msrb.mxu2 %vm960_vm2, %v950_v15  ;;  %1436 = vmatpush.msra.mxu3 %v948_v17  ;;  %v987_v20 = vld [vmem:[%s744_s30] sm:$0xff] }
  0x18   : > { %833 = vmatpush.msra.mxu0 %v804_v4  ;;  %1008 = vmatpush.msrb.mxu1 %v949_v16  ;;  %s750_s22 = scalar_lea.vmem %s1777_s1, %s1586_s26  ;;  %v1059_v31 = vld [vmem:[%s1765_s15] sm:$0xf]  ;;  %s780_s1 = scalar_lea.vmem %s1766_s16, %s1586_s26 }
  0x19   : > { %1039 = vmatpush.msrb.mxu2 %v949_v16  ;;  %1437 = vmatpush.msra.mxu3 %v947_v18  ;;  %v1018_v29 = vld [vmem:[%s750_s22] sm:$0xff]  ;;  %v1019_v30 = vld [vmem:[%s750_s22 + $0x8] sm:$0xff]  ;;  %s786_s22 = scalar_lea.vmem %s1767_s17, %s1586_s26 }
  0x1a   : > { %834 = vmatpush.msra.mxu0 %v803_v5  ;;  %1009 = vmatpush.msrb.mxu1 %v948_v17  ;;  %v1447_v53 = vld [vmem:[%s1760_s10] ss:$0 sm:$0xff] }
  0x1b   : > { %1040 = vmatpush.msrb.mxu2 %v948_v17  ;;  %1422 = vmatmul.msk.f32.vlgmr.msra.gmra.mxu3 %vm953_vm3, %v952_v21  ;;  %v878_v60 = vld [vmem:[%s756_s3] sm:$0xff] }
  0x1c   : > { %835 = vmatpush.msra.mxu0 %v802_v6  ;;  %1010 = vmatpush.msrb.mxu1 %v947_v18  ;;  %v1448_v63 = vld [vmem:[%s1761_s11] ss:$0 sm:$0xff] }
  0x1d   : > { %1414 = vmatmul.msk.f32.vlgmr.msra.gmra.mxu0 %vm813_vm0, %v800_v7  ;;  %1041 = vmatpush.msrb.mxu2 %v947_v18 }
  0x1e   : > { %1420 = vmatpush.msk.msrb.mxu0 %vm960_vm2, %v950_v15  ;;  %1429 = vmatpush.msk.msrb.mxu3 %vm960_vm2, %v1059_v31  ;;  %v1127_v31 = vld [vmem:[%s1709_s28] sm:$0xff] }
  0x20   : > { %977 = vmatpush.msrb.mxu0 %v949_v16 }
  0x22   : > { %978 = vmatpush.msrb.mxu0 %v948_v17 }
  0x24   : > { %979 = vmatpush.msrb.mxu0 %v947_v18 }
  0x25   : > { %1415 = vmatmul.msk.f32.gmra.mxu0 %vm813_vm0, %v801_v8 }
  0x2d   : > { %1421 = vmatmul.msk.f32.vlgmr.msrb.gmra.mxu0 %vm953_vm3, %v951_v19 }
  0x9a   : > { %v837_v11 = vpop.f32.mrf.mxu0 }
  0x9b   : > { %v838_v12 = vadd.f32 %v1446_v10, %v837_v11 }
  0x9d   : > { %1416 = vmatmul.msk.f32.vlgmr.msra.gmra.mxu1 %vm844_vm1, %v838_v12 }
  0x9e   : > { %v1661_v45 = vpop.f32.mrf.mxu3 }
  0x9f   : > { %v1050_v55 = vmul.f32 %v1661_v45, %v1661_v45 }
  0xa2   : > { %v840_v13 = vpop.f32.mrf.mxu0 }
  0xa3   : > { %v841_v14 = vadd.f32 %v1446_v10, %v840_v13  ;;  %v879_v10 = vld [vmem:[%s756_s3 + $0x8] sm:$0xff] }
  0xa5   : > { %1417 = vmatmul.msk.f32.gmra.mxu1 %vm844_vm1, %v841_v14 }
  0xaa   : > { %v1655_v36 = vpop.f32.mrf.mxu0 }
  0xab   : > { %v1049_v40 = vmul.f32 %v1655_v36, %v1655_v36 }
  0xad   : > { %1424 = vmatmul.msk.f32.vlgmr.msrb.gmra.mxu1 %vm953_vm3, %v987_v20 }
  0xb5   : > { %1425 = vmatmul.msk.f32.gmra.mxu1 %vm953_vm3, %v988_v22 }
 0x11a   : > { %v868_v23 = vpop.f32.mrf.mxu1 }
 0x11b   : > { %v874_v24 = vsub.f32 %v838_v12, %v868_v23 }
 0x11d   : > { %v876_v25 = vmul.f32 %v874_v24, %v874_v24 }
 0x11f   : > { %1418 = vmatmul.msk.f32.vlgmr.msra.gmra.mxu2 %vm844_vm1, %v876_v25 }
 0x122   : > { %v871_v26 = vpop.f32.mrf.mxu1 }
 0x123   : > { %v1638_v27 = vsub.f32 %v841_v14, %v871_v26 }
 0x125   : > { %v877_v28 = vmul.f32 %v1638_v27, %v1638_v27 }
 0x127   : > { %1419 = vmatmul.msk.f32.gmra.mxu2 %vm844_vm1, %v877_v28 }
 0x12a   : > { %v1653_v34 = vpop.f32.mrf.mxu1 }
 0x12b   : > { %v1051_v41 = vmul.f32 %v1653_v34, %v1653_v34 }
 0x12d   : > { %v1053_v44 = vadd.f32 %v1051_v41, %v1049_v40 }
 0x12f   : > { %1427 = vmatmul.msk.f32.vlgmr.msrb.gmra.mxu2 %vm953_vm3, %v1018_v29 }
 0x132   : > { %v1665_v48 = vpop.f32.mrf.mxu1 }
 0x133   : > { %v1052_v56 = vmul.f32 %v1665_v48, %v1665_v48 }
 0x135   : > { %v1054_v0 = vadd.f32 %v1052_v56, %v1050_v55 }
 0x137   : > { %1428 = vmatmul.msk.f32.gmra.mxu2 %vm953_vm3, %v1019_v30  ;;  %v1119_v30 = vld [vmem:[%s1703_s25] sm:$0xff] }
 0x1a2   : > { %v903_v32 = vpop.f32.mrf.mxu2 }
 0x1a3   : > { %v904_v33 = vadd.f32 1e-05, %v903_v32  ;;  %v1135_v32 = vld [vmem:[%s1715_s20] sm:$0xff] }
 0x1a5   : > { %1450 = vrsqrt.f32 %v904_v33  ;;  %vm915_vm5 = vweird.f32 %v904_v33 }
 0x1aa   : > { %v906_v35 = vpop.f32.mrf.mxu2 }
 0x1ab   : > { %v1451_v37 = vpop.eup %1450  ;;  %v907_v38 = vadd.f32 1e-05, %v906_v35 }
 0x1ac   : > { %v910_v39 = vmul.f32 %v1451_v37, %v904_v33  ;;  %vm916_vm4 = vweird.f32 %v1451_v37 }
 0x1ad   : > { %1452 = vrsqrt.f32 %v907_v38  ;;  %vm917_vm7 = vmor %vm915_vm5, %vm916_vm4  ;;  %vm925_vm9 = vweird.f32 %v907_v38 }
 0x1ae   : > { %v911_v42 = vmul.f32 %v1451_v37, %v910_v39 }
 0x1b0   : > { %v912_v43 = vmul.f32 0.5, %v911_v42 }
 0x1b2   : > { %v913_v46 = vsub.f32 1.5, %v912_v43  ;;  %v1663_v47 = vpop.f32.mrf.mxu2 }
 0x1b3   : > { %v1453_v49 = vpop.eup %1452  ;;  %v1055_v50 = vmul.f32 %v1663_v47, %v1663_v47 }
 0x1b4   : > { %v914_v51 = vmul.f32 %v1451_v37, %v913_v46  ;;  %v920_v52 = vmul.f32 %v1453_v49, %v907_v38  ;;  %vm926_vm8 = vweird.f32 %v1453_v49  ;;  %v1128_v46 = vld [vmem:[%s1709_s28 + $0x8] sm:$0xff] }
 0x1b5   : > { %v1057_v54 = vadd.f32 %v1055_v50, %v1053_v44  ;;  %vm927_vm10 = vmor %vm925_vm9, %vm926_vm8  ;;  %v1120_v44 = vld [vmem:[%s1703_s25 + $0x8] sm:$0xff] }
 0x1b6   : > { %v918_v57 = vsel %vm917_vm7, %v1451_v37, %v914_v51  ;;  %v921_v58 = vmul.f32 %v1453_v49, %v920_v52 }
 0x1b7   : > { %v929_v59 = vmul.f32 %v918_v57, %v874_v24  ;;  %1430 = vmatmul.msk.f32.vlgmr.msrb.gmra.mxu3 %vm1060_vm6, %v1057_v54  ;;  %v1449_v24 = vld [vmem:[%s1764_s14] ss:$0 sm:$0xff] }
 0x1b8   : > { %v922_v61 = vmul.f32 0.5, %v921_v58 }
 0x1b9   : > { %v935_v62 = vmul.f32 %v1447_v53, %v929_v59 }
 0x1ba   : > { %v923_v1 = vsub.f32 1.5, %v922_v61  ;;  %v1684_v2 = vpop.f32.mrf.mxu2 }
 0x1bb   : > { %v937_v3 = vadd.f32 %v935_v62, %v878_v60  ;;  %v1056_v4 = vmul.f32 %v1684_v2, %v1684_v2 }
 0x1bc   : > { %v924_v5 = vmul.f32 %v1453_v49, %v923_v1 }
 0x1bd   : > { %v943_v6 = vadd.f32 %v1448_v63, %v937_v3  ;;  %v1058_v7 = vadd.f32 %v1056_v4, %v1054_v0 }
 0x1be   : > { %v928_v8 = vsel %vm927_vm10, %v1453_v49, %v924_v5 }
 0x1bf   : > { %945 = vst.msk [vmem:[%s780_s1] sm:$0xff] %vm844_vm1, %v943_v6  ;;  %v930_v9 = vmul.f32 %v928_v8, %v1638_v27  ;;  %1431 = vmatmul.msk.f32.gmra.mxu3 %vm1060_vm6, %v1058_v7 }
 0x1c1   : > { %v936_v11 = vmul.f32 %v1447_v53, %v930_v9 }
 0x1c3   : > { %v938_v12 = vadd.f32 %v936_v11, %v879_v10 }
 0x1c5   : > { %v944_v13 = vadd.f32 %v1448_v63, %v938_v12 }
 0x1c7   : > { %946 = vst.msk [vmem:[%s780_s1 + $0x8] sm:$0xff] %vm844_vm1, %v944_v13 }
 0x23a   : > { %v1087_v14 = vpop.f32.mrf.mxu3 }
 0x23b   : > { %v1088_v15 = vadd.f32 1e-05, %v1087_v14 }
 0x23d   : > { %1454 = vrsqrt.f32 %v1088_v15  ;;  %vm1099_vm12 = vweird.f32 %v1088_v15 }
 0x242   : > { %v1090_v16 = vpop.f32.mrf.mxu3 }
 0x243   : > { %v1455_v17 = vpop.eup %1454  ;;  %v1091_v18 = vadd.f32 1e-05, %v1090_v16 }
 0x244   : > { %v1094_v19 = vmul.f32 %v1455_v17, %v1088_v15  ;;  %vm1100_vm11 = vweird.f32 %v1455_v17 }
 0x245   : > { %1456 = vrsqrt.f32 %v1091_v18  ;;  %vm1101_vm13 = vmor %vm1099_vm12, %vm1100_vm11  ;;  %vm1109_vm15 = vweird.f32 %v1091_v18 }
 0x246   : > { %v1095_v20 = vmul.f32 %v1455_v17, %v1094_v19 }
 0x248   : > { %v1096_v21 = vmul.f32 0.5, %v1095_v20 }
 0x24a   : > { %v1097_v22 = vsub.f32 1.5, %v1096_v21 }
 0x24b   : > { %v1457_v23 = vpop.eup %1456 }
 0x24c   : > { %v1098_v25 = vmul.f32 %v1455_v17, %v1097_v22  ;;  %v1104_v26 = vmul.f32 %v1457_v23, %v1091_v18  ;;  %vm1110_vm14 = vweird.f32 %v1457_v23 }
 0x24d   : > { %vm1111_vm0 = vmor %vm1109_vm15, %vm1110_vm14 }
 0x24e   : > { %v1102_v27 = vsel %vm1101_vm13, %v1455_v17, %v1098_v25  ;;  %v1105_v28 = vmul.f32 %v1457_v23, %v1104_v26 }
 0x24f   : > { %v1117_v29 = vmul.f32 %v1449_v24, %v1102_v27 }
 0x250   : > { %v1106_v33 = vmul.f32 0.5, %v1105_v28 }
 0x251   : > { %v1121_v35 = vmul.f32 %v1117_v29, %v1655_v36  ;;  %v1129_v37 = vmul.f32 %v1117_v29, %v1653_v34  ;;  %v1137_v38 = vmul.f32 %v1117_v29, %v1663_v47  ;;  %v1136_v47 = vld [vmem:[%s1715_s20 + $0x8] sm:$0xff] }
 0x252   : > { %v1107_v39 = vsub.f32 1.5, %v1106_v33 }
 0x253   : > { %v1123_v40 = vadd.f32 %v1121_v35, %v1119_v30  ;;  %v1131_v41 = vadd.f32 %v1129_v37, %v1127_v31  ;;  %v1139_v36 = vadd.f32 %v1137_v38, %v1135_v32 }
 0x254   : > { %v1108_v34 = vmul.f32 %v1457_v23, %v1107_v39 }
 0x255   : > { %1125 = vst.msk [vmem:[%s786_s22] sm:$0xff] %vm1060_vm6, %v1123_v40 }
 0x256   : > { %1133 = vst.msk [vmem:[%s792_s2] sm:$0xff] %vm1060_vm6, %v1131_v41  ;;  %v1112_v42 = vsel %vm1111_vm0, %v1457_v23, %v1108_v34 }
 0x257   : > { %1141 = vst.msk [vmem:[%s798_s29] sm:$0xff] %vm1060_vm6, %v1139_v36  ;;  %v1118_v43 = vmul.f32 %v1449_v24, %v1112_v42 }
 0x259   : > { %v1122_v49 = vmul.f32 %v1118_v43, %v1661_v45  ;;  %v1130_v50 = vmul.f32 %v1118_v43, %v1665_v48  ;;  %v1138_v51 = vmul.f32 %v1118_v43, %v1684_v2 }
 0x25b   : > { %v1124_v52 = vadd.f32 %v1122_v49, %v1120_v44  ;;  %v1132_v53 = vadd.f32 %v1130_v50, %v1128_v46  ;;  %v1140_v54 = vadd.f32 %v1138_v51, %v1136_v47 }
 0x25d   : > { %1126 = vst.msk [vmem:[%s786_s22 + $0x8] sm:$0xff] %vm1060_vm6, %v1124_v52 }
 0x25e   : > { %1134 = vst.msk [vmem:[%s792_s2 + $0x8] sm:$0xff] %vm1060_vm6, %v1132_v53 }
 0x25f   : > { %1142 = vst.msk [vmem:[%s798_s29 + $0x8] sm:$0xff] %vm1060_vm6, %v1140_v54 }
 0x260 PF: > { %s30_s0 = sadd.s32 1, %s1464_s0  }
 0x261   : > { %p27_p4 = scmp.ge.s32.totalorder %s30_s0, 4  }
 0x263   :  { %29 = sbr.rel (!%p27_p4) target bundleno = 5 (0x5), region = 171 }

// kernel: generator_apply.67
= control target key start
LH: loop header
LB: loop body
LE: loop exit
PB: predicated region body
PF: predicated region fallthrough
CT: control target
= control target key end

     0   :  { %s1937_s0 = inlined_call_operand.vmem [shape: f32[32,56], index: 0, kind: input, shape index: {}]   ;;  %s1938_s1 = inlined_call_operand.vmem [shape: f32[32,28], index: 1, kind: input, shape index: {}]   ;;  %s1939_s2 = inlined_call_operand.vmem [shape: f32[32,28], index: 2, kind: input, shape index: {}]   ;;  %s1940_s3 = inlined_call_operand.vmem [shape: f32[32,28], index: 3, kind: input, shape index: {}]   ;;  %s1941_s4 = inlined_call_operand.vmem [shape: f32[32,8], index: 4, kind: input, shape index: {}]   ;;  %s1942_s5 = inlined_call_operand.vmem [shape: f32[32,4], index: 5, kind: input, shape index: {}]   ;;  %s1943_s6 = inlined_call_operand.vmem [shape: f32[32,4], index: 6, kind: input, shape index: {}]   ;;  %s1944_s7 = inlined_call_operand.vmem [shape: f32[32,4], index: 7, kind: input, shape index: {}]   ;;  %s1945_s8 = inlined_call_operand.vmem [shape: f32[56,8], index: 8, kind: input, shape index: {}]   ;;  %s1946_s9 = inlined_call_operand.vmem [shape: f32[1,8], index: 9, kind: input, shape index: {}]   ;;  %s1947_s10 = inlined_call_operand.vmem [shape: f32[1,8], index: 10, kind: input, shape index: {}]   ;;  %s1948_s11 = inlined_call_operand.vmem [shape: f32[1,8], index: 11, kind: input, shape index: {}]   ;;  %s1949_s12 = inlined_call_operand.vmem [shape: f32[8,8], index: 12, kind: input, shape index: {}]   ;;  %s1950_s13 = inlined_call_operand.vmem [shape: f32[28,4], index: 13, kind: input, shape index: {}]   ;;  %s1951_s14 = inlined_call_operand.vmem [shape: f32[1,4], index: 14, kind: input, shape index: {}]   ;;  %s1952_s15 = inlined_call_operand.vmem [shape: f32[4,4], index: 15, kind: input, shape index: {}]   ;;  %s1953_s16 = inlined_call_operand.hbm [shape: f32[32,8], index: 16, kind: output, shape index: {0}]   ;;  %s1954_s17 = inlined_call_operand.vmem [shape: f32[32,4], index: 17, kind: output, shape index: {1}]   ;;  %s1955_s18 = inlined_call_operand.vmem [shape: f32[32,4], index: 18, kind: output, shape index: {2}]   ;;  %s1956_s19 = inlined_call_operand.vmem [shape: f32[32,4], index: 19, kind: output, shape index: {3}]  }
   0x1   :  { %1963 = sst [smem:[#allocation11_spill]] %s1937_s0 }
   0x2   :  { %1964 = sst [smem:[#allocation12_spill]] %s1938_s1 }
   0x3   :  { %1965 = sst [smem:[#allocation13_spill]] %s1939_s2 }
   0x4   :  { %1966 = sst [smem:[#allocation14_spill]] %s1940_s3 }
   0x5   :  { %1967 = sst [smem:[#allocation15_spill]] %s1941_s4 }
   0x6   :  { %1968 = sst [smem:[#allocation16_spill]] %s1945_s8 }
   0x7   :  { %1969 = sst [smem:[#allocation17_spill]] %s1946_s9 }
   0x8   :  { %25 = vsyncpa [#allocation3], 0 }
   0x9   :  { %27 = vsyncpa [#allocation3 + $0x1], 0  ;;  %s1679_s0 = smov 0   ;;  %s1681_s30 = smov 0  }
   0xa   :  { %s1683_s20 = smov 0   ;;  %s1685_s21 = smov 0  }
   0xb LB: > { %1970 = sst [smem:[#allocation5_spill]] %s1563_s0  ;;  %s1700_s1 = sadd.s32 4294967295, %s1575_s21   ;;  %s1575_s21 = sphi %s1685_s21, %s1988_s21   ;;  %s1571_s20 = sphi %s1683_s20, %s1990_s20   ;;  %s1567_s30 = sphi %s1681_s30, %s1992_s30   ;;  %s1563_s0 = sphi %s1679_s0, %s1991_s0  }
   0xc   : > { %1971 = sst [smem:[#allocation6_spill]] %s1571_s20  ;;  %s1405_s22 = sadd.s32 4294967294, %s1575_s21  }
   0xd   : > { %1972 = sst [smem:[#allocation7_spill]] %s1575_s21  ;;  %s1704_s2 = sadd.s32 1, %s1575_s21  }
   0xe   : > { %1973 = sst [smem:[#allocation8_spill]] %s1704_s2  ;;  %s416_s23 = sadd.s32 1, %s1571_s20 }
   0xf   : > { %s413_s24 = ssub.s32 %s1575_s21, %s1704_s2  ;;  %p426_p0 = scmp.ne.s32.totalorder %s1571_s20, %s1567_s30 }
  0x10   : > { %p414_p1 = scmp.eq.s32.totalorder %s413_s24, 0  ;;  %p427_p2 = scmp.eq.s32.totalorder %s1700_s1, 1 }
  0x11   : > { %p432_p3 = scmp.ne.s32.totalorder %s1567_s30, %s1563_s0  ;;  %p433_p4 = scmp.eq.s32.totalorder %s1405_s22, 1 }
  0x12   : > { %s1715_s25 = scalar_select %p414_p1, %s1571_s20, %s416_s23  }
  0x13   : > { %p1717_p5 = por %p427_p2, %p426_p0  ;;  %p1721_p6 = por %p433_p4, %p432_p3 }
  0x14   : > { %1974 = sst [smem:[#allocation9_spill]] %s1715_s25  ;;  %p1408_p7 = scmp.ge.s32.totalorder %s1575_s21, 1 }
  0x15   : > { %s1976_s26 = scalar_select %p1721_p6, 1, 0 }
  0x16   : > { %p625_p8 = scmp.lt.s32.totalorder %s1575_s21, 3 }
  0x17   : > { %1977 = sst [smem:[#allocation10_spill]] %s1976_s26 }
  0x18   : > { %p626_p9 = pnand %p1408_p7, %p625_p8 }
  0x19   : > { %s1978_s8 = sld [smem:[#allocation16_spill]] (!%p626_p9)  ;;  %s1410_s23 = sshll.u32 (!%p626_p9), %s1700_s1, 1 }
  0x1a   : > { %629 = sbr.rel (%p626_p9) target bundleno = 624 (0x270), region = 84  ;;  %p732_p10 = scmp.lt.s32.totalorder (!%p626_p9), %s1410_s23, 3 }
  0x1b   : > { %s1979_s0 = sld [smem:[#allocation11_spill]] (!%p626_p9)  ;;  %s707_s20 = sand.u32 (!%p626_p9), 1, %s1567_s30  }
  0x1c   : > { %s1980_s9 = sld [smem:[#allocation17_spill]] (!%p626_p9) }
  0x1d   : > { %s1982_s25 = sld [smem:[#allocation13_spill]] (!%p626_p9) }
  0x1e   : > { %s1983_s26 = sld [smem:[#allocation14_spill]] (!%p626_p9) }
  0x1f   : > { %v806_v0 = vld [vmem:[%s1978_s8 + $0x30] sm:$0xff]  ;;  %v805_v1 = vld [vmem:[%s1978_s8 + $0x28] sm:$0xff]  ;;  %v804_v2 = vld [vmem:[%s1978_s8 + $0x20] sm:$0xff]  ;;  %s1994_s23 = smov (!%p732_p10, %s1410_s23), 3  ;;  %vm811_vm0 = vcmask 457728   ;;  %vm842_vm1 = vcmask 64512  }
  0x20   : > { %827 = vmatpush.msra.mxu0 %v806_v0  ;;  %v803_v3 = vld [vmem:[%s1978_s8 + $0x18] sm:$0xff]  ;;  %s1740_s27 = sshll.u32 %s1994_s23, 3  ;;  %v802_v4 = vld [vmem:[%s1978_s8 + $0x10] sm:$0xff]  ;;  %v801_v5 = vld [vmem:[%s1978_s8 + $0x8] sm:$0xff]  ;;  %vm958_vm2 = vcmask 1043456   ;;  %vm951_vm3 = vcmask 228352  }
  0x21   : > { %s735_s21 = scalar_lea.vmem %s1979_s0, %s1740_s27  ;;  %v800_v6 = vld [vmem:[%s1978_s8] sm:$0xff]  ;;  %v948_v15 = vld [vmem:[%s1950_s13 + $0x18] sm:$0xf]  ;;  %v947_v16 = vld [vmem:[%s1950_s13 + $0x10] sm:$0xff]  ;;  %s1981_s0 = sld [smem:[#allocation12_spill]]  ;;  %vm1058_vm6 = vcmask 31744  }
  0x22   : > { %828 = vmatpush.msra.mxu0 %v805_v1  ;;  %v798_v7 = vld [vmem:[%s735_s21] sm:$0xff]  ;;  %v799_v8 = vld [vmem:[%s735_s21 + $0x8] sm:$0xff]  ;;  %1456 = vmatpush.msk.msra.mxu3 %vm958_vm2, %v948_v15  ;;  %s1984_s4 = sld [smem:[#allocation15_spill]] }
  0x23   : > { %v841_v9 = vld [vmem:[%s1949_s12] sm:$0xff]  ;;  %v946_v17 = vld [vmem:[%s1950_s13 + $0x8] sm:$0xff]  ;;  %s747_s24 = scalar_lea.vmem %s1982_s25, %s1740_s27 }
  0x24   : > { %829 = vmatpush.msra.mxu0 %v804_v2  ;;  %864 = vmatpush.msra.mxu1 %v841_v9  ;;  %v1501_v10 = vld [vmem:[%s1980_s9] ss:$0 sm:$0xff]  ;;  %v986_v22 = vld [vmem:[%s747_s24 + $0x8] sm:$0xff]  ;;  %s753_s23 = scalar_lea.vmem %s1983_s26, %s1740_s27  ;;  %s1142_s26 = scalar_lea.sflag [#allocation3], %s707_s20 }
  0x25   : > { %899 = vmatpush.msra.mxu2 %v841_v9  ;;  %v945_v18 = vld [vmem:[%s1950_s13] sm:$0xff]  ;;  %1457 = vmatpush.msra.mxu3 %v947_v16  ;;  %v1017_v30 = vld [vmem:[%s753_s23 + $0x8] sm:$0xff] }
  0x26   : > { %830 = vmatpush.msra.mxu0 %v803_v3  ;;  %1441 = vmatpush.msk.msrb.mxu1 %vm958_vm2, %v948_v15  ;;  %v985_v20 = vld [vmem:[%s747_s24] sm:$0xff] }
  0x27   : > { %1444 = vmatpush.msk.msrb.mxu2 %vm958_vm2, %v948_v15  ;;  %1458 = vmatpush.msra.mxu3 %v946_v17  ;;  %s741_s21 = scalar_lea.vmem %s1981_s0, %s1740_s27  ;;  %v1016_v29 = vld [vmem:[%s753_s23] sm:$0xff]  ;;  %s1409_s23 = sshll.u32 %s707_s20, 4 }
  0x28   : > { %831 = vmatpush.msra.mxu0 %v802_v4  ;;  %1006 = vmatpush.msrb.mxu1 %v947_v16  ;;  %v949_v19 = vld [vmem:[%s741_s21] sm:$0xff]  ;;  %v950_v21 = vld [vmem:[%s741_s21 + $0x8] sm:$0xff]  ;;  %s1827_s22 = scalar_lea.vmem %s1984_s4, %s1740_s27  ;;  %s709_s28 = scalar_lea.vmem [#allocation2], %s1409_s23 }
  0x29   : > { %1037 = vmatpush.msrb.mxu2 %v947_v16  ;;  %1459 = vmatpush.msra.mxu3 %v945_v18  ;;  %v1057_v31 = vld [vmem:[%s1952_s15] sm:$0xf]  ;;  %s1455_s0 = sshll.u32 %s1700_s1, 4  ;;  %s1169_s24 = sshll.u32 %s709_s28, 4  ;;  %s1170_s24 = int_to_ptr.vmem [resolvable:$true] %s1169_s24 }
  0x2a   : > { %832 = vmatpush.msra.mxu0 %v801_v5  ;;  %1007 = vmatpush.msrb.mxu1 %v946_v17  ;;  %v1502_v53 = vld [vmem:[%s1947_s10] ss:$0 sm:$0xff]  ;;  %s1168_s25 = scalar_lea.hbm %s1953_s16, %s1455_s0  ;;  %s1533_s1 = scalar_lea.hbm %s1953_s16, 32 }
  0x2b   : > { %1038 = vmatpush.msrb.mxu2 %v946_v17  ;;  %1440 = vmatmul.msk.f32.vlgmr.msra.gmra.mxu3 %vm951_vm3, %v950_v21  ;;  %v876_v60 = vld [vmem:[%s1827_s22] sm:$0xff]  ;;  %s1171_s2 = sshll.u32 %s1168_s25, 4  ;;  %s1172_s2 = int_to_ptr.hbm [resolvable:$true] %s1171_s2 }
  0x2c   : > { %833 = vmatpush.msra.mxu0 %v800_v6  ;;  %1008 = vmatpush.msrb.mxu1 %v945_v18  ;;  %v1503_v63 = vld [vmem:[%s1948_s11] ss:$0 sm:$0xff]  ;;  %s1527_s23 = sshra.s32 %s1172_s2, 4  ;;  %s1528_s23 = int_to_ptr.hbm [resolvable:$true] %s1527_s23 }
  0x2d   : > { %1432 = vmatmul.msk.f32.vlgmr.msra.gmra.mxu0 %vm811_vm0, %v798_v7  ;;  %1039 = vmatpush.msrb.mxu2 %v945_v18  ;;  %p1534_p0 = scmp.lt.s32.totalorder %s1528_s23, %s1953_s16 }
  0x2e   : > { %1438 = vmatpush.msk.msrb.mxu0 %vm958_vm2, %v948_v15  ;;  %1447 = vmatpush.msk.msrb.mxu3 %vm958_vm2, %v1057_v31 }
  0x30   : > { %975 = vmatpush.msrb.mxu0 %v947_v16 }
  0x32   : > { %976 = vmatpush.msrb.mxu0 %v946_v17 }
  0x34   : > { %977 = vmatpush.msrb.mxu0 %v945_v18 }
  0x35   : > { %1433 = vmatmul.msk.f32.gmra.mxu0 %vm811_vm0, %v799_v8 }
  0x3d   : > { %1439 = vmatmul.msk.f32.vlgmr.msrb.gmra.mxu0 %vm951_vm3, %v949_v19 }
  0xaa   : > { %v835_v11 = vpop.f32.mrf.mxu0 }
  0xab   : > { %v836_v12 = vadd.f32 %v1501_v10, %v835_v11 }
  0xad   : > { %1434 = vmatmul.msk.f32.vlgmr.msra.gmra.mxu1 %vm842_vm1, %v836_v12 }
  0xae   : > { %v1815_v45 = vpop.f32.mrf.mxu3 }
  0xaf   : > { %v1048_v55 = vmul.f32 %v1815_v45, %v1815_v45 }
  0xb2   : > { %v838_v13 = vpop.f32.mrf.mxu0 }
  0xb3   : > { %v839_v14 = vadd.f32 %v1501_v10, %v838_v13  ;;  %v877_v10 = vld [vmem:[%s1827_s22 + $0x8] sm:$0xff]  ;;  %s1529_s22 = scalar_lea.hbm %s1528_s23, 16 }
  0xb4   : > { %p1530_p11 = scmp.ne.s32.totalorder %s1528_s23, %s1529_s22  ;;  %p1535_p1 = scmp.lt.s32.totalorder %s1533_s1, %s1529_s22 }
  0xb5   : > { %1435 = vmatmul.msk.f32.gmra.mxu1 %vm842_vm1, %v839_v14 }
  0xb6   : > { %p1531_p12 = pnand %p1530_p11, %p1717_p5  ;;  %p1536_p2 = por %p1535_p1, %p1534_p0 }
  0xb8   : > { %p1532_p13 = pneg %p1531_p12 }
  0xba   : > { %v1809_v36 = vpop.f32.mrf.mxu0  ;;  %p1537_p3 = pnand %p1536_p2, %p1532_p13 }
  0xbb   : > { %v1047_v40 = vmul.f32 %v1809_v36, %v1809_v36 }
  0xbd   : > { %1442 = vmatmul.msk.f32.vlgmr.msrb.gmra.mxu1 %vm951_vm3, %v985_v20 }
  0xc5   : > { %1443 = vmatmul.msk.f32.gmra.mxu1 %vm951_vm3, %v986_v22 }
 0x12a   : > { %v866_v23 = vpop.f32.mrf.mxu1 }
 0x12b   : > { %v872_v24 = vsub.f32 %v836_v12, %v866_v23 }
 0x12d   : > { %v874_v25 = vmul.f32 %v872_v24, %v872_v24 }
 0x12f   : > { %1436 = vmatmul.msk.f32.vlgmr.msra.gmra.mxu2 %vm842_vm1, %v874_v25 }
 0x132   : > { %v869_v26 = vpop.f32.mrf.mxu1 }
 0x133   : > { %v1792_v27 = vsub.f32 %v839_v14, %v869_v26 }
 0x135   : > { %v875_v28 = vmul.f32 %v1792_v27, %v1792_v27 }
 0x137   : > { %1437 = vmatmul.msk.f32.gmra.mxu2 %vm842_vm1, %v875_v28 }
 0x13a   : > { %v1807_v34 = vpop.f32.mrf.mxu1 }
 0x13b   : > { %v1049_v41 = vmul.f32 %v1807_v34, %v1807_v34 }
 0x13d   : > { %v1051_v44 = vadd.f32 %v1049_v41, %v1047_v40 }
 0x13f   : > { %1445 = vmatmul.msk.f32.vlgmr.msrb.gmra.mxu2 %vm951_vm3, %v1016_v29 }
 0x142   : > { %v1819_v48 = vpop.f32.mrf.mxu1 }
 0x143   : > { %v1050_v56 = vmul.f32 %v1819_v48, %v1819_v48 }
 0x145   : > { %v1052_v0 = vadd.f32 %v1050_v56, %v1048_v55 }
 0x147   : > { %1446 = vmatmul.msk.f32.gmra.mxu2 %vm951_vm3, %v1017_v30 }
 0x1b2   : > { %v901_v32 = vpop.f32.mrf.mxu2 }
 0x1b3   : > { %v902_v33 = vadd.f32 1e-05, %v901_v32 }
 0x1b5   : > { %1505 = vrsqrt.f32 %v902_v33  ;;  %vm913_vm5 = vweird.f32 %v902_v33 }
 0x1ba   : > { %v904_v35 = vpop.f32.mrf.mxu2 }
 0x1bb   : > { %v1506_v37 = vpop.eup %1505  ;;  %v905_v38 = vadd.f32 1e-05, %v904_v35 }
 0x1bc   : > { %v908_v39 = vmul.f32 %v1506_v37, %v902_v33  ;;  %vm914_vm4 = vweird.f32 %v1506_v37 }
 0x1bd   : > { %1507 = vrsqrt.f32 %v905_v38  ;;  %vm915_vm7 = vmor %vm913_vm5, %vm914_vm4  ;;  %vm923_vm9 = vweird.f32 %v905_v38 }
 0x1be   : > { %v909_v42 = vmul.f32 %v1506_v37, %v908_v39 }
 0x1c0   : > { %v910_v43 = vmul.f32 0.5, %v909_v42 }
 0x1c2   : > { %v911_v46 = vsub.f32 1.5, %v910_v43  ;;  %v1817_v47 = vpop.f32.mrf.mxu2 }
 0x1c3   : > { %v1508_v49 = vpop.eup %1507  ;;  %v1053_v50 = vmul.f32 %v1817_v47, %v1817_v47 }
 0x1c4   : > { %v912_v51 = vmul.f32 %v1506_v37, %v911_v46  ;;  %v918_v52 = vmul.f32 %v1508_v49, %v905_v38  ;;  %vm924_vm8 = vweird.f32 %v1508_v49 }
 0x1c5   : > { %v1055_v54 = vadd.f32 %v1053_v50, %v1051_v44  ;;  %vm925_vm10 = vmor %vm923_vm9, %vm924_vm8 }
 0x1c6   : > { %v916_v57 = vsel %vm915_vm7, %v1506_v37, %v912_v51  ;;  %v919_v58 = vmul.f32 %v1508_v49, %v918_v52 }
 0x1c7   : > { %v927_v59 = vmul.f32 %v916_v57, %v872_v24  ;;  %1448 = vmatmul.msk.f32.vlgmr.msrb.gmra.mxu3 %vm1058_vm6, %v1055_v54 }
 0x1c8   : > { %v920_v61 = vmul.f32 0.5, %v919_v58 }
 0x1c9   : > { %v933_v62 = vmul.f32 %v1502_v53, %v927_v59 }
 0x1ca   : > { %v921_v1 = vsub.f32 1.5, %v920_v61  ;;  %v1844_v2 = vpop.f32.mrf.mxu2 }
 0x1cb   : > { %v935_v3 = vadd.f32 %v933_v62, %v876_v60  ;;  %v1054_v4 = vmul.f32 %v1844_v2, %v1844_v2 }
 0x1cc   : > { %v922_v5 = vmul.f32 %v1508_v49, %v921_v1 }
 0x1cd   : > { %v941_v6 = vadd.f32 %v1503_v63, %v935_v3  ;;  %v1056_v7 = vadd.f32 %v1054_v4, %v1052_v0 }
 0x1ce   : > { %v926_v8 = vsel %vm925_vm10, %v1508_v49, %v922_v5 }
 0x1cf   : > { %v928_v9 = vmul.f32 %v926_v8, %v1792_v27  ;;  %1449 = vmatmul.msk.f32.gmra.mxu3 %vm1058_vm6, %v1056_v7  ;;  %943 = vst.msk [vmem:[%s709_s28] sm:$0xff] %vm842_vm1, %v941_v6 }
 0x1d1   : > { %v934_v11 = vmul.f32 %v1502_v53, %v928_v9 }
 0x1d3   : > { %v936_v12 = vadd.f32 %v934_v11, %v877_v10 }
 0x1d5   : > { %v942_v13 = vadd.f32 %v1503_v63, %v936_v12 }
 0x1d7   : > { %944 = vst.msk [vmem:[%s709_s28 + $0x8] sm:$0xff] %vm842_vm1, %v942_v13 }
 0x1d8   : > { %1540 = shalt.err (!%p1537_p3)
}
 0x1d9   : > { %s1577_s20 = smov 128   ;;  %s1578_s28 = smov 8   ;;  %v1504_v24 = vld [vmem:[%s1951_s14] ss:$0 sm:$0xff] }
 0x1da   : > { %1460 = dma.vmem_to_hbm [thread:$0]  (%p1717_p5), %s1170_s24, 256, %s1172_s2, %s1142_s26, %s1577_s20, %s1577_s20, %s1578_s28  }
 0x1db   : > { %s1876_s0 = scalar_lea.vmem %s1942_s5, %s1740_s27  ;;  %s1882_s24 = scalar_lea.vmem %s1943_s6, %s1740_s27 }
 0x1dc   : > { %s1888_s23 = scalar_lea.vmem %s1944_s7, %s1740_s27  ;;  %v1117_v30 = vld [vmem:[%s1876_s0] sm:$0xff]  ;;  %s784_s21 = scalar_lea.vmem %s1954_s17, %s1740_s27  ;;  %v1118_v44 = vld [vmem:[%s1876_s0 + $0x8] sm:$0xff] }
 0x1dd   : > { %v1125_v31 = vld [vmem:[%s1882_s24] sm:$0xff]  ;;  %s790_s4 = scalar_lea.vmem %s1955_s18, %s1740_s27  ;;  %s796_s3 = scalar_lea.vmem %s1956_s19, %s1740_s27  ;;  %v1126_v46 = vld [vmem:[%s1882_s24 + $0x8] sm:$0xff] }
 0x1de   : > { %v1133_v32 = vld [vmem:[%s1888_s23] sm:$0xff] }
 0x24a   : > { %v1085_v14 = vpop.f32.mrf.mxu3 }
 0x24b   : > { %v1086_v15 = vadd.f32 1e-05, %v1085_v14 }
 0x24d   : > { %1509 = vrsqrt.f32 %v1086_v15  ;;  %vm1097_vm12 = vweird.f32 %v1086_v15 }
 0x252   : > { %v1088_v16 = vpop.f32.mrf.mxu3 }
 0x253   : > { %v1510_v17 = vpop.eup %1509  ;;  %v1089_v18 = vadd.f32 1e-05, %v1088_v16 }
 0x254   : > { %v1092_v19 = vmul.f32 %v1510_v17, %v1086_v15  ;;  %vm1098_vm11 = vweird.f32 %v1510_v17 }
 0x255   : > { %1511 = vrsqrt.f32 %v1089_v18  ;;  %vm1099_vm13 = vmor %vm1097_vm12, %vm1098_vm11  ;;  %vm1107_vm15 = vweird.f32 %v1089_v18 }
 0x256   : > { %v1093_v20 = vmul.f32 %v1510_v17, %v1092_v19 }
 0x258   : > { %v1094_v21 = vmul.f32 0.5, %v1093_v20 }
 0x25a   : > { %v1095_v22 = vsub.f32 1.5, %v1094_v21 }
 0x25b   : > { %v1512_v23 = vpop.eup %1511 }
 0x25c   : > { %v1096_v25 = vmul.f32 %v1510_v17, %v1095_v22  ;;  %v1102_v26 = vmul.f32 %v1512_v23, %v1089_v18  ;;  %vm1108_vm14 = vweird.f32 %v1512_v23 }
 0x25d   : > { %vm1109_vm0 = vmor %vm1107_vm15, %vm1108_vm14 }
 0x25e   : > { %v1100_v27 = vsel %vm1099_vm13, %v1510_v17, %v1096_v25  ;;  %v1103_v28 = vmul.f32 %v1512_v23, %v1102_v26 }
 0x25f   : > { %v1115_v29 = vmul.f32 %v1504_v24, %v1100_v27 }
 0x260   : > { %v1104_v33 = vmul.f32 0.5, %v1103_v28 }
 0x261   : > { %v1119_v35 = vmul.f32 %v1115_v29, %v1809_v36  ;;  %v1127_v37 = vmul.f32 %v1115_v29, %v1807_v34  ;;  %v1135_v38 = vmul.f32 %v1115_v29, %v1817_v47  ;;  %v1134_v47 = vld [vmem:[%s1888_s23 + $0x8] sm:$0xff] }
 0x262   : > { %v1105_v39 = vsub.f32 1.5, %v1104_v33 }
 0x263   : > { %v1121_v40 = vadd.f32 %v1119_v35, %v1117_v30  ;;  %v1129_v41 = vadd.f32 %v1127_v37, %v1125_v31  ;;  %v1137_v36 = vadd.f32 %v1135_v38, %v1133_v32 }
 0x264   : > { %v1106_v34 = vmul.f32 %v1512_v23, %v1105_v39 }
 0x265   : > { %1123 = vst.msk [vmem:[%s784_s21] sm:$0xff] %vm1058_vm6, %v1121_v40 }
 0x266   : > { %1131 = vst.msk [vmem:[%s790_s4] sm:$0xff] %vm1058_vm6, %v1129_v41  ;;  %v1110_v42 = vsel %vm1109_vm0, %v1512_v23, %v1106_v34 }
 0x267   : > { %1139 = vst.msk [vmem:[%s796_s3] sm:$0xff] %vm1058_vm6, %v1137_v36  ;;  %v1116_v43 = vmul.f32 %v1504_v24, %v1110_v42 }
 0x269   : > { %v1120_v49 = vmul.f32 %v1116_v43, %v1815_v45  ;;  %v1128_v50 = vmul.f32 %v1116_v43, %v1819_v48  ;;  %v1136_v51 = vmul.f32 %v1116_v43, %v1844_v2 }
 0x26b   : > { %v1122_v52 = vadd.f32 %v1120_v49, %v1118_v44  ;;  %v1130_v53 = vadd.f32 %v1128_v50, %v1126_v46  ;;  %v1138_v54 = vadd.f32 %v1136_v51, %v1134_v47 }
 0x26d   : > { %1124 = vst.msk [vmem:[%s784_s21 + $0x8] sm:$0xff] %vm1058_vm6, %v1122_v52 }
 0x26e   : > { %1132 = vst.msk [vmem:[%s790_s4 + $0x8] sm:$0xff] %vm1058_vm6, %v1130_v53 }
 0x26f   : > { %1140 = vst.msk [vmem:[%s796_s3 + $0x8] sm:$0xff] %vm1058_vm6, %v1138_v54 }
 0x270 PF: > { %s1985_s27 = sld [smem:[#allocation7_spill]] }
 0x271   : > { %s1986_s0 = sld [smem:[#allocation5_spill]] }
 0x276   : > { %p1466_p4 = scmp.ge.s32.totalorder %s1985_s27, 2 }
 0x277   : > { %s1198_s25 = sand.u32 1, %s1986_s0  }
 0x278   : > { %p1463_p5 = pnand %p1466_p4, %p1721_p6  ;;  %s1199_s24 = scalar_lea.sflag [#allocation3], %s1198_s25 }
 0x27a   : > { %p1464_p7 = pneg %p1463_p5 }
 0x27c   : > { %1558 = dma.done.wait (%p1464_p7), %s1199_s24, 256  }
 0x27d   : > { %1560 = vsyncadd (%p1464_p7), %s1199_s24, 4294967040  ;;  %s1988_s21 = sld [smem:[#allocation8_spill]]  ;;  %s1991_s0 = smov %s1567_s30 }
 0x27e   : > { %s1989_s2 = sld [smem:[#allocation6_spill]] }
 0x27f   : > { %s1990_s20 = sld [smem:[#allocation9_spill]] }
 0x283   : > { %p30_p8 = scmp.ge.s32.totalorder %s1988_s21, 4  }
 0x284   : > { %s1992_s30 = smov %s1989_s2 }
 0x285   :  { %32 = sbr.rel (!%p30_p8) target bundleno = 11 (0xb), region = 176 }
 0x28a   :  { %1229 = vsyncpa [#allocation3], 1 }
 0x28b   :  { %1231 = vsyncpa [#allocation3 + $0x1], 1 }

// kernel: generator_apply.68
= control target key start
LH: loop header
LB: loop body
LE: loop exit
PB: predicated region body
PF: predicated region fallthrough
CT: control target
= control target key end

     0   :  { %s660_s21 = smov 0   ;;  %s692_s0 = inlined_call_operand.vmem [shape: f32[32,4], index: 0, kind: input, shape index: {}]   ;;  %s693_s1 = inlined_call_operand.vmem [shape: f32[32,4], index: 1, kind: input, shape index: {}]   ;;  %s694_s2 = inlined_call_operand.vmem [shape: f32[32,4], index: 2, kind: input, shape index: {}]   ;;  %s695_s3 = inlined_call_operand.vmem [shape: f32[4,1], index: 3, kind: input, shape index: {}]   ;;  %s696_s4 = inlined_call_operand.vmem [shape: f32[32,1], index: 4, kind: output, shape index: {0}]   ;;  %s697_s5 = inlined_call_operand.vmem [shape: f32[32,1], index: 5, kind: output, shape index: {1}]   ;;  %s698_s6 = inlined_call_operand.vmem [shape: f32[32,1], index: 6, kind: output, shape index: {2}]  }
   0x1 LB: > { %s580_s22 = sadd.s32 4294967295, %s623_s21   ;;  %p584_p0 = scmp.ge.s32.totalorder %s623_s21, 1  ;;  %s623_s21 = sphi %s660_s21, %s17_s21  }
   0x2   : > { %p240_p1 = scmp.lt.s32.totalorder %s623_s21, 3 }
   0x4   : > { %p241_p2 = pnand %p584_p0, %p240_p1 }
   0x5   : > { %s585_s25 = sshll.u32 (!%p241_p2), %s580_s22, 1 }
   0x6   : > { %244 = sbr.rel (%p241_p2) target bundleno = 156 (0x9c), region = 36  ;;  %p291_p3 = scmp.lt.s32.totalorder (!%p241_p2), %s585_s25, 3 }
   0xb   : > { %v326_v0 = vld [vmem:[%s695_s3] sm:$0xf]  ;;  %vm336_vm0 = vcmask 1043456   ;;  %s700_s25 = smov (!%p291_p3, %s585_s25), 3  ;;  %vm329_vm1 = vcmask 31744   ;;  %vm363_vm2 = vcmask 7168  }
   0xc   : > { %603 = vmatpush.msk.msra.mxu2 %vm336_vm0, %v326_v0  ;;  %600 = vmatpush.msk.msra.mxu1 %vm336_vm0, %v326_v0  ;;  %s586_s26 = sshll.u32 %s700_s25, 3 }
   0xd   : > { %608 = vmatpush.msk.msra.mxu3 %vm336_vm0, %v326_v0  ;;  %597 = vmatpush.msk.msra.mxu0 %vm336_vm0, %v326_v0  ;;  %s306_s29 = scalar_lea.vmem %s694_s2, %s586_s26  ;;  %s300_s8 = scalar_lea.vmem %s693_s1, %s586_s26 }
   0xe   : > { %v399_v1 = vld [vmem:[%s306_s29] sm:$0xff]  ;;  %s294_s11 = scalar_lea.vmem %s692_s0, %s586_s26  ;;  %v400_v5 = vld [vmem:[%s306_s29 + $0x8] sm:$0xff]  ;;  %s318_s14 = scalar_lea.vmem %s697_s5, %s586_s26 }
   0xf   : > { %v366_v2 = vld [vmem:[%s300_s8] sm:$0xff]  ;;  %604 = vmatmul.msk.f32.vlgmr.msra.gmra.mxu2 %vm329_vm1, %v399_v1  ;;  %v328_v3 = vld [vmem:[%s294_s11 + $0x8] sm:$0xff]  ;;  %s312_s17 = scalar_lea.vmem %s696_s4, %s586_s26  ;;  %s324_s20 = scalar_lea.vmem %s698_s6, %s586_s26 }
  0x10   : > { %601 = vmatmul.msk.f32.vlgmr.msra.gmra.mxu1 %vm329_vm1, %v366_v2  ;;  %v327_v4 = vld [vmem:[%s294_s11] sm:$0xff]  ;;  %599 = vmatmul.msk.f32.vlgmr.msra.gmra.mxu3 %vm329_vm1, %v328_v3  ;;  %v367_v6 = vld [vmem:[%s300_s8 + $0x8] sm:$0xff] }
  0x11   : > { %598 = vmatmul.msk.f32.vlgmr.msra.gmra.mxu0 %vm329_vm1, %v327_v4 }
  0x17   : > { %605 = vmatmul.msk.f32.gmra.mxu2 %vm329_vm1, %v400_v5 }
  0x18   : > { %602 = vmatmul.msk.f32.gmra.mxu1 %vm329_vm1, %v367_v6 }
  0x8d   : > { %v391_v7 = vpop.f32.mrf.mxu1 }
  0x8e   : > { %397 = vst.msk [vmem:[%s318_s14] sm:$0xff] %vm363_vm2, %v391_v7  ;;  %v357_v8 = vpop.f32.mrf.mxu0 }
  0x8f   : > { %364 = vst.msk [vmem:[%s312_s17] sm:$0xff] %vm363_vm2, %v357_v8 }
  0x92   : > { %v424_v9 = vpop.f32.mrf.mxu2 }
  0x93   : > { %430 = vst.msk [vmem:[%s324_s20] sm:$0xff] %vm363_vm2, %v424_v9  ;;  %v360_v10 = vpop.f32.mrf.mxu3 }
  0x94   : > { %365 = vst.msk [vmem:[%s312_s17 + $0x8] sm:$0xff] %vm363_vm2, %v360_v10 }
  0x95   : > { %v394_v11 = vpop.f32.mrf.mxu1 }
  0x96   : > { %398 = vst.msk [vmem:[%s318_s14 + $0x8] sm:$0xff] %vm363_vm2, %v394_v11 }
  0x9a   : > { %v427_v12 = vpop.f32.mrf.mxu2 }
  0x9b   : > { %431 = vst.msk [vmem:[%s324_s20 + $0x8] sm:$0xff] %vm363_vm2, %v427_v12 }
  0x9c PF: > { %s17_s21 = sadd.s32 1, %s623_s21  }
  0x9d   : > { %p14_p4 = scmp.ge.s32.totalorder %s17_s21, 4  }
  0x9f   :  { %16 = sbr.rel (!%p14_p4) target bundleno = 1 (0x1), region = 96 }

</bundles_post_ra>
